<compile_context>
chip_gen: v6e
topology: v6e:2x2x1
jax: 0.10.0
libtpu: 0.0.40
codegen_flags: <defaults>
</compile_context>

<pallas_src>
import jax
import jax.numpy as jnp
from jax.experimental import pallas as pl
from jax.experimental.pallas import tpu as pltpu


def _fused_mlp_kernel(x_ref, w1_ref, b1_ref, w2_ref, b2_ref, w3_ref, b3_ref,
                      o_ref, acc_ref):
    """K-tiled fc1 accumulation; fc2 + fc3 fused into the last-step finalize."""
    k = pl.program_id(0)

    @pl.when(k == 0)
    def _():
        acc_ref[...] = jnp.zeros_like(acc_ref)

    # Stream this step's (B, tile_k) x slab and (tile_k, 512) bf16 w1 tile.
    acc_ref[...] += jnp.dot(
        x_ref[...], w1_ref[...], preferred_element_type=jnp.float32
    )

    @pl.when(k == pl.num_programs(0) - 1)
    def _():
        # fc1 bias + ReLU   (dropout is identity at inference)
        h1 = jnp.maximum(acc_ref[...] + b1_ref[...], 0.0)
        # fc2 + ReLU        (bf16 matmul, f32 accumulate; dropout identity)
        h2 = jnp.maximum(
            jnp.dot(h1.astype(jnp.bfloat16), w2_ref[...],
                    preferred_element_type=jnp.float32) + b2_ref[...],
            0.0,
        )
        # fc3 (logits)
        out = (
            jnp.dot(h2.astype(jnp.bfloat16), w3_ref[...],
                    preferred_element_type=jnp.float32) + b3_ref[...]
        )
        o_ref[...] = out.astype(o_ref.dtype)


def fused_mlp(x, w1, b1, w2, b2, w3, b3, *, tile_k):
    """x: (B, K) bf16; w1/w2/w3 bf16; biases f32 -> logits (B, N3) f32."""
    B, K = x.shape
    K1, N1 = w1.shape
    N1b, N2 = w2.shape
    N2b, N3 = w3.shape
    assert K == K1 and N1 == N1b and N2 == N2b
    assert K % tile_k == 0, (K, tile_k)
    nk = K // tile_k

    b1r = b1.reshape(1, N1)
    b2r = b2.reshape(1, N2)
    b3r = b3.reshape(1, N3)

    bytes_accessed = (
        x.size * 2 + w1.size * 2 + w2.size * 2 + w3.size * 2
        + (N1 + N2 + N3) * 4 + B * N3 * 4
    )
    flops = 2 * B * (K * N1 + N1 * N2 + N2 * N3)

    return pl.pallas_call(
        _fused_mlp_kernel,
        out_shape=jax.ShapeDtypeStruct((B, N3), jnp.float32),
        grid_spec=pltpu.PrefetchScalarGridSpec(
            num_scalar_prefetch=0,
            grid=(nk,),
            in_specs=[
                pl.BlockSpec((B, tile_k), lambda k: (0, k)),   # x streamed
                pl.BlockSpec((tile_k, N1), lambda k: (k, 0)),  # w1 streamed
                pl.BlockSpec((1, N1), lambda k: (0, 0)),       # b1 resident
                pl.BlockSpec((N1, N2), lambda k: (0, 0)),      # w2 resident
                pl.BlockSpec((1, N2), lambda k: (0, 0)),       # b2 resident
                pl.BlockSpec((N2, N3), lambda k: (0, 0)),      # w3 resident
                pl.BlockSpec((1, N3), lambda k: (0, 0)),       # b3 resident
            ],
            out_specs=pl.BlockSpec((B, N3), lambda k: (0, 0)),
            scratch_shapes=[pltpu.VMEM((B, N1), jnp.float32)],  # h1 accumulator
        ),
        compiler_params=pltpu.CompilerParams(
            dimension_semantics=("arbitrary",),  # K is a reduction axis
            # ~17 MiB actually used (8 MiB bf16 w1 tile double-buffered +
            # small residents); 32 MiB is safe on v5e/v6e and under the
            # v7x 64 MiB physical ceiling.
            vmem_limit_bytes=32 * 1024 * 1024,
        ),
        cost_estimate=pl.CostEstimate(
            flops=flops, transcendentals=0, bytes_accessed=bytes_accessed
        ),
    )(x, w1, b1r, w2, b2r, w3, b3r)


def init_params(key):
    """Deterministic init matching ANNModel's layer shapes (weights bf16)."""
    k1, k2, k3, k4, k5, k6 = jax.random.split(key, 6)
    d_in, d_h1, d_h2, d_out = 128 * 128 * 1, 512, 128, 2

    def linear_init(kw, kb, fan_in, fan_out):
        bound = 1.0 / jnp.sqrt(jnp.float32(fan_in))
        w = jax.random.uniform(kw, (fan_in, fan_out), jnp.float32, -bound, bound)
        b = jax.random.uniform(kb, (fan_out,), jnp.float32, -bound, bound)
        return w.astype(jnp.bfloat16), b

    w1, b1 = linear_init(k1, k2, d_in, d_h1)
    w2, b2 = linear_init(k3, k4, d_h1, d_h2)
    w3, b3 = linear_init(k5, k6, d_h2, d_out)
    return {"w1": w1, "b1": b1, "w2": w2, "b2": b2, "w3": w3, "b3": b3}


@jax.jit
def ann_forward(params, x):
    """x: (B, 1, 128, 128) NCHW float32 -> logits (B, 2) float32."""
    B = x.shape[0]
    x_flat = x.reshape(B, -1).astype(jnp.bfloat16)  # same order as torch .view
    return fused_mlp(
        x_flat,
        params["w1"], params["b1"],
        params["w2"], params["b2"],
        params["w3"], params["b3"],
        tile_k=8192,
    )


def _reference_forward(params, x):
    """Pure-JAX reference mirroring the kernel's bf16 storage/casts."""
    B = x.shape[0]
    hi = jax.lax.Precision.HIGHEST
    h = x.reshape(B, -1).astype(jnp.bfloat16).astype(jnp.float32)
    w1 = params["w1"].astype(jnp.float32)
    w2 = params["w2"].astype(jnp.float32)
    w3 = params["w3"].astype(jnp.float32)
    h1 = jnp.maximum(jnp.dot(h, w1, precision=hi) + params["b1"], 0.0)
    h1 = h1.astype(jnp.bfloat16).astype(jnp.float32)
    h2 = jnp.maximum(jnp.dot(h1, w2, precision=hi) + params["b2"], 0.0)
    h2 = h2.astype(jnp.bfloat16).astype(jnp.float32)
    return jnp.dot(h2, w3, precision=hi) + params["b3"]


if __name__ == "__main__":
    key = jax.random.PRNGKey(0)
    pkey, xkey = jax.random.split(key)

    params = init_params(pkey)
    # Spatial shape is fixed by fc1 (128*128*1 inputs); small batch of 2.
    x = jax.random.normal(xkey, (2, 1, 128, 128), dtype=jnp.float32)

    out = jax.block_until_ready(ann_forward(params, x))
    ref = _reference_forward(params, x)

    assert out.shape == (2, 2), out.shape
    assert jnp.allclose(out, ref, atol=1e-2, rtol=1e-2), (out, ref)

    print("KERNEL_OK")
</pallas_src>

<mosaic_0001>
module attributes {stable_mosaic.version = 11 : i64} {
  func.func @_fused_mlp_kernel(%arg0: i32, %arg1: memref<2x8192xbf16, #tpu.memory_space<vmem>>, %arg2: memref<8192x512xbf16, #tpu.memory_space<vmem>>, %arg3: memref<1x512xf32, #tpu.memory_space<vmem>>, %arg4: memref<512x128xbf16, #tpu.memory_space<vmem>>, %arg5: memref<1x128xf32, #tpu.memory_space<vmem>>, %arg6: memref<128x2xbf16, #tpu.memory_space<vmem>>, %arg7: memref<1x2xf32, #tpu.memory_space<vmem>>, %arg8: memref<2x2xf32, #tpu.memory_space<vmem>>, %arg9: memref<2x512xf32, #tpu.memory_space<vmem>>) attributes {dimension_semantics = [#tpu.dimension_semantics<arbitrary>], iteration_bounds = array<i64: 2>, scalar_prefetch = 0 : i64, scratch_operands = 1 : i64, tpu.core_type = #tpu.core_type<tc>, window_params = [{transform_indices = @transform_0, window_bounds = array<i64: 2, 8192>}, {transform_indices = @transform_1, window_bounds = array<i64: 8192, 512>}, {pipeline_mode = #tpu.pipeline_mode<synchronous>, transform_indices = @transform_2, window_bounds = array<i64: 1, 512>}, {pipeline_mode = #tpu.pipeline_mode<synchronous>, transform_indices = @transform_3, window_bounds = array<i64: 512, 128>}, {pipeline_mode = #tpu.pipeline_mode<synchronous>, transform_indices = @transform_4, window_bounds = array<i64: 1, 128>}, {pipeline_mode = #tpu.pipeline_mode<synchronous>, transform_indices = @transform_5, window_bounds = array<i64: 128, 2>}, {pipeline_mode = #tpu.pipeline_mode<synchronous>, transform_indices = @transform_6, window_bounds = array<i64: 1, 2>}, {pipeline_mode = #tpu.pipeline_mode<synchronous>, transform_indices = @transform_7, window_bounds = array<i64: 2, 2>}]} {
    %c0_i32 = arith.constant 0 : i32
    %0 = arith.cmpi eq, %arg0, %c0_i32 : i32
    %1 = arith.extui %0 : i1 to i32
    %c0_i32_0 = arith.constant 0 : i32
    %2 = arith.cmpi ne, %1, %c0_i32_0 : i32
    scf.if %2 {
      %cst_9 = arith.constant 0.000000e+00 : f32
      %12 = vector.broadcast %cst_9 : f32 to vector<2x512xf32>
      %c0_10 = arith.constant 0 : index
      %c0_11 = arith.constant 0 : index
      %13 = vector.load %arg9[%c0_10, %c0_11] : memref<2x512xf32, #tpu.memory_space<vmem>>, vector<2x512xf32>
      tpu.vector_store %arg9[%c0_10, %c0_11], %12 {strides = array<i32>} : memref<2x512xf32, #tpu.memory_space<vmem>>, vector<2x512xf32>,
    } else {
    }
    %c0 = arith.constant 0 : index
    %c0_1 = arith.constant 0 : index
    %3 = vector.load %arg9[%c0, %c0_1] : memref<2x512xf32, #tpu.memory_space<vmem>>, vector<2x512xf32>
    %c0_2 = arith.constant 0 : index
    %c0_3 = arith.constant 0 : index
    %4 = vector.load %arg1[%c0_2, %c0_3] : memref<2x8192xbf16, #tpu.memory_space<vmem>>, vector<2x8192xbf16>
    %c0_4 = arith.constant 0 : index
    %c0_5 = arith.constant 0 : index
    %5 = vector.load %arg2[%c0_4, %c0_5] : memref<8192x512xbf16, #tpu.memory_space<vmem>>, vector<8192x512xbf16>
    %cst = arith.constant dense<0.000000e+00> : vector<2x512xf32>
    %6 = tpu.matmul %4, %5, %cst {dimension_numbers = #tpu.dot_dimension_numbers<[1], [0], [0], [1], [0, 0, 1, 1], [], []>} : vector<2x8192xbf16>, vector<8192x512xbf16>, vector<2x512xf32> -> vector<2x512xf32>
    %7 = arith.addf %3, %6 : vector<2x512xf32>
    %c0_6 = arith.constant 0 : index
    %c0_7 = arith.constant 0 : index
    %8 = vector.load %arg9[%c0_6, %c0_7] : memref<2x512xf32, #tpu.memory_space<vmem>>, vector<2x512xf32>
    tpu.vector_store %arg9[%c0_6, %c0_7], %7 {strides = array<i32>} : memref<2x512xf32, #tpu.memory_space<vmem>>, vector<2x512xf32>,
    %c1_i32 = arith.constant 1 : i32
    %9 = arith.cmpi eq, %arg0, %c1_i32 : i32
    %10 = arith.extui %9 : i1 to i32
    %c0_i32_8 = arith.constant 0 : i32
    %11 = arith.cmpi ne, %10, %c0_i32_8 : i32
    scf.if %11 {
      %c0_9 = arith.constant 0 : index
      %c0_10 = arith.constant 0 : index
      %12 = vector.load %arg9[%c0_9, %c0_10] : memref<2x512xf32, #tpu.memory_space<vmem>>, vector<2x512xf32>
      %c0_11 = arith.constant 0 : index
      %c0_12 = arith.constant 0 : index
      %13 = vector.load %arg3[%c0_11, %c0_12] : memref<1x512xf32, #tpu.memory_space<vmem>>, vector<1x512xf32>
      %14 = vector.broadcast %13 : vector<1x512xf32> to vector<2x512xf32>
      %15 = arith.addf %12, %14 : vector<2x512xf32>
      %cst_13 = arith.constant 0.000000e+00 : f32
      %16 = vector.broadcast %cst_13 : f32 to vector<2x512xf32>
      %17 = arith.maximumf %15, %16 : vector<2x512xf32>
      %18 = arith.truncf %17 : vector<2x512xf32> to vector<2x512xbf16>
      %c0_14 = arith.constant 0 : index
      %c0_15 = arith.constant 0 : index
      %19 = vector.load %arg4[%c0_14, %c0_15] : memref<512x128xbf16, #tpu.memory_space<vmem>>, vector<512x128xbf16>
      %cst_16 = arith.constant dense<0.000000e+00> : vector<2x128xf32>
      %20 = tpu.matmul %18, %19, %cst_16 {dimension_numbers = #tpu.dot_dimension_numbers<[1], [0], [0], [1], [0, 0, 1, 1], [], []>} : vector<2x512xbf16>, vector<512x128xbf16>, vector<2x128xf32> -> vector<2x128xf32>
      %c0_17 = arith.constant 0 : index
      %c0_18 = arith.constant 0 : index
      %21 = vector.load %arg5[%c0_17, %c0_18] : memref<1x128xf32, #tpu.memory_space<vmem>>, vector<1x128xf32>
      %22 = vector.broadcast %21 : vector<1x128xf32> to vector<2x128xf32>
      %23 = arith.addf %20, %22 : vector<2x128xf32>
      %cst_19 = arith.constant 0.000000e+00 : f32
      %24 = vector.broadcast %cst_19 : f32 to vector<2x128xf32>
      %25 = arith.maximumf %23, %24 : vector<2x128xf32>
      %26 = arith.truncf %25 : vector<2x128xf32> to vector<2x128xbf16>
      %c0_20 = arith.constant 0 : index
      %c0_21 = arith.constant 0 : index
      %27 = vector.load %arg6[%c0_20, %c0_21] : memref<128x2xbf16, #tpu.memory_space<vmem>>, vector<128x2xbf16>
      %cst_22 = arith.constant dense<0.000000e+00> : vector<2x2xf32>
      %28 = tpu.matmul %26, %27, %cst_22 {dimension_numbers = #tpu.dot_dimension_numbers<[1], [0], [0], [1], [0, 0, 1, 1], [], []>} : vector<2x128xbf16>, vector<128x2xbf16>, vector<2x2xf32> -> vector<2x2xf32>
      %c0_23 = arith.constant 0 : index
      %c0_24 = arith.constant 0 : index
      %29 = vector.load %arg7[%c0_23, %c0_24] : memref<1x2xf32, #tpu.memory_space<vmem>>, vector<1x2xf32>
      %30 = vector.broadcast %29 : vector<1x2xf32> to vector<2x2xf32>
      %31 = arith.addf %28, %30 : vector<2x2xf32>
      %c0_25 = arith.constant 0 : index
      %c0_26 = arith.constant 0 : index
      %32 = vector.load %arg8[%c0_25, %c0_26] : memref<2x2xf32, #tpu.memory_space<vmem>>, vector<2x2xf32>
      tpu.vector_store %arg8[%c0_25, %c0_26], %31 {strides = array<i32>} : memref<2x2xf32, #tpu.memory_space<vmem>>, vector<2x2xf32>,
    } else {
    }
    return
  }
  func.func @transform_0(%arg0: i32) -> (i32, i32) {
    %c0_i32 = arith.constant 0 : i32
    %c0_i32_0 = arith.constant 0 : i32
    return %c0_i32, %arg0 : i32, i32
  }
  func.func @transform_1(%arg0: i32) -> (i32, i32) {
    %c0_i32 = arith.constant 0 : i32
    %c0_i32_0 = arith.constant 0 : i32
    return %arg0, %c0_i32 : i32, i32
  }
  func.func @transform_2(%arg0: i32) -> (i32, i32) {
    %c0_i32 = arith.constant 0 : i32
    %c0_i32_0 = arith.constant 0 : i32
    %c0_i32_1 = arith.constant 0 : i32
    return %c0_i32, %c0_i32_0 : i32, i32
  }
  func.func @transform_3(%arg0: i32) -> (i32, i32) {
    %c0_i32 = arith.constant 0 : i32
    %c0_i32_0 = arith.constant 0 : i32
    %c0_i32_1 = arith.constant 0 : i32
    return %c0_i32, %c0_i32_0 : i32, i32
  }
  func.func @transform_4(%arg0: i32) -> (i32, i32) {
    %c0_i32 = arith.constant 0 : i32
    %c0_i32_0 = arith.constant 0 : i32
    %c0_i32_1 = arith.constant 0 : i32
    return %c0_i32, %c0_i32_0 : i32, i32
  }
  func.func @transform_5(%arg0: i32) -> (i32, i32) {
    %c0_i32 = arith.constant 0 : i32
    %c0_i32_0 = arith.constant 0 : i32
    %c0_i32_1 = arith.constant 0 : i32
    return %c0_i32, %c0_i32_0 : i32, i32
  }
  func.func @transform_6(%arg0: i32) -> (i32, i32) {
    %c0_i32 = arith.constant 0 : i32
    %c0_i32_0 = arith.constant 0 : i32
    %c0_i32_1 = arith.constant 0 : i32
    return %c0_i32, %c0_i32_0 : i32, i32
  }
  func.func @transform_7(%arg0: i32) -> (i32, i32) {
    %c0_i32 = arith.constant 0 : i32
    %c0_i32_0 = arith.constant 0 : i32
    %c0_i32_1 = arith.constant 0 : i32
    return %c0_i32, %c0_i32_0 : i32, i32
  }
}

</mosaic_0001>

<bundles_post_ra>
// kernel: ann_forward.1
= control target key start
LH: loop header
LB: loop body
LE: loop exit
PB: predicated region body
PF: predicated region fallthrough
CT: control target
= control target key end

     0   :  { %12 = vsyncpa [#allocation4], 0  ;;  %s24998_s0 = inlined_call_operand.vmem [shape: bf16[2,16384], index: 0, kind: input, shape index: {}]   ;;  %s24999_s1 = inlined_call_operand.hbm [shape: bf16[16384,512], index: 1, kind: input, shape index: {}]   ;;  %s25000_s2 = inlined_call_operand.hbm [shape: f32[1,512], index: 2, kind: input, shape index: {}]   ;;  %s25001_s3 = inlined_call_operand.hbm [shape: bf16[512,128], index: 3, kind: input, shape index: {}]   ;;  %s25002_s4 = inlined_call_operand.hbm [shape: f32[1,128], index: 4, kind: input, shape index: {}]   ;;  %s25003_s5 = inlined_call_operand.vmem [shape: bf16[128,2], index: 5, kind: input, shape index: {}]   ;;  %s25004_s6 = inlined_call_operand.hbm [shape: f32[1,2], index: 6, kind: input, shape index: {}]   ;;  %s25005_s7 = inlined_call_operand.hbm [shape: f32[2,2], index: 7, kind: output, shape index: {}]  }
   0x1   :  { %14 = vsyncpa [#allocation4 + $0x1], 0 }
   0x2   :  { %15 = vsyncpa [#allocation7], 0 }
   0x3   :  { %16 = vsyncpa [#allocation10], 0 }
   0x4   :  { %17 = vsyncpa [#allocation5], 0  ;;  %s22068_s24 = smov 0   ;;  %s22070_s25 = smov 0  }
   0x5   :  { %s22072_s26 = smov 0   ;;  %s22074_s27 = smov 0  }
   0x6 LB: > { %s22087_s28 = sadd.s32 4294967295, %s22011_s27   ;;  %p69_p0 = scmp.ne.s32.totalorder %s22003_s25, %s21999_s24  ;;  %s22011_s27 = sphi %s22074_s27, %s25085_s27   ;;  %s22007_s26 = sphi %s22072_s26, %s25084_s26   ;;  %s22003_s25 = sphi %s22070_s25, %s25083_s25   ;;  %s21999_s24 = sphi %s22068_s24, %s25082_s24  }
   0x7   : > { %p25006_p1 = scmp.eq.s32.totalorder %s22087_s28, 0  ;;  %p16405_p2 = scmp.ge.s32.totalorder %s22011_s27, 1 }
   0x8   : > { %p206_p3 = scmp.lt.s32.totalorder %s22011_s27, 3  ;;  %s22013_s8 = smov [#allocation6]  }
   0x9   : > { %p22096_p5 = por %p25006_p1, %p69_p0  ;;  %s219_s9 = sshll.u32 %s22013_s8, 4  ;;  %s220_s9 = int_to_ptr.vmem [resolvable:$true] %s219_s9 }
   0xa   : > { %p22100_p6 = pnand %p16405_p2, %p206_p3  ;;  %s22014_s10 = smov [#allocation9]  }
   0xb   : > { %s25030_s29 = scalar_select %p22096_p5, 1, 0 }
   0xc   : > { %s25031_s30 = scalar_select %p22100_p6, 1, 0 }
   0xd   : > { %p18615_p7 = pneg %p22100_p6  ;;  %s243_s11 = sshll.u32 %s22014_s10, 4  ;;  %s244_s11 = int_to_ptr.vmem [resolvable:$true] %s243_s11 }
   0xe   : > { %s22015_s13 = smov [#allocation8]   ;;  %s21820_s15 = scalar_lea.vmem %s220_s9, 64 }
   0xf   : > { %p22108_p8 = pnand %p18615_p7, %p25006_p1  ;;  %s229_s14 = sshll.u32 %s22015_s13, 4  ;;  %s22112_s14 = int_to_ptr.vmem [resolvable:$true] %s229_s14 }
  0x10   : > { %p21821_p10 = scmp.ne.s32.totalorder %s220_s9, %s21820_s15  ;;  %p21828_p13 = scmp.lt.s32.totalorder %s220_s9, %s220_s9 }
  0x11   : > { %p21811_p9 = pneg %p22108_p8  ;;  %p21829_p0 = scmp.lt.s32.totalorder %s21820_s15, %s21820_s15 }
  0x13   : > { %p21823_p11 = pnand %p21821_p10, %p21811_p9  ;;  %p21830_p2 = por %p21829_p0, %p21828_p13 }
  0x15   : > { %p21824_p12 = pneg %p21823_p11 }
  0x17   : > { %p21831_p3 = pnand %p21830_p2, %p21824_p12 }
  0x19   : > { %21834 = shalt.err (!%p21831_p3)
}
  0x1a   : > { %18618 = dma.hbm_to_vmem [thread:$0]  (!%p22108_p8), %s25000_s2, 64, %s220_s9, [#allocation7]  }
  0x1b   : > { %s21846_s18 = scalar_lea.vmem %s244_s11, 16  ;;  %s21853_s19 = scalar_lea.vmem %s244_s11, 32 }
  0x1c   : > { %p21847_p7 = scmp.ne.s32.totalorder %s244_s11, %s21846_s18  ;;  %p21854_p10 = scmp.lt.s32.totalorder %s244_s11, %s244_s11 }
  0x1d   : > { %p21855_p11 = scmp.lt.s32.totalorder %s21853_s19, %s21846_s18 }
  0x1e   : > { %p21849_p4 = pnand %p21847_p7, %p21811_p9 }
  0x1f   : > { %p21856_p5 = por %p21855_p11, %p21854_p10 }
  0x20   : > { %p21850_p1 = pneg %p21849_p4 }
  0x22   : > { %p21857_p13 = pnand %p21856_p5, %p21850_p1 }
  0x24   : > { %21860 = shalt.err (!%p21857_p13)
}
  0x25   : > { %18624 = dma.hbm_to_vmem [thread:$0]  (!%p22108_p8), %s25002_s4, 16, %s244_s11, [#allocation10]  }
  0x26   : > { %s21872_s22 = scalar_lea.vmem %s22112_s14, 4096  ;;  %p21880_p2 = scmp.lt.s32.totalorder %s22112_s14, %s22112_s14 }
  0x27   : > { %p21873_p12 = scmp.ne.s32.totalorder %s22112_s14, %s21872_s22  ;;  %p21881_p1 = scmp.lt.s32.totalorder %s21872_s22, %s21872_s22 }
  0x29   : > { %p21875_p4 = pnand %p21873_p12, %p21811_p9  ;;  %p21882_p5 = por %p21881_p1, %p21880_p2 }
  0x2b   : > { %p21876_p0 = pneg %p21875_p4 }
  0x2d   : > { %p21883_p3 = pnand %p21882_p5, %p21876_p0 }
  0x2f   : > { %21886 = shalt.err (!%p21883_p3)
}
  0x30   : > { %s22016_s23 = smov 64   ;;  %s22017_s24 = smov 4  }
  0x31   : > { %18621 = dma.hbm_to_vmem [thread:$0]  (!%p22108_p8), %s25001_s3, 4096, %s22112_s14, [#allocation7], %s22016_s23, %s22016_s23, %s22017_s24  }
  0x32   : > { %s22018_s10 = smov [#allocation11]  }
  0x33   : > { %s257_s11 = sshll.u32 %s22018_s10, 4  ;;  %s258_s11 = int_to_ptr.vmem [resolvable:$true] %s257_s11 }
  0x34   : > { %s21898_s13 = scalar_lea.vmem %s258_s11, 16  ;;  %s21905_s15 = scalar_lea.vmem %s258_s11, 32 }
  0x35   : > { %p21899_p7 = scmp.ne.s32.totalorder %s258_s11, %s21898_s13  ;;  %p21906_p13 = scmp.lt.s32.totalorder %s258_s11, %s258_s11 }
  0x36   : > { %p21907_p12 = scmp.lt.s32.totalorder %s21905_s15, %s21898_s13 }
  0x37   : > { %p21901_p10 = pnand %p21899_p7, %p21811_p9 }
  0x38   : > { %p21908_p4 = por %p21907_p12, %p21906_p13 }
  0x39   : > { %p21902_p11 = pneg %p21901_p10 }
  0x3b   : > { %p21909_p0 = pnand %p21908_p4, %p21902_p11 }
  0x3d   : > { %21912 = shalt.err (!%p21909_p0)
}
  0x3e   : > { %18627 = dma.hbm_to_vmem [thread:$0]  (!%p22108_p8), %s25004_s6, 16, %s258_s11, [#allocation10]  }
  0x3f   : > { %s22154_s14 = sadd.s32 1, %s22011_s27   ;;  %s56_s18 = sadd.s32 1, %s22007_s26 }
  0x40   : > { %s53_s19 = ssub.s32 %s22011_s27, %s22154_s14  ;;  %p63_p9 = scmp.ne.s32.totalorder %s22007_s26, %s22003_s25 }
  0x41   : > { %p54_p2 = scmp.eq.s32.totalorder %s53_s19, 0  ;;  %p64_p1 = scmp.eq.s32.totalorder %s22011_s27, 0 }
  0x42   : > { %p18636_p5 = scmp.lt.s32.totalorder %s22011_s27, 2  ;;  %s276_s12 = sand.u32 1, %s22007_s26  }
  0x43   : > { %s22165_s20 = scalar_select %p54_p2, %s22007_s26, %s56_s18  }
  0x44   : > { %p65_p3 = por %p64_p1, %p63_p9  ;;  %s16411_s21 = sshll.u32 %s276_s12, 14 }
  0x45   : > { %s18519_s22 = sshll.u32 %s22011_s27, 18  ;;  %s280_s9 = scalar_lea.vmem [#allocation3], %s16411_s21 }
  0x46   : > { %s22171_s8 = scalar_lea.hbm %s24999_s1, %s18519_s22  ;;  %s288_s10 = sshll.u32 %s280_s9, 4  ;;  %s22177_s10 = int_to_ptr.vmem [resolvable:$true] %s288_s10 }
  0x47   : > { %p22173_p8 = pnand %p18636_p5, %p65_p3  ;;  %s22179_s13 = scalar_lea.sflag [#allocation4], %s276_s12 }
  0x48   : > { %s21913_s27 = scalar_lea.hbm %s22171_s8, 262144  ;;  %s21918_s17 = scalar_lea.hbm %s24999_s1, 524288 }
  0x49   : > { %p21914_p7 = scmp.ne.s32.totalorder %s22171_s8, %s21913_s27  ;;  %p21915_p10 = pneg %p22173_p8 }
  0x4a   : > { %p21919_p12 = scmp.lt.s32.totalorder %s22171_s8, %s24999_s1  ;;  %p21920_p4 = scmp.lt.s32.totalorder %s21918_s17, %s21913_s27 }
  0x4b   : > { %p21916_p11 = pnand %p21915_p10, %p21914_p7 }
  0x4c   : > { %p21921_p0 = por %p21920_p4, %p21919_p12 }
  0x4d   : > { %p21917_p13 = pneg %p21916_p11 }
  0x4f   : > { %p21922_p9 = pnand %p21921_p0, %p21917_p13 }
  0x51   : > { %21925 = shalt.err (!%p21922_p9)
}
  0x52   : > { %s21926_s12 = scalar_lea.vmem %s22177_s10, 262144  ;;  %s22019_s21 = smov [#allocation3]  }
  0x53   : > { %p21927_p2 = scmp.ne.s32.totalorder %s22177_s10, %s21926_s12  ;;  %s21931_s22 = sshll.u32 %s22019_s21, 4  ;;  %s21932_s22 = int_to_ptr.vmem [resolvable:$false] %s21931_s22 }
  0x54   : > { %s21933_s23 = scalar_lea.vmem %s21932_s22, 524288  ;;  %p21934_p3 = scmp.lt.s32.totalorder %s22177_s10, %s21932_s22 }
  0x55   : > { %p21929_p1 = pnand %p21927_p2, %p21915_p10  ;;  %p21935_p7 = scmp.lt.s32.totalorder %s21933_s23, %s21926_s12 }
  0x57   : > { %p21930_p5 = pneg %p21929_p1  ;;  %p21936_p11 = por %p21935_p7, %p21934_p3 }
  0x59   : > { %p21937_p6 = pnand %p21936_p11, %p21930_p5 }
  0x5b   : > { %21940 = shalt.err (!%p21937_p6)
}
  0x5c   : > { %s22020_s24 = smov 256   ;;  %s22021_s9 = smov 16  }
  0x5d   : > { %18631 = dma.hbm_to_vmem [thread:$0]  (!%p22173_p8), %s22171_s8, 262144, %s22177_s10, %s22179_s13, %s22020_s24, %s22020_s24, %s22021_s9  }
  0x5e   : > { %p25034_p10 = scmp.ne.s32.totalorder %s25031_s30, 0 }
  0x60   : > { %300 = sbr.rel (%p25034_p10) target bundleno = 2830 (0xb0e), region = 48 }
  0x65   : > { %s302_s27 = sand.u32 1, %s22003_s25   ;;  %p25035_p13 = scmp.ne.s32.totalorder %s25030_s29, 0 }
  0x66   : > { %s16416_s15 = sshll.u32 %s302_s27, 14  ;;  %s303_s16 = scalar_lea.sflag [#allocation4], %s302_s27 }
  0x67   : > { %s22203_s17 = scalar_lea.vmem [#allocation3], %s16416_s15 }
  0x68   : > { %21982 = dma.done.wait (%p25035_p13), %s303_s16, 262144  }
  0x69   : > { %21984 = vsyncadd (%p25035_p13), %s303_s16, 4294705152  ;;  %p25036_p6 = scmp.eq.s32.totalorder %s22087_s28, 0 }
  0x6b   : > { %21986 = dma.done.wait (%p25036_p6), [#allocation7], 4160   ;;  %p25037_p8 = pmov %p25036_p6 }
  0x6c   : > { %p25038_p12 = pmov %p25036_p6 }
  0x6d   : > { %21988 = vsyncadd (%p25037_p8), [#allocation7], 4294963136 }
  0x6e   : > { %21990 = dma.done.wait (%p25038_p12), [#allocation10], 32   ;;  %p25039_p4 = pmov %p25036_p6 }
  0x6f   : > { %s16421_s30 = sshll.u32 %s22087_s28, 6  ;;  %p25040_p9 = scmp.ne.s32.totalorder %s22087_s28, 0 }
  0x70   : > { %21992 = vsyncadd (%p25039_p4), [#allocation10], 4294967264  ;;  %p353_p0 = scmp.lt.s32.totalorder %s16421_s30, 127 }
  0x71   : > { %362 = sbr.rel (%p25040_p9) target bundleno = 120 (0x78), region = 72 }
  0x72   : > { %s25087_s30 = smov (!%p353_p0, %s16421_s30), 127 }
  0x73   : > { %s22221_s29 = scalar_lea.vmem %s24998_s0, %s25087_s30 }
  0x76   : > { %v22022_v0 = vmov 0.0  }
  0x77   : > { %363 = vst [vmem:[#allocation2] sm:$0xff] %v22022_v0 }
  0x78 PF: > { %v18689_v1 = vld [vmem:[%s22203_s17 + $0xe4] ss:$16 sps:$4 sm:$0xff]   ;;  %v18693_v3 = vld [vmem:[%s22203_s17 + $0xe0] ss:$16 sps:$4 sm:$0xff]   ;;  %v22023_v37 = vmov 1966171168   ;;  %v2433_v39 = vlaneseq }
  0x79   : > { %v18691_v2 = vld [vmem:[%s22203_s17 + $0x2e4] ss:$16 sps:$4 sm:$0xff]   ;;  %13125 = vmatprep.subr.bf16.mxu0 %v18689_v1  ;;  %v18694_v4 = vld [vmem:[%s22203_s17 + $0x2e0] ss:$16 sps:$4 sm:$0xff]   ;;  %v2431_v38 = vunpack.c.l.s4 %v22023_v37  ;;  %v365_v53 = vld [vmem:[%s22221_s29] sm:$0xff]  ;;  %p18471_p2 = scmp.ne.s32.totalorder %s22087_s28, 1 }
  0x7a   : > { %13166 = vmatprep.subr.bf16.mxu1 %v18691_v2  ;;  %v18695_v5 = vld [vmem:[%s22203_s17 + $0xc4] ss:$16 sps:$4 sm:$0xff]   ;;  %13126 = vmatpush1.bf16.msra.mxu0 %v18693_v3  ;;  %v18699_v7 = vld [vmem:[%s22203_s17 + $0xc0] ss:$16 sps:$4 sm:$0xff]   ;;  %v22264_v44 = vshrl.u32 %v2433_v39, 7  ;;  %v2429_v2 = vcombine.high %v365_v53, %v365_v53 }
  0x7b   : > { %13167 = vmatpush1.bf16.msra.mxu1 %v18694_v4  ;;  %v18697_v6 = vld [vmem:[%s22203_s17 + $0x2c4] ss:$16 sps:$4 sm:$0xff]   ;;  %13127 = vmatprep.subr.bf16.mxu0 %v18695_v5  ;;  %v18700_v8 = vld [vmem:[%s22203_s17 + $0x2c0] ss:$16 sps:$4 sm:$0xff]   ;;  %v2432_v43 = vunpack.c.0.s8 %v2431_v38 }
  0x7c   : > { %13168 = vmatprep.subr.bf16.mxu1 %v18697_v6  ;;  %v18701_v9 = vld [vmem:[%s22203_s17 + $0xa4] ss:$16 sps:$4 sm:$0xff]   ;;  %v18705_v11 = vld [vmem:[%s22203_s17 + $0xa0] ss:$16 sps:$4 sm:$0xff]   ;;  %25041 = vst [vmem:[#allocation17_spill] sm:$0xff] %v22264_v44 }
  0x7d   : > { %v18703_v10 = vld [vmem:[%s22203_s17 + $0x2a4] ss:$16 sps:$4 sm:$0xff]   ;;  %v18706_v12 = vld [vmem:[%s22203_s17 + $0x2a0] ss:$16 sps:$4 sm:$0xff]   ;;  %v22272_v50 = vsub.s32 %v2432_v43, %v22264_v44 }
  0x7e   : > { %13128 = vmatpush1.bf16.msra.mxu0 %v18699_v7  ;;  %v18707_v13 = vld [vmem:[%s22203_s17 + $0x84] ss:$16 sps:$4 sm:$0xff]   ;;  %v18711_v15 = vld [vmem:[%s22203_s17 + $0x80] ss:$16 sps:$4 sm:$0xff]  }
  0x7f   : > { %13169 = vmatpush1.bf16.msra.mxu1 %v18700_v8  ;;  %13129 = vmatprep.subr.bf16.mxu0 %v18701_v9  ;;  %v18709_v14 = vld [vmem:[%s22203_s17 + $0x284] ss:$16 sps:$4 sm:$0xff]   ;;  %v18712_v16 = vld [vmem:[%s22203_s17 + $0x280] ss:$16 sps:$4 sm:$0xff]   ;;  %v2436_v55 = vrot.slane %v365_v53, %v22272_v50  ;;  %v22300_v7 = vrot.slane %v2429_v2, %v22272_v50 }
  0x80   : > { %13170 = vmatprep.subr.bf16.mxu1 %v18703_v10  ;;  %v18713_v17 = vld [vmem:[%s22203_s17 + $0x64] ss:$16 sps:$4 sm:$0xff]   ;;  %v18717_v19 = vld [vmem:[%s22203_s17 + $0x60] ss:$16 sps:$4 sm:$0xff]  }
  0x81   : > { %v18715_v18 = vld [vmem:[%s22203_s17 + $0x264] ss:$16 sps:$4 sm:$0xff]   ;;  %v18718_v20 = vld [vmem:[%s22203_s17 + $0x260] ss:$16 sps:$4 sm:$0xff]   ;;  %v2444_v59 = vcombine.high %v2436_v55, %v2436_v55 }
  0x82   : > { %13130 = vmatpush1.bf16.msra.mxu0 %v18705_v11  ;;  %v18719_v21 = vld [vmem:[%s22203_s17 + $0x44] ss:$16 sps:$4 sm:$0xff]   ;;  %v18723_v23 = vld [vmem:[%s22203_s17 + $0x40] ss:$16 sps:$4 sm:$0xff]  }
  0x83   : > { %13171 = vmatpush1.bf16.msra.mxu1 %v18706_v12  ;;  %13131 = vmatprep.subr.bf16.mxu0 %v18707_v13  ;;  %v18721_v22 = vld [vmem:[%s22203_s17 + $0x244] ss:$16 sps:$4 sm:$0xff]   ;;  %v18724_v24 = vld [vmem:[%s22203_s17 + $0x240] ss:$16 sps:$4 sm:$0xff]   ;;  %v22284_v61 = vrot.slane %v2444_v59, %v22272_v50  ;;  %v2445_v12 = vcombine.high %v22300_v7, %v22300_v7 }
  0x84   : > { %13172 = vmatprep.subr.bf16.mxu1 %v18709_v14  ;;  %v18725_v25 = vld [vmem:[%s22203_s17 + $0x24] ss:$16 sps:$4 sm:$0xff]   ;;  %v18729_v27 = vld [vmem:[%s22203_s17 + $0x20] ss:$16 sps:$4 sm:$0xff]   ;;  %v22310_v14 = vrot.slane %v2436_v55, %v22272_v50 }
  0x85   : > { %v18727_v26 = vld [vmem:[%s22203_s17 + $0x224] ss:$16 sps:$4 sm:$0xff]   ;;  %v18730_v28 = vld [vmem:[%s22203_s17 + $0x220] ss:$16 sps:$4 sm:$0xff]   ;;  %v22291_v1 = vcombine.high %v22284_v61, %v22284_v61  ;;  %13157 = vmatprep.mubr.bf16.mxu0 %v22284_v61 }
  0x86   : > { %13132 = vmatpush1.bf16.msra.mxu0 %v18711_v15  ;;  %v18731_v29 = vld [vmem:[%s22203_s17 + $0x4] ss:$16 sps:$4 sm:$0xff]   ;;  %v18735_v31 = vld [vmem:[%s22203_s17] ss:$16 sps:$4 sm:$0xff]  }
  0x87   : > { %13173 = vmatpush1.bf16.msra.mxu1 %v18712_v16  ;;  %13133 = vmatprep.subr.bf16.mxu0 %v18713_v17  ;;  %v18733_v30 = vld [vmem:[%s22203_s17 + $0x204] ss:$16 sps:$4 sm:$0xff]   ;;  %v18736_v32 = vld [vmem:[%s22203_s17 + $0x200] ss:$16 sps:$4 sm:$0xff]  }
  0x88   : > { %13174 = vmatprep.subr.bf16.mxu1 %v18715_v18  ;;  %v18737_v33 = vld [vmem:[%s22203_s17 + $0x1e4] ss:$16 sps:$4 sm:$0xff]   ;;  %v18741_v35 = vld [vmem:[%s22203_s17 + $0x1e0] ss:$16 sps:$4 sm:$0xff]   ;;  %13198 = vmatprep.mubr.bf16.mxu1 %v22291_v1  ;;  %v22316_v18 = vrot.slane %v2445_v12, %v22272_v50 }
  0x89   : > { %v18739_v34 = vld [vmem:[%s22203_s17 + $0x3e4] ss:$16 sps:$4 sm:$0xff]   ;;  %v18742_v36 = vld [vmem:[%s22203_s17 + $0x3e0] ss:$16 sps:$4 sm:$0xff]  }
  0x8a   : > { %13134 = vmatpush1.bf16.msra.mxu0 %v18717_v19  ;;  %v18743_v40 = vld [vmem:[%s22203_s17 + $0x1c4] ss:$16 sps:$4 sm:$0xff]   ;;  %v18747_v42 = vld [vmem:[%s22203_s17 + $0x1c0] ss:$16 sps:$4 sm:$0xff]   ;;  %v22320_v19 = vcombine.high %v22310_v14, %v22310_v14 }
  0x8b   : > { %13175 = vmatpush1.bf16.msra.mxu1 %v18718_v20  ;;  %13135 = vmatprep.subr.bf16.mxu0 %v18719_v21  ;;  %v18745_v41 = vld [vmem:[%s22203_s17 + $0x3c4] ss:$16 sps:$4 sm:$0xff]   ;;  %v18748_v45 = vld [vmem:[%s22203_s17 + $0x3c0] ss:$16 sps:$4 sm:$0xff]  }
  0x8c   : > { %13176 = vmatprep.subr.bf16.mxu1 %v18721_v22  ;;  %v18749_v46 = vld [vmem:[%s22203_s17 + $0x1a4] ss:$16 sps:$4 sm:$0xff]   ;;  %v18753_v48 = vld [vmem:[%s22203_s17 + $0x1a0] ss:$16 sps:$4 sm:$0xff]  }
  0x8d   : > { %v18751_v47 = vld [vmem:[%s22203_s17 + $0x3a4] ss:$16 sps:$4 sm:$0xff]   ;;  %v18754_v49 = vld [vmem:[%s22203_s17 + $0x3a0] ss:$16 sps:$4 sm:$0xff]  }
  0x8e   : > { %13136 = vmatpush1.bf16.msra.mxu0 %v18723_v23  ;;  %v18755_v51 = vld [vmem:[%s22203_s17 + $0x184] ss:$16 sps:$4 sm:$0xff]   ;;  %v18759_v54 = vld [vmem:[%s22203_s17 + $0x180] ss:$16 sps:$4 sm:$0xff]  }
  0x8f   : > { %13177 = vmatpush1.bf16.msra.mxu1 %v18724_v24  ;;  %13137 = vmatprep.subr.bf16.mxu0 %v18725_v25  ;;  %v18757_v52 = vld [vmem:[%s22203_s17 + $0x384] ss:$16 sps:$4 sm:$0xff]   ;;  %v18760_v56 = vld [vmem:[%s22203_s17 + $0x380] ss:$16 sps:$4 sm:$0xff]   ;;  %v22328_v24 = vcombine.high %v22316_v18, %v22316_v18 }
  0x90   : > { %13178 = vmatprep.subr.bf16.mxu1 %v18727_v26  ;;  %v18761_v57 = vld [vmem:[%s22203_s17 + $0x164] ss:$16 sps:$4 sm:$0xff]   ;;  %v18765_v60 = vld [vmem:[%s22203_s17 + $0x160] ss:$16 sps:$4 sm:$0xff]  }
  0x91   : > { %v18763_v58 = vld [vmem:[%s22203_s17 + $0x364] ss:$16 sps:$4 sm:$0xff]   ;;  %v18766_v62 = vld [vmem:[%s22203_s17 + $0x360] ss:$16 sps:$4 sm:$0xff]  }
  0x92   : > { %13138 = vmatpush1.bf16.msra.mxu0 %v18729_v27  ;;  %v18767_v63 = vld [vmem:[%s22203_s17 + $0x144] ss:$16 sps:$4 sm:$0xff]   ;;  %v18771_v3 = vld [vmem:[%s22203_s17 + $0x140] ss:$16 sps:$4 sm:$0xff]  }
  0x93   : > { %13179 = vmatpush1.bf16.msra.mxu1 %v18730_v28  ;;  %13139 = vmatprep.subr.bf16.mxu0 %v18731_v29  ;;  %v18769_v0 = vld [vmem:[%s22203_s17 + $0x344] ss:$16 sps:$4 sm:$0xff]   ;;  %v18772_v4 = vld [vmem:[%s22203_s17 + $0x340] ss:$16 sps:$4 sm:$0xff]  }
  0x94   : > { %13180 = vmatprep.subr.bf16.mxu1 %v18733_v30  ;;  %v18773_v5 = vld [vmem:[%s22203_s17 + $0x124] ss:$16 sps:$4 sm:$0xff]   ;;  %v18777_v8 = vld [vmem:[%s22203_s17 + $0x120] ss:$16 sps:$4 sm:$0xff]  }
  0x95   : > { %v18775_v6 = vld [vmem:[%s22203_s17 + $0x324] ss:$16 sps:$4 sm:$0xff]   ;;  %v18778_v9 = vld [vmem:[%s22203_s17 + $0x320] ss:$16 sps:$4 sm:$0xff]  }
  0x96   : > { %13140 = vmatpush1.bf16.msra.mxu0 %v18735_v31  ;;  %v18779_v10 = vld [vmem:[%s22203_s17 + $0x104] ss:$16 sps:$4 sm:$0xff]   ;;  %v18783_v13 = vld [vmem:[%s22203_s17 + $0x100] ss:$16 sps:$4 sm:$0xff]  }
  0x97   : > { %13181 = vmatpush1.bf16.msra.mxu1 %v18736_v32  ;;  %13141 = vmatprep.subr.bf16.mxu0 %v18737_v33  ;;  %v18781_v11 = vld [vmem:[%s22203_s17 + $0x304] ss:$16 sps:$4 sm:$0xff]   ;;  %v18784_v15 = vld [vmem:[%s22203_s17 + $0x300] ss:$16 sps:$4 sm:$0xff]  }
  0x98   : > { %13182 = vmatprep.subr.bf16.mxu1 %v18739_v34  ;;  %v18787_v16 = vld [vmem:[%s22203_s17 + $0x4e4] ss:$16 sps:$4 sm:$0xff]   ;;  %v18785_v20 = vld [vmem:[%s22203_s17 + $0x4e0] ss:$16 sps:$4 sm:$0xff]  }
  0x99   : > { %v18790_v17 = vld [vmem:[%s22203_s17 + $0x6e4] ss:$16 sps:$4 sm:$0xff]   ;;  %v18788_v21 = vld [vmem:[%s22203_s17 + $0x6e0] ss:$16 sps:$4 sm:$0xff]  }
  0x9a   : > { %13142 = vmatpush2.bf16.msra.mxu0 %v18741_v35  ;;  %v18793_v22 = vld [vmem:[%s22203_s17 + $0x4c4] ss:$16 sps:$4 sm:$0xff]   ;;  %v18791_v25 = vld [vmem:[%s22203_s17 + $0x4c0] ss:$16 sps:$4 sm:$0xff]  }
  0x9b   : > { %13183 = vmatpush2.bf16.msra.mxu1 %v18742_v36  ;;  %13143 = vmatprep.subr.bf16.mxu0 %v18743_v40  ;;  %v18796_v23 = vld [vmem:[%s22203_s17 + $0x6c4] ss:$16 sps:$4 sm:$0xff]   ;;  %v18794_v26 = vld [vmem:[%s22203_s17 + $0x6c0] ss:$16 sps:$4 sm:$0xff]  }
  0x9c   : > { %13184 = vmatprep.subr.bf16.mxu1 %v18745_v41  ;;  %v18799_v27 = vld [vmem:[%s22203_s17 + $0x4a4] ss:$16 sps:$4 sm:$0xff]   ;;  %v18797_v29 = vld [vmem:[%s22203_s17 + $0x4a0] ss:$16 sps:$4 sm:$0xff]  }
  0x9d   : > { %v18802_v28 = vld [vmem:[%s22203_s17 + $0x6a4] ss:$16 sps:$4 sm:$0xff]   ;;  %v18800_v30 = vld [vmem:[%s22203_s17 + $0x6a0] ss:$16 sps:$4 sm:$0xff]  }
  0x9e   : > { %13144 = vmatpush2.bf16.msra.mxu0 %v18747_v42  ;;  %v18805_v31 = vld [vmem:[%s22203_s17 + $0x484] ss:$16 sps:$4 sm:$0xff]   ;;  %v18803_v33 = vld [vmem:[%s22203_s17 + $0x480] ss:$16 sps:$4 sm:$0xff]  }
  0x9f   : > { %13185 = vmatpush2.bf16.msra.mxu1 %v18748_v45  ;;  %13145 = vmatprep.subr.bf16.mxu0 %v18749_v46  ;;  %v18808_v32 = vld [vmem:[%s22203_s17 + $0x684] ss:$16 sps:$4 sm:$0xff]   ;;  %v18806_v34 = vld [vmem:[%s22203_s17 + $0x680] ss:$16 sps:$4 sm:$0xff]  }
  0xa0   : > { %13186 = vmatprep.subr.bf16.mxu1 %v18751_v47  ;;  %v18811_v35 = vld [vmem:[%s22203_s17 + $0x464] ss:$16 sps:$4 sm:$0xff]   ;;  %v18809_v37 = vld [vmem:[%s22203_s17 + $0x460] ss:$16 sps:$4 sm:$0xff]  }
  0xa1   : > { %v18814_v36 = vld [vmem:[%s22203_s17 + $0x664] ss:$16 sps:$4 sm:$0xff]   ;;  %v18812_v38 = vld [vmem:[%s22203_s17 + $0x660] ss:$16 sps:$4 sm:$0xff]  }
  0xa2   : > { %13146 = vmatpush2.bf16.msra.mxu0 %v18753_v48  ;;  %v18817_v39 = vld [vmem:[%s22203_s17 + $0x444] ss:$16 sps:$4 sm:$0xff]   ;;  %v18815_v41 = vld [vmem:[%s22203_s17 + $0x440] ss:$16 sps:$4 sm:$0xff]  }
  0xa3   : > { %13187 = vmatpush2.bf16.msra.mxu1 %v18754_v49  ;;  %13147 = vmatprep.subr.bf16.mxu0 %v18755_v51  ;;  %v18820_v40 = vld [vmem:[%s22203_s17 + $0x644] ss:$16 sps:$4 sm:$0xff]   ;;  %v18818_v42 = vld [vmem:[%s22203_s17 + $0x640] ss:$16 sps:$4 sm:$0xff]  }
  0xa4   : > { %13188 = vmatprep.subr.bf16.mxu1 %v18757_v52  ;;  %v18823_v43 = vld [vmem:[%s22203_s17 + $0x424] ss:$16 sps:$4 sm:$0xff]   ;;  %v18821_v46 = vld [vmem:[%s22203_s17 + $0x420] ss:$16 sps:$4 sm:$0xff]  }
  0xa5   : > { %v18826_v45 = vld [vmem:[%s22203_s17 + $0x624] ss:$16 sps:$4 sm:$0xff]   ;;  %v18824_v47 = vld [vmem:[%s22203_s17 + $0x620] ss:$16 sps:$4 sm:$0xff]  }
  0xa6   : > { %13148 = vmatpush2.bf16.msra.mxu0 %v18759_v54  ;;  %v18829_v48 = vld [vmem:[%s22203_s17 + $0x404] ss:$16 sps:$4 sm:$0xff]   ;;  %v18827_v51 = vld [vmem:[%s22203_s17 + $0x400] ss:$16 sps:$4 sm:$0xff]  }
  0xa7   : > { %13189 = vmatpush2.bf16.msra.mxu1 %v18760_v56  ;;  %13149 = vmatprep.subr.bf16.mxu0 %v18761_v57  ;;  %v18832_v49 = vld [vmem:[%s22203_s17 + $0x604] ss:$16 sps:$4 sm:$0xff]   ;;  %v18830_v52 = vld [vmem:[%s22203_s17 + $0x600] ss:$16 sps:$4 sm:$0xff]  }
  0xa8   : > { %13190 = vmatprep.subr.bf16.mxu1 %v18763_v58  ;;  %v18835_v53 = vld [vmem:[%s22203_s17 + $0x5e4] ss:$16 sps:$4 sm:$0xff]   ;;  %v18833_v55 = vld [vmem:[%s22203_s17 + $0x5e0] ss:$16 sps:$4 sm:$0xff]  }
  0xa9   : > { %v18838_v54 = vld [vmem:[%s22203_s17 + $0x7e4] ss:$16 sps:$4 sm:$0xff]   ;;  %v18836_v56 = vld [vmem:[%s22203_s17 + $0x7e0] ss:$16 sps:$4 sm:$0xff]  }
  0xaa   : > { %13150 = vmatpush2.bf16.msra.mxu0 %v18765_v60  ;;  %v18841_v57 = vld [vmem:[%s22203_s17 + $0x5c4] ss:$16 sps:$4 sm:$0xff]   ;;  %v18839_v59 = vld [vmem:[%s22203_s17 + $0x5c0] ss:$16 sps:$4 sm:$0xff]  }
  0xab   : > { %13191 = vmatpush2.bf16.msra.mxu1 %v18766_v62  ;;  %13151 = vmatprep.subr.bf16.mxu0 %v18767_v63  ;;  %v18844_v58 = vld [vmem:[%s22203_s17 + $0x7c4] ss:$16 sps:$4 sm:$0xff]   ;;  %v18842_v60 = vld [vmem:[%s22203_s17 + $0x7c0] ss:$16 sps:$4 sm:$0xff]  }
  0xac   : > { %13192 = vmatprep.subr.bf16.mxu1 %v18769_v0  ;;  %v18847_v62 = vld [vmem:[%s22203_s17 + $0x5a4] ss:$16 sps:$4 sm:$0xff]   ;;  %v18845_v0 = vld [vmem:[%s22203_s17 + $0x5a0] ss:$16 sps:$4 sm:$0xff]  }
  0xad   : > { %v18850_v63 = vld [vmem:[%s22203_s17 + $0x7a4] ss:$16 sps:$4 sm:$0xff]   ;;  %v18848_v2 = vld [vmem:[%s22203_s17 + $0x7a0] ss:$16 sps:$4 sm:$0xff]  }
  0xae   : > { %13152 = vmatpush2.bf16.msra.mxu0 %v18771_v3  ;;  %v18853_v3 = vld [vmem:[%s22203_s17 + $0x584] ss:$16 sps:$4 sm:$0xff]   ;;  %v19669_v44 = vld [vmem:[%s22203_s17 + $0x2aa0] ss:$16 sps:$4 sm:$0xff]  }
  0xaf   : > { %13193 = vmatpush2.bf16.msra.mxu1 %v18772_v4  ;;  %13153 = vmatprep.subr.bf16.mxu0 %v18773_v5  ;;  %v18856_v4 = vld [vmem:[%s22203_s17 + $0x784] ss:$16 sps:$4 sm:$0xff]   ;;  %v18851_v5 = vld [vmem:[%s22203_s17 + $0x580] ss:$16 sps:$4 sm:$0xff]  }
  0xb0   : > { %13194 = vmatprep.subr.bf16.mxu1 %v18775_v6  ;;  %v18854_v6 = vld [vmem:[%s22203_s17 + $0x780] ss:$16 sps:$4 sm:$0xff]   ;;  %v18865_v12 = vld [vmem:[%s22203_s17 + $0x544] ss:$16 sps:$4 sm:$0xff]  }
  0xb2   : > { %13154 = vmatpush2.bf16.msra.mxu0 %v18777_v8  ;;  %v18859_v8 = vld [vmem:[%s22203_s17 + $0x564] ss:$16 sps:$4 sm:$0xff]  }
  0xb3   : > { %13195 = vmatpush2.bf16.msra.mxu1 %v18778_v9  ;;  %13155 = vmatprep.subr.bf16.mxu0 %v18779_v10  ;;  %v18862_v9 = vld [vmem:[%s22203_s17 + $0x764] ss:$16 sps:$4 sm:$0xff]   ;;  %v18857_v10 = vld [vmem:[%s22203_s17 + $0x560] ss:$16 sps:$4 sm:$0xff]  }
  0xb4   : > { %13196 = vmatprep.subr.bf16.mxu1 %v18781_v11  ;;  %v18860_v11 = vld [vmem:[%s22203_s17 + $0x760] ss:$16 sps:$4 sm:$0xff]  }
  0xb6   : > { %13156 = vmatpush2.bf16.msra.mxu0 %v18783_v13  ;;  %v18868_v13 = vld [vmem:[%s22203_s17 + $0x744] ss:$16 sps:$4 sm:$0xff]  }
  0xb7   : > { %13197 = vmatpush2.bf16.msra.mxu1 %v18784_v15  ;;  %13207 = vmatprep.subr.bf16.mxu0 %v18787_v16  ;;  %v18863_v15 = vld [vmem:[%s22203_s17 + $0x540] ss:$16 sps:$4 sm:$0xff]  }
  0xb8   : > { %13248 = vmatprep.subr.bf16.mxu1 %v18790_v17  ;;  %v18866_v16 = vld [vmem:[%s22203_s17 + $0x740] ss:$16 sps:$4 sm:$0xff]   ;;  %v18871_v17 = vld [vmem:[%s22203_s17 + $0x524] ss:$16 sps:$4 sm:$0xff]  }
  0xb9   : > { %13158 = vmatmul.mubr.bf16.vlgmr.msra.gmra.mxu0 %v22310_v14 }
  0xba   : > { %13199 = vmatmul.mubr.bf16.vlgmr.msra.gmra.mxu1 %v22320_v19  ;;  %13208 = vmatpush1.bf16.msra.mxu0 %v18785_v20  ;;  %v18874_v20 = vld [vmem:[%s22203_s17 + $0x724] ss:$16 sps:$4 sm:$0xff]  }
  0xbb   : > { %13249 = vmatpush1.bf16.msra.mxu1 %v18788_v21  ;;  %13209 = vmatprep.subr.bf16.mxu0 %v18793_v22  ;;  %v18869_v21 = vld [vmem:[%s22203_s17 + $0x520] ss:$16 sps:$4 sm:$0xff]  }
  0xbc   : > { %13250 = vmatprep.subr.bf16.mxu1 %v18796_v23  ;;  %13239 = vmatprep.mubr.bf16.mxu0 %v22316_v18  ;;  %v18872_v22 = vld [vmem:[%s22203_s17 + $0x720] ss:$16 sps:$4 sm:$0xff]   ;;  %v18877_v23 = vld [vmem:[%s22203_s17 + $0x504] ss:$16 sps:$4 sm:$0xff]  }
  0xbd   : > { %13280 = vmatprep.mubr.bf16.mxu1 %v22328_v24 }
  0xbe   : > { %13210 = vmatpush1.bf16.msra.mxu0 %v18791_v25  ;;  %v18880_v25 = vld [vmem:[%s22203_s17 + $0x704] ss:$16 sps:$4 sm:$0xff]  }
  0xbf   : > { %13251 = vmatpush1.bf16.msra.mxu1 %v18794_v26  ;;  %13211 = vmatprep.subr.bf16.mxu0 %v18799_v27  ;;  %v18875_v26 = vld [vmem:[%s22203_s17 + $0x500] ss:$16 sps:$4 sm:$0xff]   ;;  %v22393_v27 = vrot.slane %v22300_v7, %v22272_v50 }
  0xc0   : > { %13252 = vmatprep.subr.bf16.mxu1 %v18802_v28  ;;  %v18878_v28 = vld [vmem:[%s22203_s17 + $0x700] ss:$16 sps:$4 sm:$0xff]  }
  0xc1   : > { %v18885_v7 = vld [vmem:[%s22203_s17 + $0xae0] ss:$16 sps:$4 sm:$0xff]  }
  0xc2   : > { %13212 = vmatpush1.bf16.msra.mxu0 %v18797_v29  ;;  %v18884_v29 = vld [vmem:[%s22203_s17 + $0x8e4] ss:$16 sps:$4 sm:$0xff]  }
  0xc3   : > { %13253 = vmatpush1.bf16.msra.mxu1 %v18800_v30  ;;  %13213 = vmatprep.subr.bf16.mxu0 %v18805_v31  ;;  %v18887_v30 = vld [vmem:[%s22203_s17 + $0xae4] ss:$16 sps:$4 sm:$0xff]   ;;  %v22400_v31 = vcombine.high %v22393_v27, %v22393_v27 }
  0xc4   : > { %13254 = vmatprep.subr.bf16.mxu1 %v18808_v32  ;;  %v18882_v32 = vld [vmem:[%s22203_s17 + $0x8e0] ss:$16 sps:$4 sm:$0xff]  }
  0xc6   : > { %13214 = vmatpush1.bf16.msra.mxu0 %v18803_v33  ;;  %v22405_v33 = vld [vmem:[%s22221_s29 + $0x8] sm:$0xff] }
  0xc7   : > { %13255 = vmatpush1.bf16.msra.mxu1 %v18806_v34  ;;  %13215 = vmatprep.subr.bf16.mxu0 %v18811_v35  ;;  %v18890_v34 = vld [vmem:[%s22203_s17 + $0x8c4] ss:$16 sps:$4 sm:$0xff]  }
  0xc8   : > { %13256 = vmatprep.subr.bf16.mxu1 %v18814_v36  ;;  %v18893_v35 = vld [vmem:[%s22203_s17 + $0xac4] ss:$16 sps:$4 sm:$0xff]   ;;  %v22411_v36 = vrot.slane %v22405_v33, %v22272_v50 }
  0xca   : > { %13216 = vmatpush1.bf16.msra.mxu0 %v18809_v37  ;;  %v2493_v37 = vcombine.high %v22411_v36, %v22411_v36 }
  0xcb   : > { %13257 = vmatpush1.bf16.msra.mxu1 %v18812_v38  ;;  %13217 = vmatprep.subr.bf16.mxu0 %v18817_v39  ;;  %v18888_v38 = vld [vmem:[%s22203_s17 + $0x8c0] ss:$16 sps:$4 sm:$0xff]  }
  0xcc   : > { %13258 = vmatprep.subr.bf16.mxu1 %v18820_v40  ;;  %v18891_v39 = vld [vmem:[%s22203_s17 + $0xac0] ss:$16 sps:$4 sm:$0xff]   ;;  %v18896_v40 = vld [vmem:[%s22203_s17 + $0x8a4] ss:$16 sps:$4 sm:$0xff]  }
  0xce   : > { %13218 = vmatpush1.bf16.msra.mxu0 %v18815_v41  ;;  %v18899_v41 = vld [vmem:[%s22203_s17 + $0xaa4] ss:$16 sps:$4 sm:$0xff]  }
  0xcf   : > { %13259 = vmatpush1.bf16.msra.mxu1 %v18818_v42  ;;  %13219 = vmatprep.subr.bf16.mxu0 %v18823_v43  ;;  %v22422_v42 = vrot.slane %v2493_v37, %v22272_v50  ;;  %v18960_v37 = vld [vmem:[%s22203_s17 + $0x940] ss:$16 sps:$4 sm:$0xff]  }
  0xd0   : > { %13260 = vmatprep.subr.bf16.mxu1 %v18826_v45  ;;  %v18894_v45 = vld [vmem:[%s22203_s17 + $0x8a0] ss:$16 sps:$4 sm:$0xff]  }
  0xd1   : > { %v22427_v43 = vcombine.high %v22422_v42, %v22422_v42 }
  0xd2   : > { %13220 = vmatpush1.bf16.msra.mxu0 %v18821_v46  ;;  %v18897_v46 = vld [vmem:[%s22203_s17 + $0xaa0] ss:$16 sps:$4 sm:$0xff]  }
  0xd3   : > { %13261 = vmatpush1.bf16.msra.mxu1 %v18824_v47  ;;  %13221 = vmatprep.subr.bf16.mxu0 %v18829_v48  ;;  %v18902_v47 = vld [vmem:[%s22203_s17 + $0x884] ss:$16 sps:$4 sm:$0xff]  }
  0xd4   : > { %13262 = vmatprep.subr.bf16.mxu1 %v18832_v49  ;;  %v18905_v48 = vld [vmem:[%s22203_s17 + $0xa84] ss:$16 sps:$4 sm:$0xff]   ;;  %v18900_v49 = vld [vmem:[%s22203_s17 + $0x880] ss:$16 sps:$4 sm:$0xff]  }
  0xd6   : > { %13222 = vmatpush1.bf16.msra.mxu0 %v18827_v51  ;;  %v18903_v51 = vld [vmem:[%s22203_s17 + $0xa80] ss:$16 sps:$4 sm:$0xff]  }
  0xd7   : > { %13263 = vmatpush1.bf16.msra.mxu1 %v18830_v52  ;;  %13223 = vmatprep.subr.bf16.mxu0 %v18835_v53  ;;  %v18908_v52 = vld [vmem:[%s22203_s17 + $0x864] ss:$16 sps:$4 sm:$0xff]  }
  0xd8   : > { %13264 = vmatprep.subr.bf16.mxu1 %v18838_v54  ;;  %v18911_v53 = vld [vmem:[%s22203_s17 + $0xa64] ss:$16 sps:$4 sm:$0xff]   ;;  %v18906_v54 = vld [vmem:[%s22203_s17 + $0x860] ss:$16 sps:$4 sm:$0xff]  }
  0xda   : > { %13224 = vmatpush2.bf16.msra.mxu0 %v18833_v55  ;;  %v18909_v55 = vld [vmem:[%s22203_s17 + $0xa60] ss:$16 sps:$4 sm:$0xff]  }
  0xdb   : > { %13265 = vmatpush2.bf16.msra.mxu1 %v18836_v56  ;;  %13225 = vmatprep.subr.bf16.mxu0 %v18841_v57  ;;  %v18914_v56 = vld [vmem:[%s22203_s17 + $0x844] ss:$16 sps:$4 sm:$0xff]  }
  0xdc   : > { %13266 = vmatprep.subr.bf16.mxu1 %v18844_v58  ;;  %v18917_v57 = vld [vmem:[%s22203_s17 + $0xa44] ss:$16 sps:$4 sm:$0xff]   ;;  %v18912_v58 = vld [vmem:[%s22203_s17 + $0x840] ss:$16 sps:$4 sm:$0xff]  }
  0xde   : > { %13226 = vmatpush2.bf16.msra.mxu0 %v18839_v59  ;;  %v18915_v59 = vld [vmem:[%s22203_s17 + $0xa40] ss:$16 sps:$4 sm:$0xff]  }
  0xdf   : > { %13267 = vmatpush2.bf16.msra.mxu1 %v18842_v60  ;;  %13227 = vmatprep.subr.bf16.mxu0 %v18847_v62  ;;  %v18920_v60 = vld [vmem:[%s22203_s17 + $0x824] ss:$16 sps:$4 sm:$0xff]  }
  0xe0   : > { %13268 = vmatprep.subr.bf16.mxu1 %v18850_v63  ;;  %v18923_v62 = vld [vmem:[%s22203_s17 + $0xa24] ss:$16 sps:$4 sm:$0xff]   ;;  %v18918_v63 = vld [vmem:[%s22203_s17 + $0x820] ss:$16 sps:$4 sm:$0xff]  }
  0xe2   : > { %13228 = vmatpush2.bf16.msra.mxu0 %v18845_v0  ;;  %v18921_v0 = vld [vmem:[%s22203_s17 + $0xa20] ss:$16 sps:$4 sm:$0xff]  }
  0xe3   : > { %13269 = vmatpush2.bf16.msra.mxu1 %v18848_v2  ;;  %13229 = vmatprep.subr.bf16.mxu0 %v18853_v3  ;;  %v18926_v2 = vld [vmem:[%s22203_s17 + $0x804] ss:$16 sps:$4 sm:$0xff]  }
  0xe4   : > { %13270 = vmatprep.subr.bf16.mxu1 %v18856_v4  ;;  %v18929_v3 = vld [vmem:[%s22203_s17 + $0xa04] ss:$16 sps:$4 sm:$0xff]   ;;  %v18924_v4 = vld [vmem:[%s22203_s17 + $0x800] ss:$16 sps:$4 sm:$0xff]  }
  0xe6   : > { %13230 = vmatpush2.bf16.msra.mxu0 %v18851_v5  ;;  %v18927_v5 = vld [vmem:[%s22203_s17 + $0xa00] ss:$16 sps:$4 sm:$0xff]  }
  0xe7   : > { %13271 = vmatpush2.bf16.msra.mxu1 %v18854_v6  ;;  %13231 = vmatprep.subr.bf16.mxu0 %v18859_v8  ;;  %v18932_v6 = vld [vmem:[%s22203_s17 + $0x9e4] ss:$16 sps:$4 sm:$0xff]  }
  0xe8   : > { %13272 = vmatprep.subr.bf16.mxu1 %v18862_v9  ;;  %v18935_v8 = vld [vmem:[%s22203_s17 + $0xbe4] ss:$16 sps:$4 sm:$0xff]   ;;  %v18930_v9 = vld [vmem:[%s22203_s17 + $0x9e0] ss:$16 sps:$4 sm:$0xff]  }
  0xea   : > { %13232 = vmatpush2.bf16.msra.mxu0 %v18857_v10  ;;  %v18933_v10 = vld [vmem:[%s22203_s17 + $0xbe0] ss:$16 sps:$4 sm:$0xff]  }
  0xeb   : > { %13273 = vmatpush2.bf16.msra.mxu1 %v18860_v11  ;;  %13233 = vmatprep.subr.bf16.mxu0 %v18865_v12  ;;  %v18938_v11 = vld [vmem:[%s22203_s17 + $0x9c4] ss:$16 sps:$4 sm:$0xff]  }
  0xec   : > { %13274 = vmatprep.subr.bf16.mxu1 %v18868_v13  ;;  %v18941_v12 = vld [vmem:[%s22203_s17 + $0xbc4] ss:$16 sps:$4 sm:$0xff]   ;;  %v18936_v13 = vld [vmem:[%s22203_s17 + $0x9c0] ss:$16 sps:$4 sm:$0xff]  }
  0xee   : > { %13234 = vmatpush2.bf16.msra.mxu0 %v18863_v15  ;;  %v18939_v15 = vld [vmem:[%s22203_s17 + $0xbc0] ss:$16 sps:$4 sm:$0xff]  }
  0xef   : > { %13275 = vmatpush2.bf16.msra.mxu1 %v18866_v16  ;;  %13235 = vmatprep.subr.bf16.mxu0 %v18871_v17  ;;  %v18944_v16 = vld [vmem:[%s22203_s17 + $0x9a4] ss:$16 sps:$4 sm:$0xff]  }
  0xf0   : > { %13276 = vmatprep.subr.bf16.mxu1 %v18874_v20  ;;  %v18947_v17 = vld [vmem:[%s22203_s17 + $0xba4] ss:$16 sps:$4 sm:$0xff]   ;;  %v18942_v20 = vld [vmem:[%s22203_s17 + $0x9a0] ss:$16 sps:$4 sm:$0xff]  }
  0xf2   : > { %13236 = vmatpush2.bf16.msra.mxu0 %v18869_v21  ;;  %v18945_v21 = vld [vmem:[%s22203_s17 + $0xba0] ss:$16 sps:$4 sm:$0xff]  }
  0xf3   : > { %13277 = vmatpush2.bf16.msra.mxu1 %v18872_v22  ;;  %13237 = vmatprep.subr.bf16.mxu0 %v18877_v23  ;;  %v18950_v22 = vld [vmem:[%s22203_s17 + $0x984] ss:$16 sps:$4 sm:$0xff]  }
  0xf4   : > { %13278 = vmatprep.subr.bf16.mxu1 %v18880_v25  ;;  %v18953_v23 = vld [vmem:[%s22203_s17 + $0xb84] ss:$16 sps:$4 sm:$0xff]   ;;  %v18948_v25 = vld [vmem:[%s22203_s17 + $0x980] ss:$16 sps:$4 sm:$0xff]  }
  0xf6   : > { %13238 = vmatpush2.bf16.msra.mxu0 %v18875_v26  ;;  %v18951_v26 = vld [vmem:[%s22203_s17 + $0xb80] ss:$16 sps:$4 sm:$0xff]  }
  0xf7   : > { %13279 = vmatpush2.bf16.msra.mxu1 %v18878_v28  ;;  %13289 = vmatprep.subr.bf16.mxu0 %v18884_v29  ;;  %v18956_v28 = vld [vmem:[%s22203_s17 + $0x964] ss:$16 sps:$4 sm:$0xff]  }
  0xf8   : > { %13330 = vmatprep.subr.bf16.mxu1 %v18887_v30  ;;  %v18959_v29 = vld [vmem:[%s22203_s17 + $0xb64] ss:$16 sps:$4 sm:$0xff]   ;;  %v18954_v30 = vld [vmem:[%s22203_s17 + $0x960] ss:$16 sps:$4 sm:$0xff]  }
  0xf9   : > { %13240 = vmatmul.mubr.bf16.vlgmr.msra.gmra.mxu0 %v22393_v27 }
  0xfa   : > { %13281 = vmatmul.mubr.bf16.vlgmr.msra.gmra.mxu1 %v22400_v31  ;;  %13290 = vmatpush1.bf16.msra.mxu0 %v18882_v32  ;;  %v18957_v32 = vld [vmem:[%s22203_s17 + $0xb60] ss:$16 sps:$4 sm:$0xff]  }
  0xfb   : > { %13331 = vmatpush1.bf16.msra.mxu1 %v18885_v7  ;;  %13291 = vmatprep.subr.bf16.mxu0 %v18890_v34  ;;  %v18962_v7 = vld [vmem:[%s22203_s17 + $0x944] ss:$16 sps:$4 sm:$0xff]  }
  0xfc   : > { %13332 = vmatprep.subr.bf16.mxu1 %v18893_v35  ;;  %13321 = vmatprep.mubr.bf16.mxu0 %v22422_v42  ;;  %v18965_v34 = vld [vmem:[%s22203_s17 + $0xb44] ss:$16 sps:$4 sm:$0xff]   ;;  %v2478_v35 = vcombine.high %v22405_v33, %v22405_v33  ;;  %v18966_v33 = vld [vmem:[%s22203_s17 + $0x920] ss:$16 sps:$4 sm:$0xff]  }
  0xfd   : > { %13362 = vmatprep.mubr.bf16.mxu1 %v22427_v43 }
  0xfe   : > { %13292 = vmatpush1.bf16.msra.mxu0 %v18888_v38  ;;  %v18963_v38 = vld [vmem:[%s22203_s17 + $0xb40] ss:$16 sps:$4 sm:$0xff]  }
  0xff   : > { %13333 = vmatpush1.bf16.msra.mxu1 %v18891_v39  ;;  %13293 = vmatprep.subr.bf16.mxu0 %v18896_v40  ;;  %v18968_v39 = vld [vmem:[%s22203_s17 + $0x924] ss:$16 sps:$4 sm:$0xff]  }
 0x100   : > { %13334 = vmatprep.subr.bf16.mxu1 %v18899_v41  ;;  %v18971_v40 = vld [vmem:[%s22203_s17 + $0xb24] ss:$16 sps:$4 sm:$0xff]   ;;  %v22481_v41 = vrot.slane %v2478_v35, %v22272_v50  ;;  %v19029_v35 = vld [vmem:[%s22203_s17 + $0xfe0] ss:$16 sps:$4 sm:$0xff]  }
 0x102   : > { %13294 = vmatpush1.bf16.msra.mxu0 %v18894_v45  ;;  %v18969_v45 = vld [vmem:[%s22203_s17 + $0xb20] ss:$16 sps:$4 sm:$0xff]  }
 0x103   : > { %13335 = vmatpush1.bf16.msra.mxu1 %v18897_v46  ;;  %13295 = vmatprep.subr.bf16.mxu0 %v18902_v47  ;;  %v18974_v46 = vld [vmem:[%s22203_s17 + $0x904] ss:$16 sps:$4 sm:$0xff]  }
 0x104   : > { %13336 = vmatprep.subr.bf16.mxu1 %v18905_v48  ;;  %v18977_v47 = vld [vmem:[%s22203_s17 + $0xb04] ss:$16 sps:$4 sm:$0xff]   ;;  %v2494_v48 = vcombine.high %v22481_v41, %v22481_v41 }
 0x106   : > { %13296 = vmatpush1.bf16.msra.mxu0 %v18900_v49  ;;  %v22491_v49 = vrot.slane %v22411_v36, %v22272_v50  ;;  %v18978_v36 = vld [vmem:[%s22203_s17 + $0xce0] ss:$16 sps:$4 sm:$0xff]  }
 0x107   : > { %13337 = vmatpush1.bf16.msra.mxu1 %v18903_v51  ;;  %13297 = vmatprep.subr.bf16.mxu0 %v18908_v52  ;;  %v18972_v51 = vld [vmem:[%s22203_s17 + $0x900] ss:$16 sps:$4 sm:$0xff]  }
 0x108   : > { %13338 = vmatprep.subr.bf16.mxu1 %v18911_v53  ;;  %v18975_v52 = vld [vmem:[%s22203_s17 + $0xb00] ss:$16 sps:$4 sm:$0xff]   ;;  %v18980_v53 = vld [vmem:[%s22203_s17 + $0xce4] ss:$16 sps:$4 sm:$0xff]  }
 0x10a   : > { %13298 = vmatpush1.bf16.msra.mxu0 %v18906_v54  ;;  %v18983_v54 = vld [vmem:[%s22203_s17 + $0xee4] ss:$16 sps:$4 sm:$0xff]  }
 0x10b   : > { %13339 = vmatpush1.bf16.msra.mxu1 %v18909_v55  ;;  %13299 = vmatprep.subr.bf16.mxu0 %v18914_v56  ;;  %v22498_v55 = vrot.slane %v2494_v48, %v22272_v50  ;;  %v22502_v56 = vcombine.high %v22491_v49, %v22491_v49  ;;  %v19046_v48 = vld [vmem:[%s22203_s17 + $0xd84] ss:$16 sps:$4 sm:$0xff]  }
 0x10c   : > { %13340 = vmatprep.subr.bf16.mxu1 %v18917_v57  ;;  %v18981_v57 = vld [vmem:[%s22203_s17 + $0xee0] ss:$16 sps:$4 sm:$0xff]  }
 0x10e   : > { %13300 = vmatpush1.bf16.msra.mxu0 %v18912_v58  ;;  %v18986_v58 = vld [vmem:[%s22203_s17 + $0xcc4] ss:$16 sps:$4 sm:$0xff]  }
 0x10f   : > { %13341 = vmatpush1.bf16.msra.mxu1 %v18915_v59  ;;  %13301 = vmatprep.subr.bf16.mxu0 %v18920_v60  ;;  %v18989_v59 = vld [vmem:[%s22203_s17 + $0xec4] ss:$16 sps:$4 sm:$0xff]   ;;  %v22510_v60 = vcombine.high %v22498_v55, %v22498_v55 }
 0x110   : > { %13342 = vmatprep.subr.bf16.mxu1 %v18923_v62  ;;  %v18984_v62 = vld [vmem:[%s22203_s17 + $0xcc0] ss:$16 sps:$4 sm:$0xff]  }
 0x112   : > { %13302 = vmatpush1.bf16.msra.mxu0 %v18918_v63  ;;  %v18987_v63 = vld [vmem:[%s22203_s17 + $0xec0] ss:$16 sps:$4 sm:$0xff]  }
 0x113   : > { %13343 = vmatpush1.bf16.msra.mxu1 %v18921_v0  ;;  %13303 = vmatprep.subr.bf16.mxu0 %v18926_v2  ;;  %v18992_v0 = vld [vmem:[%s22203_s17 + $0xca4] ss:$16 sps:$4 sm:$0xff]  }
 0x114   : > { %13344 = vmatprep.subr.bf16.mxu1 %v18929_v3  ;;  %v18995_v2 = vld [vmem:[%s22203_s17 + $0xea4] ss:$16 sps:$4 sm:$0xff]   ;;  %v18990_v3 = vld [vmem:[%s22203_s17 + $0xca0] ss:$16 sps:$4 sm:$0xff]  }
 0x116   : > { %13304 = vmatpush1.bf16.msra.mxu0 %v18924_v4  ;;  %v18993_v4 = vld [vmem:[%s22203_s17 + $0xea0] ss:$16 sps:$4 sm:$0xff]  }
 0x117   : > { %13345 = vmatpush1.bf16.msra.mxu1 %v18927_v5  ;;  %13305 = vmatprep.subr.bf16.mxu0 %v18932_v6  ;;  %v18998_v5 = vld [vmem:[%s22203_s17 + $0xc84] ss:$16 sps:$4 sm:$0xff]  }
 0x118   : > { %13346 = vmatprep.subr.bf16.mxu1 %v18935_v8  ;;  %v19001_v6 = vld [vmem:[%s22203_s17 + $0xe84] ss:$16 sps:$4 sm:$0xff]   ;;  %v18996_v8 = vld [vmem:[%s22203_s17 + $0xc80] ss:$16 sps:$4 sm:$0xff]  }
 0x11a   : > { %13306 = vmatpush2.bf16.msra.mxu0 %v18930_v9  ;;  %v18999_v9 = vld [vmem:[%s22203_s17 + $0xe80] ss:$16 sps:$4 sm:$0xff]  }
 0x11b   : > { %13347 = vmatpush2.bf16.msra.mxu1 %v18933_v10  ;;  %13307 = vmatprep.subr.bf16.mxu0 %v18938_v11  ;;  %v19004_v10 = vld [vmem:[%s22203_s17 + $0xc64] ss:$16 sps:$4 sm:$0xff]  }
 0x11c   : > { %13348 = vmatprep.subr.bf16.mxu1 %v18941_v12  ;;  %v19007_v11 = vld [vmem:[%s22203_s17 + $0xe64] ss:$16 sps:$4 sm:$0xff]   ;;  %v19002_v12 = vld [vmem:[%s22203_s17 + $0xc60] ss:$16 sps:$4 sm:$0xff]  }
 0x11e   : > { %13308 = vmatpush2.bf16.msra.mxu0 %v18936_v13  ;;  %v19005_v13 = vld [vmem:[%s22203_s17 + $0xe60] ss:$16 sps:$4 sm:$0xff]  }
 0x11f   : > { %13349 = vmatpush2.bf16.msra.mxu1 %v18939_v15  ;;  %13309 = vmatprep.subr.bf16.mxu0 %v18944_v16  ;;  %v19010_v15 = vld [vmem:[%s22203_s17 + $0xc44] ss:$16 sps:$4 sm:$0xff]  }
 0x120   : > { %13350 = vmatprep.subr.bf16.mxu1 %v18947_v17  ;;  %v19013_v16 = vld [vmem:[%s22203_s17 + $0xe44] ss:$16 sps:$4 sm:$0xff]   ;;  %v19008_v17 = vld [vmem:[%s22203_s17 + $0xc40] ss:$16 sps:$4 sm:$0xff]  }
 0x122   : > { %13310 = vmatpush2.bf16.msra.mxu0 %v18942_v20  ;;  %v19011_v20 = vld [vmem:[%s22203_s17 + $0xe40] ss:$16 sps:$4 sm:$0xff]  }
 0x123   : > { %13351 = vmatpush2.bf16.msra.mxu1 %v18945_v21  ;;  %13311 = vmatprep.subr.bf16.mxu0 %v18950_v22  ;;  %v19016_v21 = vld [vmem:[%s22203_s17 + $0xc24] ss:$16 sps:$4 sm:$0xff]  }
 0x124   : > { %13352 = vmatprep.subr.bf16.mxu1 %v18953_v23  ;;  %v19019_v22 = vld [vmem:[%s22203_s17 + $0xe24] ss:$16 sps:$4 sm:$0xff]   ;;  %v19014_v23 = vld [vmem:[%s22203_s17 + $0xc20] ss:$16 sps:$4 sm:$0xff]  }
 0x126   : > { %13312 = vmatpush2.bf16.msra.mxu0 %v18948_v25  ;;  %v19017_v25 = vld [vmem:[%s22203_s17 + $0xe20] ss:$16 sps:$4 sm:$0xff]  }
 0x127   : > { %13353 = vmatpush2.bf16.msra.mxu1 %v18951_v26  ;;  %13313 = vmatprep.subr.bf16.mxu0 %v18956_v28  ;;  %v19022_v26 = vld [vmem:[%s22203_s17 + $0xc04] ss:$16 sps:$4 sm:$0xff]  }
 0x128   : > { %13354 = vmatprep.subr.bf16.mxu1 %v18959_v29  ;;  %v19025_v28 = vld [vmem:[%s22203_s17 + $0xe04] ss:$16 sps:$4 sm:$0xff]   ;;  %v19020_v29 = vld [vmem:[%s22203_s17 + $0xc00] ss:$16 sps:$4 sm:$0xff]  }
 0x12a   : > { %13314 = vmatpush2.bf16.msra.mxu0 %v18954_v30  ;;  %v19023_v30 = vld [vmem:[%s22203_s17 + $0xe00] ss:$16 sps:$4 sm:$0xff]  }
 0x12b   : > { %13355 = vmatpush2.bf16.msra.mxu1 %v18957_v32  ;;  %13315 = vmatprep.subr.bf16.mxu0 %v18962_v7  ;;  %v19028_v32 = vld [vmem:[%s22203_s17 + $0xde4] ss:$16 sps:$4 sm:$0xff]  }
 0x12c   : > { %13356 = vmatprep.subr.bf16.mxu1 %v18965_v34  ;;  %v19031_v7 = vld [vmem:[%s22203_s17 + $0xfe4] ss:$16 sps:$4 sm:$0xff]   ;;  %v19026_v34 = vld [vmem:[%s22203_s17 + $0xde0] ss:$16 sps:$4 sm:$0xff]  }
 0x12e   : > { %13316 = vmatpush2.bf16.msra.mxu0 %v18960_v37  ;;  %v19034_v37 = vld [vmem:[%s22203_s17 + $0xdc4] ss:$16 sps:$4 sm:$0xff]  }
 0x12f   : > { %13357 = vmatpush2.bf16.msra.mxu1 %v18963_v38  ;;  %13317 = vmatprep.subr.bf16.mxu0 %v18968_v39  ;;  %v19037_v38 = vld [vmem:[%s22203_s17 + $0xfc4] ss:$16 sps:$4 sm:$0xff]   ;;  %v19032_v39 = vld [vmem:[%s22203_s17 + $0xdc0] ss:$16 sps:$4 sm:$0xff]  }
 0x130   : > { %13358 = vmatprep.subr.bf16.mxu1 %v18971_v40  ;;  %v19035_v40 = vld [vmem:[%s22203_s17 + $0xfc0] ss:$16 sps:$4 sm:$0xff]  }
 0x132   : > { %13318 = vmatpush2.bf16.msra.mxu0 %v18966_v33  ;;  %v19040_v33 = vld [vmem:[%s22203_s17 + $0xda4] ss:$16 sps:$4 sm:$0xff]  }
 0x133   : > { %13359 = vmatpush2.bf16.msra.mxu1 %v18969_v45  ;;  %13319 = vmatprep.subr.bf16.mxu0 %v18974_v46  ;;  %v19043_v45 = vld [vmem:[%s22203_s17 + $0xfa4] ss:$16 sps:$4 sm:$0xff]   ;;  %v19038_v46 = vld [vmem:[%s22203_s17 + $0xda0] ss:$16 sps:$4 sm:$0xff]  }
 0x134   : > { %13360 = vmatprep.subr.bf16.mxu1 %v18977_v47  ;;  %v19041_v47 = vld [vmem:[%s22203_s17 + $0xfa0] ss:$16 sps:$4 sm:$0xff]  }
 0x136   : > { %13320 = vmatpush2.bf16.msra.mxu0 %v18972_v51  ;;  %v19049_v51 = vld [vmem:[%s22203_s17 + $0xf84] ss:$16 sps:$4 sm:$0xff]  }
 0x137   : > { %13361 = vmatpush2.bf16.msra.mxu1 %v18975_v52  ;;  %13371 = vmatprep.subr.bf16.mxu0 %v18980_v53  ;;  %v19044_v52 = vld [vmem:[%s22203_s17 + $0xd80] ss:$16 sps:$4 sm:$0xff]  }
 0x138   : > { %13412 = vmatprep.subr.bf16.mxu1 %v18983_v54  ;;  %v19047_v53 = vld [vmem:[%s22203_s17 + $0xf80] ss:$16 sps:$4 sm:$0xff]   ;;  %v19052_v54 = vld [vmem:[%s22203_s17 + $0xd64] ss:$16 sps:$4 sm:$0xff]  }
 0x139   : > { %13322 = vmatmul.mubr.bf16.vlgmr.msra.gmra.mxu0 %v22491_v49 }
 0x13a   : > { %13363 = vmatmul.mubr.bf16.vlgmr.msra.gmra.mxu1 %v22502_v56  ;;  %13372 = vmatpush1.bf16.msra.mxu0 %v18978_v36  ;;  %v19055_v36 = vld [vmem:[%s22203_s17 + $0xf64] ss:$16 sps:$4 sm:$0xff]  }
 0x13b   : > { %13413 = vmatpush1.bf16.msra.mxu1 %v18981_v57  ;;  %13373 = vmatprep.subr.bf16.mxu0 %v18986_v58  ;;  %v19050_v57 = vld [vmem:[%s22203_s17 + $0xd60] ss:$16 sps:$4 sm:$0xff]  }
 0x13c   : > { %13414 = vmatprep.subr.bf16.mxu1 %v18989_v59  ;;  %13403 = vmatprep.mubr.bf16.mxu0 %v22498_v55  ;;  %v19053_v58 = vld [vmem:[%s22203_s17 + $0xf60] ss:$16 sps:$4 sm:$0xff]   ;;  %v19058_v59 = vld [vmem:[%s22203_s17 + $0xd44] ss:$16 sps:$4 sm:$0xff]  }
 0x13d   : > { %13444 = vmatprep.mubr.bf16.mxu1 %v22510_v60 }
 0x13e   : > { %13374 = vmatpush1.bf16.msra.mxu0 %v18984_v62  ;;  %v19061_v62 = vld [vmem:[%s22203_s17 + $0xf44] ss:$16 sps:$4 sm:$0xff]  }
 0x13f   : > { %13415 = vmatpush1.bf16.msra.mxu1 %v18987_v63  ;;  %13375 = vmatprep.subr.bf16.mxu0 %v18992_v0  ;;  %v19056_v63 = vld [vmem:[%s22203_s17 + $0xd40] ss:$16 sps:$4 sm:$0xff]   ;;  %v22566_v0 = vld [vmem:[%s22221_s29 + $0x10] sm:$0xff] }
 0x140   : > { %13416 = vmatprep.subr.bf16.mxu1 %v18995_v2  ;;  %v19059_v2 = vld [vmem:[%s22203_s17 + $0xf40] ss:$16 sps:$4 sm:$0xff]  }
 0x142   : > { %13376 = vmatpush1.bf16.msra.mxu0 %v18990_v3  ;;  %v19064_v3 = vld [vmem:[%s22203_s17 + $0xd24] ss:$16 sps:$4 sm:$0xff]  }
 0x143   : > { %13417 = vmatpush1.bf16.msra.mxu1 %v18993_v4  ;;  %13377 = vmatprep.subr.bf16.mxu0 %v18998_v5  ;;  %v19067_v4 = vld [vmem:[%s22203_s17 + $0xf24] ss:$16 sps:$4 sm:$0xff]   ;;  %v22573_v5 = vrot.slane %v22566_v0, %v22272_v50 }
 0x144   : > { %13418 = vmatprep.subr.bf16.mxu1 %v19001_v6  ;;  %v19062_v6 = vld [vmem:[%s22203_s17 + $0xd20] ss:$16 sps:$4 sm:$0xff]  }
 0x146   : > { %13378 = vmatpush1.bf16.msra.mxu0 %v18996_v8  ;;  %v19065_v8 = vld [vmem:[%s22203_s17 + $0xf20] ss:$16 sps:$4 sm:$0xff]  }
 0x147   : > { %13419 = vmatpush1.bf16.msra.mxu1 %v18999_v9  ;;  %13379 = vmatprep.subr.bf16.mxu0 %v19004_v10  ;;  %v19070_v9 = vld [vmem:[%s22203_s17 + $0xd04] ss:$16 sps:$4 sm:$0xff]  }
 0x148   : > { %13420 = vmatprep.subr.bf16.mxu1 %v19007_v11  ;;  %v19073_v10 = vld [vmem:[%s22203_s17 + $0xf04] ss:$16 sps:$4 sm:$0xff]   ;;  %v2542_v11 = vcombine.high %v22573_v5, %v22573_v5 }
 0x14a   : > { %13380 = vmatpush1.bf16.msra.mxu0 %v19002_v12  ;;  %v19068_v12 = vld [vmem:[%s22203_s17 + $0xd00] ss:$16 sps:$4 sm:$0xff]  }
 0x14b   : > { %13421 = vmatpush1.bf16.msra.mxu1 %v19005_v13  ;;  %13381 = vmatprep.subr.bf16.mxu0 %v19010_v15  ;;  %v22584_v13 = vrot.slane %v22481_v41, %v22272_v50  ;;  %v19071_v15 = vld [vmem:[%s22203_s17 + $0xf00] ss:$16 sps:$4 sm:$0xff]  }
 0x14c   : > { %13422 = vmatprep.subr.bf16.mxu1 %v19013_v16  ;;  %v19077_v16 = vld [vmem:[%s22203_s17 + $0x10e4] ss:$16 sps:$4 sm:$0xff]   ;;  %v19078_v41 = vld [vmem:[%s22203_s17 + $0x12e0] ss:$16 sps:$4 sm:$0xff]  }
 0x14e   : > { %13382 = vmatpush1.bf16.msra.mxu0 %v19008_v17  ;;  %v19080_v17 = vld [vmem:[%s22203_s17 + $0x12e4] ss:$16 sps:$4 sm:$0xff]  }
 0x14f   : > { %13423 = vmatpush1.bf16.msra.mxu1 %v19011_v20  ;;  %13383 = vmatprep.subr.bf16.mxu0 %v19016_v21  ;;  %v22590_v20 = vrot.slane %v2542_v11, %v22272_v50  ;;  %v22594_v21 = vcombine.high %v22584_v13, %v22584_v13  ;;  %v19122_v11 = vld [vmem:[%s22203_s17 + $0x1204] ss:$16 sps:$4 sm:$0xff]  }
 0x150   : > { %13424 = vmatprep.subr.bf16.mxu1 %v19019_v22  ;;  %v19075_v22 = vld [vmem:[%s22203_s17 + $0x10e0] ss:$16 sps:$4 sm:$0xff]  }
 0x152   : > { %13384 = vmatpush1.bf16.msra.mxu0 %v19014_v23  ;;  %v19083_v23 = vld [vmem:[%s22203_s17 + $0x10c4] ss:$16 sps:$4 sm:$0xff]  }
 0x153   : > { %13425 = vmatpush1.bf16.msra.mxu1 %v19017_v25  ;;  %13385 = vmatprep.subr.bf16.mxu0 %v19022_v26  ;;  %v19086_v25 = vld [vmem:[%s22203_s17 + $0x12c4] ss:$16 sps:$4 sm:$0xff]   ;;  %v22602_v26 = vcombine.high %v22590_v20, %v22590_v20 }
 0x154   : > { %13426 = vmatprep.subr.bf16.mxu1 %v19025_v28 }
 0x156   : > { %13386 = vmatpush1.bf16.msra.mxu0 %v19020_v29 }
 0x157   : > { %13427 = vmatpush1.bf16.msra.mxu1 %v19023_v30  ;;  %13387 = vmatprep.subr.bf16.mxu0 %v19028_v32  ;;  %v19081_v30 = vld [vmem:[%s22203_s17 + $0x10c0] ss:$16 sps:$4 sm:$0xff]  }
 0x158   : > { %13428 = vmatprep.subr.bf16.mxu1 %v19031_v7  ;;  %v19084_v32 = vld [vmem:[%s22203_s17 + $0x12c0] ss:$16 sps:$4 sm:$0xff]  }
 0x15a   : > { %13388 = vmatpush2.bf16.msra.mxu0 %v19026_v34 }
 0x15b   : > { %13429 = vmatpush2.bf16.msra.mxu1 %v19029_v35  ;;  %13389 = vmatprep.subr.bf16.mxu0 %v19034_v37  ;;  %v19089_v37 = vld [vmem:[%s22203_s17 + $0x10a4] ss:$16 sps:$4 sm:$0xff]  }
 0x15c   : > { %13430 = vmatprep.subr.bf16.mxu1 %v19037_v38  ;;  %v19092_v38 = vld [vmem:[%s22203_s17 + $0x12a4] ss:$16 sps:$4 sm:$0xff]  }
 0x15e   : > { %13390 = vmatpush2.bf16.msra.mxu0 %v19032_v39 }
 0x15f   : > { %13431 = vmatpush2.bf16.msra.mxu1 %v19035_v40  ;;  %13391 = vmatprep.subr.bf16.mxu0 %v19040_v33  ;;  %v19087_v40 = vld [vmem:[%s22203_s17 + $0x10a0] ss:$16 sps:$4 sm:$0xff]  }
 0x160   : > { %13432 = vmatprep.subr.bf16.mxu1 %v19043_v45  ;;  %v19090_v33 = vld [vmem:[%s22203_s17 + $0x12a0] ss:$16 sps:$4 sm:$0xff]  }
 0x162   : > { %13392 = vmatpush2.bf16.msra.mxu0 %v19038_v46 }
 0x163   : > { %13433 = vmatpush2.bf16.msra.mxu1 %v19041_v47  ;;  %13393 = vmatprep.subr.bf16.mxu0 %v19046_v48 }
 0x164   : > { %13434 = vmatprep.subr.bf16.mxu1 %v19049_v51  ;;  %v19095_v51 = vld [vmem:[%s22203_s17 + $0x1084] ss:$16 sps:$4 sm:$0xff]  }
 0x166   : > { %13394 = vmatpush2.bf16.msra.mxu0 %v19044_v52  ;;  %v19098_v52 = vld [vmem:[%s22203_s17 + $0x1284] ss:$16 sps:$4 sm:$0xff]  }
 0x167   : > { %13435 = vmatpush2.bf16.msra.mxu1 %v19047_v53  ;;  %13395 = vmatprep.subr.bf16.mxu0 %v19052_v54  ;;  %v19093_v53 = vld [vmem:[%s22203_s17 + $0x1080] ss:$16 sps:$4 sm:$0xff]  }
 0x168   : > { %13436 = vmatprep.subr.bf16.mxu1 %v19055_v36  ;;  %v19096_v54 = vld [vmem:[%s22203_s17 + $0x1280] ss:$16 sps:$4 sm:$0xff]   ;;  %v19101_v36 = vld [vmem:[%s22203_s17 + $0x1064] ss:$16 sps:$4 sm:$0xff]  }
 0x16a   : > { %13396 = vmatpush2.bf16.msra.mxu0 %v19050_v57  ;;  %v19104_v57 = vld [vmem:[%s22203_s17 + $0x1264] ss:$16 sps:$4 sm:$0xff]  }
 0x16b   : > { %13437 = vmatpush2.bf16.msra.mxu1 %v19053_v58  ;;  %13397 = vmatprep.subr.bf16.mxu0 %v19058_v59  ;;  %v19099_v58 = vld [vmem:[%s22203_s17 + $0x1060] ss:$16 sps:$4 sm:$0xff]  }
 0x16c   : > { %13438 = vmatprep.subr.bf16.mxu1 %v19061_v62  ;;  %v19102_v59 = vld [vmem:[%s22203_s17 + $0x1260] ss:$16 sps:$4 sm:$0xff]   ;;  %v19107_v62 = vld [vmem:[%s22203_s17 + $0x1044] ss:$16 sps:$4 sm:$0xff]  }
 0x16e   : > { %13398 = vmatpush2.bf16.msra.mxu0 %v19056_v63  ;;  %v19110_v63 = vld [vmem:[%s22203_s17 + $0x1244] ss:$16 sps:$4 sm:$0xff]  }
 0x16f   : > { %13439 = vmatpush2.bf16.msra.mxu1 %v19059_v2  ;;  %13399 = vmatprep.subr.bf16.mxu0 %v19064_v3  ;;  %v19105_v2 = vld [vmem:[%s22203_s17 + $0x1040] ss:$16 sps:$4 sm:$0xff]  }
 0x170   : > { %13440 = vmatprep.subr.bf16.mxu1 %v19067_v4  ;;  %v19108_v3 = vld [vmem:[%s22203_s17 + $0x1240] ss:$16 sps:$4 sm:$0xff]   ;;  %v19113_v4 = vld [vmem:[%s22203_s17 + $0x1024] ss:$16 sps:$4 sm:$0xff]  }
 0x172   : > { %13400 = vmatpush2.bf16.msra.mxu0 %v19062_v6  ;;  %v19116_v6 = vld [vmem:[%s22203_s17 + $0x1224] ss:$16 sps:$4 sm:$0xff]  }
 0x173   : > { %13441 = vmatpush2.bf16.msra.mxu1 %v19065_v8  ;;  %13401 = vmatprep.subr.bf16.mxu0 %v19070_v9  ;;  %v19111_v8 = vld [vmem:[%s22203_s17 + $0x1020] ss:$16 sps:$4 sm:$0xff]  }
 0x174   : > { %13442 = vmatprep.subr.bf16.mxu1 %v19073_v10  ;;  %v19114_v9 = vld [vmem:[%s22203_s17 + $0x1220] ss:$16 sps:$4 sm:$0xff]   ;;  %v19119_v10 = vld [vmem:[%s22203_s17 + $0x1004] ss:$16 sps:$4 sm:$0xff]  }
 0x176   : > { %13402 = vmatpush2.bf16.msra.mxu0 %v19068_v12  ;;  %v19117_v12 = vld [vmem:[%s22203_s17 + $0x1000] ss:$16 sps:$4 sm:$0xff]  }
 0x177   : > { %13443 = vmatpush2.bf16.msra.mxu1 %v19071_v15  ;;  %13453 = vmatprep.subr.bf16.mxu0 %v19077_v16  ;;  %v19120_v15 = vld [vmem:[%s22203_s17 + $0x1200] ss:$16 sps:$4 sm:$0xff]   ;;  %v19125_v16 = vld [vmem:[%s22203_s17 + $0x11e4] ss:$16 sps:$4 sm:$0xff]  }
 0x178   : > { %13494 = vmatprep.subr.bf16.mxu1 %v19080_v17  ;;  %v19128_v17 = vld [vmem:[%s22203_s17 + $0x13e4] ss:$16 sps:$4 sm:$0xff]  }
 0x179   : > { %v13159_v28 = vpop.f32.mrf.mxu0  ;;  %13404 = vmatmul.mubr.bf16.vlgmr.msra.gmra.mxu0 %v22584_v13 }
 0x17a   : > { %v13200_v29 = vpop.f32.mrf.mxu1  ;;  %13445 = vmatmul.mubr.bf16.vlgmr.msra.gmra.mxu1 %v22594_v21  ;;  %13454 = vmatpush1.bf16.msra.mxu0 %v19075_v22  ;;  %v19123_v22 = vld [vmem:[%s22203_s17 + $0x11e0] ss:$16 sps:$4 sm:$0xff]  }
 0x17b   : > { %v22608_v7 = vadd.f32 %v13200_v29, %v13159_v28  ;;  %13495 = vmatpush1.bf16.msra.mxu1 %v19078_v41  ;;  %v13161_v34 = vpop.f32.mrf.mxu0  ;;  %13455 = vmatprep.subr.bf16.mxu0 %v19083_v23  ;;  %v19126_v41 = vld [vmem:[%s22203_s17 + $0x13e0] ss:$16 sps:$4 sm:$0xff]   ;;  %v19131_v23 = vld [vmem:[%s22203_s17 + $0x11c4] ss:$16 sps:$4 sm:$0xff]  }
 0x17c   : > { %v13202_v35 = vpop.f32.mrf.mxu1  ;;  %13496 = vmatprep.subr.bf16.mxu1 %v19086_v25  ;;  %13485 = vmatprep.mubr.bf16.mxu0 %v22590_v20  ;;  %v19134_v25 = vld [vmem:[%s22203_s17 + $0x13c4] ss:$16 sps:$4 sm:$0xff]   ;;  %v19129_v28 = vld [vmem:[%s22203_s17 + $0x11c0] ss:$16 sps:$4 sm:$0xff]  }
 0x17d   : > { %v22612_v39 = vadd.f32 %v13202_v35, %v13161_v34  ;;  %13526 = vmatprep.mubr.bf16.mxu1 %v22602_v26  ;;  %v13163_v45 = vpop.f32.mrf.mxu0  ;;  %v19132_v29 = vld [vmem:[%s22203_s17 + $0x13c0] ss:$16 sps:$4 sm:$0xff]  }
 0x17e   : > { %v13204_v46 = vpop.f32.mrf.mxu1  ;;  %13456 = vmatpush1.bf16.msra.mxu0 %v19081_v30  ;;  %v19137_v30 = vld [vmem:[%s22203_s17 + $0x11a4] ss:$16 sps:$4 sm:$0xff]   ;;  %v19135_v34 = vld [vmem:[%s22203_s17 + $0x11a0] ss:$16 sps:$4 sm:$0xff]  }
 0x17f   : > { %13497 = vmatpush1.bf16.msra.mxu1 %v19084_v32  ;;  %v13164_v47 = vpop.f32.mrf.mxu0  ;;  %13457 = vmatprep.subr.bf16.mxu0 %v19089_v37  ;;  %v19140_v32 = vld [vmem:[%s22203_s17 + $0x13a4] ss:$16 sps:$4 sm:$0xff]   ;;  %v19138_v35 = vld [vmem:[%s22203_s17 + $0x13a0] ss:$16 sps:$4 sm:$0xff]  }
 0x180   : > { %v13205_v48 = vpop.f32.mrf.mxu1  ;;  %13498 = vmatprep.subr.bf16.mxu1 %v19092_v38  ;;  %v19143_v37 = vld [vmem:[%s22203_s17 + $0x1184] ss:$16 sps:$4 sm:$0xff]   ;;  %v19147_v47 = vld [vmem:[%s22203_s17 + $0x1160] ss:$16 sps:$4 sm:$0xff]  }
 0x181   : > { %v19146_v38 = vld [vmem:[%s22203_s17 + $0x1384] ss:$16 sps:$4 sm:$0xff]   ;;  %v19150_v48 = vld [vmem:[%s22203_s17 + $0x1360] ss:$16 sps:$4 sm:$0xff]  }
 0x182   : > { %13458 = vmatpush1.bf16.msra.mxu0 %v19087_v40  ;;  %v19141_v40 = vld [vmem:[%s22203_s17 + $0x1180] ss:$16 sps:$4 sm:$0xff]   ;;  %v19149_v45 = vld [vmem:[%s22203_s17 + $0x1164] ss:$16 sps:$4 sm:$0xff]  }
 0x183   : > { %13499 = vmatpush1.bf16.msra.mxu1 %v19090_v33  ;;  %13459 = vmatprep.subr.bf16.mxu0 %v19095_v51  ;;  %v19144_v33 = vld [vmem:[%s22203_s17 + $0x1380] ss:$16 sps:$4 sm:$0xff]   ;;  %v19152_v46 = vld [vmem:[%s22203_s17 + $0x1364] ss:$16 sps:$4 sm:$0xff]  }
 0x184   : > { %13500 = vmatprep.subr.bf16.mxu1 %v19098_v52  ;;  %v19155_v51 = vld [vmem:[%s22203_s17 + $0x1144] ss:$16 sps:$4 sm:$0xff]  }
 0x185   : > { %v19158_v52 = vld [vmem:[%s22203_s17 + $0x1344] ss:$16 sps:$4 sm:$0xff]  }
 0x186   : > { %13460 = vmatpush1.bf16.msra.mxu0 %v19093_v53  ;;  %v2527_v53 = vcombine.high %v22566_v0, %v22566_v0  ;;  %v19159_v0 = vld [vmem:[%s22203_s17 + $0x1120] ss:$16 sps:$4 sm:$0xff]  }
 0x187   : > { %13501 = vmatpush1.bf16.msra.mxu1 %v19096_v54  ;;  %13461 = vmatprep.subr.bf16.mxu0 %v19101_v36  ;;  %v19153_v54 = vld [vmem:[%s22203_s17 + $0x1140] ss:$16 sps:$4 sm:$0xff]  }
 0x188   : > { %13502 = vmatprep.subr.bf16.mxu1 %v19104_v57  ;;  %v19156_v36 = vld [vmem:[%s22203_s17 + $0x1340] ss:$16 sps:$4 sm:$0xff]   ;;  %v19161_v57 = vld [vmem:[%s22203_s17 + $0x1124] ss:$16 sps:$4 sm:$0xff]  }
 0x18a   : > { %13462 = vmatpush1.bf16.msra.mxu0 %v19099_v58  ;;  %v19164_v58 = vld [vmem:[%s22203_s17 + $0x1324] ss:$16 sps:$4 sm:$0xff]  }
 0x18b   : > { %13503 = vmatpush1.bf16.msra.mxu1 %v19102_v59  ;;  %13463 = vmatprep.subr.bf16.mxu0 %v19107_v62  ;;  %v22667_v59 = vrot.slane %v2527_v53, %v22272_v50  ;;  %v19162_v62 = vld [vmem:[%s22203_s17 + $0x1320] ss:$16 sps:$4 sm:$0xff]  }
 0x18c   : > { %13504 = vmatprep.subr.bf16.mxu1 %v19110_v63  ;;  %v19167_v63 = vld [vmem:[%s22203_s17 + $0x1104] ss:$16 sps:$4 sm:$0xff]   ;;  %v19192_v53 = vld [vmem:[%s22203_s17 + $0x1680] ss:$16 sps:$4 sm:$0xff]  }
 0x18e   : > { %13464 = vmatpush1.bf16.msra.mxu0 %v19105_v2  ;;  %v19170_v2 = vld [vmem:[%s22203_s17 + $0x1304] ss:$16 sps:$4 sm:$0xff]  }
 0x18f   : > { %13505 = vmatpush1.bf16.msra.mxu1 %v19108_v3  ;;  %13465 = vmatprep.subr.bf16.mxu0 %v19113_v4  ;;  %v2543_v3 = vcombine.high %v22667_v59, %v22667_v59  ;;  %v22677_v4 = vrot.slane %v22573_v5, %v22272_v50 }
 0x190   : > { %13506 = vmatprep.subr.bf16.mxu1 %v19116_v6  ;;  %v19165_v6 = vld [vmem:[%s22203_s17 + $0x1100] ss:$16 sps:$4 sm:$0xff]  }
 0x191   : > { %v22690_v5 = vcombine.high %v22677_v4, %v22677_v4 }
 0x192   : > { %13466 = vmatpush1.bf16.msra.mxu0 %v19111_v8  ;;  %v19168_v8 = vld [vmem:[%s22203_s17 + $0x1300] ss:$16 sps:$4 sm:$0xff]  }
 0x193   : > { %13507 = vmatpush1.bf16.msra.mxu1 %v19114_v9  ;;  %13467 = vmatprep.subr.bf16.mxu0 %v19119_v10  ;;  %v19173_v9 = vld [vmem:[%s22203_s17 + $0x14e4] ss:$16 sps:$4 sm:$0xff]  }
 0x194   : > { %13508 = vmatprep.subr.bf16.mxu1 %v19122_v11  ;;  %v19176_v10 = vld [vmem:[%s22203_s17 + $0x16e4] ss:$16 sps:$4 sm:$0xff]   ;;  %v19171_v11 = vld [vmem:[%s22203_s17 + $0x14e0] ss:$16 sps:$4 sm:$0xff]  }
 0x196   : > { %13468 = vmatpush1.bf16.msra.mxu0 %v19117_v12  ;;  %v19174_v12 = vld [vmem:[%s22203_s17 + $0x16e0] ss:$16 sps:$4 sm:$0xff]  }
 0x197   : > { %13509 = vmatpush1.bf16.msra.mxu1 %v19120_v15  ;;  %13469 = vmatprep.subr.bf16.mxu0 %v19125_v16  ;;  %v22686_v15 = vrot.slane %v2543_v3, %v22272_v50  ;;  %v19179_v16 = vld [vmem:[%s22203_s17 + $0x14c4] ss:$16 sps:$4 sm:$0xff]  }
 0x198   : > { %13510 = vmatprep.subr.bf16.mxu1 %v19128_v17  ;;  %v19182_v17 = vld [vmem:[%s22203_s17 + $0x16c4] ss:$16 sps:$4 sm:$0xff]  }
 0x199   : > { %v19209_v3 = vld [vmem:[%s22203_s17 + $0x1424] ss:$16 sps:$4 sm:$0xff]  }
 0x19a   : > { %13470 = vmatpush2.bf16.msra.mxu0 %v19123_v22  ;;  %v19177_v22 = vld [vmem:[%s22203_s17 + $0x14c0] ss:$16 sps:$4 sm:$0xff]  }
 0x19b   : > { %13511 = vmatpush2.bf16.msra.mxu1 %v19126_v41  ;;  %13471 = vmatprep.subr.bf16.mxu0 %v19131_v23  ;;  %v19180_v41 = vld [vmem:[%s22203_s17 + $0x16c0] ss:$16 sps:$4 sm:$0xff]   ;;  %v22698_v23 = vcombine.high %v22686_v15, %v22686_v15 }
 0x19c   : > { %13512 = vmatprep.subr.bf16.mxu1 %v19134_v25 }
 0x19e   : > { %13472 = vmatpush2.bf16.msra.mxu0 %v19129_v28 }
 0x19f   : > { %13513 = vmatpush2.bf16.msra.mxu1 %v19132_v29  ;;  %13473 = vmatprep.subr.bf16.mxu0 %v19137_v30 }
 0x1a0   : > { %13514 = vmatprep.subr.bf16.mxu1 %v19140_v32 }
 0x1a2   : > { %13474 = vmatpush2.bf16.msra.mxu0 %v19135_v34  ;;  %v19185_v34 = vld [vmem:[%s22203_s17 + $0x14a4] ss:$16 sps:$4 sm:$0xff]  }
 0x1a3   : > { %13515 = vmatpush2.bf16.msra.mxu1 %v19138_v35  ;;  %13475 = vmatprep.subr.bf16.mxu0 %v19143_v37  ;;  %v19188_v35 = vld [vmem:[%s22203_s17 + $0x16a4] ss:$16 sps:$4 sm:$0xff]  }
 0x1a4   : > { %13516 = vmatprep.subr.bf16.mxu1 %v19146_v38 }
 0x1a6   : > { %13476 = vmatpush2.bf16.msra.mxu0 %v19141_v40  ;;  %v19183_v40 = vld [vmem:[%s22203_s17 + $0x14a0] ss:$16 sps:$4 sm:$0xff]  }
 0x1a7   : > { %13517 = vmatpush2.bf16.msra.mxu1 %v19144_v33  ;;  %13477 = vmatprep.subr.bf16.mxu0 %v19149_v45  ;;  %v19186_v33 = vld [vmem:[%s22203_s17 + $0x16a0] ss:$16 sps:$4 sm:$0xff]  }
 0x1a8   : > { %13518 = vmatprep.subr.bf16.mxu1 %v19152_v46 }
 0x1aa   : > { %13478 = vmatpush2.bf16.msra.mxu0 %v19147_v47 }
 0x1ab   : > { %13519 = vmatpush2.bf16.msra.mxu1 %v19150_v48  ;;  %13479 = vmatprep.subr.bf16.mxu0 %v19155_v51  ;;  %v19194_v51 = vld [vmem:[%s22203_s17 + $0x1684] ss:$16 sps:$4 sm:$0xff]  }
 0x1ac   : > { %13520 = vmatprep.subr.bf16.mxu1 %v19158_v52  ;;  %v19189_v52 = vld [vmem:[%s22203_s17 + $0x1480] ss:$16 sps:$4 sm:$0xff]  }
 0x1ae   : > { %13480 = vmatpush2.bf16.msra.mxu0 %v19153_v54  ;;  %v19197_v54 = vld [vmem:[%s22203_s17 + $0x1464] ss:$16 sps:$4 sm:$0xff]  }
 0x1af   : > { %13521 = vmatpush2.bf16.msra.mxu1 %v19156_v36  ;;  %13481 = vmatprep.subr.bf16.mxu0 %v19161_v57  ;;  %v19200_v36 = vld [vmem:[%s22203_s17 + $0x1664] ss:$16 sps:$4 sm:$0xff]   ;;  %v19195_v57 = vld [vmem:[%s22203_s17 + $0x1460] ss:$16 sps:$4 sm:$0xff]  }
 0x1b0   : > { %13522 = vmatprep.subr.bf16.mxu1 %v19164_v58  ;;  %v19198_v58 = vld [vmem:[%s22203_s17 + $0x1660] ss:$16 sps:$4 sm:$0xff]  }
 0x1b2   : > { %13482 = vmatpush2.bf16.msra.mxu0 %v19159_v0  ;;  %v19203_v0 = vld [vmem:[%s22203_s17 + $0x1444] ss:$16 sps:$4 sm:$0xff]  }
 0x1b3   : > { %13523 = vmatpush2.bf16.msra.mxu1 %v19162_v62  ;;  %13483 = vmatprep.subr.bf16.mxu0 %v19167_v63  ;;  %v19206_v62 = vld [vmem:[%s22203_s17 + $0x1644] ss:$16 sps:$4 sm:$0xff]   ;;  %v19201_v63 = vld [vmem:[%s22203_s17 + $0x1440] ss:$16 sps:$4 sm:$0xff]  }
 0x1b4   : > { %13524 = vmatprep.subr.bf16.mxu1 %v19170_v2  ;;  %v19204_v2 = vld [vmem:[%s22203_s17 + $0x1640] ss:$16 sps:$4 sm:$0xff]  }
 0x1b6   : > { %13484 = vmatpush2.bf16.msra.mxu0 %v19165_v6  ;;  %v19212_v6 = vld [vmem:[%s22203_s17 + $0x1624] ss:$16 sps:$4 sm:$0xff]  }
 0x1b7   : > { %13525 = vmatpush2.bf16.msra.mxu1 %v19168_v8  ;;  %13535 = vmatprep.subr.bf16.mxu0 %v19173_v9  ;;  %v19207_v8 = vld [vmem:[%s22203_s17 + $0x1420] ss:$16 sps:$4 sm:$0xff]  }
 0x1b8   : > { %13576 = vmatprep.subr.bf16.mxu1 %v19176_v10  ;;  %v19210_v9 = vld [vmem:[%s22203_s17 + $0x1620] ss:$16 sps:$4 sm:$0xff]   ;;  %v19215_v10 = vld [vmem:[%s22203_s17 + $0x1404] ss:$16 sps:$4 sm:$0xff]  }
 0x1b9   : > { %v13241_v25 = vpop.f32.mrf.mxu0  ;;  %13486 = vmatmul.mubr.bf16.vlgmr.msra.gmra.mxu0 %v22677_v4 }
 0x1ba   : > { %v13282_v28 = vpop.f32.mrf.mxu1  ;;  %13527 = vmatmul.mubr.bf16.vlgmr.msra.gmra.mxu1 %v22690_v5  ;;  %v13242_v29 = vadd.f32 %v13241_v25, %v22608_v7  ;;  %13536 = vmatpush1.bf16.msra.mxu0 %v19171_v11  ;;  %v19218_v11 = vld [vmem:[%s22203_s17 + $0x1604] ss:$16 sps:$4 sm:$0xff]   ;;  %v19222_v25 = vld [vmem:[%s22203_s17 + $0x17e0] ss:$16 sps:$4 sm:$0xff]  }
 0x1bb   : > { %13577 = vmatpush1.bf16.msra.mxu1 %v19174_v12  ;;  %v13243_v30 = vpop.f32.mrf.mxu0  ;;  %13537 = vmatprep.subr.bf16.mxu0 %v19179_v16  ;;  %v19213_v12 = vld [vmem:[%s22203_s17 + $0x1400] ss:$16 sps:$4 sm:$0xff]  }
 0x1bc   : > { %v13284_v32 = vpop.f32.mrf.mxu1  ;;  %13578 = vmatprep.subr.bf16.mxu1 %v19182_v17  ;;  %v22705_v37 = vadd.f32 %v13282_v28, %v13242_v29  ;;  %v13244_v38 = vadd.f32 %v13243_v30, %v22612_v39  ;;  %13567 = vmatprep.mubr.bf16.mxu0 %v22686_v15  ;;  %v19191_v39 = vld [vmem:[%s22203_s17 + $0x1484] ss:$16 sps:$4 sm:$0xff]   ;;  %v19216_v16 = vld [vmem:[%s22203_s17 + $0x1600] ss:$16 sps:$4 sm:$0xff]  }
 0x1bd   : > { %13608 = vmatprep.mubr.bf16.mxu1 %v22698_v23  ;;  %v13245_v7 = vpop.f32.mrf.mxu0  ;;  %v19221_v17 = vld [vmem:[%s22203_s17 + $0x15e4] ss:$16 sps:$4 sm:$0xff]   ;;  %v19225_v30 = vld [vmem:[%s22203_s17 + $0x15c0] ss:$16 sps:$4 sm:$0xff]  }
 0x1be   : > { %v13286_v45 = vpop.f32.mrf.mxu1  ;;  %v22712_v46 = vadd.f32 %v13284_v32, %v13244_v38  ;;  %13538 = vmatpush1.bf16.msra.mxu0 %v19177_v22  ;;  %v19224_v22 = vld [vmem:[%s22203_s17 + $0x17e4] ss:$16 sps:$4 sm:$0xff]   ;;  %v19228_v32 = vld [vmem:[%s22203_s17 + $0x17c0] ss:$16 sps:$4 sm:$0xff]  }
 0x1bf   : > { %13579 = vmatpush1.bf16.msra.mxu1 %v19180_v41  ;;  %v13246_v47 = vpop.f32.mrf.mxu0  ;;  %13539 = vmatprep.subr.bf16.mxu0 %v19185_v34  ;;  %v19219_v41 = vld [vmem:[%s22203_s17 + $0x15e0] ss:$16 sps:$4 sm:$0xff]   ;;  %v19227_v28 = vld [vmem:[%s22203_s17 + $0x15c4] ss:$16 sps:$4 sm:$0xff]  }
 0x1c0   : > { %v13287_v48 = vpop.f32.mrf.mxu1  ;;  %13580 = vmatprep.subr.bf16.mxu1 %v19188_v35  ;;  %v19230_v29 = vld [vmem:[%s22203_s17 + $0x17c4] ss:$16 sps:$4 sm:$0xff]   ;;  %v19231_v38 = vld [vmem:[%s22203_s17 + $0x15a0] ss:$16 sps:$4 sm:$0xff]  }
 0x1c1   : > { %v19233_v34 = vld [vmem:[%s22203_s17 + $0x15a4] ss:$16 sps:$4 sm:$0xff]   ;;  %v19237_v45 = vld [vmem:[%s22203_s17 + $0x1580] ss:$16 sps:$4 sm:$0xff]  }
 0x1c2   : > { %13540 = vmatpush1.bf16.msra.mxu0 %v19183_v40  ;;  %v19236_v35 = vld [vmem:[%s22203_s17 + $0x17a4] ss:$16 sps:$4 sm:$0xff]   ;;  %v19234_v40 = vld [vmem:[%s22203_s17 + $0x17a0] ss:$16 sps:$4 sm:$0xff]  }
 0x1c3   : > { %13581 = vmatpush1.bf16.msra.mxu1 %v19186_v33  ;;  %13541 = vmatprep.subr.bf16.mxu0 %v19191_v39  ;;  %v19239_v33 = vld [vmem:[%s22203_s17 + $0x1584] ss:$16 sps:$4 sm:$0xff]   ;;  %v19240_v47 = vld [vmem:[%s22203_s17 + $0x1780] ss:$16 sps:$4 sm:$0xff]  }
 0x1c4   : > { %13582 = vmatprep.subr.bf16.mxu1 %v19194_v51  ;;  %v19242_v7 = vld [vmem:[%s22203_s17 + $0x1784] ss:$16 sps:$4 sm:$0xff]   ;;  %v19243_v51 = vld [vmem:[%s22203_s17 + $0x1560] ss:$16 sps:$4 sm:$0xff]  }
 0x1c5   : > { %v19245_v48 = vld [vmem:[%s22203_s17 + $0x1564] ss:$16 sps:$4 sm:$0xff]  }
 0x1c6   : > { %13542 = vmatpush1.bf16.msra.mxu0 %v19189_v52  ;;  %v19248_v39 = vld [vmem:[%s22203_s17 + $0x1764] ss:$16 sps:$4 sm:$0xff]   ;;  %v19246_v52 = vld [vmem:[%s22203_s17 + $0x1760] ss:$16 sps:$4 sm:$0xff]  }
 0x1c7   : > { %13583 = vmatpush1.bf16.msra.mxu1 %v19192_v53  ;;  %13543 = vmatprep.subr.bf16.mxu0 %v19197_v54  ;;  %v19251_v53 = vld [vmem:[%s22203_s17 + $0x1544] ss:$16 sps:$4 sm:$0xff]  }
 0x1c8   : > { %13584 = vmatprep.subr.bf16.mxu1 %v19200_v36  ;;  %v19254_v54 = vld [vmem:[%s22203_s17 + $0x1744] ss:$16 sps:$4 sm:$0xff]  }
 0x1c9   : > { %v22757_v36 = vld [vmem:[%s22221_s29 + $0x18] sm:$0xff] }
 0x1ca   : > { %13544 = vmatpush1.bf16.msra.mxu0 %v19195_v57  ;;  %v19249_v57 = vld [vmem:[%s22203_s17 + $0x1540] ss:$16 sps:$4 sm:$0xff]  }
 0x1cb   : > { %13585 = vmatpush1.bf16.msra.mxu1 %v19198_v58  ;;  %13545 = vmatprep.subr.bf16.mxu0 %v19203_v0  ;;  %v19252_v58 = vld [vmem:[%s22203_s17 + $0x1740] ss:$16 sps:$4 sm:$0xff]   ;;  %v19257_v0 = vld [vmem:[%s22203_s17 + $0x1524] ss:$16 sps:$4 sm:$0xff]  }
 0x1cc   : > { %13586 = vmatprep.subr.bf16.mxu1 %v19206_v62  ;;  %v19260_v62 = vld [vmem:[%s22203_s17 + $0x1724] ss:$16 sps:$4 sm:$0xff]  }
 0x1ce   : > { %13546 = vmatpush1.bf16.msra.mxu0 %v19201_v63  ;;  %v22765_v63 = vrot.slane %v22757_v36, %v22272_v50 }
 0x1cf   : > { %13587 = vmatpush1.bf16.msra.mxu1 %v19204_v2  ;;  %13547 = vmatprep.subr.bf16.mxu0 %v19209_v3  ;;  %v19255_v2 = vld [vmem:[%s22203_s17 + $0x1520] ss:$16 sps:$4 sm:$0xff]  }
 0x1d0   : > { %13588 = vmatprep.subr.bf16.mxu1 %v19212_v6  ;;  %v19258_v3 = vld [vmem:[%s22203_s17 + $0x1720] ss:$16 sps:$4 sm:$0xff]   ;;  %v19263_v6 = vld [vmem:[%s22203_s17 + $0x1504] ss:$16 sps:$4 sm:$0xff]  }
 0x1d2   : > { %13548 = vmatpush1.bf16.msra.mxu0 %v19207_v8  ;;  %v19266_v8 = vld [vmem:[%s22203_s17 + $0x1704] ss:$16 sps:$4 sm:$0xff]  }
 0x1d3   : > { %13589 = vmatpush1.bf16.msra.mxu1 %v19210_v9  ;;  %13549 = vmatprep.subr.bf16.mxu0 %v19215_v10  ;;  %v2591_v9 = vcombine.high %v22765_v63, %v22765_v63  ;;  %v22775_v10 = vrot.slane %v22667_v59, %v22272_v50 }
 0x1d4   : > { %13590 = vmatprep.subr.bf16.mxu1 %v19218_v11  ;;  %v19261_v11 = vld [vmem:[%s22203_s17 + $0x1500] ss:$16 sps:$4 sm:$0xff]  }
 0x1d5   : > { %v22788_v59 = vcombine.high %v22775_v10, %v22775_v10 }
 0x1d6   : > { %13550 = vmatpush1.bf16.msra.mxu0 %v19213_v12  ;;  %v19264_v12 = vld [vmem:[%s22203_s17 + $0x1700] ss:$16 sps:$4 sm:$0xff]  }
 0x1d7   : > { %13591 = vmatpush1.bf16.msra.mxu1 %v19216_v16  ;;  %13551 = vmatprep.subr.bf16.mxu0 %v19221_v17  ;;  %v19270_v16 = vld [vmem:[%s22203_s17 + $0x18e4] ss:$16 sps:$4 sm:$0xff]  }
 0x1d8   : > { %13592 = vmatprep.subr.bf16.mxu1 %v19224_v22  ;;  %v19273_v17 = vld [vmem:[%s22203_s17 + $0x1ae4] ss:$16 sps:$4 sm:$0xff]   ;;  %v19268_v22 = vld [vmem:[%s22203_s17 + $0x18e0] ss:$16 sps:$4 sm:$0xff]  }
 0x1da   : > { %13552 = vmatpush2.bf16.msra.mxu0 %v19219_v41  ;;  %v19271_v41 = vld [vmem:[%s22203_s17 + $0x1ae0] ss:$16 sps:$4 sm:$0xff]  }
 0x1db   : > { %13593 = vmatpush2.bf16.msra.mxu1 %v19222_v25  ;;  %13553 = vmatprep.subr.bf16.mxu0 %v19227_v28  ;;  %v22784_v25 = vrot.slane %v2591_v9, %v22272_v50  ;;  %v19276_v28 = vld [vmem:[%s22203_s17 + $0x18c4] ss:$16 sps:$4 sm:$0xff]   ;;  %v19295_v9 = vld [vmem:[%s22203_s17 + $0x1a60] ss:$16 sps:$4 sm:$0xff]  }
 0x1dc   : > { %13594 = vmatprep.subr.bf16.mxu1 %v19230_v29  ;;  %v19279_v29 = vld [vmem:[%s22203_s17 + $0x1ac4] ss:$16 sps:$4 sm:$0xff]  }
 0x1de   : > { %13554 = vmatpush2.bf16.msra.mxu0 %v19225_v30  ;;  %v19274_v30 = vld [vmem:[%s22203_s17 + $0x18c0] ss:$16 sps:$4 sm:$0xff]  }
 0x1df   : > { %13595 = vmatpush2.bf16.msra.mxu1 %v19228_v32  ;;  %13555 = vmatprep.subr.bf16.mxu0 %v19233_v34  ;;  %v19277_v32 = vld [vmem:[%s22203_s17 + $0x1ac0] ss:$16 sps:$4 sm:$0xff]   ;;  %v22796_v34 = vcombine.high %v22784_v25, %v22784_v25 }
 0x1e0   : > { %13596 = vmatprep.subr.bf16.mxu1 %v19236_v35 }
 0x1e2   : > { %13556 = vmatpush2.bf16.msra.mxu0 %v19231_v38 }
 0x1e3   : > { %13597 = vmatpush2.bf16.msra.mxu1 %v19234_v40  ;;  %13557 = vmatprep.subr.bf16.mxu0 %v19239_v33 }
 0x1e4   : > { %13598 = vmatprep.subr.bf16.mxu1 %v19242_v7 }
 0x1e6   : > { %13558 = vmatpush2.bf16.msra.mxu0 %v19237_v45  ;;  %v19282_v45 = vld [vmem:[%s22203_s17 + $0x18a4] ss:$16 sps:$4 sm:$0xff]  }
 0x1e7   : > { %13599 = vmatpush2.bf16.msra.mxu1 %v19240_v47  ;;  %13559 = vmatprep.subr.bf16.mxu0 %v19245_v48  ;;  %v19285_v47 = vld [vmem:[%s22203_s17 + $0x1aa4] ss:$16 sps:$4 sm:$0xff]  }
 0x1e8   : > { %13600 = vmatprep.subr.bf16.mxu1 %v19248_v39 }
 0x1ea   : > { %13560 = vmatpush2.bf16.msra.mxu0 %v19243_v51  ;;  %v19280_v51 = vld [vmem:[%s22203_s17 + $0x18a0] ss:$16 sps:$4 sm:$0xff]  }
 0x1eb   : > { %13601 = vmatpush2.bf16.msra.mxu1 %v19246_v52  ;;  %13561 = vmatprep.subr.bf16.mxu0 %v19251_v53  ;;  %v19283_v52 = vld [vmem:[%s22203_s17 + $0x1aa0] ss:$16 sps:$4 sm:$0xff]  }
 0x1ec   : > { %13602 = vmatprep.subr.bf16.mxu1 %v19254_v54 }
 0x1ee   : > { %13562 = vmatpush2.bf16.msra.mxu0 %v19249_v57 }
 0x1ef   : > { %13603 = vmatpush2.bf16.msra.mxu1 %v19252_v58  ;;  %13563 = vmatprep.subr.bf16.mxu0 %v19257_v0  ;;  %v19291_v0 = vld [vmem:[%s22203_s17 + $0x1a84] ss:$16 sps:$4 sm:$0xff]  }
 0x1f0   : > { %13604 = vmatprep.subr.bf16.mxu1 %v19260_v62  ;;  %v19286_v62 = vld [vmem:[%s22203_s17 + $0x1880] ss:$16 sps:$4 sm:$0xff]  }
 0x1f2   : > { %13564 = vmatpush2.bf16.msra.mxu0 %v19255_v2  ;;  %v19289_v2 = vld [vmem:[%s22203_s17 + $0x1a80] ss:$16 sps:$4 sm:$0xff]  }
 0x1f3   : > { %13605 = vmatpush2.bf16.msra.mxu1 %v19258_v3  ;;  %13565 = vmatprep.subr.bf16.mxu0 %v19263_v6  ;;  %v19294_v3 = vld [vmem:[%s22203_s17 + $0x1864] ss:$16 sps:$4 sm:$0xff]  }
 0x1f4   : > { %13606 = vmatprep.subr.bf16.mxu1 %v19266_v8  ;;  %v19297_v6 = vld [vmem:[%s22203_s17 + $0x1a64] ss:$16 sps:$4 sm:$0xff]   ;;  %v19292_v8 = vld [vmem:[%s22203_s17 + $0x1860] ss:$16 sps:$4 sm:$0xff]  }
 0x1f6   : > { %13566 = vmatpush2.bf16.msra.mxu0 %v19261_v11  ;;  %v19300_v11 = vld [vmem:[%s22203_s17 + $0x1844] ss:$16 sps:$4 sm:$0xff]  }
 0x1f7   : > { %13607 = vmatpush2.bf16.msra.mxu1 %v19264_v12  ;;  %13617 = vmatprep.subr.bf16.mxu0 %v19270_v16  ;;  %v19303_v12 = vld [vmem:[%s22203_s17 + $0x1a44] ss:$16 sps:$4 sm:$0xff]   ;;  %v19298_v16 = vld [vmem:[%s22203_s17 + $0x1840] ss:$16 sps:$4 sm:$0xff]  }
 0x1f8   : > { %13658 = vmatprep.subr.bf16.mxu1 %v19273_v17  ;;  %v19301_v17 = vld [vmem:[%s22203_s17 + $0x1a40] ss:$16 sps:$4 sm:$0xff]  }
 0x1f9   : > { %v13323_v35 = vpop.f32.mrf.mxu0  ;;  %13568 = vmatmul.mubr.bf16.vlgmr.msra.gmra.mxu0 %v22775_v10 }
 0x1fa   : > { %v13364_v38 = vpop.f32.mrf.mxu1  ;;  %13609 = vmatmul.mubr.bf16.vlgmr.msra.gmra.mxu1 %v22788_v59  ;;  %v13324_v40 = vadd.f32 %v13323_v35, %v22705_v37  ;;  %13618 = vmatpush1.bf16.msra.mxu0 %v19268_v22  ;;  %v19306_v22 = vld [vmem:[%s22203_s17 + $0x1824] ss:$16 sps:$4 sm:$0xff]   ;;  %v19310_v35 = vld [vmem:[%s22203_s17 + $0x1800] ss:$16 sps:$4 sm:$0xff]  }
 0x1fb   : > { %13659 = vmatpush1.bf16.msra.mxu1 %v19271_v41  ;;  %v13325_v33 = vpop.f32.mrf.mxu0  ;;  %13619 = vmatprep.subr.bf16.mxu0 %v19276_v28  ;;  %v19309_v41 = vld [vmem:[%s22203_s17 + $0x1a24] ss:$16 sps:$4 sm:$0xff]   ;;  %v19304_v28 = vld [vmem:[%s22203_s17 + $0x1820] ss:$16 sps:$4 sm:$0xff]  }
 0x1fc   : > { %v13366_v7 = vpop.f32.mrf.mxu1  ;;  %13660 = vmatprep.subr.bf16.mxu1 %v19279_v29  ;;  %v22803_v48 = vadd.f32 %v13364_v38, %v13324_v40  ;;  %v13326_v39 = vadd.f32 %v13325_v33, %v22712_v46  ;;  %13649 = vmatprep.mubr.bf16.mxu0 %v22784_v25  ;;  %v19288_v46 = vld [vmem:[%s22203_s17 + $0x1884] ss:$16 sps:$4 sm:$0xff]   ;;  %v19307_v29 = vld [vmem:[%s22203_s17 + $0x1a20] ss:$16 sps:$4 sm:$0xff]  }
 0x1fd   : > { %13690 = vmatprep.mubr.bf16.mxu1 %v22796_v34  ;;  %v13327_v37 = vpop.f32.mrf.mxu0  ;;  %v19313_v38 = vld [vmem:[%s22203_s17 + $0x1a00] ss:$16 sps:$4 sm:$0xff]   ;;  %v19318_v40 = vld [vmem:[%s22203_s17 + $0x19e4] ss:$16 sps:$4 sm:$0xff]  }
 0x1fe   : > { %v13368_v53 = vpop.f32.mrf.mxu1  ;;  %v22810_v54 = vadd.f32 %v13366_v7, %v13326_v39  ;;  %13620 = vmatpush1.bf16.msra.mxu0 %v19274_v30  ;;  %v19312_v30 = vld [vmem:[%s22203_s17 + $0x1804] ss:$16 sps:$4 sm:$0xff]   ;;  %v19316_v7 = vld [vmem:[%s22203_s17 + $0x19e0] ss:$16 sps:$4 sm:$0xff]  }
 0x1ff   : > { %13661 = vmatpush1.bf16.msra.mxu1 %v19277_v32  ;;  %v13328_v57 = vpop.f32.mrf.mxu0  ;;  %13621 = vmatprep.subr.bf16.mxu0 %v19282_v45  ;;  %v19315_v32 = vld [vmem:[%s22203_s17 + $0x1a04] ss:$16 sps:$4 sm:$0xff]   ;;  %v19319_v45 = vld [vmem:[%s22203_s17 + $0x1be0] ss:$16 sps:$4 sm:$0xff]  }
 0x200   : > { %v13369_v58 = vpop.f32.mrf.mxu1  ;;  %13662 = vmatprep.subr.bf16.mxu1 %v19285_v47  ;;  %v19321_v33 = vld [vmem:[%s22203_s17 + $0x1be4] ss:$16 sps:$4 sm:$0xff]   ;;  %v19328_v57 = vld [vmem:[%s22203_s17 + $0x19a0] ss:$16 sps:$4 sm:$0xff]  }
 0x201   : > { %v19324_v47 = vld [vmem:[%s22203_s17 + $0x19c4] ss:$16 sps:$4 sm:$0xff]   ;;  %v19331_v58 = vld [vmem:[%s22203_s17 + $0x1ba0] ss:$16 sps:$4 sm:$0xff]  }
 0x202   : > { %13622 = vmatpush1.bf16.msra.mxu0 %v19280_v51  ;;  %v19327_v39 = vld [vmem:[%s22203_s17 + $0x1bc4] ss:$16 sps:$4 sm:$0xff]   ;;  %v19322_v51 = vld [vmem:[%s22203_s17 + $0x19c0] ss:$16 sps:$4 sm:$0xff]  }
 0x203   : > { %13663 = vmatpush1.bf16.msra.mxu1 %v19283_v52  ;;  %13623 = vmatprep.subr.bf16.mxu0 %v19288_v46  ;;  %v19325_v52 = vld [vmem:[%s22203_s17 + $0x1bc0] ss:$16 sps:$4 sm:$0xff]   ;;  %v19330_v37 = vld [vmem:[%s22203_s17 + $0x19a4] ss:$16 sps:$4 sm:$0xff]  }
 0x204   : > { %13664 = vmatprep.subr.bf16.mxu1 %v19291_v0  ;;  %v19333_v53 = vld [vmem:[%s22203_s17 + $0x1ba4] ss:$16 sps:$4 sm:$0xff]  }
 0x205   : > { %v19336_v46 = vld [vmem:[%s22203_s17 + $0x1984] ss:$16 sps:$4 sm:$0xff]  }
 0x206   : > { %13624 = vmatpush1.bf16.msra.mxu0 %v19286_v62  ;;  %v19339_v0 = vld [vmem:[%s22203_s17 + $0x1b84] ss:$16 sps:$4 sm:$0xff]   ;;  %v19334_v62 = vld [vmem:[%s22203_s17 + $0x1980] ss:$16 sps:$4 sm:$0xff]  }
 0x207   : > { %13665 = vmatpush1.bf16.msra.mxu1 %v19289_v2  ;;  %13625 = vmatprep.subr.bf16.mxu0 %v19294_v3  ;;  %v19337_v2 = vld [vmem:[%s22203_s17 + $0x1b80] ss:$16 sps:$4 sm:$0xff]   ;;  %v19342_v3 = vld [vmem:[%s22203_s17 + $0x1964] ss:$16 sps:$4 sm:$0xff]  }
 0x208   : > { %13666 = vmatprep.subr.bf16.mxu1 %v19297_v6  ;;  %v19345_v6 = vld [vmem:[%s22203_s17 + $0x1b64] ss:$16 sps:$4 sm:$0xff]  }
 0x20a   : > { %13626 = vmatpush1.bf16.msra.mxu0 %v19292_v8  ;;  %v19340_v8 = vld [vmem:[%s22203_s17 + $0x1960] ss:$16 sps:$4 sm:$0xff]  }
 0x20b   : > { %13667 = vmatpush1.bf16.msra.mxu1 %v19295_v9  ;;  %13627 = vmatprep.subr.bf16.mxu0 %v19300_v11  ;;  %v19343_v9 = vld [vmem:[%s22203_s17 + $0x1b60] ss:$16 sps:$4 sm:$0xff]   ;;  %v19348_v11 = vld [vmem:[%s22203_s17 + $0x1944] ss:$16 sps:$4 sm:$0xff]  }
 0x20c   : > { %13668 = vmatprep.subr.bf16.mxu1 %v19303_v12  ;;  %v19351_v12 = vld [vmem:[%s22203_s17 + $0x1b44] ss:$16 sps:$4 sm:$0xff]  }
 0x20e   : > { %13628 = vmatpush1.bf16.msra.mxu0 %v19298_v16  ;;  %v2576_v16 = vcombine.high %v22757_v36, %v22757_v36  ;;  %v19352_v36 = vld [vmem:[%s22203_s17 + $0x1920] ss:$16 sps:$4 sm:$0xff]  }
 0x20f   : > { %13669 = vmatpush1.bf16.msra.mxu1 %v19301_v17  ;;  %13629 = vmatprep.subr.bf16.mxu0 %v19306_v22  ;;  %v19346_v17 = vld [vmem:[%s22203_s17 + $0x1940] ss:$16 sps:$4 sm:$0xff]  }
 0x210   : > { %13670 = vmatprep.subr.bf16.mxu1 %v19309_v41  ;;  %v19349_v22 = vld [vmem:[%s22203_s17 + $0x1b40] ss:$16 sps:$4 sm:$0xff]   ;;  %v19354_v41 = vld [vmem:[%s22203_s17 + $0x1924] ss:$16 sps:$4 sm:$0xff]  }
 0x212   : > { %13630 = vmatpush1.bf16.msra.mxu0 %v19304_v28  ;;  %v19357_v28 = vld [vmem:[%s22203_s17 + $0x1b24] ss:$16 sps:$4 sm:$0xff]  }
 0x213   : > { %13671 = vmatpush1.bf16.msra.mxu1 %v19307_v29  ;;  %13631 = vmatprep.subr.bf16.mxu0 %v19312_v30  ;;  %v22861_v29 = vrot.slane %v2576_v16, %v22272_v50  ;;  %v19355_v30 = vld [vmem:[%s22203_s17 + $0x1b20] ss:$16 sps:$4 sm:$0xff]  }
 0x214   : > { %13672 = vmatprep.subr.bf16.mxu1 %v19315_v32  ;;  %v19360_v32 = vld [vmem:[%s22203_s17 + $0x1904] ss:$16 sps:$4 sm:$0xff]   ;;  %v19376_v16 = vld [vmem:[%s22203_s17 + $0x1ca0] ss:$16 sps:$4 sm:$0xff]  }
 0x216   : > { %13632 = vmatpush1.bf16.msra.mxu0 %v19310_v35  ;;  %v19363_v35 = vld [vmem:[%s22203_s17 + $0x1b04] ss:$16 sps:$4 sm:$0xff]  }
 0x217   : > { %13673 = vmatpush1.bf16.msra.mxu1 %v19313_v38  ;;  %13633 = vmatprep.subr.bf16.mxu0 %v19318_v40  ;;  %v2592_v38 = vcombine.high %v22861_v29, %v22861_v29  ;;  %v22871_v40 = vrot.slane %v22765_v63, %v22272_v50 }
 0x218   : > { %13674 = vmatprep.subr.bf16.mxu1 %v19321_v33  ;;  %v19358_v33 = vld [vmem:[%s22203_s17 + $0x1900] ss:$16 sps:$4 sm:$0xff]  }
 0x219   : > { %v22884_v63 = vcombine.high %v22871_v40, %v22871_v40 }
 0x21a   : > { %13634 = vmatpush2.bf16.msra.mxu0 %v19316_v7  ;;  %v19361_v7 = vld [vmem:[%s22203_s17 + $0x1b00] ss:$16 sps:$4 sm:$0xff]  }
 0x21b   : > { %13675 = vmatpush2.bf16.msra.mxu1 %v19319_v45  ;;  %13635 = vmatprep.subr.bf16.mxu0 %v19324_v47  ;;  %v19366_v45 = vld [vmem:[%s22203_s17 + $0x1ce4] ss:$16 sps:$4 sm:$0xff]  }
 0x21c   : > { %13676 = vmatprep.subr.bf16.mxu1 %v19327_v39  ;;  %v19369_v47 = vld [vmem:[%s22203_s17 + $0x1ee4] ss:$16 sps:$4 sm:$0xff]   ;;  %v19364_v39 = vld [vmem:[%s22203_s17 + $0x1ce0] ss:$16 sps:$4 sm:$0xff]  }
 0x21e   : > { %13636 = vmatpush2.bf16.msra.mxu0 %v19322_v51  ;;  %v19367_v51 = vld [vmem:[%s22203_s17 + $0x1ee0] ss:$16 sps:$4 sm:$0xff]  }
 0x21f   : > { %13677 = vmatpush2.bf16.msra.mxu1 %v19325_v52  ;;  %13637 = vmatprep.subr.bf16.mxu0 %v19330_v37  ;;  %v22880_v52 = vrot.slane %v2592_v38, %v22272_v50  ;;  %v19372_v37 = vld [vmem:[%s22203_s17 + $0x1cc4] ss:$16 sps:$4 sm:$0xff]  }
 0x220   : > { %13678 = vmatprep.subr.bf16.mxu1 %v19333_v53  ;;  %v19375_v53 = vld [vmem:[%s22203_s17 + $0x1ec4] ss:$16 sps:$4 sm:$0xff]  }
 0x221   : > { %v19390_v38 = vld [vmem:[%s22203_s17 + $0x1c64] ss:$16 sps:$4 sm:$0xff]  }
 0x222   : > { %13638 = vmatpush2.bf16.msra.mxu0 %v19328_v57  ;;  %v19370_v57 = vld [vmem:[%s22203_s17 + $0x1cc0] ss:$16 sps:$4 sm:$0xff]  }
 0x223   : > { %13679 = vmatpush2.bf16.msra.mxu1 %v19331_v58  ;;  %13639 = vmatprep.subr.bf16.mxu0 %v19336_v46  ;;  %v19373_v58 = vld [vmem:[%s22203_s17 + $0x1ec0] ss:$16 sps:$4 sm:$0xff]   ;;  %v22892_v46 = vcombine.high %v22880_v52, %v22880_v52 }
 0x224   : > { %13680 = vmatprep.subr.bf16.mxu1 %v19339_v0 }
 0x226   : > { %13640 = vmatpush2.bf16.msra.mxu0 %v19334_v62 }
 0x227   : > { %13681 = vmatpush2.bf16.msra.mxu1 %v19337_v2  ;;  %13641 = vmatprep.subr.bf16.mxu0 %v19342_v3 }
 0x228   : > { %13682 = vmatprep.subr.bf16.mxu1 %v19345_v6 }
 0x22a   : > { %13642 = vmatpush2.bf16.msra.mxu0 %v19340_v8  ;;  %v19378_v8 = vld [vmem:[%s22203_s17 + $0x1ca4] ss:$16 sps:$4 sm:$0xff]  }
 0x22b   : > { %13683 = vmatpush2.bf16.msra.mxu1 %v19343_v9  ;;  %13643 = vmatprep.subr.bf16.mxu0 %v19348_v11  ;;  %v19381_v9 = vld [vmem:[%s22203_s17 + $0x1ea4] ss:$16 sps:$4 sm:$0xff]  }
 0x22c   : > { %13684 = vmatprep.subr.bf16.mxu1 %v19351_v12 }
 0x22e   : > { %13644 = vmatpush2.bf16.msra.mxu0 %v19346_v17  ;;  %v19379_v17 = vld [vmem:[%s22203_s17 + $0x1ea0] ss:$16 sps:$4 sm:$0xff]  }
 0x22f   : > { %13685 = vmatpush2.bf16.msra.mxu1 %v19349_v22  ;;  %13645 = vmatprep.subr.bf16.mxu0 %v19354_v41 }
 0x230   : > { %13686 = vmatprep.subr.bf16.mxu1 %v19357_v28 }
 0x232   : > { %13646 = vmatpush2.bf16.msra.mxu0 %v19352_v36 }
 0x233   : > { %13687 = vmatpush2.bf16.msra.mxu1 %v19355_v30  ;;  %13647 = vmatprep.subr.bf16.mxu0 %v19360_v32  ;;  %v19387_v30 = vld [vmem:[%s22203_s17 + $0x1e84] ss:$16 sps:$4 sm:$0xff]   ;;  %v19382_v32 = vld [vmem:[%s22203_s17 + $0x1c80] ss:$16 sps:$4 sm:$0xff]  }
 0x234   : > { %13688 = vmatprep.subr.bf16.mxu1 %v19363_v35  ;;  %v19385_v35 = vld [vmem:[%s22203_s17 + $0x1e80] ss:$16 sps:$4 sm:$0xff]  }
 0x236   : > { %13648 = vmatpush2.bf16.msra.mxu0 %v19358_v33  ;;  %v19393_v33 = vld [vmem:[%s22203_s17 + $0x1e64] ss:$16 sps:$4 sm:$0xff]  }
 0x237   : > { %13689 = vmatpush2.bf16.msra.mxu1 %v19361_v7  ;;  %13699 = vmatprep.subr.bf16.mxu0 %v19366_v45  ;;  %v19388_v7 = vld [vmem:[%s22203_s17 + $0x1c60] ss:$16 sps:$4 sm:$0xff]  }
 0x238   : > { %13740 = vmatprep.subr.bf16.mxu1 %v19369_v47  ;;  %v19391_v45 = vld [vmem:[%s22203_s17 + $0x1e60] ss:$16 sps:$4 sm:$0xff]   ;;  %v19396_v47 = vld [vmem:[%s22203_s17 + $0x1c44] ss:$16 sps:$4 sm:$0xff]  }
 0x239   : > { %v13405_v0 = vpop.f32.mrf.mxu0  ;;  %13650 = vmatmul.mubr.bf16.vlgmr.msra.gmra.mxu0 %v22871_v40 }
 0x23a   : > { %v13446_v62 = vpop.f32.mrf.mxu1  ;;  %13691 = vmatmul.mubr.bf16.vlgmr.msra.gmra.mxu1 %v22884_v63  ;;  %v13406_v2 = vadd.f32 %v13405_v0, %v22803_v48  ;;  %13700 = vmatpush1.bf16.msra.mxu0 %v19364_v39  ;;  %v19399_v39 = vld [vmem:[%s22203_s17 + $0x1e44] ss:$16 sps:$4 sm:$0xff]   ;;  %v19403_v0 = vld [vmem:[%s22203_s17 + $0x1e20] ss:$16 sps:$4 sm:$0xff]  }
 0x23b   : > { %13741 = vmatpush1.bf16.msra.mxu1 %v19367_v51  ;;  %v13407_v3 = vpop.f32.mrf.mxu0  ;;  %13701 = vmatprep.subr.bf16.mxu0 %v19372_v37  ;;  %v19394_v51 = vld [vmem:[%s22203_s17 + $0x1c40] ss:$16 sps:$4 sm:$0xff]  }
 0x23c   : > { %v13448_v6 = vpop.f32.mrf.mxu1  ;;  %13742 = vmatprep.subr.bf16.mxu1 %v19375_v53  ;;  %v22899_v11 = vadd.f32 %v13446_v62, %v13406_v2  ;;  %v13408_v12 = vadd.f32 %v13407_v3, %v22810_v54  ;;  %13731 = vmatprep.mubr.bf16.mxu0 %v22880_v52  ;;  %v19384_v54 = vld [vmem:[%s22203_s17 + $0x1c84] ss:$16 sps:$4 sm:$0xff]   ;;  %v19397_v37 = vld [vmem:[%s22203_s17 + $0x1e40] ss:$16 sps:$4 sm:$0xff]  }
 0x23d   : > { %13772 = vmatprep.mubr.bf16.mxu1 %v22892_v46  ;;  %v13409_v48 = vpop.f32.mrf.mxu0  ;;  %v19402_v53 = vld [vmem:[%s22203_s17 + $0x1c24] ss:$16 sps:$4 sm:$0xff]   ;;  %v19406_v3 = vld [vmem:[%s22203_s17 + $0x1c00] ss:$16 sps:$4 sm:$0xff]  }
 0x23e   : > { %v13450_v22 = vpop.f32.mrf.mxu1  ;;  %v22906_v41 = vadd.f32 %v13448_v6, %v13408_v12  ;;  %13702 = vmatpush1.bf16.msra.mxu0 %v19370_v57  ;;  %v19405_v57 = vld [vmem:[%s22203_s17 + $0x1e24] ss:$16 sps:$4 sm:$0xff]   ;;  %v19409_v6 = vld [vmem:[%s22203_s17 + $0x1e00] ss:$16 sps:$4 sm:$0xff]  }
 0x23f   : > { %13743 = vmatpush1.bf16.msra.mxu1 %v19373_v58  ;;  %v13410_v28 = vpop.f32.mrf.mxu0  ;;  %13703 = vmatprep.subr.bf16.mxu0 %v19378_v8  ;;  %v19400_v58 = vld [vmem:[%s22203_s17 + $0x1c20] ss:$16 sps:$4 sm:$0xff]   ;;  %v19408_v62 = vld [vmem:[%s22203_s17 + $0x1c04] ss:$16 sps:$4 sm:$0xff]  }
 0x240   : > { %v13451_v36 = vpop.f32.mrf.mxu1  ;;  %13744 = vmatprep.subr.bf16.mxu1 %v19381_v9  ;;  %v19411_v2 = vld [vmem:[%s22203_s17 + $0x1e04] ss:$16 sps:$4 sm:$0xff]   ;;  %v19412_v12 = vld [vmem:[%s22203_s17 + $0x1de0] ss:$16 sps:$4 sm:$0xff]  }
 0x241   : > { %v19414_v8 = vld [vmem:[%s22203_s17 + $0x1de4] ss:$16 sps:$4 sm:$0xff]   ;;  %v19418_v22 = vld [vmem:[%s22203_s17 + $0x1dc0] ss:$16 sps:$4 sm:$0xff]  }
 0x242   : > { %13704 = vmatpush1.bf16.msra.mxu0 %v19376_v16  ;;  %v19417_v9 = vld [vmem:[%s22203_s17 + $0x1fe4] ss:$16 sps:$4 sm:$0xff]   ;;  %v19415_v16 = vld [vmem:[%s22203_s17 + $0x1fe0] ss:$16 sps:$4 sm:$0xff]  }
 0x243   : > { %13745 = vmatpush1.bf16.msra.mxu1 %v19379_v17  ;;  %13705 = vmatprep.subr.bf16.mxu0 %v19384_v54  ;;  %v19420_v17 = vld [vmem:[%s22203_s17 + $0x1dc4] ss:$16 sps:$4 sm:$0xff]   ;;  %v19421_v28 = vld [vmem:[%s22203_s17 + $0x1fc0] ss:$16 sps:$4 sm:$0xff]  }
 0x244   : > { %13746 = vmatprep.subr.bf16.mxu1 %v19387_v30  ;;  %v19423_v48 = vld [vmem:[%s22203_s17 + $0x1fc4] ss:$16 sps:$4 sm:$0xff]   ;;  %v19424_v30 = vld [vmem:[%s22203_s17 + $0x1da0] ss:$16 sps:$4 sm:$0xff]  }
 0x245   : > { %v19426_v36 = vld [vmem:[%s22203_s17 + $0x1da4] ss:$16 sps:$4 sm:$0xff]  }
 0x246   : > { %13706 = vmatpush1.bf16.msra.mxu0 %v19382_v32  ;;  %v19429_v54 = vld [vmem:[%s22203_s17 + $0x1fa4] ss:$16 sps:$4 sm:$0xff]   ;;  %v19427_v32 = vld [vmem:[%s22203_s17 + $0x1fa0] ss:$16 sps:$4 sm:$0xff]  }
 0x247   : > { %13747 = vmatpush1.bf16.msra.mxu1 %v19385_v35  ;;  %13707 = vmatprep.subr.bf16.mxu0 %v19390_v38  ;;  %v19432_v35 = vld [vmem:[%s22203_s17 + $0x1d84] ss:$16 sps:$4 sm:$0xff]  }
 0x248   : > { %13748 = vmatprep.subr.bf16.mxu1 %v19393_v33  ;;  %v19435_v38 = vld [vmem:[%s22203_s17 + $0x1f84] ss:$16 sps:$4 sm:$0xff]   ;;  %v19430_v33 = vld [vmem:[%s22203_s17 + $0x1d80] ss:$16 sps:$4 sm:$0xff]  }
 0x24a   : > { %13708 = vmatpush1.bf16.msra.mxu0 %v19388_v7  ;;  %v19433_v7 = vld [vmem:[%s22203_s17 + $0x1f80] ss:$16 sps:$4 sm:$0xff]  }
 0x24b   : > { %13749 = vmatpush1.bf16.msra.mxu1 %v19391_v45  ;;  %13709 = vmatprep.subr.bf16.mxu0 %v19396_v47  ;;  %v19438_v45 = vld [vmem:[%s22203_s17 + $0x1d64] ss:$16 sps:$4 sm:$0xff]  }
 0x24c   : > { %13750 = vmatprep.subr.bf16.mxu1 %v19399_v39  ;;  %v19441_v47 = vld [vmem:[%s22203_s17 + $0x1f64] ss:$16 sps:$4 sm:$0xff]   ;;  %v19436_v39 = vld [vmem:[%s22203_s17 + $0x1d60] ss:$16 sps:$4 sm:$0xff]  }
 0x24e   : > { %13710 = vmatpush1.bf16.msra.mxu0 %v19394_v51  ;;  %v19439_v51 = vld [vmem:[%s22203_s17 + $0x1f60] ss:$16 sps:$4 sm:$0xff]  }
 0x24f   : > { %13751 = vmatpush1.bf16.msra.mxu1 %v19397_v37  ;;  %13711 = vmatprep.subr.bf16.mxu0 %v19402_v53  ;;  %v19444_v37 = vld [vmem:[%s22203_s17 + $0x1d44] ss:$16 sps:$4 sm:$0xff]  }
 0x250   : > { %13752 = vmatprep.subr.bf16.mxu1 %v19405_v57  ;;  %v19447_v53 = vld [vmem:[%s22203_s17 + $0x1f44] ss:$16 sps:$4 sm:$0xff]   ;;  %v22951_v57 = vld [vmem:[%s22221_s29 + $0x20] sm:$0xff] }
 0x252   : > { %13712 = vmatpush1.bf16.msra.mxu0 %v19400_v58  ;;  %v19442_v58 = vld [vmem:[%s22203_s17 + $0x1d40] ss:$16 sps:$4 sm:$0xff]  }
 0x253   : > { %13753 = vmatpush1.bf16.msra.mxu1 %v19403_v0  ;;  %13713 = vmatprep.subr.bf16.mxu0 %v19408_v62  ;;  %v19445_v0 = vld [vmem:[%s22203_s17 + $0x1f40] ss:$16 sps:$4 sm:$0xff]   ;;  %v19450_v62 = vld [vmem:[%s22203_s17 + $0x1d24] ss:$16 sps:$4 sm:$0xff]  }
 0x254   : > { %13754 = vmatprep.subr.bf16.mxu1 %v19411_v2  ;;  %v19453_v2 = vld [vmem:[%s22203_s17 + $0x1f24] ss:$16 sps:$4 sm:$0xff]  }
 0x256   : > { %13714 = vmatpush1.bf16.msra.mxu0 %v19406_v3  ;;  %v22959_v3 = vrot.slane %v22951_v57, %v22272_v50 }
 0x257   : > { %13755 = vmatpush1.bf16.msra.mxu1 %v19409_v6  ;;  %13715 = vmatprep.subr.bf16.mxu0 %v19414_v8  ;;  %v19448_v6 = vld [vmem:[%s22203_s17 + $0x1d20] ss:$16 sps:$4 sm:$0xff]  }
 0x258   : > { %13756 = vmatprep.subr.bf16.mxu1 %v19417_v9  ;;  %v19451_v8 = vld [vmem:[%s22203_s17 + $0x1f20] ss:$16 sps:$4 sm:$0xff]   ;;  %v19456_v9 = vld [vmem:[%s22203_s17 + $0x1d04] ss:$16 sps:$4 sm:$0xff]  }
 0x25a   : > { %13716 = vmatpush2.bf16.msra.mxu0 %v19412_v12  ;;  %v19459_v12 = vld [vmem:[%s22203_s17 + $0x1f04] ss:$16 sps:$4 sm:$0xff]  }
 0x25b   : > { %13757 = vmatpush2.bf16.msra.mxu1 %v19415_v16  ;;  %13717 = vmatprep.subr.bf16.mxu0 %v19420_v17  ;;  %v2640_v16 = vcombine.high %v22959_v3, %v22959_v3  ;;  %v22969_v17 = vrot.slane %v22861_v29, %v22272_v50 }
 0x25c   : > { %13758 = vmatprep.subr.bf16.mxu1 %v19423_v48  ;;  %v19454_v48 = vld [vmem:[%s22203_s17 + $0x1d00] ss:$16 sps:$4 sm:$0xff]  }
 0x25d   : > { %v22982_v29 = vcombine.high %v22969_v17, %v22969_v17 }
 0x25e   : > { %13718 = vmatpush2.bf16.msra.mxu0 %v19418_v22  ;;  %v19457_v22 = vld [vmem:[%s22203_s17 + $0x1f00] ss:$16 sps:$4 sm:$0xff]  }
 0x25f   : > { %13759 = vmatpush2.bf16.msra.mxu1 %v19421_v28  ;;  %13719 = vmatprep.subr.bf16.mxu0 %v19426_v36  ;;  %v19463_v28 = vld [vmem:[%s22203_s17 + $0x20e4] ss:$16 sps:$4 sm:$0xff]  }
 0x260   : > { %13760 = vmatprep.subr.bf16.mxu1 %v19429_v54  ;;  %v19466_v36 = vld [vmem:[%s22203_s17 + $0x22e4] ss:$16 sps:$4 sm:$0xff]   ;;  %v19461_v54 = vld [vmem:[%s22203_s17 + $0x20e0] ss:$16 sps:$4 sm:$0xff]  }
 0x262   : > { %13720 = vmatpush2.bf16.msra.mxu0 %v19424_v30  ;;  %v19464_v30 = vld [vmem:[%s22203_s17 + $0x22e0] ss:$16 sps:$4 sm:$0xff]  }
 0x263   : > { %13761 = vmatpush2.bf16.msra.mxu1 %v19427_v32  ;;  %13721 = vmatprep.subr.bf16.mxu0 %v19432_v35  ;;  %v22978_v32 = vrot.slane %v2640_v16, %v22272_v50  ;;  %v19469_v35 = vld [vmem:[%s22203_s17 + $0x20c4] ss:$16 sps:$4 sm:$0xff]  }
 0x264   : > { %13762 = vmatprep.subr.bf16.mxu1 %v19435_v38  ;;  %v19472_v38 = vld [vmem:[%s22203_s17 + $0x22c4] ss:$16 sps:$4 sm:$0xff]  }
 0x266   : > { %13722 = vmatpush2.bf16.msra.mxu0 %v19430_v33  ;;  %v19467_v33 = vld [vmem:[%s22203_s17 + $0x20c0] ss:$16 sps:$4 sm:$0xff]  }
 0x267   : > { %13763 = vmatpush2.bf16.msra.mxu1 %v19433_v7  ;;  %13723 = vmatprep.subr.bf16.mxu0 %v19438_v45  ;;  %v19470_v7 = vld [vmem:[%s22203_s17 + $0x22c0] ss:$16 sps:$4 sm:$0xff]   ;;  %v22990_v45 = vcombine.high %v22978_v32, %v22978_v32 }
 0x268   : > { %13764 = vmatprep.subr.bf16.mxu1 %v19441_v47 }
 0x26a   : > { %13724 = vmatpush2.bf16.msra.mxu0 %v19436_v39 }
 0x26b   : > { %13765 = vmatpush2.bf16.msra.mxu1 %v19439_v51  ;;  %13725 = vmatprep.subr.bf16.mxu0 %v19444_v37 }
 0x26c   : > { %13766 = vmatprep.subr.bf16.mxu1 %v19447_v53 }
 0x26e   : > { %13726 = vmatpush2.bf16.msra.mxu0 %v19442_v58  ;;  %v19475_v58 = vld [vmem:[%s22203_s17 + $0x20a4] ss:$16 sps:$4 sm:$0xff]  }
 0x26f   : > { %13767 = vmatpush2.bf16.msra.mxu1 %v19445_v0  ;;  %13727 = vmatprep.subr.bf16.mxu0 %v19450_v62  ;;  %v19478_v0 = vld [vmem:[%s22203_s17 + $0x22a4] ss:$16 sps:$4 sm:$0xff]  }
 0x270   : > { %13768 = vmatprep.subr.bf16.mxu1 %v19453_v2 }
 0x272   : > { %13728 = vmatpush2.bf16.msra.mxu0 %v19448_v6  ;;  %v19473_v6 = vld [vmem:[%s22203_s17 + $0x20a0] ss:$16 sps:$4 sm:$0xff]  }
 0x273   : > { %13769 = vmatpush2.bf16.msra.mxu1 %v19451_v8  ;;  %13729 = vmatprep.subr.bf16.mxu0 %v19456_v9  ;;  %v19476_v8 = vld [vmem:[%s22203_s17 + $0x22a0] ss:$16 sps:$4 sm:$0xff]  }
 0x274   : > { %13770 = vmatprep.subr.bf16.mxu1 %v19459_v12 }
 0x276   : > { %13730 = vmatpush2.bf16.msra.mxu0 %v19454_v48 }
 0x277   : > { %13771 = vmatpush2.bf16.msra.mxu1 %v19457_v22  ;;  %13781 = vmatprep.subr.bf16.mxu0 %v19463_v28  ;;  %v19484_v22 = vld [vmem:[%s22203_s17 + $0x2284] ss:$16 sps:$4 sm:$0xff]   ;;  %v19479_v28 = vld [vmem:[%s22203_s17 + $0x2080] ss:$16 sps:$4 sm:$0xff]  }
 0x278   : > { %13822 = vmatprep.subr.bf16.mxu1 %v19466_v36  ;;  %v19482_v36 = vld [vmem:[%s22203_s17 + $0x2280] ss:$16 sps:$4 sm:$0xff]  }
 0x279   : > { %v13487_v47 = vpop.f32.mrf.mxu0  ;;  %13732 = vmatmul.mubr.bf16.vlgmr.msra.gmra.mxu0 %v22969_v17 }
 0x27a   : > { %v13528_v39 = vpop.f32.mrf.mxu1  ;;  %13773 = vmatmul.mubr.bf16.vlgmr.msra.gmra.mxu1 %v22982_v29  ;;  %v13488_v51 = vadd.f32 %v13487_v47, %v22899_v11  ;;  %13782 = vmatpush1.bf16.msra.mxu0 %v19461_v54  ;;  %v19487_v54 = vld [vmem:[%s22203_s17 + $0x2064] ss:$16 sps:$4 sm:$0xff]   ;;  %v19491_v47 = vld [vmem:[%s22203_s17 + $0x2040] ss:$16 sps:$4 sm:$0xff]  }
 0x27b   : > { %13823 = vmatpush1.bf16.msra.mxu1 %v19464_v30  ;;  %v13489_v37 = vpop.f32.mrf.mxu0  ;;  %13783 = vmatprep.subr.bf16.mxu0 %v19469_v35  ;;  %v19490_v30 = vld [vmem:[%s22203_s17 + $0x2264] ss:$16 sps:$4 sm:$0xff]   ;;  %v19485_v35 = vld [vmem:[%s22203_s17 + $0x2060] ss:$16 sps:$4 sm:$0xff]  }
 0x27c   : > { %v13530_v53 = vpop.f32.mrf.mxu1  ;;  %13824 = vmatprep.subr.bf16.mxu1 %v19472_v38  ;;  %v22997_v62 = vadd.f32 %v13528_v39, %v13488_v51  ;;  %v13490_v2 = vadd.f32 %v13489_v37, %v22906_v41  ;;  %13813 = vmatprep.mubr.bf16.mxu0 %v22978_v32  ;;  %v19481_v41 = vld [vmem:[%s22203_s17 + $0x2084] ss:$16 sps:$4 sm:$0xff]   ;;  %v19488_v38 = vld [vmem:[%s22203_s17 + $0x2260] ss:$16 sps:$4 sm:$0xff]  }
 0x27d   : > { %13854 = vmatprep.mubr.bf16.mxu1 %v22990_v45  ;;  %v13491_v11 = vpop.f32.mrf.mxu0  ;;  %v19494_v39 = vld [vmem:[%s22203_s17 + $0x2240] ss:$16 sps:$4 sm:$0xff]   ;;  %v19499_v51 = vld [vmem:[%s22203_s17 + $0x2024] ss:$16 sps:$4 sm:$0xff]  }
 0x27e   : > { %v13532_v9 = vpop.f32.mrf.mxu1  ;;  %v23004_v12 = vadd.f32 %v13530_v53, %v13490_v2  ;;  %13784 = vmatpush1.bf16.msra.mxu0 %v19467_v33  ;;  %v19493_v33 = vld [vmem:[%s22203_s17 + $0x2044] ss:$16 sps:$4 sm:$0xff]   ;;  %v19497_v53 = vld [vmem:[%s22203_s17 + $0x2020] ss:$16 sps:$4 sm:$0xff]  }
 0x27f   : > { %13825 = vmatpush1.bf16.msra.mxu1 %v19470_v7  ;;  %v13492_v16 = vpop.f32.mrf.mxu0  ;;  %13785 = vmatprep.subr.bf16.mxu0 %v19475_v58  ;;  %v19496_v7 = vld [vmem:[%s22203_s17 + $0x2244] ss:$16 sps:$4 sm:$0xff]   ;;  %v19500_v58 = vld [vmem:[%s22203_s17 + $0x2220] ss:$16 sps:$4 sm:$0xff]  }
 0x280   : > { %v13533_v48 = vpop.f32.mrf.mxu1  ;;  %13826 = vmatprep.subr.bf16.mxu1 %v19478_v0  ;;  %v19502_v37 = vld [vmem:[%s22203_s17 + $0x2224] ss:$16 sps:$4 sm:$0xff]   ;;  %v19509_v16 = vld [vmem:[%s22203_s17 + $0x21e0] ss:$16 sps:$4 sm:$0xff]  }
 0x281   : > { %v19505_v0 = vld [vmem:[%s22203_s17 + $0x2004] ss:$16 sps:$4 sm:$0xff]   ;;  %v19512_v48 = vld [vmem:[%s22203_s17 + $0x23e0] ss:$16 sps:$4 sm:$0xff]  }
 0x282   : > { %13786 = vmatpush1.bf16.msra.mxu0 %v19473_v6  ;;  %v19508_v2 = vld [vmem:[%s22203_s17 + $0x2204] ss:$16 sps:$4 sm:$0xff]   ;;  %v19503_v6 = vld [vmem:[%s22203_s17 + $0x2000] ss:$16 sps:$4 sm:$0xff]  }
 0x283   : > { %13827 = vmatpush1.bf16.msra.mxu1 %v19476_v8  ;;  %13787 = vmatprep.subr.bf16.mxu0 %v19481_v41  ;;  %v19506_v8 = vld [vmem:[%s22203_s17 + $0x2200] ss:$16 sps:$4 sm:$0xff]   ;;  %v19511_v11 = vld [vmem:[%s22203_s17 + $0x21e4] ss:$16 sps:$4 sm:$0xff]  }
 0x284   : > { %13828 = vmatprep.subr.bf16.mxu1 %v19484_v22  ;;  %v19514_v9 = vld [vmem:[%s22203_s17 + $0x23e4] ss:$16 sps:$4 sm:$0xff]  }
 0x285   : > { %v19517_v41 = vld [vmem:[%s22203_s17 + $0x21c4] ss:$16 sps:$4 sm:$0xff]  }
 0x286   : > { %13788 = vmatpush1.bf16.msra.mxu0 %v19479_v28  ;;  %v19520_v22 = vld [vmem:[%s22203_s17 + $0x23c4] ss:$16 sps:$4 sm:$0xff]   ;;  %v19515_v28 = vld [vmem:[%s22203_s17 + $0x21c0] ss:$16 sps:$4 sm:$0xff]  }
 0x287   : > { %13829 = vmatpush1.bf16.msra.mxu1 %v19482_v36  ;;  %13789 = vmatprep.subr.bf16.mxu0 %v19487_v54  ;;  %v19518_v36 = vld [vmem:[%s22203_s17 + $0x23c0] ss:$16 sps:$4 sm:$0xff]   ;;  %v19523_v54 = vld [vmem:[%s22203_s17 + $0x21a4] ss:$16 sps:$4 sm:$0xff]  }
 0x288   : > { %13830 = vmatprep.subr.bf16.mxu1 %v19490_v30  ;;  %v19526_v30 = vld [vmem:[%s22203_s17 + $0x23a4] ss:$16 sps:$4 sm:$0xff]  }
 0x28a   : > { %13790 = vmatpush1.bf16.msra.mxu0 %v19485_v35  ;;  %v19521_v35 = vld [vmem:[%s22203_s17 + $0x21a0] ss:$16 sps:$4 sm:$0xff]  }
 0x28b   : > { %13831 = vmatpush1.bf16.msra.mxu1 %v19488_v38  ;;  %13791 = vmatprep.subr.bf16.mxu0 %v19493_v33  ;;  %v19524_v38 = vld [vmem:[%s22203_s17 + $0x23a0] ss:$16 sps:$4 sm:$0xff]   ;;  %v19529_v33 = vld [vmem:[%s22203_s17 + $0x2184] ss:$16 sps:$4 sm:$0xff]  }
 0x28c   : > { %13832 = vmatprep.subr.bf16.mxu1 %v19496_v7  ;;  %v19532_v7 = vld [vmem:[%s22203_s17 + $0x2384] ss:$16 sps:$4 sm:$0xff]  }
 0x28e   : > { %13792 = vmatpush1.bf16.msra.mxu0 %v19491_v47  ;;  %v19527_v47 = vld [vmem:[%s22203_s17 + $0x2180] ss:$16 sps:$4 sm:$0xff]  }
 0x28f   : > { %13833 = vmatpush1.bf16.msra.mxu1 %v19494_v39  ;;  %13793 = vmatprep.subr.bf16.mxu0 %v19499_v51  ;;  %v19530_v39 = vld [vmem:[%s22203_s17 + $0x2380] ss:$16 sps:$4 sm:$0xff]   ;;  %v19535_v51 = vld [vmem:[%s22203_s17 + $0x2164] ss:$16 sps:$4 sm:$0xff]  }
 0x290   : > { %13834 = vmatprep.subr.bf16.mxu1 %v19502_v37  ;;  %v19538_v37 = vld [vmem:[%s22203_s17 + $0x2364] ss:$16 sps:$4 sm:$0xff]  }
 0x292   : > { %13794 = vmatpush1.bf16.msra.mxu0 %v19497_v53  ;;  %v19533_v53 = vld [vmem:[%s22203_s17 + $0x2160] ss:$16 sps:$4 sm:$0xff]  }
 0x293   : > { %13835 = vmatpush1.bf16.msra.mxu1 %v19500_v58  ;;  %13795 = vmatprep.subr.bf16.mxu0 %v19505_v0  ;;  %v19536_v58 = vld [vmem:[%s22203_s17 + $0x2360] ss:$16 sps:$4 sm:$0xff]   ;;  %v19541_v0 = vld [vmem:[%s22203_s17 + $0x2144] ss:$16 sps:$4 sm:$0xff]  }
 0x294   : > { %13836 = vmatprep.subr.bf16.mxu1 %v19508_v2  ;;  %v19544_v2 = vld [vmem:[%s22203_s17 + $0x2344] ss:$16 sps:$4 sm:$0xff]  }
 0x296   : > { %13796 = vmatpush1.bf16.msra.mxu0 %v19503_v6  ;;  %v2625_v6 = vcombine.high %v22951_v57, %v22951_v57  ;;  %v19545_v57 = vld [vmem:[%s22203_s17 + $0x2120] ss:$16 sps:$4 sm:$0xff]  }
 0x297   : > { %13837 = vmatpush1.bf16.msra.mxu1 %v19506_v8  ;;  %13797 = vmatprep.subr.bf16.mxu0 %v19511_v11  ;;  %v19539_v8 = vld [vmem:[%s22203_s17 + $0x2140] ss:$16 sps:$4 sm:$0xff]  }
 0x298   : > { %13838 = vmatprep.subr.bf16.mxu1 %v19514_v9  ;;  %v19542_v11 = vld [vmem:[%s22203_s17 + $0x2340] ss:$16 sps:$4 sm:$0xff]   ;;  %v19547_v9 = vld [vmem:[%s22203_s17 + $0x2124] ss:$16 sps:$4 sm:$0xff]  }
 0x29a   : > { %13798 = vmatpush2.bf16.msra.mxu0 %v19509_v16  ;;  %v19550_v16 = vld [vmem:[%s22203_s17 + $0x2324] ss:$16 sps:$4 sm:$0xff]  }
 0x29b   : > { %13839 = vmatpush2.bf16.msra.mxu1 %v19512_v48  ;;  %13799 = vmatprep.subr.bf16.mxu0 %v19517_v41  ;;  %v23055_v48 = vrot.slane %v2625_v6, %v22272_v50  ;;  %v19548_v41 = vld [vmem:[%s22203_s17 + $0x2320] ss:$16 sps:$4 sm:$0xff]  }
 0x29c   : > { %13840 = vmatprep.subr.bf16.mxu1 %v19520_v22  ;;  %v19553_v22 = vld [vmem:[%s22203_s17 + $0x2104] ss:$16 sps:$4 sm:$0xff]  }
 0x29e   : > { %13800 = vmatpush2.bf16.msra.mxu0 %v19515_v28  ;;  %v19556_v28 = vld [vmem:[%s22203_s17 + $0x2304] ss:$16 sps:$4 sm:$0xff]  }
 0x29f   : > { %13841 = vmatpush2.bf16.msra.mxu1 %v19518_v36  ;;  %13801 = vmatprep.subr.bf16.mxu0 %v19523_v54  ;;  %v2641_v36 = vcombine.high %v23055_v48, %v23055_v48  ;;  %v23065_v54 = vrot.slane %v22959_v3, %v22272_v50 }
 0x2a0   : > { %13842 = vmatprep.subr.bf16.mxu1 %v19526_v30  ;;  %v19551_v30 = vld [vmem:[%s22203_s17 + $0x2100] ss:$16 sps:$4 sm:$0xff]  }
 0x2a1   : > { %v23078_v3 = vcombine.high %v23065_v54, %v23065_v54 }
 0x2a2   : > { %13802 = vmatpush2.bf16.msra.mxu0 %v19521_v35  ;;  %v19554_v35 = vld [vmem:[%s22203_s17 + $0x2300] ss:$16 sps:$4 sm:$0xff]  }
 0x2a3   : > { %13843 = vmatpush2.bf16.msra.mxu1 %v19524_v38  ;;  %13803 = vmatprep.subr.bf16.mxu0 %v19529_v33  ;;  %v19559_v38 = vld [vmem:[%s22203_s17 + $0x24e4] ss:$16 sps:$4 sm:$0xff]  }
 0x2a4   : > { %13844 = vmatprep.subr.bf16.mxu1 %v19532_v7  ;;  %v19562_v33 = vld [vmem:[%s22203_s17 + $0x26e4] ss:$16 sps:$4 sm:$0xff]   ;;  %v19557_v7 = vld [vmem:[%s22203_s17 + $0x24e0] ss:$16 sps:$4 sm:$0xff]  }
 0x2a6   : > { %13804 = vmatpush2.bf16.msra.mxu0 %v19527_v47  ;;  %v19560_v47 = vld [vmem:[%s22203_s17 + $0x26e0] ss:$16 sps:$4 sm:$0xff]  }
 0x2a7   : > { %13845 = vmatpush2.bf16.msra.mxu1 %v19530_v39  ;;  %13805 = vmatprep.subr.bf16.mxu0 %v19535_v51  ;;  %v23074_v39 = vrot.slane %v2641_v36, %v22272_v50  ;;  %v19565_v51 = vld [vmem:[%s22203_s17 + $0x24c4] ss:$16 sps:$4 sm:$0xff]   ;;  %v19572_v36 = vld [vmem:[%s22203_s17 + $0x26a0] ss:$16 sps:$4 sm:$0xff]  }
 0x2a8   : > { %13846 = vmatprep.subr.bf16.mxu1 %v19538_v37  ;;  %v19568_v37 = vld [vmem:[%s22203_s17 + $0x26c4] ss:$16 sps:$4 sm:$0xff]  }
 0x2aa   : > { %13806 = vmatpush2.bf16.msra.mxu0 %v19533_v53  ;;  %v19563_v53 = vld [vmem:[%s22203_s17 + $0x24c0] ss:$16 sps:$4 sm:$0xff]  }
 0x2ab   : > { %13847 = vmatpush2.bf16.msra.mxu1 %v19536_v58  ;;  %13807 = vmatprep.subr.bf16.mxu0 %v19541_v0  ;;  %v19566_v58 = vld [vmem:[%s22203_s17 + $0x26c0] ss:$16 sps:$4 sm:$0xff]   ;;  %v23086_v0 = vcombine.high %v23074_v39, %v23074_v39 }
 0x2ac   : > { %13848 = vmatprep.subr.bf16.mxu1 %v19544_v2 }
 0x2ae   : > { %13808 = vmatpush2.bf16.msra.mxu0 %v19539_v8 }
 0x2af   : > { %13849 = vmatpush2.bf16.msra.mxu1 %v19542_v11  ;;  %13809 = vmatprep.subr.bf16.mxu0 %v19547_v9 }
 0x2b0   : > { %13850 = vmatprep.subr.bf16.mxu1 %v19550_v16  ;;  %v19571_v16 = vld [vmem:[%s22203_s17 + $0x24a4] ss:$16 sps:$4 sm:$0xff]  }
 0x2b2   : > { %13810 = vmatpush2.bf16.msra.mxu0 %v19545_v57  ;;  %v19574_v57 = vld [vmem:[%s22203_s17 + $0x26a4] ss:$16 sps:$4 sm:$0xff]  }
 0x2b3   : > { %13851 = vmatpush2.bf16.msra.mxu1 %v19548_v41  ;;  %13811 = vmatprep.subr.bf16.mxu0 %v19553_v22 }
 0x2b4   : > { %13852 = vmatprep.subr.bf16.mxu1 %v19556_v28  ;;  %v19569_v28 = vld [vmem:[%s22203_s17 + $0x24a0] ss:$16 sps:$4 sm:$0xff]  }
 0x2b6   : > { %13812 = vmatpush2.bf16.msra.mxu0 %v19551_v30 }
 0x2b7   : > { %13853 = vmatpush2.bf16.msra.mxu1 %v19554_v35  ;;  %13863 = vmatprep.subr.bf16.mxu0 %v19559_v38 }
 0x2b8   : > { %13904 = vmatprep.subr.bf16.mxu1 %v19562_v33 }
 0x2b9   : > { %v13569_v2 = vpop.f32.mrf.mxu0  ;;  %13814 = vmatmul.mubr.bf16.vlgmr.msra.gmra.mxu0 %v23065_v54 }
 0x2ba   : > { %v13610_v6 = vpop.f32.mrf.mxu1  ;;  %13855 = vmatmul.mubr.bf16.vlgmr.msra.gmra.mxu1 %v23078_v3  ;;  %v13570_v8 = vadd.f32 %v13569_v2, %v22997_v62  ;;  %13864 = vmatpush1.bf16.msra.mxu0 %v19557_v7  ;;  %v19580_v7 = vld [vmem:[%s22203_s17 + $0x2684] ss:$16 sps:$4 sm:$0xff]   ;;  %v19584_v2 = vld [vmem:[%s22203_s17 + $0x2660] ss:$16 sps:$4 sm:$0xff]  }
 0x2bb   : > { %13905 = vmatpush1.bf16.msra.mxu1 %v19560_v47  ;;  %v13571_v11 = vpop.f32.mrf.mxu0  ;;  %13865 = vmatprep.subr.bf16.mxu0 %v19565_v51  ;;  %v19575_v47 = vld [vmem:[%s22203_s17 + $0x2480] ss:$16 sps:$4 sm:$0xff]  }
 0x2bc   : > { %v13612_v9 = vpop.f32.mrf.mxu1  ;;  %13906 = vmatprep.subr.bf16.mxu1 %v19568_v37  ;;  %v23093_v41 = vadd.f32 %v13610_v6, %v13570_v8  ;;  %v13572_v22 = vadd.f32 %v13571_v11, %v23004_v12  ;;  %13895 = vmatprep.mubr.bf16.mxu0 %v23074_v39  ;;  %v19577_v12 = vld [vmem:[%s22203_s17 + $0x2484] ss:$16 sps:$4 sm:$0xff]   ;;  %v19578_v51 = vld [vmem:[%s22203_s17 + $0x2680] ss:$16 sps:$4 sm:$0xff]  }
 0x2bd   : > { %13936 = vmatprep.mubr.bf16.mxu1 %v23086_v0  ;;  %v13573_v62 = vpop.f32.mrf.mxu0  ;;  %v19583_v37 = vld [vmem:[%s22203_s17 + $0x2464] ss:$16 sps:$4 sm:$0xff]   ;;  %v19587_v11 = vld [vmem:[%s22203_s17 + $0x2440] ss:$16 sps:$4 sm:$0xff]  }
 0x2be   : > { %v13614_v30 = vpop.f32.mrf.mxu1  ;;  %v23100_v35 = vadd.f32 %v13612_v9, %v13572_v22  ;;  %13866 = vmatpush1.bf16.msra.mxu0 %v19563_v53  ;;  %v19586_v53 = vld [vmem:[%s22203_s17 + $0x2664] ss:$16 sps:$4 sm:$0xff]   ;;  %v19590_v9 = vld [vmem:[%s22203_s17 + $0x2640] ss:$16 sps:$4 sm:$0xff]  }
 0x2bf   : > { %13907 = vmatpush1.bf16.msra.mxu1 %v19566_v58  ;;  %v13574_v38 = vpop.f32.mrf.mxu0  ;;  %13867 = vmatprep.subr.bf16.mxu0 %v19571_v16  ;;  %v19581_v58 = vld [vmem:[%s22203_s17 + $0x2460] ss:$16 sps:$4 sm:$0xff]   ;;  %v19589_v6 = vld [vmem:[%s22203_s17 + $0x2444] ss:$16 sps:$4 sm:$0xff]  }
 0x2c0   : > { %v13615_v33 = vpop.f32.mrf.mxu1  ;;  %13908 = vmatprep.subr.bf16.mxu1 %v19574_v57  ;;  %v19592_v8 = vld [vmem:[%s22203_s17 + $0x2644] ss:$16 sps:$4 sm:$0xff]   ;;  %v19593_v22 = vld [vmem:[%s22203_s17 + $0x2420] ss:$16 sps:$4 sm:$0xff]  }
 0x2c1   : > { %v19595_v16 = vld [vmem:[%s22203_s17 + $0x2424] ss:$16 sps:$4 sm:$0xff]   ;;  %v19599_v30 = vld [vmem:[%s22203_s17 + $0x2400] ss:$16 sps:$4 sm:$0xff]  }
 0x2c2   : > { %13868 = vmatpush1.bf16.msra.mxu0 %v19569_v28  ;;  %v19598_v57 = vld [vmem:[%s22203_s17 + $0x2624] ss:$16 sps:$4 sm:$0xff]   ;;  %v19596_v28 = vld [vmem:[%s22203_s17 + $0x2620] ss:$16 sps:$4 sm:$0xff]  }
 0x2c3   : > { %13909 = vmatpush1.bf16.msra.mxu1 %v19572_v36  ;;  %13869 = vmatprep.subr.bf16.mxu0 %v19577_v12  ;;  %v19601_v36 = vld [vmem:[%s22203_s17 + $0x2404] ss:$16 sps:$4 sm:$0xff]   ;;  %v19602_v38 = vld [vmem:[%s22203_s17 + $0x2600] ss:$16 sps:$4 sm:$0xff]  }
 0x2c4   : > { %13910 = vmatprep.subr.bf16.mxu1 %v19580_v7  ;;  %v19604_v62 = vld [vmem:[%s22203_s17 + $0x2604] ss:$16 sps:$4 sm:$0xff]   ;;  %v19605_v7 = vld [vmem:[%s22203_s17 + $0x25e0] ss:$16 sps:$4 sm:$0xff]  }
 0x2c5   : > { %v19607_v33 = vld [vmem:[%s22203_s17 + $0x25e4] ss:$16 sps:$4 sm:$0xff]  }
 0x2c6   : > { %13870 = vmatpush1.bf16.msra.mxu0 %v19575_v47  ;;  %v19610_v12 = vld [vmem:[%s22203_s17 + $0x27e4] ss:$16 sps:$4 sm:$0xff]   ;;  %v19608_v47 = vld [vmem:[%s22203_s17 + $0x27e0] ss:$16 sps:$4 sm:$0xff]  }
 0x2c7   : > { %13911 = vmatpush1.bf16.msra.mxu1 %v19578_v51  ;;  %13871 = vmatprep.subr.bf16.mxu0 %v19583_v37  ;;  %v19613_v51 = vld [vmem:[%s22203_s17 + $0x25c4] ss:$16 sps:$4 sm:$0xff]  }
 0x2c8   : > { %13912 = vmatprep.subr.bf16.mxu1 %v19586_v53  ;;  %v19616_v37 = vld [vmem:[%s22203_s17 + $0x27c4] ss:$16 sps:$4 sm:$0xff]   ;;  %v19611_v53 = vld [vmem:[%s22203_s17 + $0x25c0] ss:$16 sps:$4 sm:$0xff]  }
 0x2ca   : > { %13872 = vmatpush1.bf16.msra.mxu0 %v19581_v58  ;;  %v19614_v58 = vld [vmem:[%s22203_s17 + $0x27c0] ss:$16 sps:$4 sm:$0xff]  }
 0x2cb   : > { %13913 = vmatpush1.bf16.msra.mxu1 %v19584_v2  ;;  %13873 = vmatprep.subr.bf16.mxu0 %v19589_v6  ;;  %v19619_v2 = vld [vmem:[%s22203_s17 + $0x25a4] ss:$16 sps:$4 sm:$0xff]  }
 0x2cc   : > { %13914 = vmatprep.subr.bf16.mxu1 %v19592_v8  ;;  %v19622_v6 = vld [vmem:[%s22203_s17 + $0x27a4] ss:$16 sps:$4 sm:$0xff]   ;;  %v19617_v8 = vld [vmem:[%s22203_s17 + $0x25a0] ss:$16 sps:$4 sm:$0xff]  }
 0x2ce   : > { %13874 = vmatpush1.bf16.msra.mxu0 %v19587_v11  ;;  %v19620_v11 = vld [vmem:[%s22203_s17 + $0x27a0] ss:$16 sps:$4 sm:$0xff]  }
 0x2cf   : > { %13915 = vmatpush1.bf16.msra.mxu1 %v19590_v9  ;;  %13875 = vmatprep.subr.bf16.mxu0 %v19595_v16  ;;  %v19625_v9 = vld [vmem:[%s22203_s17 + $0x2584] ss:$16 sps:$4 sm:$0xff]  }
 0x2d0   : > { %13916 = vmatprep.subr.bf16.mxu1 %v19598_v57  ;;  %v19628_v16 = vld [vmem:[%s22203_s17 + $0x2784] ss:$16 sps:$4 sm:$0xff]   ;;  %v19623_v57 = vld [vmem:[%s22203_s17 + $0x2580] ss:$16 sps:$4 sm:$0xff]  }
 0x2d2   : > { %13876 = vmatpush1.bf16.msra.mxu0 %v19593_v22  ;;  %v19626_v22 = vld [vmem:[%s22203_s17 + $0x2780] ss:$16 sps:$4 sm:$0xff]  }
 0x2d3   : > { %13917 = vmatpush1.bf16.msra.mxu1 %v19596_v28  ;;  %13877 = vmatprep.subr.bf16.mxu0 %v19601_v36  ;;  %v19631_v28 = vld [vmem:[%s22203_s17 + $0x2564] ss:$16 sps:$4 sm:$0xff]  }
 0x2d4   : > { %13918 = vmatprep.subr.bf16.mxu1 %v19604_v62  ;;  %v19634_v36 = vld [vmem:[%s22203_s17 + $0x2764] ss:$16 sps:$4 sm:$0xff]   ;;  %v19629_v62 = vld [vmem:[%s22203_s17 + $0x2560] ss:$16 sps:$4 sm:$0xff]  }
 0x2d6   : > { %13878 = vmatpush1.bf16.msra.mxu0 %v19599_v30  ;;  %v19632_v30 = vld [vmem:[%s22203_s17 + $0x2760] ss:$16 sps:$4 sm:$0xff]  }
 0x2d7   : > { %13919 = vmatpush1.bf16.msra.mxu1 %v19602_v38  ;;  %13879 = vmatprep.subr.bf16.mxu0 %v19607_v33  ;;  %v19637_v38 = vld [vmem:[%s22203_s17 + $0x2544] ss:$16 sps:$4 sm:$0xff]  }
 0x2d8   : > { %13920 = vmatprep.subr.bf16.mxu1 %v19610_v12  ;;  %v19640_v33 = vld [vmem:[%s22203_s17 + $0x2744] ss:$16 sps:$4 sm:$0xff]  }
 0x2d9   : > { %v23145_v12 = vld [vmem:[%s22221_s29 + $0x28] sm:$0xff] }
 0x2da   : > { %13880 = vmatpush2.bf16.msra.mxu0 %v19605_v7  ;;  %v19635_v7 = vld [vmem:[%s22203_s17 + $0x2540] ss:$16 sps:$4 sm:$0xff]  }
 0x2db   : > { %13921 = vmatpush2.bf16.msra.mxu1 %v19608_v47  ;;  %13881 = vmatprep.subr.bf16.mxu0 %v19613_v51  ;;  %v19638_v47 = vld [vmem:[%s22203_s17 + $0x2740] ss:$16 sps:$4 sm:$0xff]   ;;  %v19643_v51 = vld [vmem:[%s22203_s17 + $0x2524] ss:$16 sps:$4 sm:$0xff]  }
 0x2dc   : > { %13922 = vmatprep.subr.bf16.mxu1 %v19616_v37  ;;  %v19646_v37 = vld [vmem:[%s22203_s17 + $0x2724] ss:$16 sps:$4 sm:$0xff]  }
 0x2de   : > { %13882 = vmatpush2.bf16.msra.mxu0 %v19611_v53  ;;  %v23153_v53 = vrot.slane %v23145_v12, %v22272_v50 }
 0x2df   : > { %13923 = vmatpush2.bf16.msra.mxu1 %v19614_v58  ;;  %13883 = vmatprep.subr.bf16.mxu0 %v19619_v2  ;;  %v19641_v58 = vld [vmem:[%s22203_s17 + $0x2520] ss:$16 sps:$4 sm:$0xff]  }
 0x2e0   : > { %13924 = vmatprep.subr.bf16.mxu1 %v19622_v6  ;;  %v19644_v2 = vld [vmem:[%s22203_s17 + $0x2720] ss:$16 sps:$4 sm:$0xff]   ;;  %v19649_v6 = vld [vmem:[%s22203_s17 + $0x2504] ss:$16 sps:$4 sm:$0xff]  }
 0x2e2   : > { %13884 = vmatpush2.bf16.msra.mxu0 %v19617_v8  ;;  %v19652_v8 = vld [vmem:[%s22203_s17 + $0x2704] ss:$16 sps:$4 sm:$0xff]  }
 0x2e3   : > { %13925 = vmatpush2.bf16.msra.mxu1 %v19620_v11  ;;  %13885 = vmatprep.subr.bf16.mxu0 %v19625_v9  ;;  %v2689_v11 = vcombine.high %v23153_v53, %v23153_v53  ;;  %v23163_v9 = vrot.slane %v23055_v48, %v22272_v50 }
 0x2e4   : > { %13926 = vmatprep.subr.bf16.mxu1 %v19628_v16  ;;  %v19647_v16 = vld [vmem:[%s22203_s17 + $0x2500] ss:$16 sps:$4 sm:$0xff]  }
 0x2e5   : > { %v23176_v48 = vcombine.high %v23163_v9, %v23163_v9 }
 0x2e6   : > { %13886 = vmatpush2.bf16.msra.mxu0 %v19623_v57  ;;  %v19650_v57 = vld [vmem:[%s22203_s17 + $0x2700] ss:$16 sps:$4 sm:$0xff]  }
 0x2e7   : > { %13927 = vmatpush2.bf16.msra.mxu1 %v19626_v22  ;;  %13887 = vmatprep.subr.bf16.mxu0 %v19631_v28  ;;  %v19656_v22 = vld [vmem:[%s22203_s17 + $0x28e4] ss:$16 sps:$4 sm:$0xff]   ;;  %25043 = vst [vmem:[#allocation19_spill] sm:$0xff] %v23176_v48 }
 0x2e8   : > { %13928 = vmatprep.subr.bf16.mxu1 %v19634_v36  ;;  %v19659_v28 = vld [vmem:[%s22203_s17 + $0x2ae4] ss:$16 sps:$4 sm:$0xff]   ;;  %v19654_v36 = vld [vmem:[%s22203_s17 + $0x28e0] ss:$16 sps:$4 sm:$0xff]  }
 0x2ea   : > { %13888 = vmatpush2.bf16.msra.mxu0 %v19629_v62  ;;  %v19657_v62 = vld [vmem:[%s22203_s17 + $0x2ae0] ss:$16 sps:$4 sm:$0xff]  }
 0x2eb   : > { %13929 = vmatpush2.bf16.msra.mxu1 %v19632_v30  ;;  %13889 = vmatprep.subr.bf16.mxu0 %v19637_v38  ;;  %v23172_v30 = vrot.slane %v2689_v11, %v22272_v50  ;;  %v19662_v38 = vld [vmem:[%s22203_s17 + $0x28c4] ss:$16 sps:$4 sm:$0xff]  }
 0x2ec   : > { %13930 = vmatprep.subr.bf16.mxu1 %v19640_v33  ;;  %v19665_v33 = vld [vmem:[%s22203_s17 + $0x2ac4] ss:$16 sps:$4 sm:$0xff]  }
 0x2ed   : > { %25042 = vst [vmem:[#allocation18_spill] sm:$0xff] %v23172_v30  ;;  %v19668_v11 = vld [vmem:[%s22203_s17 + $0x28a4] ss:$16 sps:$4 sm:$0xff]  }
 0x2ee   : > { %13890 = vmatpush2.bf16.msra.mxu0 %v19635_v7  ;;  %v19660_v7 = vld [vmem:[%s22203_s17 + $0x28c0] ss:$16 sps:$4 sm:$0xff]  }
 0x2ef   : > { %13931 = vmatpush2.bf16.msra.mxu1 %v19638_v47  ;;  %13891 = vmatprep.subr.bf16.mxu0 %v19643_v51  ;;  %v19663_v47 = vld [vmem:[%s22203_s17 + $0x2ac0] ss:$16 sps:$4 sm:$0xff]   ;;  %v23184_v51 = vcombine.high %v23172_v30, %v23172_v30 }
 0x2f0   : > { %13932 = vmatprep.subr.bf16.mxu1 %v19646_v37 }
 0x2f1   : > { %25044 = vst [vmem:[#allocation20_spill] sm:$0xff] %v23184_v51 }
 0x2f2   : > { %13892 = vmatpush2.bf16.msra.mxu0 %v19641_v58 }
 0x2f3   : > { %13933 = vmatpush2.bf16.msra.mxu1 %v19644_v2  ;;  %13893 = vmatprep.subr.bf16.mxu0 %v19649_v6 }
 0x2f4   : > { %13934 = vmatprep.subr.bf16.mxu1 %v19652_v8 }
 0x2f6   : > { %13894 = vmatpush2.bf16.msra.mxu0 %v19647_v16  ;;  %v19671_v16 = vld [vmem:[%s22203_s17 + $0x2aa4] ss:$16 sps:$4 sm:$0xff]  }
 0x2f7   : > { %13935 = vmatpush2.bf16.msra.mxu1 %v19650_v57  ;;  %13945 = vmatprep.subr.bf16.mxu0 %v19656_v22 }
 0x2f8   : > { %13986 = vmatprep.subr.bf16.mxu1 %v19659_v28  ;;  %v19666_v28 = vld [vmem:[%s22203_s17 + $0x28a0] ss:$16 sps:$4 sm:$0xff]  }
 0x2f9   : > { %v13651_v37 = vpop.f32.mrf.mxu0  ;;  %13896 = vmatmul.mubr.bf16.vlgmr.msra.gmra.mxu0 %v23163_v9 }
 0x2fa   : > { %v13692_v58 = vpop.f32.mrf.mxu1  ;;  %13937 = vmatmul.mubr.bf16.vlgmr.msra.gmra.mxu1 %v23176_v48  ;;  %v13652_v2 = vadd.f32 %v13651_v37, %v23093_v41  ;;  %13946 = vmatpush1.bf16.msra.mxu0 %v19654_v36  ;;  %v19677_v37 = vld [vmem:[%s22203_s17 + $0x2a84] ss:$16 sps:$4 sm:$0xff]   ;;  %v19859_v48 = vld [vmem:[%s22203_s17 + $0x30a0] ss:$16 sps:$4 sm:$0xff]  }
 0x2fb   : > { %13987 = vmatpush1.bf16.msra.mxu1 %v19657_v62  ;;  %v13653_v6 = vpop.f32.mrf.mxu0  ;;  %13947 = vmatprep.subr.bf16.mxu0 %v19662_v38 }
 0x2fc   : > { %v13694_v8 = vpop.f32.mrf.mxu1  ;;  %13988 = vmatprep.subr.bf16.mxu1 %v19665_v33  ;;  %v23191_v57 = vadd.f32 %v13692_v58, %v13652_v2  ;;  %v13654_v22 = vadd.f32 %v13653_v6, %v23100_v35  ;;  %13977 = vmatprep.mubr.bf16.mxu0 %v23172_v30  ;;  %v19674_v35 = vld [vmem:[%s22203_s17 + $0x2884] ss:$16 sps:$4 sm:$0xff]   ;;  %v19672_v58 = vld [vmem:[%s22203_s17 + $0x2880] ss:$16 sps:$4 sm:$0xff]  }
 0x2fd   : > { %14018 = vmatprep.mubr.bf16.mxu1 %v23184_v51  ;;  %v13655_v41 = vpop.f32.mrf.mxu0  ;;  %v19675_v2 = vld [vmem:[%s22203_s17 + $0x2a80] ss:$16 sps:$4 sm:$0xff]  }
 0x2fe   : > { %v13696_v36 = vpop.f32.mrf.mxu1  ;;  %v23198_v62 = vadd.f32 %v13694_v8, %v13654_v22  ;;  %13948 = vmatpush1.bf16.msra.mxu0 %v19660_v7  ;;  %v19680_v7 = vld [vmem:[%s22203_s17 + $0x2864] ss:$16 sps:$4 sm:$0xff]   ;;  %v19678_v6 = vld [vmem:[%s22203_s17 + $0x2860] ss:$16 sps:$4 sm:$0xff]  }
 0x2ff   : > { %13989 = vmatpush1.bf16.msra.mxu1 %v19663_v47  ;;  %v13656_v38 = vpop.f32.mrf.mxu0  ;;  %13949 = vmatprep.subr.bf16.mxu0 %v19668_v11  ;;  %v19683_v47 = vld [vmem:[%s22203_s17 + $0x2a64] ss:$16 sps:$4 sm:$0xff]   ;;  %v19681_v8 = vld [vmem:[%s22203_s17 + $0x2a60] ss:$16 sps:$4 sm:$0xff]  }
 0x300   : > { %v13697_v33 = vpop.f32.mrf.mxu1  ;;  %13990 = vmatprep.subr.bf16.mxu1 %v19671_v16  ;;  %v19686_v11 = vld [vmem:[%s22203_s17 + $0x2844] ss:$16 sps:$4 sm:$0xff]   ;;  %v19684_v16 = vld [vmem:[%s22203_s17 + $0x2840] ss:$16 sps:$4 sm:$0xff]  }
 0x301   : > { %v19687_v22 = vld [vmem:[%s22203_s17 + $0x2a40] ss:$16 sps:$4 sm:$0xff]   ;;  %v19695_v41 = vld [vmem:[%s22203_s17 + $0x2a24] ss:$16 sps:$4 sm:$0xff]  }
 0x302   : > { %13950 = vmatpush1.bf16.msra.mxu0 %v19666_v28  ;;  %v19692_v28 = vld [vmem:[%s22203_s17 + $0x2824] ss:$16 sps:$4 sm:$0xff]   ;;  %v19690_v36 = vld [vmem:[%s22203_s17 + $0x2820] ss:$16 sps:$4 sm:$0xff]  }
 0x303   : > { %13991 = vmatpush1.bf16.msra.mxu1 %v19669_v44  ;;  %13951 = vmatprep.subr.bf16.mxu0 %v19674_v35  ;;  %v19689_v44 = vld [vmem:[%s22203_s17 + $0x2a44] ss:$16 sps:$4 sm:$0xff]   ;;  %v19693_v38 = vld [vmem:[%s22203_s17 + $0x2a20] ss:$16 sps:$4 sm:$0xff]  }
 0x304   : > { %13992 = vmatprep.subr.bf16.mxu1 %v19677_v37  ;;  %v19698_v33 = vld [vmem:[%s22203_s17 + $0x2804] ss:$16 sps:$4 sm:$0xff]   ;;  %v19696_v37 = vld [vmem:[%s22203_s17 + $0x2800] ss:$16 sps:$4 sm:$0xff]  }
 0x305   : > { %v19701_v35 = vld [vmem:[%s22203_s17 + $0x2a04] ss:$16 sps:$4 sm:$0xff]   ;;  %v19762_v30 = vld [vmem:[%s22203_s17 + $0x2ca0] ss:$16 sps:$4 sm:$0xff]  }
 0x306   : > { %13952 = vmatpush1.bf16.msra.mxu0 %v19672_v58  ;;  %v19699_v58 = vld [vmem:[%s22203_s17 + $0x2a00] ss:$16 sps:$4 sm:$0xff]  }
 0x307   : > { %13993 = vmatpush1.bf16.msra.mxu1 %v19675_v2  ;;  %13953 = vmatprep.subr.bf16.mxu0 %v19680_v7  ;;  %v19704_v2 = vld [vmem:[%s22203_s17 + $0x29e4] ss:$16 sps:$4 sm:$0xff]  }
 0x308   : > { %13994 = vmatprep.subr.bf16.mxu1 %v19683_v47  ;;  %v19707_v7 = vld [vmem:[%s22203_s17 + $0x2be4] ss:$16 sps:$4 sm:$0xff]   ;;  %v19702_v47 = vld [vmem:[%s22203_s17 + $0x29e0] ss:$16 sps:$4 sm:$0xff]  }
 0x30a   : > { %13954 = vmatpush1.bf16.msra.mxu0 %v19678_v6  ;;  %v19705_v6 = vld [vmem:[%s22203_s17 + $0x2be0] ss:$16 sps:$4 sm:$0xff]  }
 0x30b   : > { %13995 = vmatpush1.bf16.msra.mxu1 %v19681_v8  ;;  %13955 = vmatprep.subr.bf16.mxu0 %v19686_v11  ;;  %v19710_v8 = vld [vmem:[%s22203_s17 + $0x29c4] ss:$16 sps:$4 sm:$0xff]  }
 0x30c   : > { %13996 = vmatprep.subr.bf16.mxu1 %v19689_v44  ;;  %v19713_v11 = vld [vmem:[%s22203_s17 + $0x2bc4] ss:$16 sps:$4 sm:$0xff]   ;;  %v19708_v44 = vld [vmem:[%s22203_s17 + $0x29c0] ss:$16 sps:$4 sm:$0xff]  }
 0x30e   : > { %13956 = vmatpush1.bf16.msra.mxu0 %v19684_v16  ;;  %v19711_v16 = vld [vmem:[%s22203_s17 + $0x2bc0] ss:$16 sps:$4 sm:$0xff]  }
 0x30f   : > { %13997 = vmatpush1.bf16.msra.mxu1 %v19687_v22  ;;  %13957 = vmatprep.subr.bf16.mxu0 %v19692_v28  ;;  %v19716_v22 = vld [vmem:[%s22203_s17 + $0x29a4] ss:$16 sps:$4 sm:$0xff]  }
 0x310   : > { %13998 = vmatprep.subr.bf16.mxu1 %v19695_v41  ;;  %v19719_v28 = vld [vmem:[%s22203_s17 + $0x2ba4] ss:$16 sps:$4 sm:$0xff]   ;;  %v19714_v41 = vld [vmem:[%s22203_s17 + $0x29a0] ss:$16 sps:$4 sm:$0xff]  }
 0x312   : > { %13958 = vmatpush1.bf16.msra.mxu0 %v19690_v36  ;;  %v19717_v36 = vld [vmem:[%s22203_s17 + $0x2ba0] ss:$16 sps:$4 sm:$0xff]  }
 0x313   : > { %13999 = vmatpush1.bf16.msra.mxu1 %v19693_v38  ;;  %13959 = vmatprep.subr.bf16.mxu0 %v19698_v33  ;;  %v19722_v38 = vld [vmem:[%s22203_s17 + $0x2984] ss:$16 sps:$4 sm:$0xff]  }
 0x314   : > { %14000 = vmatprep.subr.bf16.mxu1 %v19701_v35  ;;  %v19725_v33 = vld [vmem:[%s22203_s17 + $0x2b84] ss:$16 sps:$4 sm:$0xff]   ;;  %v19720_v35 = vld [vmem:[%s22203_s17 + $0x2980] ss:$16 sps:$4 sm:$0xff]  }
 0x316   : > { %13960 = vmatpush1.bf16.msra.mxu0 %v19696_v37  ;;  %v19723_v37 = vld [vmem:[%s22203_s17 + $0x2b80] ss:$16 sps:$4 sm:$0xff]  }
 0x317   : > { %14001 = vmatpush1.bf16.msra.mxu1 %v19699_v58  ;;  %13961 = vmatprep.subr.bf16.mxu0 %v19704_v2  ;;  %v19728_v58 = vld [vmem:[%s22203_s17 + $0x2964] ss:$16 sps:$4 sm:$0xff]  }
 0x318   : > { %14002 = vmatprep.subr.bf16.mxu1 %v19707_v7  ;;  %v19731_v2 = vld [vmem:[%s22203_s17 + $0x2b64] ss:$16 sps:$4 sm:$0xff]   ;;  %v19726_v7 = vld [vmem:[%s22203_s17 + $0x2960] ss:$16 sps:$4 sm:$0xff]  }
 0x31a   : > { %13962 = vmatpush2.bf16.msra.mxu0 %v19702_v47  ;;  %v19729_v47 = vld [vmem:[%s22203_s17 + $0x2b60] ss:$16 sps:$4 sm:$0xff]  }
 0x31b   : > { %14003 = vmatpush2.bf16.msra.mxu1 %v19705_v6  ;;  %13963 = vmatprep.subr.bf16.mxu0 %v19710_v8  ;;  %v19734_v6 = vld [vmem:[%s22203_s17 + $0x2944] ss:$16 sps:$4 sm:$0xff]  }
 0x31c   : > { %14004 = vmatprep.subr.bf16.mxu1 %v19713_v11  ;;  %v19737_v8 = vld [vmem:[%s22203_s17 + $0x2b44] ss:$16 sps:$4 sm:$0xff]   ;;  %v2674_v11 = vcombine.high %v23145_v12, %v23145_v12  ;;  %v19738_v12 = vld [vmem:[%s22203_s17 + $0x2920] ss:$16 sps:$4 sm:$0xff]  }
 0x31e   : > { %13964 = vmatpush2.bf16.msra.mxu0 %v19708_v44  ;;  %v19732_v44 = vld [vmem:[%s22203_s17 + $0x2940] ss:$16 sps:$4 sm:$0xff]  }
 0x31f   : > { %14005 = vmatpush2.bf16.msra.mxu1 %v19711_v16  ;;  %13965 = vmatprep.subr.bf16.mxu0 %v19716_v22  ;;  %v19735_v16 = vld [vmem:[%s22203_s17 + $0x2b40] ss:$16 sps:$4 sm:$0xff]   ;;  %v19740_v22 = vld [vmem:[%s22203_s17 + $0x2924] ss:$16 sps:$4 sm:$0xff]  }
 0x320   : > { %14006 = vmatprep.subr.bf16.mxu1 %v19719_v28  ;;  %v19743_v28 = vld [vmem:[%s22203_s17 + $0x2b24] ss:$16 sps:$4 sm:$0xff]  }
 0x322   : > { %13966 = vmatpush2.bf16.msra.mxu0 %v19714_v41  ;;  %v23249_v41 = vrot.slane %v2674_v11, %v22272_v50 }
 0x323   : > { %14007 = vmatpush2.bf16.msra.mxu1 %v19717_v36  ;;  %13967 = vmatprep.subr.bf16.mxu0 %v19722_v38  ;;  %v19741_v36 = vld [vmem:[%s22203_s17 + $0x2b20] ss:$16 sps:$4 sm:$0xff]   ;;  %v19746_v38 = vld [vmem:[%s22203_s17 + $0x2904] ss:$16 sps:$4 sm:$0xff]  }
 0x324   : > { %14008 = vmatprep.subr.bf16.mxu1 %v19725_v33  ;;  %v19749_v33 = vld [vmem:[%s22203_s17 + $0x2b04] ss:$16 sps:$4 sm:$0xff]  }
 0x326   : > { %13968 = vmatpush2.bf16.msra.mxu0 %v19720_v35  ;;  %v2690_v35 = vcombine.high %v23249_v41, %v23249_v41 }
 0x327   : > { %14009 = vmatpush2.bf16.msra.mxu1 %v19723_v37  ;;  %13969 = vmatprep.subr.bf16.mxu0 %v19728_v58  ;;  %v23259_v37 = vrot.slane %v23153_v53, %v22272_v50  ;;  %v19744_v58 = vld [vmem:[%s22203_s17 + $0x2900] ss:$16 sps:$4 sm:$0xff]  }
 0x328   : > { %14010 = vmatprep.subr.bf16.mxu1 %v19731_v2  ;;  %v19747_v2 = vld [vmem:[%s22203_s17 + $0x2b00] ss:$16 sps:$4 sm:$0xff]   ;;  %v23268_v11 = vrot.slane %v2690_v35, %v22272_v50 }
 0x329   : > { %25045 = vst [vmem:[#allocation21_spill] sm:$0xff] %v23259_v37  ;;  %v23272_v53 = vcombine.high %v23259_v37, %v23259_v37 }
 0x32a   : > { %13970 = vmatpush2.bf16.msra.mxu0 %v19726_v7  ;;  %v19752_v7 = vld [vmem:[%s22203_s17 + $0x2ce4] ss:$16 sps:$4 sm:$0xff]   ;;  %25046 = vst [vmem:[#allocation22_spill] sm:$0xff] %v23268_v11 }
 0x32b   : > { %14011 = vmatpush2.bf16.msra.mxu1 %v19729_v47  ;;  %13971 = vmatprep.subr.bf16.mxu0 %v19734_v6  ;;  %v19755_v47 = vld [vmem:[%s22203_s17 + $0x2ee4] ss:$16 sps:$4 sm:$0xff]   ;;  %v19750_v6 = vld [vmem:[%s22203_s17 + $0x2ce0] ss:$16 sps:$4 sm:$0xff]   ;;  %25047 = vst [vmem:[#allocation23_spill] sm:$0xff] %v23272_v53 }
 0x32c   : > { %14012 = vmatprep.subr.bf16.mxu1 %v19737_v8  ;;  %v19753_v8 = vld [vmem:[%s22203_s17 + $0x2ee0] ss:$16 sps:$4 sm:$0xff]  }
 0x32e   : > { %13972 = vmatpush2.bf16.msra.mxu0 %v19732_v44  ;;  %v19758_v44 = vld [vmem:[%s22203_s17 + $0x2cc4] ss:$16 sps:$4 sm:$0xff]  }
 0x32f   : > { %14013 = vmatpush2.bf16.msra.mxu1 %v19735_v16  ;;  %13973 = vmatprep.subr.bf16.mxu0 %v19740_v22  ;;  %v19761_v16 = vld [vmem:[%s22203_s17 + $0x2ec4] ss:$16 sps:$4 sm:$0xff]   ;;  %v19756_v22 = vld [vmem:[%s22203_s17 + $0x2cc0] ss:$16 sps:$4 sm:$0xff]  }
 0x330   : > { %14014 = vmatprep.subr.bf16.mxu1 %v19743_v28  ;;  %v19759_v28 = vld [vmem:[%s22203_s17 + $0x2ec0] ss:$16 sps:$4 sm:$0xff]  }
 0x332   : > { %13974 = vmatpush2.bf16.msra.mxu0 %v19738_v12  ;;  %v23280_v12 = vcombine.high %v23268_v11, %v23268_v11 }
 0x333   : > { %14015 = vmatpush2.bf16.msra.mxu1 %v19741_v36  ;;  %13975 = vmatprep.subr.bf16.mxu0 %v19746_v38 }
 0x334   : > { %14016 = vmatprep.subr.bf16.mxu1 %v19749_v33  ;;  %25048 = vst [vmem:[#allocation24_spill] sm:$0xff] %v23280_v12 }
 0x336   : > { %13976 = vmatpush2.bf16.msra.mxu0 %v19744_v58 }
 0x337   : > { %14017 = vmatpush2.bf16.msra.mxu1 %v19747_v2  ;;  %14027 = vmatprep.subr.bf16.mxu0 %v19752_v7  ;;  %v19764_v2 = vld [vmem:[%s22203_s17 + $0x2ca4] ss:$16 sps:$4 sm:$0xff]  }
 0x338   : > { %14068 = vmatprep.subr.bf16.mxu1 %v19755_v47  ;;  %v19767_v7 = vld [vmem:[%s22203_s17 + $0x2ea4] ss:$16 sps:$4 sm:$0xff]  }
 0x339   : > { %v13733_v36 = vpop.f32.mrf.mxu0  ;;  %13978 = vmatmul.mubr.bf16.vlgmr.msra.gmra.mxu0 %v23259_v37  ;;  %v19765_v37 = vld [vmem:[%s22203_s17 + $0x2ea0] ss:$16 sps:$4 sm:$0xff]  }
 0x33a   : > { %v13774_v38 = vpop.f32.mrf.mxu1  ;;  %14019 = vmatmul.mubr.bf16.vlgmr.msra.gmra.mxu1 %v23272_v53  ;;  %v13734_v33 = vadd.f32 %v13733_v36, %v23191_v57  ;;  %14028 = vmatpush1.bf16.msra.mxu0 %v19750_v6  ;;  %v19773_v36 = vld [vmem:[%s22203_s17 + $0x2e84] ss:$16 sps:$4 sm:$0xff]  }
 0x33b   : > { %14069 = vmatpush1.bf16.msra.mxu1 %v19753_v8  ;;  %v13735_v35 = vpop.f32.mrf.mxu0  ;;  %14029 = vmatprep.subr.bf16.mxu0 %v19758_v44 }
 0x33c   : > { %v13776_v58 = vpop.f32.mrf.mxu1  ;;  %14070 = vmatprep.subr.bf16.mxu1 %v19761_v16  ;;  %v23287_v47 = vadd.f32 %v13774_v38, %v13734_v33  ;;  %v13736_v51 = vadd.f32 %v13735_v35, %v23198_v62  ;;  %14059 = vmatprep.mubr.bf16.mxu0 %v23268_v11  ;;  %v19770_v62 = vld [vmem:[%s22203_s17 + $0x2c84] ss:$16 sps:$4 sm:$0xff]   ;;  %v19768_v38 = vld [vmem:[%s22203_s17 + $0x2c80] ss:$16 sps:$4 sm:$0xff]  }
 0x33d   : > { %14100 = vmatprep.mubr.bf16.mxu1 %v23280_v12  ;;  %v13737_v57 = vpop.f32.mrf.mxu0  ;;  %v19771_v33 = vld [vmem:[%s22203_s17 + $0x2e80] ss:$16 sps:$4 sm:$0xff]   ;;  %v19864_v12 = vld [vmem:[%s22203_s17 + $0x32a4] ss:$16 sps:$4 sm:$0xff]  }
 0x33e   : > { %v13778_v6 = vpop.f32.mrf.mxu1  ;;  %v23294_v8 = vadd.f32 %v13776_v58, %v13736_v51  ;;  %14030 = vmatpush1.bf16.msra.mxu0 %v19756_v22  ;;  %v19776_v51 = vld [vmem:[%s22203_s17 + $0x2c64] ss:$16 sps:$4 sm:$0xff]   ;;  %v19777_v35 = vld [vmem:[%s22203_s17 + $0x2e60] ss:$16 sps:$4 sm:$0xff]  }
 0x33f   : > { %14071 = vmatpush1.bf16.msra.mxu1 %v19759_v28  ;;  %v13738_v44 = vpop.f32.mrf.mxu0  ;;  %14031 = vmatprep.subr.bf16.mxu0 %v19764_v2  ;;  %v19779_v22 = vld [vmem:[%s22203_s17 + $0x2e64] ss:$16 sps:$4 sm:$0xff]   ;;  %v19774_v28 = vld [vmem:[%s22203_s17 + $0x2c60] ss:$16 sps:$4 sm:$0xff]  }
 0x340   : > { %v13779_v16 = vpop.f32.mrf.mxu1  ;;  %14072 = vmatprep.subr.bf16.mxu1 %v19767_v7  ;;  %v19780_v58 = vld [vmem:[%s22203_s17 + $0x2c40] ss:$16 sps:$4 sm:$0xff]   ;;  %v19788_v7 = vld [vmem:[%s22203_s17 + $0x2c24] ss:$16 sps:$4 sm:$0xff]  }
 0x341   : > { %v19783_v2 = vld [vmem:[%s22203_s17 + $0x2e40] ss:$16 sps:$4 sm:$0xff]   ;;  %v19791_v57 = vld [vmem:[%s22203_s17 + $0x2e24] ss:$16 sps:$4 sm:$0xff]  }
 0x342   : > { %14032 = vmatpush1.bf16.msra.mxu0 %v19762_v30  ;;  %v19782_v30 = vld [vmem:[%s22203_s17 + $0x2c44] ss:$16 sps:$4 sm:$0xff]   ;;  %v19786_v6 = vld [vmem:[%s22203_s17 + $0x2c20] ss:$16 sps:$4 sm:$0xff]  }
 0x343   : > { %14073 = vmatpush1.bf16.msra.mxu1 %v19765_v37  ;;  %14033 = vmatprep.subr.bf16.mxu0 %v19770_v62  ;;  %v19785_v37 = vld [vmem:[%s22203_s17 + $0x2e44] ss:$16 sps:$4 sm:$0xff]   ;;  %v19789_v44 = vld [vmem:[%s22203_s17 + $0x2e20] ss:$16 sps:$4 sm:$0xff]  }
 0x344   : > { %14074 = vmatprep.subr.bf16.mxu1 %v19773_v36  ;;  %v19794_v16 = vld [vmem:[%s22203_s17 + $0x2c04] ss:$16 sps:$4 sm:$0xff]   ;;  %v19792_v36 = vld [vmem:[%s22203_s17 + $0x2c00] ss:$16 sps:$4 sm:$0xff]  }
 0x345   : > { %v19797_v62 = vld [vmem:[%s22203_s17 + $0x2e04] ss:$16 sps:$4 sm:$0xff]  }
 0x346   : > { %14034 = vmatpush1.bf16.msra.mxu0 %v19768_v38  ;;  %v19795_v38 = vld [vmem:[%s22203_s17 + $0x2e00] ss:$16 sps:$4 sm:$0xff]  }
 0x347   : > { %14075 = vmatpush1.bf16.msra.mxu1 %v19771_v33  ;;  %14035 = vmatprep.subr.bf16.mxu0 %v19776_v51  ;;  %v19800_v33 = vld [vmem:[%s22203_s17 + $0x2de4] ss:$16 sps:$4 sm:$0xff]  }
 0x348   : > { %14076 = vmatprep.subr.bf16.mxu1 %v19779_v22  ;;  %v19803_v51 = vld [vmem:[%s22203_s17 + $0x2fe4] ss:$16 sps:$4 sm:$0xff]   ;;  %v19798_v22 = vld [vmem:[%s22203_s17 + $0x2de0] ss:$16 sps:$4 sm:$0xff]  }
 0x34a   : > { %14036 = vmatpush1.bf16.msra.mxu0 %v19774_v28  ;;  %v19801_v28 = vld [vmem:[%s22203_s17 + $0x2fe0] ss:$16 sps:$4 sm:$0xff]  }
 0x34b   : > { %14077 = vmatpush1.bf16.msra.mxu1 %v19777_v35  ;;  %14037 = vmatprep.subr.bf16.mxu0 %v19782_v30  ;;  %v19806_v35 = vld [vmem:[%s22203_s17 + $0x2dc4] ss:$16 sps:$4 sm:$0xff]  }
 0x34c   : > { %14078 = vmatprep.subr.bf16.mxu1 %v19785_v37  ;;  %v19809_v30 = vld [vmem:[%s22203_s17 + $0x2fc4] ss:$16 sps:$4 sm:$0xff]   ;;  %v19804_v37 = vld [vmem:[%s22203_s17 + $0x2dc0] ss:$16 sps:$4 sm:$0xff]  }
 0x34e   : > { %14038 = vmatpush1.bf16.msra.mxu0 %v19780_v58  ;;  %v19807_v58 = vld [vmem:[%s22203_s17 + $0x2fc0] ss:$16 sps:$4 sm:$0xff]  }
 0x34f   : > { %14079 = vmatpush1.bf16.msra.mxu1 %v19783_v2  ;;  %14039 = vmatprep.subr.bf16.mxu0 %v19788_v7  ;;  %v19812_v2 = vld [vmem:[%s22203_s17 + $0x2da4] ss:$16 sps:$4 sm:$0xff]  }
 0x350   : > { %14080 = vmatprep.subr.bf16.mxu1 %v19791_v57  ;;  %v19815_v7 = vld [vmem:[%s22203_s17 + $0x2fa4] ss:$16 sps:$4 sm:$0xff]   ;;  %v19810_v57 = vld [vmem:[%s22203_s17 + $0x2da0] ss:$16 sps:$4 sm:$0xff]  }
 0x352   : > { %14040 = vmatpush1.bf16.msra.mxu0 %v19786_v6  ;;  %v19813_v6 = vld [vmem:[%s22203_s17 + $0x2fa0] ss:$16 sps:$4 sm:$0xff]  }
 0x353   : > { %14081 = vmatpush1.bf16.msra.mxu1 %v19789_v44  ;;  %14041 = vmatprep.subr.bf16.mxu0 %v19794_v16  ;;  %v19818_v44 = vld [vmem:[%s22203_s17 + $0x2d84] ss:$16 sps:$4 sm:$0xff]  }
 0x354   : > { %14082 = vmatprep.subr.bf16.mxu1 %v19797_v62  ;;  %v19821_v16 = vld [vmem:[%s22203_s17 + $0x2f84] ss:$16 sps:$4 sm:$0xff]   ;;  %v19816_v62 = vld [vmem:[%s22203_s17 + $0x2d80] ss:$16 sps:$4 sm:$0xff]  }
 0x356   : > { %14042 = vmatpush1.bf16.msra.mxu0 %v19792_v36  ;;  %v19819_v36 = vld [vmem:[%s22203_s17 + $0x2f80] ss:$16 sps:$4 sm:$0xff]  }
 0x357   : > { %14083 = vmatpush1.bf16.msra.mxu1 %v19795_v38  ;;  %14043 = vmatprep.subr.bf16.mxu0 %v19800_v33  ;;  %v19824_v38 = vld [vmem:[%s22203_s17 + $0x2d64] ss:$16 sps:$4 sm:$0xff]  }
 0x358   : > { %14084 = vmatprep.subr.bf16.mxu1 %v19803_v51  ;;  %v19827_v33 = vld [vmem:[%s22203_s17 + $0x2f64] ss:$16 sps:$4 sm:$0xff]   ;;  %v19822_v51 = vld [vmem:[%s22203_s17 + $0x2d60] ss:$16 sps:$4 sm:$0xff]  }
 0x35a   : > { %14044 = vmatpush2.bf16.msra.mxu0 %v19798_v22  ;;  %v19825_v22 = vld [vmem:[%s22203_s17 + $0x2f60] ss:$16 sps:$4 sm:$0xff]  }
 0x35b   : > { %14085 = vmatpush2.bf16.msra.mxu1 %v19801_v28  ;;  %14045 = vmatprep.subr.bf16.mxu0 %v19806_v35  ;;  %v19830_v28 = vld [vmem:[%s22203_s17 + $0x2d44] ss:$16 sps:$4 sm:$0xff]  }
 0x35c   : > { %14086 = vmatprep.subr.bf16.mxu1 %v19809_v30  ;;  %v19833_v35 = vld [vmem:[%s22203_s17 + $0x2f44] ss:$16 sps:$4 sm:$0xff]   ;;  %v23339_v30 = vld [vmem:[%s22221_s29 + $0x30] sm:$0xff] }
 0x35e   : > { %14046 = vmatpush2.bf16.msra.mxu0 %v19804_v37  ;;  %v19828_v37 = vld [vmem:[%s22203_s17 + $0x2d40] ss:$16 sps:$4 sm:$0xff]  }
 0x35f   : > { %14087 = vmatpush2.bf16.msra.mxu1 %v19807_v58  ;;  %14047 = vmatprep.subr.bf16.mxu0 %v19812_v2  ;;  %v19831_v58 = vld [vmem:[%s22203_s17 + $0x2f40] ss:$16 sps:$4 sm:$0xff]   ;;  %v19836_v2 = vld [vmem:[%s22203_s17 + $0x2d24] ss:$16 sps:$4 sm:$0xff]  }
 0x360   : > { %14088 = vmatprep.subr.bf16.mxu1 %v19815_v7  ;;  %v19839_v7 = vld [vmem:[%s22203_s17 + $0x2f24] ss:$16 sps:$4 sm:$0xff]  }
 0x362   : > { %14048 = vmatpush2.bf16.msra.mxu0 %v19810_v57  ;;  %v23347_v57 = vrot.slane %v23339_v30, %v22272_v50 }
 0x363   : > { %14089 = vmatpush2.bf16.msra.mxu1 %v19813_v6  ;;  %14049 = vmatprep.subr.bf16.mxu0 %v19818_v44  ;;  %v19834_v6 = vld [vmem:[%s22203_s17 + $0x2d20] ss:$16 sps:$4 sm:$0xff]  }
 0x364   : > { %14090 = vmatprep.subr.bf16.mxu1 %v19821_v16  ;;  %v19837_v44 = vld [vmem:[%s22203_s17 + $0x2f20] ss:$16 sps:$4 sm:$0xff]   ;;  %v19842_v16 = vld [vmem:[%s22203_s17 + $0x2d04] ss:$16 sps:$4 sm:$0xff]  }
 0x366   : > { %14050 = vmatpush2.bf16.msra.mxu0 %v19816_v62  ;;  %v19845_v62 = vld [vmem:[%s22203_s17 + $0x2f04] ss:$16 sps:$4 sm:$0xff]  }
 0x367   : > { %14091 = vmatpush2.bf16.msra.mxu1 %v19819_v36  ;;  %14051 = vmatprep.subr.bf16.mxu0 %v19824_v38  ;;  %v2738_v36 = vcombine.high %v23347_v57, %v23347_v57  ;;  %v23357_v38 = vrot.slane %v23249_v41, %v22272_v50 }
 0x368   : > { %14092 = vmatprep.subr.bf16.mxu1 %v19827_v33  ;;  %v19840_v33 = vld [vmem:[%s22203_s17 + $0x2d00] ss:$16 sps:$4 sm:$0xff]  }
 0x369   : > { %25049 = vst [vmem:[#allocation25_spill] sm:$0xff] %v23357_v38  ;;  %v23370_v41 = vcombine.high %v23357_v38, %v23357_v38 }
 0x36a   : > { %14052 = vmatpush2.bf16.msra.mxu0 %v19822_v51  ;;  %v19843_v51 = vld [vmem:[%s22203_s17 + $0x2f00] ss:$16 sps:$4 sm:$0xff]  }
 0x36b   : > { %14093 = vmatpush2.bf16.msra.mxu1 %v19825_v22  ;;  %14053 = vmatprep.subr.bf16.mxu0 %v19830_v28  ;;  %v19849_v22 = vld [vmem:[%s22203_s17 + $0x30e4] ss:$16 sps:$4 sm:$0xff]   ;;  %25051 = vst [vmem:[#allocation27_spill] sm:$0xff] %v23370_v41 }
 0x36c   : > { %14094 = vmatprep.subr.bf16.mxu1 %v19833_v35  ;;  %v19852_v28 = vld [vmem:[%s22203_s17 + $0x32e4] ss:$16 sps:$4 sm:$0xff]   ;;  %v19847_v35 = vld [vmem:[%s22203_s17 + $0x30e0] ss:$16 sps:$4 sm:$0xff]  }
 0x36e   : > { %14054 = vmatpush2.bf16.msra.mxu0 %v19828_v37  ;;  %v19850_v37 = vld [vmem:[%s22203_s17 + $0x32e0] ss:$16 sps:$4 sm:$0xff]  }
 0x36f   : > { %14095 = vmatpush2.bf16.msra.mxu1 %v19831_v58  ;;  %14055 = vmatprep.subr.bf16.mxu0 %v19836_v2  ;;  %v23366_v58 = vrot.slane %v2738_v36, %v22272_v50  ;;  %v19855_v2 = vld [vmem:[%s22203_s17 + $0x30c4] ss:$16 sps:$4 sm:$0xff]  }
 0x370   : > { %14096 = vmatprep.subr.bf16.mxu1 %v19839_v7  ;;  %v19858_v7 = vld [vmem:[%s22203_s17 + $0x32c4] ss:$16 sps:$4 sm:$0xff]  }
 0x371   : > { %25050 = vst [vmem:[#allocation26_spill] sm:$0xff] %v23366_v58 }
 0x372   : > { %14056 = vmatpush2.bf16.msra.mxu0 %v19834_v6  ;;  %v19853_v6 = vld [vmem:[%s22203_s17 + $0x30c0] ss:$16 sps:$4 sm:$0xff]  }
 0x373   : > { %14097 = vmatpush2.bf16.msra.mxu1 %v19837_v44  ;;  %14057 = vmatprep.subr.bf16.mxu0 %v19842_v16  ;;  %v19856_v44 = vld [vmem:[%s22203_s17 + $0x32c0] ss:$16 sps:$4 sm:$0xff]   ;;  %v23378_v16 = vcombine.high %v23366_v58, %v23366_v58 }
 0x374   : > { %14098 = vmatprep.subr.bf16.mxu1 %v19845_v62 }
 0x375   : > { %25052 = vst [vmem:[#allocation28_spill] sm:$0xff] %v23378_v16 }
 0x376   : > { %14058 = vmatpush2.bf16.msra.mxu0 %v19840_v33 }
 0x377   : > { %14099 = vmatpush2.bf16.msra.mxu1 %v19843_v51  ;;  %14109 = vmatprep.subr.bf16.mxu0 %v19849_v22 }
 0x378   : > { %14150 = vmatprep.subr.bf16.mxu1 %v19852_v28  ;;  %v19861_v28 = vld [vmem:[%s22203_s17 + $0x30a4] ss:$16 sps:$4 sm:$0xff]  }
 0x379   : > { %v13815_v62 = vpop.f32.mrf.mxu0  ;;  %14060 = vmatmul.mubr.bf16.vlgmr.msra.gmra.mxu0 %v23357_v38  ;;  %v19862_v38 = vld [vmem:[%s22203_s17 + $0x32a0] ss:$16 sps:$4 sm:$0xff]  }
 0x37a   : > { %v13856_v36 = vpop.f32.mrf.mxu1  ;;  %14101 = vmatmul.mubr.bf16.vlgmr.msra.gmra.mxu1 %v23370_v41  ;;  %v13816_v33 = vadd.f32 %v13815_v62, %v23287_v47  ;;  %14110 = vmatpush1.bf16.msra.mxu0 %v19847_v35  ;;  %v19870_v62 = vld [vmem:[%s22203_s17 + $0x3284] ss:$16 sps:$4 sm:$0xff]   ;;  %v20052_v41 = vld [vmem:[%s22203_s17 + $0x38a0] ss:$16 sps:$4 sm:$0xff]  }
 0x37b   : > { %14151 = vmatpush1.bf16.msra.mxu1 %v19850_v37  ;;  %v13817_v51 = vpop.f32.mrf.mxu0  ;;  %14111 = vmatprep.subr.bf16.mxu0 %v19855_v2 }
 0x37c   : > { %v13858_v22 = vpop.f32.mrf.mxu1  ;;  %14152 = vmatprep.subr.bf16.mxu1 %v19858_v7  ;;  %v23385_v11 = vadd.f32 %v13856_v36, %v13816_v33  ;;  %v13818_v53 = vadd.f32 %v13817_v51, %v23294_v8  ;;  %14141 = vmatprep.mubr.bf16.mxu0 %v23366_v58  ;;  %v19867_v8 = vld [vmem:[%s22203_s17 + $0x3084] ss:$16 sps:$4 sm:$0xff]   ;;  %v19865_v36 = vld [vmem:[%s22203_s17 + $0x3080] ss:$16 sps:$4 sm:$0xff]  }
 0x37d   : > { %14182 = vmatprep.mubr.bf16.mxu1 %v23378_v16  ;;  %v13819_v47 = vpop.f32.mrf.mxu0  ;;  %v19868_v33 = vld [vmem:[%s22203_s17 + $0x3280] ss:$16 sps:$4 sm:$0xff]  }
 0x37e   : > { %v13860_v35 = vpop.f32.mrf.mxu1  ;;  %v23392_v37 = vadd.f32 %v13858_v22, %v13818_v53  ;;  %14112 = vmatpush1.bf16.msra.mxu0 %v19853_v6  ;;  %v19873_v53 = vld [vmem:[%s22203_s17 + $0x3064] ss:$16 sps:$4 sm:$0xff]   ;;  %v19877_v51 = vld [vmem:[%s22203_s17 + $0x3040] ss:$16 sps:$4 sm:$0xff]  }
 0x37f   : > { %14153 = vmatpush1.bf16.msra.mxu1 %v19856_v44  ;;  %v13820_v2 = vpop.f32.mrf.mxu0  ;;  %14113 = vmatprep.subr.bf16.mxu0 %v19861_v28  ;;  %v19876_v6 = vld [vmem:[%s22203_s17 + $0x3264] ss:$16 sps:$4 sm:$0xff]   ;;  %v19871_v44 = vld [vmem:[%s22203_s17 + $0x3060] ss:$16 sps:$4 sm:$0xff]  }
 0x380   : > { %v13861_v7 = vpop.f32.mrf.mxu1  ;;  %14154 = vmatprep.subr.bf16.mxu1 %v19864_v12  ;;  %v19874_v12 = vld [vmem:[%s22203_s17 + $0x3260] ss:$16 sps:$4 sm:$0xff]   ;;  %v19885_v28 = vld [vmem:[%s22203_s17 + $0x3024] ss:$16 sps:$4 sm:$0xff]  }
 0x381   : > { %v19880_v22 = vld [vmem:[%s22203_s17 + $0x3240] ss:$16 sps:$4 sm:$0xff]   ;;  %v19888_v47 = vld [vmem:[%s22203_s17 + $0x3224] ss:$16 sps:$4 sm:$0xff]  }
 0x382   : > { %14114 = vmatpush1.bf16.msra.mxu0 %v19859_v48  ;;  %v19879_v48 = vld [vmem:[%s22203_s17 + $0x3044] ss:$16 sps:$4 sm:$0xff]   ;;  %v19883_v35 = vld [vmem:[%s22203_s17 + $0x3020] ss:$16 sps:$4 sm:$0xff]  }
 0x383   : > { %14155 = vmatpush1.bf16.msra.mxu1 %v19862_v38  ;;  %14115 = vmatprep.subr.bf16.mxu0 %v19867_v8  ;;  %v19882_v38 = vld [vmem:[%s22203_s17 + $0x3244] ss:$16 sps:$4 sm:$0xff]   ;;  %v19886_v2 = vld [vmem:[%s22203_s17 + $0x3220] ss:$16 sps:$4 sm:$0xff]  }
 0x384   : > { %14156 = vmatprep.subr.bf16.mxu1 %v19870_v62  ;;  %v19891_v7 = vld [vmem:[%s22203_s17 + $0x3004] ss:$16 sps:$4 sm:$0xff]   ;;  %v19889_v62 = vld [vmem:[%s22203_s17 + $0x3000] ss:$16 sps:$4 sm:$0xff]  }
 0x385   : > { %v19894_v8 = vld [vmem:[%s22203_s17 + $0x3204] ss:$16 sps:$4 sm:$0xff]   ;;  %v19955_v58 = vld [vmem:[%s22203_s17 + $0x34a0] ss:$16 sps:$4 sm:$0xff]  }
 0x386   : > { %14116 = vmatpush1.bf16.msra.mxu0 %v19865_v36  ;;  %v19892_v36 = vld [vmem:[%s22203_s17 + $0x3200] ss:$16 sps:$4 sm:$0xff]  }
 0x387   : > { %14157 = vmatpush1.bf16.msra.mxu1 %v19868_v33  ;;  %14117 = vmatprep.subr.bf16.mxu0 %v19873_v53  ;;  %v19897_v33 = vld [vmem:[%s22203_s17 + $0x31e4] ss:$16 sps:$4 sm:$0xff]  }
 0x388   : > { %14158 = vmatprep.subr.bf16.mxu1 %v19876_v6  ;;  %v19900_v53 = vld [vmem:[%s22203_s17 + $0x33e4] ss:$16 sps:$4 sm:$0xff]   ;;  %v19895_v6 = vld [vmem:[%s22203_s17 + $0x31e0] ss:$16 sps:$4 sm:$0xff]  }
 0x38a   : > { %14118 = vmatpush1.bf16.msra.mxu0 %v19871_v44  ;;  %v19898_v44 = vld [vmem:[%s22203_s17 + $0x33e0] ss:$16 sps:$4 sm:$0xff]  }
 0x38b   : > { %14159 = vmatpush1.bf16.msra.mxu1 %v19874_v12  ;;  %14119 = vmatprep.subr.bf16.mxu0 %v19879_v48  ;;  %v19903_v12 = vld [vmem:[%s22203_s17 + $0x31c4] ss:$16 sps:$4 sm:$0xff]  }
 0x38c   : > { %14160 = vmatprep.subr.bf16.mxu1 %v19882_v38  ;;  %v19906_v48 = vld [vmem:[%s22203_s17 + $0x33c4] ss:$16 sps:$4 sm:$0xff]   ;;  %v19901_v38 = vld [vmem:[%s22203_s17 + $0x31c0] ss:$16 sps:$4 sm:$0xff]  }
 0x38e   : > { %14120 = vmatpush1.bf16.msra.mxu0 %v19877_v51  ;;  %v19904_v51 = vld [vmem:[%s22203_s17 + $0x33c0] ss:$16 sps:$4 sm:$0xff]  }
 0x38f   : > { %14161 = vmatpush1.bf16.msra.mxu1 %v19880_v22  ;;  %14121 = vmatprep.subr.bf16.mxu0 %v19885_v28  ;;  %v19909_v22 = vld [vmem:[%s22203_s17 + $0x31a4] ss:$16 sps:$4 sm:$0xff]  }
 0x390   : > { %14162 = vmatprep.subr.bf16.mxu1 %v19888_v47  ;;  %v19912_v28 = vld [vmem:[%s22203_s17 + $0x33a4] ss:$16 sps:$4 sm:$0xff]   ;;  %v19907_v47 = vld [vmem:[%s22203_s17 + $0x31a0] ss:$16 sps:$4 sm:$0xff]  }
 0x392   : > { %14122 = vmatpush1.bf16.msra.mxu0 %v19883_v35  ;;  %v19910_v35 = vld [vmem:[%s22203_s17 + $0x33a0] ss:$16 sps:$4 sm:$0xff]  }
 0x393   : > { %14163 = vmatpush1.bf16.msra.mxu1 %v19886_v2  ;;  %14123 = vmatprep.subr.bf16.mxu0 %v19891_v7  ;;  %v19915_v2 = vld [vmem:[%s22203_s17 + $0x3184] ss:$16 sps:$4 sm:$0xff]  }
 0x394   : > { %14164 = vmatprep.subr.bf16.mxu1 %v19894_v8  ;;  %v19918_v7 = vld [vmem:[%s22203_s17 + $0x3384] ss:$16 sps:$4 sm:$0xff]   ;;  %v19913_v8 = vld [vmem:[%s22203_s17 + $0x3180] ss:$16 sps:$4 sm:$0xff]  }
 0x396   : > { %14124 = vmatpush1.bf16.msra.mxu0 %v19889_v62  ;;  %v19916_v62 = vld [vmem:[%s22203_s17 + $0x3380] ss:$16 sps:$4 sm:$0xff]  }
 0x397   : > { %14165 = vmatpush1.bf16.msra.mxu1 %v19892_v36  ;;  %14125 = vmatprep.subr.bf16.mxu0 %v19897_v33  ;;  %v19921_v36 = vld [vmem:[%s22203_s17 + $0x3164] ss:$16 sps:$4 sm:$0xff]  }
 0x398   : > { %14166 = vmatprep.subr.bf16.mxu1 %v19900_v53  ;;  %v19924_v33 = vld [vmem:[%s22203_s17 + $0x3364] ss:$16 sps:$4 sm:$0xff]   ;;  %v19919_v53 = vld [vmem:[%s22203_s17 + $0x3160] ss:$16 sps:$4 sm:$0xff]  }
 0x39a   : > { %14126 = vmatpush2.bf16.msra.mxu0 %v19895_v6  ;;  %v19922_v6 = vld [vmem:[%s22203_s17 + $0x3360] ss:$16 sps:$4 sm:$0xff]  }
 0x39b   : > { %14167 = vmatpush2.bf16.msra.mxu1 %v19898_v44  ;;  %14127 = vmatprep.subr.bf16.mxu0 %v19903_v12  ;;  %v19927_v44 = vld [vmem:[%s22203_s17 + $0x3144] ss:$16 sps:$4 sm:$0xff]  }
 0x39c   : > { %14168 = vmatprep.subr.bf16.mxu1 %v19906_v48  ;;  %v19930_v12 = vld [vmem:[%s22203_s17 + $0x3344] ss:$16 sps:$4 sm:$0xff]   ;;  %v2723_v48 = vcombine.high %v23339_v30, %v23339_v30  ;;  %v19931_v30 = vld [vmem:[%s22203_s17 + $0x3120] ss:$16 sps:$4 sm:$0xff]  }
 0x39e   : > { %14128 = vmatpush2.bf16.msra.mxu0 %v19901_v38  ;;  %v19925_v38 = vld [vmem:[%s22203_s17 + $0x3140] ss:$16 sps:$4 sm:$0xff]  }
 0x39f   : > { %14169 = vmatpush2.bf16.msra.mxu1 %v19904_v51  ;;  %14129 = vmatprep.subr.bf16.mxu0 %v19909_v22  ;;  %v19928_v51 = vld [vmem:[%s22203_s17 + $0x3340] ss:$16 sps:$4 sm:$0xff]   ;;  %v19933_v22 = vld [vmem:[%s22203_s17 + $0x3124] ss:$16 sps:$4 sm:$0xff]  }
 0x3a0   : > { %14170 = vmatprep.subr.bf16.mxu1 %v19912_v28  ;;  %v19936_v28 = vld [vmem:[%s22203_s17 + $0x3324] ss:$16 sps:$4 sm:$0xff]  }
 0x3a2   : > { %14130 = vmatpush2.bf16.msra.mxu0 %v19907_v47  ;;  %v23443_v47 = vrot.slane %v2723_v48, %v22272_v50 }
 0x3a3   : > { %14171 = vmatpush2.bf16.msra.mxu1 %v19910_v35  ;;  %14131 = vmatprep.subr.bf16.mxu0 %v19915_v2  ;;  %v19934_v35 = vld [vmem:[%s22203_s17 + $0x3320] ss:$16 sps:$4 sm:$0xff]   ;;  %v19939_v2 = vld [vmem:[%s22203_s17 + $0x3104] ss:$16 sps:$4 sm:$0xff]  }
 0x3a4   : > { %14172 = vmatprep.subr.bf16.mxu1 %v19918_v7  ;;  %v19942_v7 = vld [vmem:[%s22203_s17 + $0x3304] ss:$16 sps:$4 sm:$0xff]  }
 0x3a6   : > { %14132 = vmatpush2.bf16.msra.mxu0 %v19913_v8  ;;  %v2739_v8 = vcombine.high %v23443_v47, %v23443_v47 }
 0x3a7   : > { %14173 = vmatpush2.bf16.msra.mxu1 %v19916_v62  ;;  %14133 = vmatprep.subr.bf16.mxu0 %v19921_v36  ;;  %v23453_v62 = vrot.slane %v23347_v57, %v22272_v50  ;;  %v19937_v36 = vld [vmem:[%s22203_s17 + $0x3100] ss:$16 sps:$4 sm:$0xff]  }
 0x3a8   : > { %14174 = vmatprep.subr.bf16.mxu1 %v19924_v33  ;;  %v19940_v33 = vld [vmem:[%s22203_s17 + $0x3300] ss:$16 sps:$4 sm:$0xff]   ;;  %v23462_v48 = vrot.slane %v2739_v8, %v22272_v50 }
 0x3a9   : > { %25053 = vst [vmem:[#allocation29_spill] sm:$0xff] %v23453_v62  ;;  %v23466_v57 = vcombine.high %v23453_v62, %v23453_v62 }
 0x3aa   : > { %14134 = vmatpush2.bf16.msra.mxu0 %v19919_v53  ;;  %v19945_v53 = vld [vmem:[%s22203_s17 + $0x34e4] ss:$16 sps:$4 sm:$0xff]   ;;  %25054 = vst [vmem:[#allocation30_spill] sm:$0xff] %v23462_v48 }
 0x3ab   : > { %14175 = vmatpush2.bf16.msra.mxu1 %v19922_v6  ;;  %14135 = vmatprep.subr.bf16.mxu0 %v19927_v44  ;;  %v19948_v6 = vld [vmem:[%s22203_s17 + $0x36e4] ss:$16 sps:$4 sm:$0xff]   ;;  %v19943_v44 = vld [vmem:[%s22203_s17 + $0x34e0] ss:$16 sps:$4 sm:$0xff]   ;;  %25055 = vst [vmem:[#allocation31_spill] sm:$0xff] %v23466_v57 }
 0x3ac   : > { %14176 = vmatprep.subr.bf16.mxu1 %v19930_v12  ;;  %v19946_v12 = vld [vmem:[%s22203_s17 + $0x36e0] ss:$16 sps:$4 sm:$0xff]  }
 0x3ae   : > { %14136 = vmatpush2.bf16.msra.mxu0 %v19925_v38  ;;  %v19951_v38 = vld [vmem:[%s22203_s17 + $0x34c4] ss:$16 sps:$4 sm:$0xff]  }
 0x3af   : > { %14177 = vmatpush2.bf16.msra.mxu1 %v19928_v51  ;;  %14137 = vmatprep.subr.bf16.mxu0 %v19933_v22  ;;  %v19954_v51 = vld [vmem:[%s22203_s17 + $0x36c4] ss:$16 sps:$4 sm:$0xff]   ;;  %v19949_v22 = vld [vmem:[%s22203_s17 + $0x34c0] ss:$16 sps:$4 sm:$0xff]  }
 0x3b0   : > { %14178 = vmatprep.subr.bf16.mxu1 %v19936_v28  ;;  %v19952_v28 = vld [vmem:[%s22203_s17 + $0x36c0] ss:$16 sps:$4 sm:$0xff]  }
 0x3b2   : > { %14138 = vmatpush2.bf16.msra.mxu0 %v19931_v30  ;;  %v23474_v30 = vcombine.high %v23462_v48, %v23462_v48 }
 0x3b3   : > { %14179 = vmatpush2.bf16.msra.mxu1 %v19934_v35  ;;  %14139 = vmatprep.subr.bf16.mxu0 %v19939_v2 }
 0x3b4   : > { %14180 = vmatprep.subr.bf16.mxu1 %v19942_v7  ;;  %25056 = vst [vmem:[#allocation32_spill] sm:$0xff] %v23474_v30 }
 0x3b6   : > { %14140 = vmatpush2.bf16.msra.mxu0 %v19937_v36 }
 0x3b7   : > { %14181 = vmatpush2.bf16.msra.mxu1 %v19940_v33  ;;  %14191 = vmatprep.subr.bf16.mxu0 %v19945_v53  ;;  %v19957_v33 = vld [vmem:[%s22203_s17 + $0x34a4] ss:$16 sps:$4 sm:$0xff]  }
 0x3b8   : > { %14232 = vmatprep.subr.bf16.mxu1 %v19948_v6  ;;  %v19960_v53 = vld [vmem:[%s22203_s17 + $0x36a4] ss:$16 sps:$4 sm:$0xff]  }
 0x3b9   : > { %v13897_v35 = vpop.f32.mrf.mxu0  ;;  %14142 = vmatmul.mubr.bf16.vlgmr.msra.gmra.mxu0 %v23453_v62  ;;  %v19958_v62 = vld [vmem:[%s22203_s17 + $0x36a0] ss:$16 sps:$4 sm:$0xff]  }
 0x3ba   : > { %v13938_v2 = vpop.f32.mrf.mxu1  ;;  %14183 = vmatmul.mubr.bf16.vlgmr.msra.gmra.mxu1 %v23466_v57  ;;  %v13898_v7 = vadd.f32 %v13897_v35, %v23385_v11  ;;  %14192 = vmatpush1.bf16.msra.mxu0 %v19943_v44  ;;  %v19966_v35 = vld [vmem:[%s22203_s17 + $0x3684] ss:$16 sps:$4 sm:$0xff]  }
 0x3bb   : > { %14233 = vmatpush1.bf16.msra.mxu1 %v19946_v12  ;;  %v13899_v8 = vpop.f32.mrf.mxu0  ;;  %14193 = vmatprep.subr.bf16.mxu0 %v19951_v38 }
 0x3bc   : > { %v13940_v36 = vpop.f32.mrf.mxu1  ;;  %14234 = vmatprep.subr.bf16.mxu1 %v19954_v51  ;;  %v23481_v6 = vadd.f32 %v13938_v2, %v13898_v7  ;;  %v13900_v16 = vadd.f32 %v13899_v8, %v23392_v37  ;;  %14223 = vmatprep.mubr.bf16.mxu0 %v23462_v48  ;;  %v19963_v37 = vld [vmem:[%s22203_s17 + $0x3484] ss:$16 sps:$4 sm:$0xff]   ;;  %v19961_v2 = vld [vmem:[%s22203_s17 + $0x3480] ss:$16 sps:$4 sm:$0xff]  }
 0x3bd   : > { %14264 = vmatprep.mubr.bf16.mxu1 %v23474_v30  ;;  %v13901_v11 = vpop.f32.mrf.mxu0  ;;  %v19964_v7 = vld [vmem:[%s22203_s17 + $0x3680] ss:$16 sps:$4 sm:$0xff]   ;;  %v20057_v30 = vld [vmem:[%s22203_s17 + $0x3aa4] ss:$16 sps:$4 sm:$0xff]  }
 0x3be   : > { %v13942_v44 = vpop.f32.mrf.mxu1  ;;  %v23488_v12 = vadd.f32 %v13940_v36, %v13900_v16  ;;  %14194 = vmatpush1.bf16.msra.mxu0 %v19949_v22  ;;  %v19969_v16 = vld [vmem:[%s22203_s17 + $0x3464] ss:$16 sps:$4 sm:$0xff]   ;;  %v19970_v8 = vld [vmem:[%s22203_s17 + $0x3660] ss:$16 sps:$4 sm:$0xff]  }
 0x3bf   : > { %14235 = vmatpush1.bf16.msra.mxu1 %v19952_v28  ;;  %v13902_v38 = vpop.f32.mrf.mxu0  ;;  %14195 = vmatprep.subr.bf16.mxu0 %v19957_v33  ;;  %v19972_v22 = vld [vmem:[%s22203_s17 + $0x3664] ss:$16 sps:$4 sm:$0xff]   ;;  %v19967_v28 = vld [vmem:[%s22203_s17 + $0x3460] ss:$16 sps:$4 sm:$0xff]  }
 0x3c0   : > { %v13943_v51 = vpop.f32.mrf.mxu1  ;;  %14236 = vmatprep.subr.bf16.mxu1 %v19960_v53  ;;  %v19973_v36 = vld [vmem:[%s22203_s17 + $0x3440] ss:$16 sps:$4 sm:$0xff]   ;;  %v19981_v53 = vld [vmem:[%s22203_s17 + $0x3424] ss:$16 sps:$4 sm:$0xff]  }
 0x3c1   : > { %v19976_v33 = vld [vmem:[%s22203_s17 + $0x3640] ss:$16 sps:$4 sm:$0xff]   ;;  %v19984_v11 = vld [vmem:[%s22203_s17 + $0x3624] ss:$16 sps:$4 sm:$0xff]  }
 0x3c2   : > { %14196 = vmatpush1.bf16.msra.mxu0 %v19955_v58  ;;  %v19975_v58 = vld [vmem:[%s22203_s17 + $0x3444] ss:$16 sps:$4 sm:$0xff]   ;;  %v19979_v44 = vld [vmem:[%s22203_s17 + $0x3420] ss:$16 sps:$4 sm:$0xff]  }
 0x3c3   : > { %14237 = vmatpush1.bf16.msra.mxu1 %v19958_v62  ;;  %14197 = vmatprep.subr.bf16.mxu0 %v19963_v37  ;;  %v19978_v62 = vld [vmem:[%s22203_s17 + $0x3644] ss:$16 sps:$4 sm:$0xff]   ;;  %v19982_v38 = vld [vmem:[%s22203_s17 + $0x3620] ss:$16 sps:$4 sm:$0xff]  }
 0x3c4   : > { %14238 = vmatprep.subr.bf16.mxu1 %v19966_v35  ;;  %v19987_v51 = vld [vmem:[%s22203_s17 + $0x3404] ss:$16 sps:$4 sm:$0xff]   ;;  %v19985_v35 = vld [vmem:[%s22203_s17 + $0x3400] ss:$16 sps:$4 sm:$0xff]  }
 0x3c5   : > { %v19990_v37 = vld [vmem:[%s22203_s17 + $0x3604] ss:$16 sps:$4 sm:$0xff]  }
 0x3c6   : > { %14198 = vmatpush1.bf16.msra.mxu0 %v19961_v2  ;;  %v19988_v2 = vld [vmem:[%s22203_s17 + $0x3600] ss:$16 sps:$4 sm:$0xff]  }
 0x3c7   : > { %14239 = vmatpush1.bf16.msra.mxu1 %v19964_v7  ;;  %14199 = vmatprep.subr.bf16.mxu0 %v19969_v16  ;;  %v19993_v7 = vld [vmem:[%s22203_s17 + $0x35e4] ss:$16 sps:$4 sm:$0xff]  }
 0x3c8   : > { %14240 = vmatprep.subr.bf16.mxu1 %v19972_v22  ;;  %v19996_v16 = vld [vmem:[%s22203_s17 + $0x37e4] ss:$16 sps:$4 sm:$0xff]   ;;  %v19991_v22 = vld [vmem:[%s22203_s17 + $0x35e0] ss:$16 sps:$4 sm:$0xff]  }
 0x3ca   : > { %14200 = vmatpush1.bf16.msra.mxu0 %v19967_v28  ;;  %v19994_v28 = vld [vmem:[%s22203_s17 + $0x37e0] ss:$16 sps:$4 sm:$0xff]  }
 0x3cb   : > { %14241 = vmatpush1.bf16.msra.mxu1 %v19970_v8  ;;  %14201 = vmatprep.subr.bf16.mxu0 %v19975_v58  ;;  %v19999_v8 = vld [vmem:[%s22203_s17 + $0x35c4] ss:$16 sps:$4 sm:$0xff]  }
 0x3cc   : > { %14242 = vmatprep.subr.bf16.mxu1 %v19978_v62  ;;  %v20002_v58 = vld [vmem:[%s22203_s17 + $0x37c4] ss:$16 sps:$4 sm:$0xff]   ;;  %v19997_v62 = vld [vmem:[%s22203_s17 + $0x35c0] ss:$16 sps:$4 sm:$0xff]  }
 0x3ce   : > { %14202 = vmatpush1.bf16.msra.mxu0 %v19973_v36  ;;  %v20000_v36 = vld [vmem:[%s22203_s17 + $0x37c0] ss:$16 sps:$4 sm:$0xff]  }
 0x3cf   : > { %14243 = vmatpush1.bf16.msra.mxu1 %v19976_v33  ;;  %14203 = vmatprep.subr.bf16.mxu0 %v19981_v53  ;;  %v20005_v33 = vld [vmem:[%s22203_s17 + $0x35a4] ss:$16 sps:$4 sm:$0xff]  }
 0x3d0   : > { %14244 = vmatprep.subr.bf16.mxu1 %v19984_v11  ;;  %v20008_v53 = vld [vmem:[%s22203_s17 + $0x37a4] ss:$16 sps:$4 sm:$0xff]   ;;  %v20003_v11 = vld [vmem:[%s22203_s17 + $0x35a0] ss:$16 sps:$4 sm:$0xff]  }
 0x3d2   : > { %14204 = vmatpush1.bf16.msra.mxu0 %v19979_v44  ;;  %v20006_v44 = vld [vmem:[%s22203_s17 + $0x37a0] ss:$16 sps:$4 sm:$0xff]  }
 0x3d3   : > { %14245 = vmatpush1.bf16.msra.mxu1 %v19982_v38  ;;  %14205 = vmatprep.subr.bf16.mxu0 %v19987_v51  ;;  %v20011_v38 = vld [vmem:[%s22203_s17 + $0x3584] ss:$16 sps:$4 sm:$0xff]  }
 0x3d4   : > { %14246 = vmatprep.subr.bf16.mxu1 %v19990_v37  ;;  %v20014_v51 = vld [vmem:[%s22203_s17 + $0x3784] ss:$16 sps:$4 sm:$0xff]   ;;  %v20009_v37 = vld [vmem:[%s22203_s17 + $0x3580] ss:$16 sps:$4 sm:$0xff]  }
 0x3d6   : > { %14206 = vmatpush1.bf16.msra.mxu0 %v19985_v35  ;;  %v20012_v35 = vld [vmem:[%s22203_s17 + $0x3780] ss:$16 sps:$4 sm:$0xff]  }
 0x3d7   : > { %14247 = vmatpush1.bf16.msra.mxu1 %v19988_v2  ;;  %14207 = vmatprep.subr.bf16.mxu0 %v19993_v7  ;;  %v20017_v2 = vld [vmem:[%s22203_s17 + $0x3564] ss:$16 sps:$4 sm:$0xff]  }
 0x3d8   : > { %14248 = vmatprep.subr.bf16.mxu1 %v19996_v16  ;;  %v20020_v7 = vld [vmem:[%s22203_s17 + $0x3764] ss:$16 sps:$4 sm:$0xff]   ;;  %v20015_v16 = vld [vmem:[%s22203_s17 + $0x3560] ss:$16 sps:$4 sm:$0xff]  }
 0x3da   : > { %14208 = vmatpush2.bf16.msra.mxu0 %v19991_v22  ;;  %v20018_v22 = vld [vmem:[%s22203_s17 + $0x3760] ss:$16 sps:$4 sm:$0xff]  }
 0x3db   : > { %14249 = vmatpush2.bf16.msra.mxu1 %v19994_v28  ;;  %14209 = vmatprep.subr.bf16.mxu0 %v19999_v8  ;;  %v20023_v28 = vld [vmem:[%s22203_s17 + $0x3544] ss:$16 sps:$4 sm:$0xff]  }
 0x3dc   : > { %14250 = vmatprep.subr.bf16.mxu1 %v20002_v58  ;;  %v20026_v8 = vld [vmem:[%s22203_s17 + $0x3744] ss:$16 sps:$4 sm:$0xff]  }
 0x3dd   : > { %v23533_v58 = vld [vmem:[%s22221_s29 + $0x38] sm:$0xff] }
 0x3de   : > { %14210 = vmatpush2.bf16.msra.mxu0 %v19997_v62  ;;  %v20021_v62 = vld [vmem:[%s22203_s17 + $0x3540] ss:$16 sps:$4 sm:$0xff]  }
 0x3df   : > { %14251 = vmatpush2.bf16.msra.mxu1 %v20000_v36  ;;  %14211 = vmatprep.subr.bf16.mxu0 %v20005_v33  ;;  %v20024_v36 = vld [vmem:[%s22203_s17 + $0x3740] ss:$16 sps:$4 sm:$0xff]   ;;  %v20029_v33 = vld [vmem:[%s22203_s17 + $0x3524] ss:$16 sps:$4 sm:$0xff]  }
 0x3e0   : > { %14252 = vmatprep.subr.bf16.mxu1 %v20008_v53  ;;  %v20032_v53 = vld [vmem:[%s22203_s17 + $0x3724] ss:$16 sps:$4 sm:$0xff]  }
 0x3e2   : > { %14212 = vmatpush2.bf16.msra.mxu0 %v20003_v11  ;;  %v23541_v11 = vrot.slane %v23533_v58, %v22272_v50 }
 0x3e3   : > { %14253 = vmatpush2.bf16.msra.mxu1 %v20006_v44  ;;  %14213 = vmatprep.subr.bf16.mxu0 %v20011_v38  ;;  %v20027_v44 = vld [vmem:[%s22203_s17 + $0x3520] ss:$16 sps:$4 sm:$0xff]  }
 0x3e4   : > { %14254 = vmatprep.subr.bf16.mxu1 %v20014_v51  ;;  %v20030_v38 = vld [vmem:[%s22203_s17 + $0x3720] ss:$16 sps:$4 sm:$0xff]   ;;  %v20035_v51 = vld [vmem:[%s22203_s17 + $0x3504] ss:$16 sps:$4 sm:$0xff]  }
 0x3e6   : > { %14214 = vmatpush2.bf16.msra.mxu0 %v20009_v37  ;;  %v20038_v37 = vld [vmem:[%s22203_s17 + $0x3704] ss:$16 sps:$4 sm:$0xff]  }
 0x3e7   : > { %14255 = vmatpush2.bf16.msra.mxu1 %v20012_v35  ;;  %14215 = vmatprep.subr.bf16.mxu0 %v20017_v2  ;;  %v2787_v35 = vcombine.high %v23541_v11, %v23541_v11  ;;  %v23551_v2 = vrot.slane %v23443_v47, %v22272_v50 }
 0x3e8   : > { %14256 = vmatprep.subr.bf16.mxu1 %v20020_v7  ;;  %v20033_v7 = vld [vmem:[%s22203_s17 + $0x3500] ss:$16 sps:$4 sm:$0xff]  }
 0x3e9   : > { %25057 = vst [vmem:[#allocation33_spill] sm:$0xff] %v23551_v2  ;;  %v23564_v47 = vcombine.high %v23551_v2, %v23551_v2 }
 0x3ea   : > { %14216 = vmatpush2.bf16.msra.mxu0 %v20015_v16  ;;  %v20036_v16 = vld [vmem:[%s22203_s17 + $0x3700] ss:$16 sps:$4 sm:$0xff]  }
 0x3eb   : > { %14257 = vmatpush2.bf16.msra.mxu1 %v20018_v22  ;;  %14217 = vmatprep.subr.bf16.mxu0 %v20023_v28  ;;  %v20042_v22 = vld [vmem:[%s22203_s17 + $0x38e4] ss:$16 sps:$4 sm:$0xff]  }
 0x3ec   : > { %14258 = vmatprep.subr.bf16.mxu1 %v20026_v8  ;;  %v20045_v28 = vld [vmem:[%s22203_s17 + $0x3ae4] ss:$16 sps:$4 sm:$0xff]   ;;  %v20040_v8 = vld [vmem:[%s22203_s17 + $0x38e0] ss:$16 sps:$4 sm:$0xff]  }
 0x3ee   : > { %14218 = vmatpush2.bf16.msra.mxu0 %v20021_v62  ;;  %v20043_v62 = vld [vmem:[%s22203_s17 + $0x3ae0] ss:$16 sps:$4 sm:$0xff]  }
 0x3ef   : > { %14259 = vmatpush2.bf16.msra.mxu1 %v20024_v36  ;;  %14219 = vmatprep.subr.bf16.mxu0 %v20029_v33  ;;  %v23560_v36 = vrot.slane %v2787_v35, %v22272_v50  ;;  %v20048_v33 = vld [vmem:[%s22203_s17 + $0x38c4] ss:$16 sps:$4 sm:$0xff]  }
 0x3f0   : > { %14260 = vmatprep.subr.bf16.mxu1 %v20032_v53  ;;  %v20051_v53 = vld [vmem:[%s22203_s17 + $0x3ac4] ss:$16 sps:$4 sm:$0xff]  }
 0x3f1   : > { %25058 = vst [vmem:[#allocation34_spill] sm:$0xff] %v23560_v36 }
 0x3f2   : > { %14220 = vmatpush2.bf16.msra.mxu0 %v20027_v44  ;;  %v20046_v44 = vld [vmem:[%s22203_s17 + $0x38c0] ss:$16 sps:$4 sm:$0xff]  }
 0x3f3   : > { %14261 = vmatpush2.bf16.msra.mxu1 %v20030_v38  ;;  %14221 = vmatprep.subr.bf16.mxu0 %v20035_v51  ;;  %v20049_v38 = vld [vmem:[%s22203_s17 + $0x3ac0] ss:$16 sps:$4 sm:$0xff]   ;;  %v23572_v51 = vcombine.high %v23560_v36, %v23560_v36 }
 0x3f4   : > { %14262 = vmatprep.subr.bf16.mxu1 %v20038_v37 }
 0x3f5   : > { %25059 = vst [vmem:[#allocation35_spill] sm:$0xff] %v23572_v51 }
 0x3f6   : > { %14222 = vmatpush2.bf16.msra.mxu0 %v20033_v7 }
 0x3f7   : > { %14263 = vmatpush2.bf16.msra.mxu1 %v20036_v16  ;;  %14273 = vmatprep.subr.bf16.mxu0 %v20042_v22 }
 0x3f8   : > { %14314 = vmatprep.subr.bf16.mxu1 %v20045_v28  ;;  %v20054_v28 = vld [vmem:[%s22203_s17 + $0x38a4] ss:$16 sps:$4 sm:$0xff]  }
 0x3f9   : > { %v13979_v37 = vpop.f32.mrf.mxu0  ;;  %14224 = vmatmul.mubr.bf16.vlgmr.msra.gmra.mxu0 %v23551_v2  ;;  %v20055_v2 = vld [vmem:[%s22203_s17 + $0x3aa0] ss:$16 sps:$4 sm:$0xff]  }
 0x3fa   : > { %v14020_v35 = vpop.f32.mrf.mxu1  ;;  %14265 = vmatmul.mubr.bf16.vlgmr.msra.gmra.mxu1 %v23564_v47  ;;  %v13980_v7 = vadd.f32 %v13979_v37, %v23481_v6  ;;  %14274 = vmatpush1.bf16.msra.mxu0 %v20040_v8  ;;  %v20063_v37 = vld [vmem:[%s22203_s17 + $0x3a84] ss:$16 sps:$4 sm:$0xff]  }
 0x3fb   : > { %14315 = vmatpush1.bf16.msra.mxu1 %v20043_v62  ;;  %v13981_v16 = vpop.f32.mrf.mxu0  ;;  %14275 = vmatprep.subr.bf16.mxu0 %v20048_v33 }
 0x3fc   : > { %v14022_v22 = vpop.f32.mrf.mxu1  ;;  %14316 = vmatprep.subr.bf16.mxu1 %v20051_v53  ;;  %v23579_v48 = vadd.f32 %v14020_v35, %v13980_v7  ;;  %v13982_v57 = vadd.f32 %v13981_v16, %v23488_v12  ;;  %14305 = vmatprep.mubr.bf16.mxu0 %v23560_v36  ;;  %v20060_v12 = vld [vmem:[%s22203_s17 + $0x3884] ss:$16 sps:$4 sm:$0xff]   ;;  %v20058_v35 = vld [vmem:[%s22203_s17 + $0x3880] ss:$16 sps:$4 sm:$0xff]  }
 0x3fd   : > { %14346 = vmatprep.mubr.bf16.mxu1 %v23572_v51  ;;  %v13983_v6 = vpop.f32.mrf.mxu0  ;;  %v20061_v7 = vld [vmem:[%s22203_s17 + $0x3a80] ss:$16 sps:$4 sm:$0xff]  }
 0x3fe   : > { %v14024_v8 = vpop.f32.mrf.mxu1  ;;  %v23586_v62 = vadd.f32 %v14022_v22, %v13982_v57  ;;  %14276 = vmatpush1.bf16.msra.mxu0 %v20046_v44  ;;  %v20066_v57 = vld [vmem:[%s22203_s17 + $0x3864] ss:$16 sps:$4 sm:$0xff]   ;;  %v20070_v16 = vld [vmem:[%s22203_s17 + $0x3840] ss:$16 sps:$4 sm:$0xff]  }
 0x3ff   : > { %14317 = vmatpush1.bf16.msra.mxu1 %v20049_v38  ;;  %v13984_v33 = vpop.f32.mrf.mxu0  ;;  %14277 = vmatprep.subr.bf16.mxu0 %v20054_v28  ;;  %v20069_v44 = vld [vmem:[%s22203_s17 + $0x3a64] ss:$16 sps:$4 sm:$0xff]   ;;  %v20064_v38 = vld [vmem:[%s22203_s17 + $0x3860] ss:$16 sps:$4 sm:$0xff]  }
 0x400   : > { %v14025_v53 = vpop.f32.mrf.mxu1  ;;  %14318 = vmatprep.subr.bf16.mxu1 %v20057_v30  ;;  %v20067_v30 = vld [vmem:[%s22203_s17 + $0x3a60] ss:$16 sps:$4 sm:$0xff]   ;;  %v20078_v28 = vld [vmem:[%s22203_s17 + $0x3824] ss:$16 sps:$4 sm:$0xff]  }
 0x401   : > { %v20073_v22 = vld [vmem:[%s22203_s17 + $0x3a40] ss:$16 sps:$4 sm:$0xff]   ;;  %v20081_v6 = vld [vmem:[%s22203_s17 + $0x3a24] ss:$16 sps:$4 sm:$0xff]  }
 0x402   : > { %14278 = vmatpush1.bf16.msra.mxu0 %v20052_v41  ;;  %v20072_v41 = vld [vmem:[%s22203_s17 + $0x3844] ss:$16 sps:$4 sm:$0xff]   ;;  %v20076_v8 = vld [vmem:[%s22203_s17 + $0x3820] ss:$16 sps:$4 sm:$0xff]  }
 0x403   : > { %14319 = vmatpush1.bf16.msra.mxu1 %v20055_v2  ;;  %14279 = vmatprep.subr.bf16.mxu0 %v20060_v12  ;;  %v20075_v2 = vld [vmem:[%s22203_s17 + $0x3a44] ss:$16 sps:$4 sm:$0xff]   ;;  %v20079_v33 = vld [vmem:[%s22203_s17 + $0x3a20] ss:$16 sps:$4 sm:$0xff]  }
 0x404   : > { %14320 = vmatprep.subr.bf16.mxu1 %v20063_v37  ;;  %v20084_v53 = vld [vmem:[%s22203_s17 + $0x3804] ss:$16 sps:$4 sm:$0xff]   ;;  %v20082_v37 = vld [vmem:[%s22203_s17 + $0x3800] ss:$16 sps:$4 sm:$0xff]  }
 0x405   : > { %v20087_v12 = vld [vmem:[%s22203_s17 + $0x3a04] ss:$16 sps:$4 sm:$0xff]   ;;  %v20148_v36 = vld [vmem:[%s22203_s17 + $0x3ca0] ss:$16 sps:$4 sm:$0xff]  }
 0x406   : > { %14280 = vmatpush1.bf16.msra.mxu0 %v20058_v35  ;;  %v20085_v35 = vld [vmem:[%s22203_s17 + $0x3a00] ss:$16 sps:$4 sm:$0xff]  }
 0x407   : > { %14321 = vmatpush1.bf16.msra.mxu1 %v20061_v7  ;;  %14281 = vmatprep.subr.bf16.mxu0 %v20066_v57  ;;  %v20090_v7 = vld [vmem:[%s22203_s17 + $0x39e4] ss:$16 sps:$4 sm:$0xff]  }
 0x408   : > { %14322 = vmatprep.subr.bf16.mxu1 %v20069_v44  ;;  %v20093_v57 = vld [vmem:[%s22203_s17 + $0x3be4] ss:$16 sps:$4 sm:$0xff]   ;;  %v20088_v44 = vld [vmem:[%s22203_s17 + $0x39e0] ss:$16 sps:$4 sm:$0xff]  }
 0x40a   : > { %14282 = vmatpush1.bf16.msra.mxu0 %v20064_v38  ;;  %v20091_v38 = vld [vmem:[%s22203_s17 + $0x3be0] ss:$16 sps:$4 sm:$0xff]  }
 0x40b   : > { %14323 = vmatpush1.bf16.msra.mxu1 %v20067_v30  ;;  %14283 = vmatprep.subr.bf16.mxu0 %v20072_v41  ;;  %v20096_v30 = vld [vmem:[%s22203_s17 + $0x39c4] ss:$16 sps:$4 sm:$0xff]  }
 0x40c   : > { %14324 = vmatprep.subr.bf16.mxu1 %v20075_v2  ;;  %v20099_v41 = vld [vmem:[%s22203_s17 + $0x3bc4] ss:$16 sps:$4 sm:$0xff]   ;;  %v20094_v2 = vld [vmem:[%s22203_s17 + $0x39c0] ss:$16 sps:$4 sm:$0xff]  }
 0x40e   : > { %14284 = vmatpush1.bf16.msra.mxu0 %v20070_v16  ;;  %v20097_v16 = vld [vmem:[%s22203_s17 + $0x3bc0] ss:$16 sps:$4 sm:$0xff]  }
 0x40f   : > { %14325 = vmatpush1.bf16.msra.mxu1 %v20073_v22  ;;  %14285 = vmatprep.subr.bf16.mxu0 %v20078_v28  ;;  %v20102_v22 = vld [vmem:[%s22203_s17 + $0x39a4] ss:$16 sps:$4 sm:$0xff]  }
 0x410   : > { %14326 = vmatprep.subr.bf16.mxu1 %v20081_v6  ;;  %v20105_v28 = vld [vmem:[%s22203_s17 + $0x3ba4] ss:$16 sps:$4 sm:$0xff]   ;;  %v20100_v6 = vld [vmem:[%s22203_s17 + $0x39a0] ss:$16 sps:$4 sm:$0xff]  }
 0x412   : > { %14286 = vmatpush1.bf16.msra.mxu0 %v20076_v8  ;;  %v20103_v8 = vld [vmem:[%s22203_s17 + $0x3ba0] ss:$16 sps:$4 sm:$0xff]  }
 0x413   : > { %14327 = vmatpush1.bf16.msra.mxu1 %v20079_v33  ;;  %14287 = vmatprep.subr.bf16.mxu0 %v20084_v53  ;;  %v20108_v33 = vld [vmem:[%s22203_s17 + $0x3984] ss:$16 sps:$4 sm:$0xff]  }
 0x414   : > { %14328 = vmatprep.subr.bf16.mxu1 %v20087_v12  ;;  %v20111_v53 = vld [vmem:[%s22203_s17 + $0x3b84] ss:$16 sps:$4 sm:$0xff]   ;;  %v20106_v12 = vld [vmem:[%s22203_s17 + $0x3980] ss:$16 sps:$4 sm:$0xff]  }
 0x416   : > { %14288 = vmatpush1.bf16.msra.mxu0 %v20082_v37  ;;  %v20109_v37 = vld [vmem:[%s22203_s17 + $0x3b80] ss:$16 sps:$4 sm:$0xff]  }
 0x417   : > { %14329 = vmatpush1.bf16.msra.mxu1 %v20085_v35  ;;  %14289 = vmatprep.subr.bf16.mxu0 %v20090_v7  ;;  %v20114_v35 = vld [vmem:[%s22203_s17 + $0x3964] ss:$16 sps:$4 sm:$0xff]  }
 0x418   : > { %14330 = vmatprep.subr.bf16.mxu1 %v20093_v57  ;;  %v20117_v7 = vld [vmem:[%s22203_s17 + $0x3b64] ss:$16 sps:$4 sm:$0xff]   ;;  %v20112_v57 = vld [vmem:[%s22203_s17 + $0x3960] ss:$16 sps:$4 sm:$0xff]  }
 0x41a   : > { %14290 = vmatpush2.bf16.msra.mxu0 %v20088_v44  ;;  %v20115_v44 = vld [vmem:[%s22203_s17 + $0x3b60] ss:$16 sps:$4 sm:$0xff]  }
 0x41b   : > { %14331 = vmatpush2.bf16.msra.mxu1 %v20091_v38  ;;  %14291 = vmatprep.subr.bf16.mxu0 %v20096_v30  ;;  %v20120_v38 = vld [vmem:[%s22203_s17 + $0x3944] ss:$16 sps:$4 sm:$0xff]  }
 0x41c   : > { %14332 = vmatprep.subr.bf16.mxu1 %v20099_v41  ;;  %v20123_v30 = vld [vmem:[%s22203_s17 + $0x3b44] ss:$16 sps:$4 sm:$0xff]   ;;  %v2772_v41 = vcombine.high %v23533_v58, %v23533_v58  ;;  %v20124_v58 = vld [vmem:[%s22203_s17 + $0x3920] ss:$16 sps:$4 sm:$0xff]  }
 0x41e   : > { %14292 = vmatpush2.bf16.msra.mxu0 %v20094_v2  ;;  %v20118_v2 = vld [vmem:[%s22203_s17 + $0x3940] ss:$16 sps:$4 sm:$0xff]  }
 0x41f   : > { %14333 = vmatpush2.bf16.msra.mxu1 %v20097_v16  ;;  %14293 = vmatprep.subr.bf16.mxu0 %v20102_v22  ;;  %v20121_v16 = vld [vmem:[%s22203_s17 + $0x3b40] ss:$16 sps:$4 sm:$0xff]   ;;  %v20126_v22 = vld [vmem:[%s22203_s17 + $0x3924] ss:$16 sps:$4 sm:$0xff]  }
 0x420   : > { %14334 = vmatprep.subr.bf16.mxu1 %v20105_v28  ;;  %v20129_v28 = vld [vmem:[%s22203_s17 + $0x3b24] ss:$16 sps:$4 sm:$0xff]  }
 0x422   : > { %14294 = vmatpush2.bf16.msra.mxu0 %v20100_v6  ;;  %v23637_v6 = vrot.slane %v2772_v41, %v22272_v50 }
 0x423   : > { %14335 = vmatpush2.bf16.msra.mxu1 %v20103_v8  ;;  %14295 = vmatprep.subr.bf16.mxu0 %v20108_v33  ;;  %v20127_v8 = vld [vmem:[%s22203_s17 + $0x3b20] ss:$16 sps:$4 sm:$0xff]   ;;  %v20132_v33 = vld [vmem:[%s22203_s17 + $0x3904] ss:$16 sps:$4 sm:$0xff]  }
 0x424   : > { %14336 = vmatprep.subr.bf16.mxu1 %v20111_v53  ;;  %v20135_v53 = vld [vmem:[%s22203_s17 + $0x3b04] ss:$16 sps:$4 sm:$0xff]  }
 0x426   : > { %14296 = vmatpush2.bf16.msra.mxu0 %v20106_v12  ;;  %v2788_v12 = vcombine.high %v23637_v6, %v23637_v6 }
 0x427   : > { %14337 = vmatpush2.bf16.msra.mxu1 %v20109_v37  ;;  %14297 = vmatprep.subr.bf16.mxu0 %v20114_v35  ;;  %v23647_v37 = vrot.slane %v23541_v11, %v22272_v50  ;;  %v20130_v35 = vld [vmem:[%s22203_s17 + $0x3900] ss:$16 sps:$4 sm:$0xff]  }
 0x428   : > { %14338 = vmatprep.subr.bf16.mxu1 %v20117_v7  ;;  %v20133_v7 = vld [vmem:[%s22203_s17 + $0x3b00] ss:$16 sps:$4 sm:$0xff]   ;;  %v23656_v41 = vrot.slane %v2788_v12, %v22272_v50 }
 0x429   : > { %25060 = vst [vmem:[#allocation36_spill] sm:$0xff] %v23647_v37  ;;  %v23660_v11 = vcombine.high %v23647_v37, %v23647_v37 }
 0x42a   : > { %14298 = vmatpush2.bf16.msra.mxu0 %v20112_v57  ;;  %v20138_v57 = vld [vmem:[%s22203_s17 + $0x3ce4] ss:$16 sps:$4 sm:$0xff]  }
 0x42b   : > { %14339 = vmatpush2.bf16.msra.mxu1 %v20115_v44  ;;  %14299 = vmatprep.subr.bf16.mxu0 %v20120_v38  ;;  %v20141_v44 = vld [vmem:[%s22203_s17 + $0x3ee4] ss:$16 sps:$4 sm:$0xff]   ;;  %v20136_v38 = vld [vmem:[%s22203_s17 + $0x3ce0] ss:$16 sps:$4 sm:$0xff]  }
 0x42c   : > { %14340 = vmatprep.subr.bf16.mxu1 %v20123_v30  ;;  %v20139_v30 = vld [vmem:[%s22203_s17 + $0x3ee0] ss:$16 sps:$4 sm:$0xff]  }
 0x42e   : > { %14300 = vmatpush2.bf16.msra.mxu0 %v20118_v2  ;;  %v20144_v2 = vld [vmem:[%s22203_s17 + $0x3cc4] ss:$16 sps:$4 sm:$0xff]  }
 0x42f   : > { %14341 = vmatpush2.bf16.msra.mxu1 %v20121_v16  ;;  %14301 = vmatprep.subr.bf16.mxu0 %v20126_v22  ;;  %v20147_v16 = vld [vmem:[%s22203_s17 + $0x3ec4] ss:$16 sps:$4 sm:$0xff]   ;;  %v20142_v22 = vld [vmem:[%s22203_s17 + $0x3cc0] ss:$16 sps:$4 sm:$0xff]  }
 0x430   : > { %14342 = vmatprep.subr.bf16.mxu1 %v20129_v28  ;;  %v20145_v28 = vld [vmem:[%s22203_s17 + $0x3ec0] ss:$16 sps:$4 sm:$0xff]  }
 0x432   : > { %14302 = vmatpush2.bf16.msra.mxu0 %v20124_v58  ;;  %v23668_v58 = vcombine.high %v23656_v41, %v23656_v41 }
 0x433   : > { %14343 = vmatpush2.bf16.msra.mxu1 %v20127_v8  ;;  %14303 = vmatprep.subr.bf16.mxu0 %v20132_v33 }
 0x434   : > { %14344 = vmatprep.subr.bf16.mxu1 %v20135_v53 }
 0x436   : > { %14304 = vmatpush2.bf16.msra.mxu0 %v20130_v35 }
 0x437   : > { %14345 = vmatpush2.bf16.msra.mxu1 %v20133_v7  ;;  %14355 = vmatprep.subr.bf16.mxu0 %v20138_v57  ;;  %v20150_v7 = vld [vmem:[%s22203_s17 + $0x3ca4] ss:$16 sps:$4 sm:$0xff]  }
 0x438   : > { %14396 = vmatprep.subr.bf16.mxu1 %v20141_v44  ;;  %v20153_v57 = vld [vmem:[%s22203_s17 + $0x3ea4] ss:$16 sps:$4 sm:$0xff]  }
 0x439   : > { %v14061_v8 = vpop.f32.mrf.mxu0  ;;  %14306 = vmatmul.mubr.bf16.vlgmr.msra.gmra.mxu0 %v23647_v37  ;;  %v20151_v37 = vld [vmem:[%s22203_s17 + $0x3ea0] ss:$16 sps:$4 sm:$0xff]  }
 0x43a   : > { %v14102_v33 = vpop.f32.mrf.mxu1  ;;  %14347 = vmatmul.mubr.bf16.vlgmr.msra.gmra.mxu1 %v23660_v11  ;;  %v14062_v53 = vadd.f32 %v14061_v8, %v23579_v48  ;;  %14356 = vmatpush1.bf16.msra.mxu0 %v20136_v38  ;;  %v20159_v8 = vld [vmem:[%s22203_s17 + $0x3e84] ss:$16 sps:$4 sm:$0xff]  }
 0x43b   : > { %14397 = vmatpush1.bf16.msra.mxu1 %v20139_v30  ;;  %v14063_v12 = vpop.f32.mrf.mxu0  ;;  %14357 = vmatprep.subr.bf16.mxu0 %v20144_v2 }
 0x43c   : > { %v14104_v35 = vpop.f32.mrf.mxu1  ;;  %14398 = vmatprep.subr.bf16.mxu1 %v20147_v16  ;;  %v23675_v44 = vadd.f32 %v14102_v33, %v14062_v53  ;;  %v14064_v51 = vadd.f32 %v14063_v12, %v23586_v62  ;;  %14387 = vmatprep.mubr.bf16.mxu0 %v23656_v41  ;;  %v20156_v62 = vld [vmem:[%s22203_s17 + $0x3c84] ss:$16 sps:$4 sm:$0xff]   ;;  %v20154_v33 = vld [vmem:[%s22203_s17 + $0x3c80] ss:$16 sps:$4 sm:$0xff]  }
 0x43d   : > { %14428 = vmatprep.mubr.bf16.mxu1 %v23668_v58  ;;  %v14065_v48 = vpop.f32.mrf.mxu0  ;;  %v20157_v53 = vld [vmem:[%s22203_s17 + $0x3e80] ss:$16 sps:$4 sm:$0xff]  }
 0x43e   : > { %v14106_v38 = vpop.f32.mrf.mxu1  ;;  %v23682_v30 = vadd.f32 %v14104_v35, %v14064_v51  ;;  %14358 = vmatpush1.bf16.msra.mxu0 %v20142_v22  ;;  %v20162_v51 = vld [vmem:[%s22203_s17 + $0x3c64] ss:$16 sps:$4 sm:$0xff]   ;;  %v20163_v12 = vld [vmem:[%s22203_s17 + $0x3e60] ss:$16 sps:$4 sm:$0xff]  }
 0x43f   : > { %14399 = vmatpush1.bf16.msra.mxu1 %v20145_v28  ;;  %v14066_v2 = vpop.f32.mrf.mxu0  ;;  %14359 = vmatprep.subr.bf16.mxu0 %v20150_v7  ;;  %v20165_v22 = vld [vmem:[%s22203_s17 + $0x3e64] ss:$16 sps:$4 sm:$0xff]   ;;  %v20160_v28 = vld [vmem:[%s22203_s17 + $0x3c60] ss:$16 sps:$4 sm:$0xff]  }
 0x440   : > { %v14107_v16 = vpop.f32.mrf.mxu1  ;;  %14400 = vmatprep.subr.bf16.mxu1 %v20153_v57  ;;  %v20166_v35 = vld [vmem:[%s22203_s17 + $0x3c40] ss:$16 sps:$4 sm:$0xff]   ;;  %v20174_v57 = vld [vmem:[%s22203_s17 + $0x3c24] ss:$16 sps:$4 sm:$0xff]  }
 0x441   : > { %v20169_v7 = vld [vmem:[%s22203_s17 + $0x3e40] ss:$16 sps:$4 sm:$0xff]   ;;  %v20177_v48 = vld [vmem:[%s22203_s17 + $0x3e24] ss:$16 sps:$4 sm:$0xff]  }
 0x442   : > { %14360 = vmatpush1.bf16.msra.mxu0 %v20148_v36  ;;  %v20168_v36 = vld [vmem:[%s22203_s17 + $0x3c44] ss:$16 sps:$4 sm:$0xff]   ;;  %v20172_v38 = vld [vmem:[%s22203_s17 + $0x3c20] ss:$16 sps:$4 sm:$0xff]  }
 0x443   : > { %14401 = vmatpush1.bf16.msra.mxu1 %v20151_v37  ;;  %14361 = vmatprep.subr.bf16.mxu0 %v20156_v62  ;;  %v20171_v37 = vld [vmem:[%s22203_s17 + $0x3e44] ss:$16 sps:$4 sm:$0xff]   ;;  %v20175_v2 = vld [vmem:[%s22203_s17 + $0x3e20] ss:$16 sps:$4 sm:$0xff]  }
 0x444   : > { %14402 = vmatprep.subr.bf16.mxu1 %v20159_v8  ;;  %v20180_v16 = vld [vmem:[%s22203_s17 + $0x3c04] ss:$16 sps:$4 sm:$0xff]   ;;  %v20178_v8 = vld [vmem:[%s22203_s17 + $0x3c00] ss:$16 sps:$4 sm:$0xff]  }
 0x445   : > { %v20183_v62 = vld [vmem:[%s22203_s17 + $0x3e04] ss:$16 sps:$4 sm:$0xff]  }
 0x446   : > { %14362 = vmatpush1.bf16.msra.mxu0 %v20154_v33  ;;  %v20181_v33 = vld [vmem:[%s22203_s17 + $0x3e00] ss:$16 sps:$4 sm:$0xff]  }
 0x447   : > { %14403 = vmatpush1.bf16.msra.mxu1 %v20157_v53  ;;  %14363 = vmatprep.subr.bf16.mxu0 %v20162_v51  ;;  %v20186_v53 = vld [vmem:[%s22203_s17 + $0x3de4] ss:$16 sps:$4 sm:$0xff]  }
 0x448   : > { %14404 = vmatprep.subr.bf16.mxu1 %v20165_v22  ;;  %v20189_v51 = vld [vmem:[%s22203_s17 + $0x3fe4] ss:$16 sps:$4 sm:$0xff]   ;;  %v20184_v22 = vld [vmem:[%s22203_s17 + $0x3de0] ss:$16 sps:$4 sm:$0xff]  }
 0x44a   : > { %14364 = vmatpush1.bf16.msra.mxu0 %v20160_v28  ;;  %v20187_v28 = vld [vmem:[%s22203_s17 + $0x3fe0] ss:$16 sps:$4 sm:$0xff]  }
 0x44b   : > { %14405 = vmatpush1.bf16.msra.mxu1 %v20163_v12  ;;  %14365 = vmatprep.subr.bf16.mxu0 %v20168_v36  ;;  %v20192_v12 = vld [vmem:[%s22203_s17 + $0x3dc4] ss:$16 sps:$4 sm:$0xff]  }
 0x44c   : > { %14406 = vmatprep.subr.bf16.mxu1 %v20171_v37  ;;  %v20195_v36 = vld [vmem:[%s22203_s17 + $0x3fc4] ss:$16 sps:$4 sm:$0xff]   ;;  %v20190_v37 = vld [vmem:[%s22203_s17 + $0x3dc0] ss:$16 sps:$4 sm:$0xff]  }
 0x44e   : > { %14366 = vmatpush1.bf16.msra.mxu0 %v20166_v35  ;;  %v20193_v35 = vld [vmem:[%s22203_s17 + $0x3fc0] ss:$16 sps:$4 sm:$0xff]  }
 0x44f   : > { %14407 = vmatpush1.bf16.msra.mxu1 %v20169_v7  ;;  %14367 = vmatprep.subr.bf16.mxu0 %v20174_v57  ;;  %v20198_v7 = vld [vmem:[%s22203_s17 + $0x3da4] ss:$16 sps:$4 sm:$0xff]  }
 0x450   : > { %14408 = vmatprep.subr.bf16.mxu1 %v20177_v48  ;;  %v20201_v57 = vld [vmem:[%s22203_s17 + $0x3fa4] ss:$16 sps:$4 sm:$0xff]   ;;  %v20196_v48 = vld [vmem:[%s22203_s17 + $0x3da0] ss:$16 sps:$4 sm:$0xff]  }
 0x452   : > { %14368 = vmatpush1.bf16.msra.mxu0 %v20172_v38  ;;  %v20199_v38 = vld [vmem:[%s22203_s17 + $0x3fa0] ss:$16 sps:$4 sm:$0xff]  }
 0x453   : > { %14409 = vmatpush1.bf16.msra.mxu1 %v20175_v2  ;;  %14369 = vmatprep.subr.bf16.mxu0 %v20180_v16  ;;  %v20204_v2 = vld [vmem:[%s22203_s17 + $0x3d84] ss:$16 sps:$4 sm:$0xff]  }
 0x454   : > { %14410 = vmatprep.subr.bf16.mxu1 %v20183_v62  ;;  %v20207_v16 = vld [vmem:[%s22203_s17 + $0x3f84] ss:$16 sps:$4 sm:$0xff]   ;;  %v20202_v62 = vld [vmem:[%s22203_s17 + $0x3d80] ss:$16 sps:$4 sm:$0xff]  }
 0x456   : > { %14370 = vmatpush1.bf16.msra.mxu0 %v20178_v8  ;;  %v20205_v8 = vld [vmem:[%s22203_s17 + $0x3f80] ss:$16 sps:$4 sm:$0xff]  }
 0x457   : > { %14411 = vmatpush1.bf16.msra.mxu1 %v20181_v33  ;;  %14371 = vmatprep.subr.bf16.mxu0 %v20186_v53  ;;  %v20210_v33 = vld [vmem:[%s22203_s17 + $0x3d64] ss:$16 sps:$4 sm:$0xff]  }
 0x458   : > { %14412 = vmatprep.subr.bf16.mxu1 %v20189_v51  ;;  %v20213_v53 = vld [vmem:[%s22203_s17 + $0x3f64] ss:$16 sps:$4 sm:$0xff]   ;;  %v20208_v51 = vld [vmem:[%s22203_s17 + $0x3d60] ss:$16 sps:$4 sm:$0xff]  }
 0x45a   : > { %14372 = vmatpush2.bf16.msra.mxu0 %v20184_v22  ;;  %v20211_v22 = vld [vmem:[%s22203_s17 + $0x3f60] ss:$16 sps:$4 sm:$0xff]  }
 0x45b   : > { %14413 = vmatpush2.bf16.msra.mxu1 %v20187_v28  ;;  %14373 = vmatprep.subr.bf16.mxu0 %v20192_v12  ;;  %v20216_v28 = vld [vmem:[%s22203_s17 + $0x3d44] ss:$16 sps:$4 sm:$0xff]  }
 0x45c   : > { %14414 = vmatprep.subr.bf16.mxu1 %v20195_v36  ;;  %v20219_v12 = vld [vmem:[%s22203_s17 + $0x3f44] ss:$16 sps:$4 sm:$0xff]   ;;  %v20214_v36 = vld [vmem:[%s22203_s17 + $0x3d40] ss:$16 sps:$4 sm:$0xff]  }
 0x45e   : > { %14374 = vmatpush2.bf16.msra.mxu0 %v20190_v37  ;;  %v20217_v37 = vld [vmem:[%s22203_s17 + $0x3f40] ss:$16 sps:$4 sm:$0xff]  }
 0x45f   : > { %14415 = vmatpush2.bf16.msra.mxu1 %v20193_v35  ;;  %14375 = vmatprep.subr.bf16.mxu0 %v20198_v7  ;;  %v20222_v35 = vld [vmem:[%s22203_s17 + $0x3d24] ss:$16 sps:$4 sm:$0xff]  }
 0x460   : > { %14416 = vmatprep.subr.bf16.mxu1 %v20201_v57  ;;  %v20225_v7 = vld [vmem:[%s22203_s17 + $0x3f24] ss:$16 sps:$4 sm:$0xff]   ;;  %v20220_v57 = vld [vmem:[%s22203_s17 + $0x3d20] ss:$16 sps:$4 sm:$0xff]  }
 0x462   : > { %14376 = vmatpush2.bf16.msra.mxu0 %v20196_v48  ;;  %v20223_v48 = vld [vmem:[%s22203_s17 + $0x3f20] ss:$16 sps:$4 sm:$0xff]  }
 0x463   : > { %14417 = vmatpush2.bf16.msra.mxu1 %v20199_v38  ;;  %14377 = vmatprep.subr.bf16.mxu0 %v20204_v2  ;;  %v20228_v38 = vld [vmem:[%s22203_s17 + $0x3d04] ss:$16 sps:$4 sm:$0xff]  }
 0x464   : > { %14418 = vmatprep.subr.bf16.mxu1 %v20207_v16  ;;  %v20231_v2 = vld [vmem:[%s22203_s17 + $0x3f04] ss:$16 sps:$4 sm:$0xff]   ;;  %v23736_v16 = vrot.slane %v23637_v6, %v22272_v50  ;;  %v20241_v50 = vld [vmem:[%s22203_s17 + $0xcc] ss:$16 sps:$4 sm:$0xff]  }
 0x465   : > { %v20244_v6 = vld [vmem:[%s22203_s17 + $0x2cc] ss:$16 sps:$4 sm:$0xff]  }
 0x466   : > { %14378 = vmatpush2.bf16.msra.mxu0 %v20202_v62  ;;  %v20226_v62 = vld [vmem:[%s22203_s17 + $0x3d00] ss:$16 sps:$4 sm:$0xff]  }
 0x467   : > { %14419 = vmatpush2.bf16.msra.mxu1 %v20205_v8  ;;  %14379 = vmatprep.subr.bf16.mxu0 %v20210_v33  ;;  %v20229_v8 = vld [vmem:[%s22203_s17 + $0x3f00] ss:$16 sps:$4 sm:$0xff]   ;;  %v20235_v33 = vld [vmem:[%s22203_s17 + $0xec] ss:$16 sps:$4 sm:$0xff]  }
 0x468   : > { %14420 = vmatprep.subr.bf16.mxu1 %v20213_v53  ;;  %v20238_v53 = vld [vmem:[%s22203_s17 + $0x2ec] ss:$16 sps:$4 sm:$0xff]  }
 0x46a   : > { %14380 = vmatpush2.bf16.msra.mxu0 %v20208_v51  ;;  %v20233_v51 = vld [vmem:[%s22203_s17 + $0xe8] ss:$16 sps:$4 sm:$0xff]  }
 0x46b   : > { %14421 = vmatpush2.bf16.msra.mxu1 %v20211_v22  ;;  %14381 = vmatprep.subr.bf16.mxu0 %v20216_v28  ;;  %v20236_v22 = vld [vmem:[%s22203_s17 + $0x2e8] ss:$16 sps:$4 sm:$0xff]   ;;  %v23746_v28 = vcombine.high %v23736_v16, %v23736_v16 }
 0x46c   : > { %14422 = vmatprep.subr.bf16.mxu1 %v20219_v12  ;;  %v20239_v12 = vld [vmem:[%s22203_s17 + $0xc8] ss:$16 sps:$4 sm:$0xff]  }
 0x46e   : > { %14382 = vmatpush2.bf16.msra.mxu0 %v20214_v36  ;;  %v20242_v36 = vld [vmem:[%s22203_s17 + $0x2c8] ss:$16 sps:$4 sm:$0xff]  }
 0x46f   : > { %14423 = vmatpush2.bf16.msra.mxu1 %v20217_v37  ;;  %14383 = vmatprep.subr.bf16.mxu0 %v20222_v35 }
 0x470   : > { %14424 = vmatprep.subr.bf16.mxu1 %v20225_v7 }
 0x472   : > { %14384 = vmatpush2.bf16.msra.mxu0 %v20220_v57 }
 0x473   : > { %14425 = vmatpush2.bf16.msra.mxu1 %v20223_v48  ;;  %14385 = vmatprep.subr.bf16.mxu0 %v20228_v38  ;;  %v20247_v38 = vld [vmem:[%s22203_s17 + $0xac] ss:$16 sps:$4 sm:$0xff]  }
 0x474   : > { %14426 = vmatprep.subr.bf16.mxu1 %v20231_v2  ;;  %v20250_v2 = vld [vmem:[%s22203_s17 + $0x2ac] ss:$16 sps:$4 sm:$0xff]  }
 0x476   : > { %14386 = vmatpush2.bf16.msra.mxu0 %v20226_v62 }
 0x477   : > { %14427 = vmatpush2.bf16.msra.mxu1 %v20229_v8  ;;  %14437 = vmatprep.subr.bf16.mxu0 %v20235_v33  ;;  %v20245_v33 = vld [vmem:[%s22203_s17 + $0xa8] ss:$16 sps:$4 sm:$0xff]  }
 0x478   : > { %14478 = vmatprep.subr.bf16.mxu1 %v20238_v53  ;;  %v20248_v53 = vld [vmem:[%s22203_s17 + $0x2a8] ss:$16 sps:$4 sm:$0xff]  }
 0x479   : > { %v14143_v37 = vpop.f32.mrf.mxu0  ;;  %14388 = vmatmul.mubr.bf16.vlgmr.msra.gmra.mxu0 %v23736_v16 }
 0x47a   : > { %v14184_v35 = vpop.f32.mrf.mxu1  ;;  %14429 = vmatmul.mubr.bf16.vlgmr.msra.gmra.mxu1 %v23746_v28  ;;  %v14144_v7 = vadd.f32 %v14143_v37, %v23675_v44  ;;  %14438 = vmatpush1.bf16.msra.mxu0 %v20233_v51  ;;  %v20254_v37 = vld [vmem:[%s22203_s17 + $0x288] ss:$16 sps:$4 sm:$0xff]  }
 0x47b   : > { %14479 = vmatpush1.bf16.msra.mxu1 %v20236_v22  ;;  %v14145_v57 = vpop.f32.mrf.mxu0  ;;  %14439 = vmatprep.subr.bf16.mxu0 %v20241_v50 }
 0x47c   : > { %v14186_v48 = vpop.f32.mrf.mxu1  ;;  %14480 = vmatprep.subr.bf16.mxu1 %v20244_v6  ;;  %v23757_v62 = vadd.f32 %v14184_v35, %v14144_v7  ;;  %v14146_v8 = vadd.f32 %v14145_v57, %v23682_v30  ;;  %14469 = vmatprep.mubr.bf16.mxu0 %v22284_v61  ;;  %v20253_v30 = vld [vmem:[%s22203_s17 + $0x8c] ss:$16 sps:$4 sm:$0xff]   ;;  %v20257_v35 = vld [vmem:[%s22203_s17 + $0x68] ss:$16 sps:$4 sm:$0xff]  }
 0x47d   : > { %14510 = vmatprep.mubr.bf16.mxu1 %v22291_v1  ;;  %v14147_v44 = vpop.f32.mrf.mxu0  ;;  %v20256_v61 = vld [vmem:[%s22203_s17 + $0x28c] ss:$16 sps:$4 sm:$0xff]   ;;  %v20251_v1 = vld [vmem:[%s22203_s17 + $0x88] ss:$16 sps:$4 sm:$0xff]  }
 0x47e   : > { %v14188_v51 = vpop.f32.mrf.mxu1  ;;  %v23764_v22 = vadd.f32 %v14186_v48, %v14146_v8  ;;  %14440 = vmatpush1.bf16.msra.mxu0 %v20239_v12  ;;  %v20259_v12 = vld [vmem:[%s22203_s17 + $0x6c] ss:$16 sps:$4 sm:$0xff]   ;;  %v20260_v7 = vld [vmem:[%s22203_s17 + $0x268] ss:$16 sps:$4 sm:$0xff]  }
 0x47f   : > { %14481 = vmatpush1.bf16.msra.mxu1 %v20242_v36  ;;  %v14148_v50 = vpop.f32.mrf.mxu0  ;;  %14441 = vmatprep.subr.bf16.mxu0 %v20247_v38  ;;  %v20262_v36 = vld [vmem:[%s22203_s17 + $0x26c] ss:$16 sps:$4 sm:$0xff]   ;;  %v20263_v38 = vld [vmem:[%s22203_s17 + $0x48] ss:$16 sps:$4 sm:$0xff]  }
 0x480   : > { %v14189_v6 = vpop.f32.mrf.mxu1  ;;  %14482 = vmatprep.subr.bf16.mxu1 %v20250_v2  ;;  %v20265_v57 = vld [vmem:[%s22203_s17 + $0x4c] ss:$16 sps:$4 sm:$0xff]   ;;  %v20266_v2 = vld [vmem:[%s22203_s17 + $0x248] ss:$16 sps:$4 sm:$0xff]  }
 0x481   : > { %v20268_v48 = vld [vmem:[%s22203_s17 + $0x24c] ss:$16 sps:$4 sm:$0xff]   ;;  %v20272_v44 = vld [vmem:[%s22203_s17 + $0x228] ss:$16 sps:$4 sm:$0xff]  }
 0x482   : > { %14442 = vmatpush1.bf16.msra.mxu0 %v20245_v33  ;;  %v20271_v8 = vld [vmem:[%s22203_s17 + $0x2c] ss:$16 sps:$4 sm:$0xff]   ;;  %v20275_v6 = vld [vmem:[%s22203_s17 + $0x8] ss:$16 sps:$4 sm:$0xff]  }
 0x483   : > { %14483 = vmatpush1.bf16.msra.mxu1 %v20248_v53  ;;  %14443 = vmatprep.subr.bf16.mxu0 %v20253_v30  ;;  %v20274_v33 = vld [vmem:[%s22203_s17 + $0x22c] ss:$16 sps:$4 sm:$0xff]   ;;  %v20269_v53 = vld [vmem:[%s22203_s17 + $0x28] ss:$16 sps:$4 sm:$0xff]  }
 0x484   : > { %14484 = vmatprep.subr.bf16.mxu1 %v20256_v61  ;;  %v20277_v51 = vld [vmem:[%s22203_s17 + $0xc] ss:$16 sps:$4 sm:$0xff]   ;;  %v20278_v30 = vld [vmem:[%s22203_s17 + $0x208] ss:$16 sps:$4 sm:$0xff]  }
 0x485   : > { %v20280_v50 = vld [vmem:[%s22203_s17 + $0x20c] ss:$16 sps:$4 sm:$0xff]  }
 0x486   : > { %14444 = vmatpush1.bf16.msra.mxu0 %v20251_v1  ;;  %v20283_v61 = vld [vmem:[%s22203_s17 + $0x1ec] ss:$16 sps:$4 sm:$0xff]  }
 0x487   : > { %14485 = vmatpush1.bf16.msra.mxu1 %v20254_v37  ;;  %14445 = vmatprep.subr.bf16.mxu0 %v20259_v12  ;;  %v20286_v1 = vld [vmem:[%s22203_s17 + $0x3ec] ss:$16 sps:$4 sm:$0xff]   ;;  %v20281_v37 = vld [vmem:[%s22203_s17 + $0x1e8] ss:$16 sps:$4 sm:$0xff]  }
 0x488   : > { %14486 = vmatprep.subr.bf16.mxu1 %v20262_v36  ;;  %v20284_v12 = vld [vmem:[%s22203_s17 + $0x3e8] ss:$16 sps:$4 sm:$0xff]   ;;  %v20289_v36 = vld [vmem:[%s22203_s17 + $0x1cc] ss:$16 sps:$4 sm:$0xff]  }
 0x48a   : > { %14446 = vmatpush1.bf16.msra.mxu0 %v20257_v35  ;;  %v20292_v35 = vld [vmem:[%s22203_s17 + $0x3cc] ss:$16 sps:$4 sm:$0xff]  }
 0x48b   : > { %14487 = vmatpush1.bf16.msra.mxu1 %v20260_v7  ;;  %14447 = vmatprep.subr.bf16.mxu0 %v20265_v57  ;;  %v20287_v7 = vld [vmem:[%s22203_s17 + $0x1c8] ss:$16 sps:$4 sm:$0xff]  }
 0x48c   : > { %14488 = vmatprep.subr.bf16.mxu1 %v20268_v48  ;;  %v20290_v57 = vld [vmem:[%s22203_s17 + $0x3c8] ss:$16 sps:$4 sm:$0xff]   ;;  %v20295_v48 = vld [vmem:[%s22203_s17 + $0x1ac] ss:$16 sps:$4 sm:$0xff]  }
 0x48e   : > { %14448 = vmatpush1.bf16.msra.mxu0 %v20263_v38  ;;  %v20298_v38 = vld [vmem:[%s22203_s17 + $0x3ac] ss:$16 sps:$4 sm:$0xff]  }
 0x48f   : > { %14489 = vmatpush1.bf16.msra.mxu1 %v20266_v2  ;;  %14449 = vmatprep.subr.bf16.mxu0 %v20271_v8  ;;  %v20293_v2 = vld [vmem:[%s22203_s17 + $0x1a8] ss:$16 sps:$4 sm:$0xff]  }
 0x490   : > { %14490 = vmatprep.subr.bf16.mxu1 %v20274_v33  ;;  %v20296_v8 = vld [vmem:[%s22203_s17 + $0x3a8] ss:$16 sps:$4 sm:$0xff]   ;;  %v20301_v33 = vld [vmem:[%s22203_s17 + $0x18c] ss:$16 sps:$4 sm:$0xff]  }
 0x492   : > { %14450 = vmatpush1.bf16.msra.mxu0 %v20269_v53  ;;  %v20304_v53 = vld [vmem:[%s22203_s17 + $0x38c] ss:$16 sps:$4 sm:$0xff]  }
 0x493   : > { %14491 = vmatpush1.bf16.msra.mxu1 %v20272_v44  ;;  %14451 = vmatprep.subr.bf16.mxu0 %v20277_v51  ;;  %v20299_v44 = vld [vmem:[%s22203_s17 + $0x188] ss:$16 sps:$4 sm:$0xff]  }
 0x494   : > { %14492 = vmatprep.subr.bf16.mxu1 %v20280_v50  ;;  %v20302_v51 = vld [vmem:[%s22203_s17 + $0x388] ss:$16 sps:$4 sm:$0xff]   ;;  %v20307_v50 = vld [vmem:[%s22203_s17 + $0x16c] ss:$16 sps:$4 sm:$0xff]  }
 0x496   : > { %14452 = vmatpush1.bf16.msra.mxu0 %v20275_v6  ;;  %v20310_v6 = vld [vmem:[%s22203_s17 + $0x36c] ss:$16 sps:$4 sm:$0xff]  }
 0x497   : > { %14493 = vmatpush1.bf16.msra.mxu1 %v20278_v30  ;;  %14453 = vmatprep.subr.bf16.mxu0 %v20283_v61  ;;  %v20305_v30 = vld [vmem:[%s22203_s17 + $0x168] ss:$16 sps:$4 sm:$0xff]  }
 0x498   : > { %14494 = vmatprep.subr.bf16.mxu1 %v20286_v1  ;;  %v20308_v61 = vld [vmem:[%s22203_s17 + $0x368] ss:$16 sps:$4 sm:$0xff]   ;;  %v20313_v1 = vld [vmem:[%s22203_s17 + $0x14c] ss:$16 sps:$4 sm:$0xff]  }
 0x49a   : > { %14454 = vmatpush2.bf16.msra.mxu0 %v20281_v37  ;;  %v20316_v37 = vld [vmem:[%s22203_s17 + $0x34c] ss:$16 sps:$4 sm:$0xff]  }
 0x49b   : > { %14495 = vmatpush2.bf16.msra.mxu1 %v20284_v12  ;;  %14455 = vmatprep.subr.bf16.mxu0 %v20289_v36  ;;  %v20311_v12 = vld [vmem:[%s22203_s17 + $0x148] ss:$16 sps:$4 sm:$0xff]  }
 0x49c   : > { %14496 = vmatprep.subr.bf16.mxu1 %v20292_v35  ;;  %v20314_v36 = vld [vmem:[%s22203_s17 + $0x348] ss:$16 sps:$4 sm:$0xff]   ;;  %v20319_v35 = vld [vmem:[%s22203_s17 + $0x12c] ss:$16 sps:$4 sm:$0xff]  }
 0x49e   : > { %14456 = vmatpush2.bf16.msra.mxu0 %v20287_v7  ;;  %v20322_v7 = vld [vmem:[%s22203_s17 + $0x32c] ss:$16 sps:$4 sm:$0xff]  }
 0x49f   : > { %14497 = vmatpush2.bf16.msra.mxu1 %v20290_v57  ;;  %14457 = vmatprep.subr.bf16.mxu0 %v20295_v48  ;;  %v20317_v57 = vld [vmem:[%s22203_s17 + $0x128] ss:$16 sps:$4 sm:$0xff]  }
 0x4a0   : > { %14498 = vmatprep.subr.bf16.mxu1 %v20298_v38  ;;  %v20320_v48 = vld [vmem:[%s22203_s17 + $0x328] ss:$16 sps:$4 sm:$0xff]   ;;  %v20325_v38 = vld [vmem:[%s22203_s17 + $0x10c] ss:$16 sps:$4 sm:$0xff]  }
 0x4a2   : > { %14458 = vmatpush2.bf16.msra.mxu0 %v20293_v2  ;;  %v20328_v2 = vld [vmem:[%s22203_s17 + $0x30c] ss:$16 sps:$4 sm:$0xff]  }
 0x4a3   : > { %14499 = vmatpush2.bf16.msra.mxu1 %v20296_v8  ;;  %14459 = vmatprep.subr.bf16.mxu0 %v20301_v33  ;;  %v20323_v8 = vld [vmem:[%s22203_s17 + $0x108] ss:$16 sps:$4 sm:$0xff]  }
 0x4a4   : > { %14500 = vmatprep.subr.bf16.mxu1 %v20304_v53  ;;  %v20326_v33 = vld [vmem:[%s22203_s17 + $0x308] ss:$16 sps:$4 sm:$0xff]   ;;  %v20331_v53 = vld [vmem:[%s22203_s17 + $0x4ec] ss:$16 sps:$4 sm:$0xff]  }
 0x4a6   : > { %14460 = vmatpush2.bf16.msra.mxu0 %v20299_v44  ;;  %v20334_v44 = vld [vmem:[%s22203_s17 + $0x6ec] ss:$16 sps:$4 sm:$0xff]  }
 0x4a7   : > { %14501 = vmatpush2.bf16.msra.mxu1 %v20302_v51  ;;  %14461 = vmatprep.subr.bf16.mxu0 %v20307_v50  ;;  %v20329_v51 = vld [vmem:[%s22203_s17 + $0x4e8] ss:$16 sps:$4 sm:$0xff]  }
 0x4a8   : > { %14502 = vmatprep.subr.bf16.mxu1 %v20310_v6  ;;  %v20332_v50 = vld [vmem:[%s22203_s17 + $0x6e8] ss:$16 sps:$4 sm:$0xff]   ;;  %v20337_v6 = vld [vmem:[%s22203_s17 + $0x4cc] ss:$16 sps:$4 sm:$0xff]  }
 0x4aa   : > { %14462 = vmatpush2.bf16.msra.mxu0 %v20305_v30  ;;  %v20340_v30 = vld [vmem:[%s22203_s17 + $0x6cc] ss:$16 sps:$4 sm:$0xff]  }
 0x4ab   : > { %14503 = vmatpush2.bf16.msra.mxu1 %v20308_v61  ;;  %14463 = vmatprep.subr.bf16.mxu0 %v20313_v1 }
 0x4ac   : > { %14504 = vmatprep.subr.bf16.mxu1 %v20316_v37 }
 0x4ae   : > { %14464 = vmatpush2.bf16.msra.mxu0 %v20311_v12  ;;  %v20335_v12 = vld [vmem:[%s22203_s17 + $0x4c8] ss:$16 sps:$4 sm:$0xff]  }
 0x4af   : > { %14505 = vmatpush2.bf16.msra.mxu1 %v20314_v36  ;;  %14465 = vmatprep.subr.bf16.mxu0 %v20319_v35  ;;  %v20338_v36 = vld [vmem:[%s22203_s17 + $0x6c8] ss:$16 sps:$4 sm:$0xff]  }
 0x4b0   : > { %14506 = vmatprep.subr.bf16.mxu1 %v20322_v7 }
 0x4b2   : > { %14466 = vmatpush2.bf16.msra.mxu0 %v20317_v57  ;;  %v20343_v57 = vld [vmem:[%s22203_s17 + $0x4ac] ss:$16 sps:$4 sm:$0xff]  }
 0x4b3   : > { %14507 = vmatpush2.bf16.msra.mxu1 %v20320_v48  ;;  %14467 = vmatprep.subr.bf16.mxu0 %v20325_v38  ;;  %v20346_v48 = vld [vmem:[%s22203_s17 + $0x6ac] ss:$16 sps:$4 sm:$0xff]  }
 0x4b4   : > { %14508 = vmatprep.subr.bf16.mxu1 %v20328_v2 }
 0x4b6   : > { %14468 = vmatpush2.bf16.msra.mxu0 %v20323_v8  ;;  %v20341_v8 = vld [vmem:[%s22203_s17 + $0x4a8] ss:$16 sps:$4 sm:$0xff]  }
 0x4b7   : > { %14509 = vmatpush2.bf16.msra.mxu1 %v20326_v33  ;;  %14519 = vmatprep.subr.bf16.mxu0 %v20331_v53  ;;  %v20344_v33 = vld [vmem:[%s22203_s17 + $0x6a8] ss:$16 sps:$4 sm:$0xff]  }
 0x4b8   : > { %14560 = vmatprep.subr.bf16.mxu1 %v20334_v44 }
 0x4b9   : > { %v14225_v61 = vpop.f32.mrf.mxu0  ;;  %14470 = vmatmul.mubr.bf16.vlgmr.msra.gmra.mxu0 %v22310_v14 }
 0x4ba   : > { %v14266_v1 = vpop.f32.mrf.mxu1  ;;  %14511 = vmatmul.mubr.bf16.vlgmr.msra.gmra.mxu1 %v22320_v19  ;;  %v14226_v37 = vadd.f32 %v14225_v61, %v23757_v62  ;;  %14520 = vmatpush1.bf16.msra.mxu0 %v20329_v51  ;;  %v20350_v51 = vld [vmem:[%s22203_s17 + $0x688] ss:$16 sps:$4 sm:$0xff]  }
 0x4bb   : > { %14561 = vmatpush1.bf16.msra.mxu1 %v20332_v50  ;;  %v14227_v35 = vpop.f32.mrf.mxu0  ;;  %14521 = vmatprep.subr.bf16.mxu0 %v20337_v6  ;;  %v20355_v50 = vld [vmem:[%s22203_s17 + $0x46c] ss:$16 sps:$4 sm:$0xff]   ;;  %v20356_v61 = vld [vmem:[%s22203_s17 + $0x668] ss:$16 sps:$4 sm:$0xff]  }
 0x4bc   : > { %v14268_v7 = vpop.f32.mrf.mxu1  ;;  %14562 = vmatprep.subr.bf16.mxu1 %v20340_v30  ;;  %v23831_v38 = vadd.f32 %v14266_v1, %v14226_v37  ;;  %v14228_v14 = vadd.f32 %v14227_v35, %v23764_v22  ;;  %14551 = vmatprep.mubr.bf16.mxu0 %v22316_v18  ;;  %v20349_v18 = vld [vmem:[%s22203_s17 + $0x48c] ss:$16 sps:$4 sm:$0xff]   ;;  %v20347_v22 = vld [vmem:[%s22203_s17 + $0x488] ss:$16 sps:$4 sm:$0xff]  }
 0x4bd   : > { %14592 = vmatprep.mubr.bf16.mxu1 %v22328_v24  ;;  %v14229_v19 = vpop.f32.mrf.mxu0  ;;  %v20352_v24 = vld [vmem:[%s22203_s17 + $0x68c] ss:$16 sps:$4 sm:$0xff]   ;;  %v20353_v30 = vld [vmem:[%s22203_s17 + $0x468] ss:$16 sps:$4 sm:$0xff]  }
 0x4be   : > { %v14270_v62 = vpop.f32.mrf.mxu1  ;;  %v23836_v2 = vadd.f32 %v14268_v7, %v14228_v14  ;;  %14522 = vmatpush1.bf16.msra.mxu0 %v20335_v12  ;;  %v20358_v6 = vld [vmem:[%s22203_s17 + $0x66c] ss:$16 sps:$4 sm:$0xff]   ;;  %v20359_v12 = vld [vmem:[%s22203_s17 + $0x448] ss:$16 sps:$4 sm:$0xff]  }
 0x4bf   : > { %14563 = vmatpush1.bf16.msra.mxu1 %v20338_v36  ;;  %v14230_v53 = vpop.f32.mrf.mxu0  ;;  %14523 = vmatprep.subr.bf16.mxu0 %v20343_v57  ;;  %v20361_v1 = vld [vmem:[%s22203_s17 + $0x44c] ss:$16 sps:$4 sm:$0xff]   ;;  %v20362_v36 = vld [vmem:[%s22203_s17 + $0x648] ss:$16 sps:$4 sm:$0xff]  }
 0x4c0   : > { %v14271_v44 = vpop.f32.mrf.mxu1  ;;  %14564 = vmatprep.subr.bf16.mxu1 %v20346_v48  ;;  %v20364_v37 = vld [vmem:[%s22203_s17 + $0x64c] ss:$16 sps:$4 sm:$0xff]   ;;  %v20365_v57 = vld [vmem:[%s22203_s17 + $0x428] ss:$16 sps:$4 sm:$0xff]  }
 0x4c1   : > { %v20367_v35 = vld [vmem:[%s22203_s17 + $0x42c] ss:$16 sps:$4 sm:$0xff]   ;;  %v20368_v48 = vld [vmem:[%s22203_s17 + $0x628] ss:$16 sps:$4 sm:$0xff]  }
 0x4c2   : > { %14524 = vmatpush1.bf16.msra.mxu0 %v20341_v8  ;;  %v20370_v7 = vld [vmem:[%s22203_s17 + $0x62c] ss:$16 sps:$4 sm:$0xff]   ;;  %v20371_v62 = vld [vmem:[%s22203_s17 + $0x408] ss:$16 sps:$4 sm:$0xff]  }
 0x4c3   : > { %14565 = vmatpush1.bf16.msra.mxu1 %v20344_v33  ;;  %14525 = vmatprep.subr.bf16.mxu0 %v20349_v18  ;;  %v20373_v14 = vld [vmem:[%s22203_s17 + $0x40c] ss:$16 sps:$4 sm:$0xff]   ;;  %v20374_v8 = vld [vmem:[%s22203_s17 + $0x608] ss:$16 sps:$4 sm:$0xff]  }
 0x4c4   : > { %14566 = vmatprep.subr.bf16.mxu1 %v20352_v24  ;;  %v20376_v19 = vld [vmem:[%s22203_s17 + $0x60c] ss:$16 sps:$4 sm:$0xff]   ;;  %v20377_v44 = vld [vmem:[%s22203_s17 + $0x5e8] ss:$16 sps:$4 sm:$0xff]  }
 0x4c5   : > { %v20379_v33 = vld [vmem:[%s22203_s17 + $0x5ec] ss:$16 sps:$4 sm:$0xff]   ;;  %v20380_v18 = vld [vmem:[%s22203_s17 + $0x7e8] ss:$16 sps:$4 sm:$0xff]  }
 0x4c6   : > { %14526 = vmatpush1.bf16.msra.mxu0 %v20347_v22  ;;  %v20382_v53 = vld [vmem:[%s22203_s17 + $0x7ec] ss:$16 sps:$4 sm:$0xff]  }
 0x4c7   : > { %14567 = vmatpush1.bf16.msra.mxu1 %v20350_v51  ;;  %14527 = vmatprep.subr.bf16.mxu0 %v20355_v50  ;;  %v20385_v24 = vld [vmem:[%s22203_s17 + $0x5cc] ss:$16 sps:$4 sm:$0xff]   ;;  %v20383_v51 = vld [vmem:[%s22203_s17 + $0x5c8] ss:$16 sps:$4 sm:$0xff]  }
 0x4c8   : > { %14568 = vmatprep.subr.bf16.mxu1 %v20358_v6  ;;  %v20388_v22 = vld [vmem:[%s22203_s17 + $0x7cc] ss:$16 sps:$4 sm:$0xff]   ;;  %v20386_v50 = vld [vmem:[%s22203_s17 + $0x7c8] ss:$16 sps:$4 sm:$0xff]  }
 0x4c9   : > { %v20391_v6 = vld [vmem:[%s22203_s17 + $0x5ac] ss:$16 sps:$4 sm:$0xff]  }
 0x4ca   : > { %14528 = vmatpush1.bf16.msra.mxu0 %v20353_v30  ;;  %v20394_v30 = vld [vmem:[%s22203_s17 + $0x7ac] ss:$16 sps:$4 sm:$0xff]  }
 0x4cb   : > { %14569 = vmatpush1.bf16.msra.mxu1 %v20356_v61  ;;  %14529 = vmatprep.subr.bf16.mxu0 %v20361_v1  ;;  %v20389_v61 = vld [vmem:[%s22203_s17 + $0x5a8] ss:$16 sps:$4 sm:$0xff]  }
 0x4cc   : > { %14570 = vmatprep.subr.bf16.mxu1 %v20364_v37  ;;  %v20392_v1 = vld [vmem:[%s22203_s17 + $0x7a8] ss:$16 sps:$4 sm:$0xff]   ;;  %v20397_v37 = vld [vmem:[%s22203_s17 + $0x58c] ss:$16 sps:$4 sm:$0xff]  }
 0x4ce   : > { %14530 = vmatpush1.bf16.msra.mxu0 %v20359_v12  ;;  %v20400_v12 = vld [vmem:[%s22203_s17 + $0x78c] ss:$16 sps:$4 sm:$0xff]  }
 0x4cf   : > { %14571 = vmatpush1.bf16.msra.mxu1 %v20362_v36  ;;  %14531 = vmatprep.subr.bf16.mxu0 %v20367_v35  ;;  %v20395_v36 = vld [vmem:[%s22203_s17 + $0x588] ss:$16 sps:$4 sm:$0xff]  }
 0x4d0   : > { %14572 = vmatprep.subr.bf16.mxu1 %v20370_v7  ;;  %v20398_v35 = vld [vmem:[%s22203_s17 + $0x788] ss:$16 sps:$4 sm:$0xff]   ;;  %v20403_v7 = vld [vmem:[%s22203_s17 + $0x56c] ss:$16 sps:$4 sm:$0xff]  }
 0x4d2   : > { %14532 = vmatpush1.bf16.msra.mxu0 %v20365_v57  ;;  %v20406_v57 = vld [vmem:[%s22203_s17 + $0x76c] ss:$16 sps:$4 sm:$0xff]  }
 0x4d3   : > { %14573 = vmatpush1.bf16.msra.mxu1 %v20368_v48  ;;  %14533 = vmatprep.subr.bf16.mxu0 %v20373_v14  ;;  %v20401_v48 = vld [vmem:[%s22203_s17 + $0x568] ss:$16 sps:$4 sm:$0xff]  }
 0x4d4   : > { %14574 = vmatprep.subr.bf16.mxu1 %v20376_v19  ;;  %v20404_v14 = vld [vmem:[%s22203_s17 + $0x768] ss:$16 sps:$4 sm:$0xff]   ;;  %v20409_v19 = vld [vmem:[%s22203_s17 + $0x54c] ss:$16 sps:$4 sm:$0xff]  }
 0x4d6   : > { %14534 = vmatpush1.bf16.msra.mxu0 %v20371_v62  ;;  %v20412_v62 = vld [vmem:[%s22203_s17 + $0x74c] ss:$16 sps:$4 sm:$0xff]  }
 0x4d7   : > { %14575 = vmatpush1.bf16.msra.mxu1 %v20374_v8  ;;  %14535 = vmatprep.subr.bf16.mxu0 %v20379_v33  ;;  %v20407_v8 = vld [vmem:[%s22203_s17 + $0x548] ss:$16 sps:$4 sm:$0xff]  }
 0x4d8   : > { %14576 = vmatprep.subr.bf16.mxu1 %v20382_v53  ;;  %v20410_v33 = vld [vmem:[%s22203_s17 + $0x748] ss:$16 sps:$4 sm:$0xff]   ;;  %v20415_v53 = vld [vmem:[%s22203_s17 + $0x52c] ss:$16 sps:$4 sm:$0xff]  }
 0x4da   : > { %14536 = vmatpush2.bf16.msra.mxu0 %v20377_v44  ;;  %v20418_v44 = vld [vmem:[%s22203_s17 + $0x72c] ss:$16 sps:$4 sm:$0xff]  }
 0x4db   : > { %14577 = vmatpush2.bf16.msra.mxu1 %v20380_v18  ;;  %14537 = vmatprep.subr.bf16.mxu0 %v20385_v24  ;;  %v20413_v18 = vld [vmem:[%s22203_s17 + $0x528] ss:$16 sps:$4 sm:$0xff]  }
 0x4dc   : > { %14578 = vmatprep.subr.bf16.mxu1 %v20388_v22  ;;  %v20416_v24 = vld [vmem:[%s22203_s17 + $0x728] ss:$16 sps:$4 sm:$0xff]   ;;  %v20421_v22 = vld [vmem:[%s22203_s17 + $0x50c] ss:$16 sps:$4 sm:$0xff]  }
 0x4de   : > { %14538 = vmatpush2.bf16.msra.mxu0 %v20383_v51  ;;  %v20424_v51 = vld [vmem:[%s22203_s17 + $0x70c] ss:$16 sps:$4 sm:$0xff]  }
 0x4df   : > { %14579 = vmatpush2.bf16.msra.mxu1 %v20386_v50  ;;  %14539 = vmatprep.subr.bf16.mxu0 %v20391_v6  ;;  %v20419_v50 = vld [vmem:[%s22203_s17 + $0x508] ss:$16 sps:$4 sm:$0xff]  }
 0x4e0   : > { %14580 = vmatprep.subr.bf16.mxu1 %v20394_v30  ;;  %v20422_v6 = vld [vmem:[%s22203_s17 + $0x708] ss:$16 sps:$4 sm:$0xff]   ;;  %v20427_v30 = vld [vmem:[%s22203_s17 + $0x8ec] ss:$16 sps:$4 sm:$0xff]  }
 0x4e2   : > { %14540 = vmatpush2.bf16.msra.mxu0 %v20389_v61  ;;  %v20430_v61 = vld [vmem:[%s22203_s17 + $0xaec] ss:$16 sps:$4 sm:$0xff]  }
 0x4e3   : > { %14581 = vmatpush2.bf16.msra.mxu1 %v20392_v1  ;;  %14541 = vmatprep.subr.bf16.mxu0 %v20397_v37  ;;  %v20425_v1 = vld [vmem:[%s22203_s17 + $0x8e8] ss:$16 sps:$4 sm:$0xff]  }
 0x4e4   : > { %14582 = vmatprep.subr.bf16.mxu1 %v20400_v12  ;;  %v20428_v37 = vld [vmem:[%s22203_s17 + $0xae8] ss:$16 sps:$4 sm:$0xff]   ;;  %v20433_v12 = vld [vmem:[%s22203_s17 + $0x8cc] ss:$16 sps:$4 sm:$0xff]  }
 0x4e6   : > { %14542 = vmatpush2.bf16.msra.mxu0 %v20395_v36  ;;  %v20436_v36 = vld [vmem:[%s22203_s17 + $0xacc] ss:$16 sps:$4 sm:$0xff]  }
 0x4e7   : > { %14583 = vmatpush2.bf16.msra.mxu1 %v20398_v35  ;;  %14543 = vmatprep.subr.bf16.mxu0 %v20403_v7 }
 0x4e8   : > { %14584 = vmatprep.subr.bf16.mxu1 %v20406_v57 }
 0x4ea   : > { %14544 = vmatpush2.bf16.msra.mxu0 %v20401_v48  ;;  %v20431_v48 = vld [vmem:[%s22203_s17 + $0x8c8] ss:$16 sps:$4 sm:$0xff]  }
 0x4eb   : > { %14585 = vmatpush2.bf16.msra.mxu1 %v20404_v14  ;;  %14545 = vmatprep.subr.bf16.mxu0 %v20409_v19  ;;  %v20434_v14 = vld [vmem:[%s22203_s17 + $0xac8] ss:$16 sps:$4 sm:$0xff]  }
 0x4ec   : > { %14586 = vmatprep.subr.bf16.mxu1 %v20412_v62 }
 0x4ee   : > { %14546 = vmatpush2.bf16.msra.mxu0 %v20407_v8  ;;  %v20439_v8 = vld [vmem:[%s22203_s17 + $0x8ac] ss:$16 sps:$4 sm:$0xff]  }
 0x4ef   : > { %14587 = vmatpush2.bf16.msra.mxu1 %v20410_v33  ;;  %14547 = vmatprep.subr.bf16.mxu0 %v20415_v53  ;;  %v20442_v33 = vld [vmem:[%s22203_s17 + $0xaac] ss:$16 sps:$4 sm:$0xff]  }
 0x4f0   : > { %14588 = vmatprep.subr.bf16.mxu1 %v20418_v44 }
 0x4f2   : > { %14548 = vmatpush2.bf16.msra.mxu0 %v20413_v18  ;;  %v20437_v18 = vld [vmem:[%s22203_s17 + $0x8a8] ss:$16 sps:$4 sm:$0xff]  }
 0x4f3   : > { %14589 = vmatpush2.bf16.msra.mxu1 %v20416_v24  ;;  %14549 = vmatprep.subr.bf16.mxu0 %v20421_v22  ;;  %v20440_v24 = vld [vmem:[%s22203_s17 + $0xaa8] ss:$16 sps:$4 sm:$0xff]  }
 0x4f4   : > { %14590 = vmatprep.subr.bf16.mxu1 %v20424_v51 }
 0x4f6   : > { %14550 = vmatpush2.bf16.msra.mxu0 %v20419_v50  ;;  %v20446_v50 = vld [vmem:[%s22203_s17 + $0xa88] ss:$16 sps:$4 sm:$0xff]  }
 0x4f7   : > { %14591 = vmatpush2.bf16.msra.mxu1 %v20422_v6  ;;  %14601 = vmatprep.subr.bf16.mxu0 %v20427_v30  ;;  %v20451_v6 = vld [vmem:[%s22203_s17 + $0x86c] ss:$16 sps:$4 sm:$0xff]  }
 0x4f8   : > { %14642 = vmatprep.subr.bf16.mxu1 %v20430_v61  ;;  %v20454_v30 = vld [vmem:[%s22203_s17 + $0xa6c] ss:$16 sps:$4 sm:$0xff]   ;;  %v20449_v61 = vld [vmem:[%s22203_s17 + $0x868] ss:$16 sps:$4 sm:$0xff]  }
 0x4f9   : > { %v14307_v35 = vpop.f32.mrf.mxu0  ;;  %14552 = vmatmul.mubr.bf16.vlgmr.msra.gmra.mxu0 %v22393_v27 }
 0x4fa   : > { %v14348_v7 = vpop.f32.mrf.mxu1  ;;  %14593 = vmatmul.mubr.bf16.vlgmr.msra.gmra.mxu1 %v22400_v31  ;;  %v14308_v57 = vadd.f32 %v14307_v35, %v23831_v38  ;;  %14602 = vmatpush1.bf16.msra.mxu0 %v20425_v1  ;;  %v20452_v1 = vld [vmem:[%s22203_s17 + $0xa68] ss:$16 sps:$4 sm:$0xff]  }
 0x4fb   : > { %14643 = vmatpush1.bf16.msra.mxu1 %v20428_v37  ;;  %v14309_v19 = vpop.f32.mrf.mxu0  ;;  %14603 = vmatprep.subr.bf16.mxu0 %v20433_v12  ;;  %v20457_v37 = vld [vmem:[%s22203_s17 + $0x84c] ss:$16 sps:$4 sm:$0xff]   ;;  %v20458_v35 = vld [vmem:[%s22203_s17 + $0xa48] ss:$16 sps:$4 sm:$0xff]  }
 0x4fc   : > { %v14350_v62 = vpop.f32.mrf.mxu1  ;;  %14644 = vmatprep.subr.bf16.mxu1 %v20436_v36  ;;  %v23905_v53 = vadd.f32 %v14348_v7, %v14308_v57  ;;  %v14310_v27 = vadd.f32 %v14309_v19, %v23836_v2  ;;  %14633 = vmatprep.mubr.bf16.mxu0 %v22422_v42  ;;  %v20445_v42 = vld [vmem:[%s22203_s17 + $0x88c] ss:$16 sps:$4 sm:$0xff]   ;;  %v20443_v2 = vld [vmem:[%s22203_s17 + $0x888] ss:$16 sps:$4 sm:$0xff]  }
 0x4fd   : > { %14674 = vmatprep.mubr.bf16.mxu1 %v22427_v43  ;;  %v14311_v31 = vpop.f32.mrf.mxu0  ;;  %v20448_v43 = vld [vmem:[%s22203_s17 + $0xa8c] ss:$16 sps:$4 sm:$0xff]   ;;  %v20455_v36 = vld [vmem:[%s22203_s17 + $0x848] ss:$16 sps:$4 sm:$0xff]  }
 0x4fe   : > { %v14352_v38 = vpop.f32.mrf.mxu1  ;;  %v23910_v44 = vadd.f32 %v14350_v62, %v14310_v27  ;;  %14604 = vmatpush1.bf16.msra.mxu0 %v20431_v48  ;;  %v20460_v12 = vld [vmem:[%s22203_s17 + $0xa4c] ss:$16 sps:$4 sm:$0xff]   ;;  %v20461_v48 = vld [vmem:[%s22203_s17 + $0x828] ss:$16 sps:$4 sm:$0xff]  }
 0x4ff   : > { %14645 = vmatpush1.bf16.msra.mxu1 %v20434_v14  ;;  %v14312_v22 = vpop.f32.mrf.mxu0  ;;  %14605 = vmatprep.subr.bf16.mxu0 %v20439_v8  ;;  %v20463_v7 = vld [vmem:[%s22203_s17 + $0x82c] ss:$16 sps:$4 sm:$0xff]   ;;  %v20464_v14 = vld [vmem:[%s22203_s17 + $0xa28] ss:$16 sps:$4 sm:$0xff]  }
 0x500   : > { %v14353_v51 = vpop.f32.mrf.mxu1  ;;  %14646 = vmatprep.subr.bf16.mxu1 %v20442_v33  ;;  %v20466_v57 = vld [vmem:[%s22203_s17 + $0xa2c] ss:$16 sps:$4 sm:$0xff]   ;;  %v20467_v8 = vld [vmem:[%s22203_s17 + $0x808] ss:$16 sps:$4 sm:$0xff]  }
 0x501   : > { %v20469_v19 = vld [vmem:[%s22203_s17 + $0x80c] ss:$16 sps:$4 sm:$0xff]   ;;  %v20470_v33 = vld [vmem:[%s22203_s17 + $0xa08] ss:$16 sps:$4 sm:$0xff]  }
 0x502   : > { %14606 = vmatpush1.bf16.msra.mxu0 %v20437_v18  ;;  %v20472_v62 = vld [vmem:[%s22203_s17 + $0xa0c] ss:$16 sps:$4 sm:$0xff]   ;;  %v20473_v38 = vld [vmem:[%s22203_s17 + $0x9e8] ss:$16 sps:$4 sm:$0xff]  }
 0x503   : > { %14647 = vmatpush1.bf16.msra.mxu1 %v20440_v24  ;;  %14607 = vmatprep.subr.bf16.mxu0 %v20445_v42  ;;  %v20475_v27 = vld [vmem:[%s22203_s17 + $0x9ec] ss:$16 sps:$4 sm:$0xff]   ;;  %v20476_v18 = vld [vmem:[%s22203_s17 + $0xbe8] ss:$16 sps:$4 sm:$0xff]  }
 0x504   : > { %14648 = vmatprep.subr.bf16.mxu1 %v20448_v43  ;;  %v20478_v31 = vld [vmem:[%s22203_s17 + $0xbec] ss:$16 sps:$4 sm:$0xff]   ;;  %v20479_v51 = vld [vmem:[%s22203_s17 + $0x9c8] ss:$16 sps:$4 sm:$0xff]  }
 0x505   : > { %v20481_v24 = vld [vmem:[%s22203_s17 + $0x9cc] ss:$16 sps:$4 sm:$0xff]   ;;  %v20482_v42 = vld [vmem:[%s22203_s17 + $0xbc8] ss:$16 sps:$4 sm:$0xff]  }
 0x506   : > { %14608 = vmatpush1.bf16.msra.mxu0 %v20443_v2  ;;  %v20484_v22 = vld [vmem:[%s22203_s17 + $0xbcc] ss:$16 sps:$4 sm:$0xff]  }
 0x507   : > { %14649 = vmatpush1.bf16.msra.mxu1 %v20446_v50  ;;  %14609 = vmatprep.subr.bf16.mxu0 %v20451_v6  ;;  %v20487_v43 = vld [vmem:[%s22203_s17 + $0x9ac] ss:$16 sps:$4 sm:$0xff]   ;;  %v20485_v50 = vld [vmem:[%s22203_s17 + $0x9a8] ss:$16 sps:$4 sm:$0xff]  }
 0x508   : > { %14650 = vmatprep.subr.bf16.mxu1 %v20454_v30  ;;  %v20490_v2 = vld [vmem:[%s22203_s17 + $0xbac] ss:$16 sps:$4 sm:$0xff]   ;;  %v20488_v6 = vld [vmem:[%s22203_s17 + $0xba8] ss:$16 sps:$4 sm:$0xff]  }
 0x509   : > { %v20493_v30 = vld [vmem:[%s22203_s17 + $0x98c] ss:$16 sps:$4 sm:$0xff]  }
 0x50a   : > { %14610 = vmatpush1.bf16.msra.mxu0 %v20449_v61  ;;  %v20496_v61 = vld [vmem:[%s22203_s17 + $0xb8c] ss:$16 sps:$4 sm:$0xff]  }
 0x50b   : > { %14651 = vmatpush1.bf16.msra.mxu1 %v20452_v1  ;;  %14611 = vmatprep.subr.bf16.mxu0 %v20457_v37  ;;  %v20491_v1 = vld [vmem:[%s22203_s17 + $0x988] ss:$16 sps:$4 sm:$0xff]  }
 0x50c   : > { %14652 = vmatprep.subr.bf16.mxu1 %v20460_v12  ;;  %v20494_v37 = vld [vmem:[%s22203_s17 + $0xb88] ss:$16 sps:$4 sm:$0xff]   ;;  %v20499_v12 = vld [vmem:[%s22203_s17 + $0x96c] ss:$16 sps:$4 sm:$0xff]  }
 0x50e   : > { %14612 = vmatpush1.bf16.msra.mxu0 %v20455_v36  ;;  %v20502_v36 = vld [vmem:[%s22203_s17 + $0xb6c] ss:$16 sps:$4 sm:$0xff]  }
 0x50f   : > { %14653 = vmatpush1.bf16.msra.mxu1 %v20458_v35  ;;  %14613 = vmatprep.subr.bf16.mxu0 %v20463_v7  ;;  %v20497_v35 = vld [vmem:[%s22203_s17 + $0x968] ss:$16 sps:$4 sm:$0xff]  }
 0x510   : > { %14654 = vmatprep.subr.bf16.mxu1 %v20466_v57  ;;  %v20500_v7 = vld [vmem:[%s22203_s17 + $0xb68] ss:$16 sps:$4 sm:$0xff]   ;;  %v20505_v57 = vld [vmem:[%s22203_s17 + $0x94c] ss:$16 sps:$4 sm:$0xff]  }
 0x512   : > { %14614 = vmatpush1.bf16.msra.mxu0 %v20461_v48  ;;  %v20508_v48 = vld [vmem:[%s22203_s17 + $0xb4c] ss:$16 sps:$4 sm:$0xff]  }
 0x513   : > { %14655 = vmatpush1.bf16.msra.mxu1 %v20464_v14  ;;  %14615 = vmatprep.subr.bf16.mxu0 %v20469_v19  ;;  %v20503_v14 = vld [vmem:[%s22203_s17 + $0x948] ss:$16 sps:$4 sm:$0xff]  }
 0x514   : > { %14656 = vmatprep.subr.bf16.mxu1 %v20472_v62  ;;  %v20506_v19 = vld [vmem:[%s22203_s17 + $0xb48] ss:$16 sps:$4 sm:$0xff]   ;;  %v20511_v62 = vld [vmem:[%s22203_s17 + $0x92c] ss:$16 sps:$4 sm:$0xff]  }
 0x516   : > { %14616 = vmatpush1.bf16.msra.mxu0 %v20467_v8  ;;  %v20514_v8 = vld [vmem:[%s22203_s17 + $0xb2c] ss:$16 sps:$4 sm:$0xff]  }
 0x517   : > { %14657 = vmatpush1.bf16.msra.mxu1 %v20470_v33  ;;  %14617 = vmatprep.subr.bf16.mxu0 %v20475_v27  ;;  %v20509_v33 = vld [vmem:[%s22203_s17 + $0x928] ss:$16 sps:$4 sm:$0xff]  }
 0x518   : > { %14658 = vmatprep.subr.bf16.mxu1 %v20478_v31  ;;  %v20512_v27 = vld [vmem:[%s22203_s17 + $0xb28] ss:$16 sps:$4 sm:$0xff]   ;;  %v20517_v31 = vld [vmem:[%s22203_s17 + $0x90c] ss:$16 sps:$4 sm:$0xff]  }
 0x51a   : > { %14618 = vmatpush2.bf16.msra.mxu0 %v20473_v38  ;;  %v20520_v38 = vld [vmem:[%s22203_s17 + $0xb0c] ss:$16 sps:$4 sm:$0xff]  }
 0x51b   : > { %14659 = vmatpush2.bf16.msra.mxu1 %v20476_v18  ;;  %14619 = vmatprep.subr.bf16.mxu0 %v20481_v24  ;;  %v20515_v18 = vld [vmem:[%s22203_s17 + $0x908] ss:$16 sps:$4 sm:$0xff]  }
 0x51c   : > { %14660 = vmatprep.subr.bf16.mxu1 %v20484_v22  ;;  %v20518_v24 = vld [vmem:[%s22203_s17 + $0xb08] ss:$16 sps:$4 sm:$0xff]   ;;  %v20523_v22 = vld [vmem:[%s22203_s17 + $0xcec] ss:$16 sps:$4 sm:$0xff]  }
 0x51e   : > { %14620 = vmatpush2.bf16.msra.mxu0 %v20479_v51  ;;  %v20526_v51 = vld [vmem:[%s22203_s17 + $0xeec] ss:$16 sps:$4 sm:$0xff]  }
 0x51f   : > { %14661 = vmatpush2.bf16.msra.mxu1 %v20482_v42  ;;  %14621 = vmatprep.subr.bf16.mxu0 %v20487_v43  ;;  %v20521_v42 = vld [vmem:[%s22203_s17 + $0xce8] ss:$16 sps:$4 sm:$0xff]  }
 0x520   : > { %14662 = vmatprep.subr.bf16.mxu1 %v20490_v2  ;;  %v20524_v43 = vld [vmem:[%s22203_s17 + $0xee8] ss:$16 sps:$4 sm:$0xff]   ;;  %v20529_v2 = vld [vmem:[%s22203_s17 + $0xccc] ss:$16 sps:$4 sm:$0xff]  }
 0x522   : > { %14622 = vmatpush2.bf16.msra.mxu0 %v20485_v50  ;;  %v20532_v50 = vld [vmem:[%s22203_s17 + $0xecc] ss:$16 sps:$4 sm:$0xff]  }
 0x523   : > { %14663 = vmatpush2.bf16.msra.mxu1 %v20488_v6  ;;  %14623 = vmatprep.subr.bf16.mxu0 %v20493_v30 }
 0x524   : > { %14664 = vmatprep.subr.bf16.mxu1 %v20496_v61 }
 0x526   : > { %14624 = vmatpush2.bf16.msra.mxu0 %v20491_v1  ;;  %v20527_v1 = vld [vmem:[%s22203_s17 + $0xcc8] ss:$16 sps:$4 sm:$0xff]  }
 0x527   : > { %14665 = vmatpush2.bf16.msra.mxu1 %v20494_v37  ;;  %14625 = vmatprep.subr.bf16.mxu0 %v20499_v12  ;;  %v20530_v37 = vld [vmem:[%s22203_s17 + $0xec8] ss:$16 sps:$4 sm:$0xff]  }
 0x528   : > { %14666 = vmatprep.subr.bf16.mxu1 %v20502_v36 }
 0x52a   : > { %14626 = vmatpush2.bf16.msra.mxu0 %v20497_v35  ;;  %v20535_v35 = vld [vmem:[%s22203_s17 + $0xcac] ss:$16 sps:$4 sm:$0xff]  }
 0x52b   : > { %14667 = vmatpush2.bf16.msra.mxu1 %v20500_v7  ;;  %14627 = vmatprep.subr.bf16.mxu0 %v20505_v57  ;;  %v20538_v7 = vld [vmem:[%s22203_s17 + $0xeac] ss:$16 sps:$4 sm:$0xff]  }
 0x52c   : > { %14668 = vmatprep.subr.bf16.mxu1 %v20508_v48 }
 0x52e   : > { %14628 = vmatpush2.bf16.msra.mxu0 %v20503_v14  ;;  %v20533_v14 = vld [vmem:[%s22203_s17 + $0xca8] ss:$16 sps:$4 sm:$0xff]  }
 0x52f   : > { %14669 = vmatpush2.bf16.msra.mxu1 %v20506_v19  ;;  %14629 = vmatprep.subr.bf16.mxu0 %v20511_v62  ;;  %v20536_v19 = vld [vmem:[%s22203_s17 + $0xea8] ss:$16 sps:$4 sm:$0xff]  }
 0x530   : > { %14670 = vmatprep.subr.bf16.mxu1 %v20514_v8 }
 0x532   : > { %14630 = vmatpush2.bf16.msra.mxu0 %v20509_v33  ;;  %v20539_v33 = vld [vmem:[%s22203_s17 + $0xc88] ss:$16 sps:$4 sm:$0xff]  }
 0x533   : > { %14671 = vmatpush2.bf16.msra.mxu1 %v20512_v27  ;;  %14631 = vmatprep.subr.bf16.mxu0 %v20517_v31  ;;  %v20542_v27 = vld [vmem:[%s22203_s17 + $0xe88] ss:$16 sps:$4 sm:$0xff]   ;;  %v20547_v31 = vld [vmem:[%s22203_s17 + $0xc6c] ss:$16 sps:$4 sm:$0xff]  }
 0x534   : > { %14672 = vmatprep.subr.bf16.mxu1 %v20520_v38  ;;  %v20550_v38 = vld [vmem:[%s22203_s17 + $0xe6c] ss:$16 sps:$4 sm:$0xff]  }
 0x536   : > { %14632 = vmatpush2.bf16.msra.mxu0 %v20515_v18  ;;  %v20545_v18 = vld [vmem:[%s22203_s17 + $0xc68] ss:$16 sps:$4 sm:$0xff]  }
 0x537   : > { %14673 = vmatpush2.bf16.msra.mxu1 %v20518_v24  ;;  %14683 = vmatprep.subr.bf16.mxu0 %v20523_v22  ;;  %v20548_v24 = vld [vmem:[%s22203_s17 + $0xe68] ss:$16 sps:$4 sm:$0xff]   ;;  %v20553_v22 = vld [vmem:[%s22203_s17 + $0xc4c] ss:$16 sps:$4 sm:$0xff]  }
 0x538   : > { %14724 = vmatprep.subr.bf16.mxu1 %v20526_v51  ;;  %v20556_v51 = vld [vmem:[%s22203_s17 + $0xe4c] ss:$16 sps:$4 sm:$0xff]  }
 0x539   : > { %v14389_v6 = vpop.f32.mrf.mxu0  ;;  %14634 = vmatmul.mubr.bf16.vlgmr.msra.gmra.mxu0 %v22491_v49 }
 0x53a   : > { %v14430_v30 = vpop.f32.mrf.mxu1  ;;  %14675 = vmatmul.mubr.bf16.vlgmr.msra.gmra.mxu1 %v22502_v56  ;;  %v14390_v61 = vadd.f32 %v14389_v6, %v23905_v53  ;;  %14684 = vmatpush1.bf16.msra.mxu0 %v20521_v42  ;;  %v20551_v42 = vld [vmem:[%s22203_s17 + $0xc48] ss:$16 sps:$4 sm:$0xff]  }
 0x53b   : > { %14725 = vmatpush1.bf16.msra.mxu1 %v20524_v43  ;;  %v14391_v12 = vpop.f32.mrf.mxu0  ;;  %14685 = vmatprep.subr.bf16.mxu0 %v20529_v2  ;;  %v20554_v43 = vld [vmem:[%s22203_s17 + $0xe48] ss:$16 sps:$4 sm:$0xff]   ;;  %v20559_v2 = vld [vmem:[%s22203_s17 + $0xc2c] ss:$16 sps:$4 sm:$0xff]  }
 0x53c   : > { %v14432_v36 = vpop.f32.mrf.mxu1  ;;  %14726 = vmatprep.subr.bf16.mxu1 %v20532_v50  ;;  %v23979_v57 = vadd.f32 %v14430_v30, %v14390_v61  ;;  %v14392_v49 = vadd.f32 %v14391_v12, %v23910_v44  ;;  %14715 = vmatprep.mubr.bf16.mxu0 %v22498_v55  ;;  %v20541_v55 = vld [vmem:[%s22203_s17 + $0xc8c] ss:$16 sps:$4 sm:$0xff]   ;;  %v20557_v6 = vld [vmem:[%s22203_s17 + $0xc28] ss:$16 sps:$4 sm:$0xff]  }
 0x53d   : > { %14756 = vmatprep.mubr.bf16.mxu1 %v22510_v60  ;;  %v14393_v56 = vpop.f32.mrf.mxu0  ;;  %v20544_v60 = vld [vmem:[%s22203_s17 + $0xe8c] ss:$16 sps:$4 sm:$0xff]   ;;  %v20560_v30 = vld [vmem:[%s22203_s17 + $0xe28] ss:$16 sps:$4 sm:$0xff]  }
 0x53e   : > { %v14434_v53 = vpop.f32.mrf.mxu1  ;;  %v23984_v48 = vadd.f32 %v14432_v36, %v14392_v49  ;;  %14686 = vmatpush1.bf16.msra.mxu0 %v20527_v1  ;;  %v20562_v50 = vld [vmem:[%s22203_s17 + $0xe2c] ss:$16 sps:$4 sm:$0xff]   ;;  %v20566_v12 = vld [vmem:[%s22203_s17 + $0xe08] ss:$16 sps:$4 sm:$0xff]  }
 0x53f   : > { %14727 = vmatpush1.bf16.msra.mxu1 %v20530_v37  ;;  %v14394_v62 = vpop.f32.mrf.mxu0  ;;  %14687 = vmatprep.subr.bf16.mxu0 %v20535_v35  ;;  %v20565_v61 = vld [vmem:[%s22203_s17 + $0xc0c] ss:$16 sps:$4 sm:$0xff]   ;;  %v20563_v37 = vld [vmem:[%s22203_s17 + $0xc08] ss:$16 sps:$4 sm:$0xff]  }
 0x540   : > { %v14435_v8 = vpop.f32.mrf.mxu1  ;;  %14728 = vmatprep.subr.bf16.mxu1 %v20538_v7  ;;  %v15753_v44 = vcombine.low %v23979_v57, %v23984_v48  ;;  %v20568_v1 = vld [vmem:[%s22203_s17 + $0xe0c] ss:$16 sps:$4 sm:$0xff]   ;;  %v20569_v7 = vld [vmem:[%s22203_s17 + $0xde8] ss:$16 sps:$4 sm:$0xff]  }
 0x541   : > { %v20571_v36 = vld [vmem:[%s22203_s17 + $0xdec] ss:$16 sps:$4 sm:$0xff]   ;;  %v20572_v49 = vld [vmem:[%s22203_s17 + $0xfe8] ss:$16 sps:$4 sm:$0xff]  }
 0x542   : > { %14688 = vmatpush1.bf16.msra.mxu0 %v20533_v14  ;;  %v20574_v35 = vld [vmem:[%s22203_s17 + $0xfec] ss:$16 sps:$4 sm:$0xff]   ;;  %v20575_v14 = vld [vmem:[%s22203_s17 + $0xdc8] ss:$16 sps:$4 sm:$0xff]  }
 0x543   : > { %14729 = vmatpush1.bf16.msra.mxu1 %v20536_v19  ;;  %14689 = vmatprep.subr.bf16.mxu0 %v20541_v55  ;;  %v20577_v56 = vld [vmem:[%s22203_s17 + $0xdcc] ss:$16 sps:$4 sm:$0xff]   ;;  %v20578_v19 = vld [vmem:[%s22203_s17 + $0xfc8] ss:$16 sps:$4 sm:$0xff]  }
 0x544   : > { %14730 = vmatprep.subr.bf16.mxu1 %v20544_v60  ;;  %v20580_v53 = vld [vmem:[%s22203_s17 + $0xfcc] ss:$16 sps:$4 sm:$0xff]   ;;  %v20581_v55 = vld [vmem:[%s22203_s17 + $0xda8] ss:$16 sps:$4 sm:$0xff]  }
 0x545   : > { %v20583_v62 = vld [vmem:[%s22203_s17 + $0xdac] ss:$16 sps:$4 sm:$0xff]   ;;  %v20584_v60 = vld [vmem:[%s22203_s17 + $0xfa8] ss:$16 sps:$4 sm:$0xff]  }
 0x546   : > { %14690 = vmatpush1.bf16.msra.mxu0 %v20539_v33  ;;  %v20586_v8 = vld [vmem:[%s22203_s17 + $0xfac] ss:$16 sps:$4 sm:$0xff]  }
 0x547   : > { %14731 = vmatpush1.bf16.msra.mxu1 %v20542_v27  ;;  %14691 = vmatprep.subr.bf16.mxu0 %v20547_v31  ;;  %v20589_v33 = vld [vmem:[%s22203_s17 + $0xd8c] ss:$16 sps:$4 sm:$0xff]   ;;  %v20587_v31 = vld [vmem:[%s22203_s17 + $0xd88] ss:$16 sps:$4 sm:$0xff]  }
 0x548   : > { %14732 = vmatprep.subr.bf16.mxu1 %v20550_v38  ;;  %v20592_v27 = vld [vmem:[%s22203_s17 + $0xf8c] ss:$16 sps:$4 sm:$0xff]   ;;  %v20590_v38 = vld [vmem:[%s22203_s17 + $0xf88] ss:$16 sps:$4 sm:$0xff]  }
 0x54a   : > { %14692 = vmatpush1.bf16.msra.mxu0 %v20545_v18  ;;  %v20595_v18 = vld [vmem:[%s22203_s17 + $0xd6c] ss:$16 sps:$4 sm:$0xff]  }
 0x54b   : > { %14733 = vmatpush1.bf16.msra.mxu1 %v20548_v24  ;;  %14693 = vmatprep.subr.bf16.mxu0 %v20553_v22  ;;  %v20598_v24 = vld [vmem:[%s22203_s17 + $0xf6c] ss:$16 sps:$4 sm:$0xff]   ;;  %v20593_v22 = vld [vmem:[%s22203_s17 + $0xd68] ss:$16 sps:$4 sm:$0xff]  }
 0x54c   : > { %14734 = vmatprep.subr.bf16.mxu1 %v20556_v51  ;;  %v20596_v51 = vld [vmem:[%s22203_s17 + $0xf68] ss:$16 sps:$4 sm:$0xff]  }
 0x54e   : > { %14694 = vmatpush1.bf16.msra.mxu0 %v20551_v42  ;;  %v20601_v42 = vld [vmem:[%s22203_s17 + $0xd4c] ss:$16 sps:$4 sm:$0xff]  }
 0x54f   : > { %14735 = vmatpush1.bf16.msra.mxu1 %v20554_v43  ;;  %14695 = vmatprep.subr.bf16.mxu0 %v20559_v2  ;;  %v20604_v43 = vld [vmem:[%s22203_s17 + $0xf4c] ss:$16 sps:$4 sm:$0xff]   ;;  %v20599_v2 = vld [vmem:[%s22203_s17 + $0xd48] ss:$16 sps:$4 sm:$0xff]  }
 0x550   : > { %14736 = vmatprep.subr.bf16.mxu1 %v20562_v50  ;;  %v20602_v50 = vld [vmem:[%s22203_s17 + $0xf48] ss:$16 sps:$4 sm:$0xff]  }
 0x552   : > { %14696 = vmatpush1.bf16.msra.mxu0 %v20557_v6  ;;  %v20607_v6 = vld [vmem:[%s22203_s17 + $0xd2c] ss:$16 sps:$4 sm:$0xff]  }
 0x553   : > { %14737 = vmatpush1.bf16.msra.mxu1 %v20560_v30  ;;  %14697 = vmatprep.subr.bf16.mxu0 %v20565_v61  ;;  %v20610_v30 = vld [vmem:[%s22203_s17 + $0xf2c] ss:$16 sps:$4 sm:$0xff]   ;;  %v20605_v61 = vld [vmem:[%s22203_s17 + $0xd28] ss:$16 sps:$4 sm:$0xff]  }
 0x554   : > { %14738 = vmatprep.subr.bf16.mxu1 %v20568_v1  ;;  %v20608_v1 = vld [vmem:[%s22203_s17 + $0xf28] ss:$16 sps:$4 sm:$0xff]  }
 0x556   : > { %14698 = vmatpush1.bf16.msra.mxu0 %v20563_v37  ;;  %v20613_v37 = vld [vmem:[%s22203_s17 + $0xd0c] ss:$16 sps:$4 sm:$0xff]  }
 0x557   : > { %14739 = vmatpush1.bf16.msra.mxu1 %v20566_v12  ;;  %14699 = vmatprep.subr.bf16.mxu0 %v20571_v36  ;;  %v20616_v12 = vld [vmem:[%s22203_s17 + $0xf0c] ss:$16 sps:$4 sm:$0xff]   ;;  %v20611_v36 = vld [vmem:[%s22203_s17 + $0xd08] ss:$16 sps:$4 sm:$0xff]  }
 0x558   : > { %14740 = vmatprep.subr.bf16.mxu1 %v20574_v35  ;;  %v20614_v35 = vld [vmem:[%s22203_s17 + $0xf08] ss:$16 sps:$4 sm:$0xff]  }
 0x55a   : > { %14700 = vmatpush2.bf16.msra.mxu0 %v20569_v7  ;;  %v20619_v7 = vld [vmem:[%s22203_s17 + $0x10ec] ss:$16 sps:$4 sm:$0xff]  }
 0x55b   : > { %14741 = vmatpush2.bf16.msra.mxu1 %v20572_v49  ;;  %14701 = vmatprep.subr.bf16.mxu0 %v20577_v56  ;;  %v20622_v49 = vld [vmem:[%s22203_s17 + $0x12ec] ss:$16 sps:$4 sm:$0xff]   ;;  %v20617_v56 = vld [vmem:[%s22203_s17 + $0x10e8] ss:$16 sps:$4 sm:$0xff]  }
 0x55c   : > { %14742 = vmatprep.subr.bf16.mxu1 %v20580_v53  ;;  %v20620_v53 = vld [vmem:[%s22203_s17 + $0x12e8] ss:$16 sps:$4 sm:$0xff]  }
 0x55e   : > { %14702 = vmatpush2.bf16.msra.mxu0 %v20575_v14  ;;  %v20625_v14 = vld [vmem:[%s22203_s17 + $0x10cc] ss:$16 sps:$4 sm:$0xff]  }
 0x55f   : > { %14743 = vmatpush2.bf16.msra.mxu1 %v20578_v19  ;;  %14703 = vmatprep.subr.bf16.mxu0 %v20583_v62  ;;  %v20628_v19 = vld [vmem:[%s22203_s17 + $0x12cc] ss:$16 sps:$4 sm:$0xff]  }
 0x560   : > { %14744 = vmatprep.subr.bf16.mxu1 %v20586_v8 }
 0x562   : > { %14704 = vmatpush2.bf16.msra.mxu0 %v20581_v55 }
 0x563   : > { %14745 = vmatpush2.bf16.msra.mxu1 %v20584_v60  ;;  %14705 = vmatprep.subr.bf16.mxu0 %v20589_v33  ;;  %v20623_v60 = vld [vmem:[%s22203_s17 + $0x10c8] ss:$16 sps:$4 sm:$0xff]  }
 0x564   : > { %14746 = vmatprep.subr.bf16.mxu1 %v20592_v27  ;;  %v20626_v33 = vld [vmem:[%s22203_s17 + $0x12c8] ss:$16 sps:$4 sm:$0xff]  }
 0x566   : > { %14706 = vmatpush2.bf16.msra.mxu0 %v20587_v31 }
 0x567   : > { %14747 = vmatpush2.bf16.msra.mxu1 %v20590_v38  ;;  %14707 = vmatprep.subr.bf16.mxu0 %v20595_v18  ;;  %v20631_v38 = vld [vmem:[%s22203_s17 + $0x10ac] ss:$16 sps:$4 sm:$0xff]  }
 0x568   : > { %14748 = vmatprep.subr.bf16.mxu1 %v20598_v24  ;;  %v20634_v18 = vld [vmem:[%s22203_s17 + $0x12ac] ss:$16 sps:$4 sm:$0xff]  }
 0x56a   : > { %14708 = vmatpush2.bf16.msra.mxu0 %v20593_v22  ;;  %v20629_v22 = vld [vmem:[%s22203_s17 + $0x10a8] ss:$16 sps:$4 sm:$0xff]  }
 0x56b   : > { %14749 = vmatpush2.bf16.msra.mxu1 %v20596_v51  ;;  %14709 = vmatprep.subr.bf16.mxu0 %v20601_v42  ;;  %v20632_v51 = vld [vmem:[%s22203_s17 + $0x12a8] ss:$16 sps:$4 sm:$0xff]  }
 0x56c   : > { %14750 = vmatprep.subr.bf16.mxu1 %v20604_v43 }
 0x56e   : > { %14710 = vmatpush2.bf16.msra.mxu0 %v20599_v2  ;;  %v20637_v2 = vld [vmem:[%s22203_s17 + $0x108c] ss:$16 sps:$4 sm:$0xff]  }
 0x56f   : > { %14751 = vmatpush2.bf16.msra.mxu1 %v20602_v50  ;;  %14711 = vmatprep.subr.bf16.mxu0 %v20607_v6  ;;  %v20638_v50 = vld [vmem:[%s22203_s17 + $0x1288] ss:$16 sps:$4 sm:$0xff]   ;;  %v20643_v6 = vld [vmem:[%s22203_s17 + $0x106c] ss:$16 sps:$4 sm:$0xff]  }
 0x570   : > { %14752 = vmatprep.subr.bf16.mxu1 %v20610_v30  ;;  %v20646_v30 = vld [vmem:[%s22203_s17 + $0x126c] ss:$16 sps:$4 sm:$0xff]  }
 0x572   : > { %14712 = vmatpush2.bf16.msra.mxu0 %v20605_v61  ;;  %v20641_v61 = vld [vmem:[%s22203_s17 + $0x1068] ss:$16 sps:$4 sm:$0xff]  }
 0x573   : > { %14753 = vmatpush2.bf16.msra.mxu1 %v20608_v1  ;;  %14713 = vmatprep.subr.bf16.mxu0 %v20613_v37  ;;  %v20644_v1 = vld [vmem:[%s22203_s17 + $0x1268] ss:$16 sps:$4 sm:$0xff]   ;;  %v20649_v37 = vld [vmem:[%s22203_s17 + $0x104c] ss:$16 sps:$4 sm:$0xff]  }
 0x574   : > { %14754 = vmatprep.subr.bf16.mxu1 %v20616_v12  ;;  %v20652_v12 = vld [vmem:[%s22203_s17 + $0x124c] ss:$16 sps:$4 sm:$0xff]  }
 0x576   : > { %14714 = vmatpush2.bf16.msra.mxu0 %v20611_v36  ;;  %v20647_v36 = vld [vmem:[%s22203_s17 + $0x1048] ss:$16 sps:$4 sm:$0xff]  }
 0x577   : > { %14755 = vmatpush2.bf16.msra.mxu1 %v20614_v35  ;;  %14765 = vmatprep.subr.bf16.mxu0 %v20619_v7  ;;  %v20650_v35 = vld [vmem:[%s22203_s17 + $0x1248] ss:$16 sps:$4 sm:$0xff]   ;;  %v20655_v7 = vld [vmem:[%s22203_s17 + $0x102c] ss:$16 sps:$4 sm:$0xff]  }
 0x578   : > { %14806 = vmatprep.subr.bf16.mxu1 %v20622_v49  ;;  %v20658_v49 = vld [vmem:[%s22203_s17 + $0x122c] ss:$16 sps:$4 sm:$0xff]  }
 0x579   : > { %v14471_v62 = vpop.f32.mrf.mxu0  ;;  %14716 = vmatmul.mubr.bf16.vlgmr.msra.gmra.mxu0 %v22584_v13 }
 0x57a   : > { %v14512_v8 = vpop.f32.mrf.mxu1  ;;  %14757 = vmatmul.mubr.bf16.vlgmr.msra.gmra.mxu1 %v22594_v21  ;;  %14766 = vmatpush1.bf16.msra.mxu0 %v20617_v56  ;;  %v20653_v56 = vld [vmem:[%s22203_s17 + $0x1028] ss:$16 sps:$4 sm:$0xff]  }
 0x57b   : > { %v24050_v55 = vadd.f32 %v14512_v8, %v14471_v62  ;;  %14807 = vmatpush1.bf16.msra.mxu1 %v20620_v53  ;;  %v14473_v27 = vpop.f32.mrf.mxu0  ;;  %14767 = vmatprep.subr.bf16.mxu0 %v20625_v14  ;;  %v20656_v53 = vld [vmem:[%s22203_s17 + $0x1228] ss:$16 sps:$4 sm:$0xff]   ;;  %v20661_v14 = vld [vmem:[%s22203_s17 + $0x100c] ss:$16 sps:$4 sm:$0xff]  }
 0x57c   : > { %v14514_v31 = vpop.f32.mrf.mxu1  ;;  %14808 = vmatprep.subr.bf16.mxu1 %v20628_v19  ;;  %14797 = vmatprep.mubr.bf16.mxu0 %v22590_v20  ;;  %v20640_v20 = vld [vmem:[%s22203_s17 + $0x128c] ss:$16 sps:$4 sm:$0xff]   ;;  %v20659_v62 = vld [vmem:[%s22203_s17 + $0x1008] ss:$16 sps:$4 sm:$0xff]  }
 0x57d   : > { %v24056_v24 = vadd.f32 %v14514_v31, %v14473_v27  ;;  %14838 = vmatprep.mubr.bf16.mxu1 %v22602_v26  ;;  %v14475_v13 = vpop.f32.mrf.mxu0  ;;  %v20635_v26 = vld [vmem:[%s22203_s17 + $0x1088] ss:$16 sps:$4 sm:$0xff]   ;;  %v20664_v19 = vld [vmem:[%s22203_s17 + $0x120c] ss:$16 sps:$4 sm:$0xff]  }
 0x57e   : > { %v14516_v21 = vpop.f32.mrf.mxu1  ;;  %14768 = vmatpush1.bf16.msra.mxu0 %v20623_v60  ;;  %v20662_v8 = vld [vmem:[%s22203_s17 + $0x1208] ss:$16 sps:$4 sm:$0xff]   ;;  %v20667_v60 = vld [vmem:[%s22203_s17 + $0x11ec] ss:$16 sps:$4 sm:$0xff]  }
 0x57f   : > { %14809 = vmatpush1.bf16.msra.mxu1 %v20626_v33  ;;  %v14476_v42 = vpop.f32.mrf.mxu0  ;;  %14769 = vmatprep.subr.bf16.mxu0 %v20631_v38  ;;  %v20670_v33 = vld [vmem:[%s22203_s17 + $0x13ec] ss:$16 sps:$4 sm:$0xff]   ;;  %v20665_v27 = vld [vmem:[%s22203_s17 + $0x11e8] ss:$16 sps:$4 sm:$0xff]  }
 0x580   : > { %v14517_v43 = vpop.f32.mrf.mxu1  ;;  %14810 = vmatprep.subr.bf16.mxu1 %v20634_v18  ;;  %v20668_v31 = vld [vmem:[%s22203_s17 + $0x13e8] ss:$16 sps:$4 sm:$0xff]   ;;  %v20673_v38 = vld [vmem:[%s22203_s17 + $0x11cc] ss:$16 sps:$4 sm:$0xff]  }
 0x581   : > { %v20676_v18 = vld [vmem:[%s22203_s17 + $0x13cc] ss:$16 sps:$4 sm:$0xff]   ;;  %v20671_v13 = vld [vmem:[%s22203_s17 + $0x11c8] ss:$16 sps:$4 sm:$0xff]  }
 0x582   : > { %14770 = vmatpush1.bf16.msra.mxu0 %v20629_v22  ;;  %v20674_v21 = vld [vmem:[%s22203_s17 + $0x13c8] ss:$16 sps:$4 sm:$0xff]   ;;  %v20679_v22 = vld [vmem:[%s22203_s17 + $0x11ac] ss:$16 sps:$4 sm:$0xff]  }
 0x583   : > { %14811 = vmatpush1.bf16.msra.mxu1 %v20632_v51  ;;  %14771 = vmatprep.subr.bf16.mxu0 %v20637_v2  ;;  %v20682_v51 = vld [vmem:[%s22203_s17 + $0x13ac] ss:$16 sps:$4 sm:$0xff]   ;;  %v20677_v42 = vld [vmem:[%s22203_s17 + $0x11a8] ss:$16 sps:$4 sm:$0xff]  }
 0x584   : > { %14812 = vmatprep.subr.bf16.mxu1 %v20640_v20  ;;  %v20680_v43 = vld [vmem:[%s22203_s17 + $0x13a8] ss:$16 sps:$4 sm:$0xff]   ;;  %v20685_v2 = vld [vmem:[%s22203_s17 + $0x118c] ss:$16 sps:$4 sm:$0xff]  }
 0x585   : > { %v20688_v20 = vld [vmem:[%s22203_s17 + $0x138c] ss:$16 sps:$4 sm:$0xff]  }
 0x586   : > { %14772 = vmatpush1.bf16.msra.mxu0 %v20635_v26  ;;  %v20683_v26 = vld [vmem:[%s22203_s17 + $0x1188] ss:$16 sps:$4 sm:$0xff]  }
 0x587   : > { %14813 = vmatpush1.bf16.msra.mxu1 %v20638_v50  ;;  %14773 = vmatprep.subr.bf16.mxu0 %v20643_v6  ;;  %v20686_v50 = vld [vmem:[%s22203_s17 + $0x1388] ss:$16 sps:$4 sm:$0xff]   ;;  %v20691_v6 = vld [vmem:[%s22203_s17 + $0x116c] ss:$16 sps:$4 sm:$0xff]  }
 0x588   : > { %14814 = vmatprep.subr.bf16.mxu1 %v20646_v30  ;;  %v20694_v30 = vld [vmem:[%s22203_s17 + $0x136c] ss:$16 sps:$4 sm:$0xff]  }
 0x58a   : > { %14774 = vmatpush1.bf16.msra.mxu0 %v20641_v61  ;;  %v20689_v61 = vld [vmem:[%s22203_s17 + $0x1168] ss:$16 sps:$4 sm:$0xff]  }
 0x58b   : > { %14815 = vmatpush1.bf16.msra.mxu1 %v20644_v1  ;;  %14775 = vmatprep.subr.bf16.mxu0 %v20649_v37  ;;  %v20692_v1 = vld [vmem:[%s22203_s17 + $0x1368] ss:$16 sps:$4 sm:$0xff]   ;;  %v20697_v37 = vld [vmem:[%s22203_s17 + $0x114c] ss:$16 sps:$4 sm:$0xff]  }
 0x58c   : > { %14816 = vmatprep.subr.bf16.mxu1 %v20652_v12  ;;  %v20700_v12 = vld [vmem:[%s22203_s17 + $0x134c] ss:$16 sps:$4 sm:$0xff]  }
 0x58e   : > { %14776 = vmatpush1.bf16.msra.mxu0 %v20647_v36  ;;  %v20695_v36 = vld [vmem:[%s22203_s17 + $0x1148] ss:$16 sps:$4 sm:$0xff]  }
 0x58f   : > { %14817 = vmatpush1.bf16.msra.mxu1 %v20650_v35  ;;  %14777 = vmatprep.subr.bf16.mxu0 %v20655_v7  ;;  %v20698_v35 = vld [vmem:[%s22203_s17 + $0x1348] ss:$16 sps:$4 sm:$0xff]   ;;  %v20703_v7 = vld [vmem:[%s22203_s17 + $0x112c] ss:$16 sps:$4 sm:$0xff]  }
 0x590   : > { %14818 = vmatprep.subr.bf16.mxu1 %v20658_v49  ;;  %v20706_v49 = vld [vmem:[%s22203_s17 + $0x132c] ss:$16 sps:$4 sm:$0xff]  }
 0x592   : > { %14778 = vmatpush1.bf16.msra.mxu0 %v20653_v56  ;;  %v20701_v56 = vld [vmem:[%s22203_s17 + $0x1128] ss:$16 sps:$4 sm:$0xff]  }
 0x593   : > { %14819 = vmatpush1.bf16.msra.mxu1 %v20656_v53  ;;  %14779 = vmatprep.subr.bf16.mxu0 %v20661_v14  ;;  %v20704_v53 = vld [vmem:[%s22203_s17 + $0x1328] ss:$16 sps:$4 sm:$0xff]   ;;  %v20709_v14 = vld [vmem:[%s22203_s17 + $0x110c] ss:$16 sps:$4 sm:$0xff]  }
 0x594   : > { %14820 = vmatprep.subr.bf16.mxu1 %v20664_v19  ;;  %v20712_v19 = vld [vmem:[%s22203_s17 + $0x130c] ss:$16 sps:$4 sm:$0xff]  }
 0x596   : > { %14780 = vmatpush1.bf16.msra.mxu0 %v20659_v62  ;;  %v20707_v62 = vld [vmem:[%s22203_s17 + $0x1108] ss:$16 sps:$4 sm:$0xff]  }
 0x597   : > { %14821 = vmatpush1.bf16.msra.mxu1 %v20662_v8  ;;  %14781 = vmatprep.subr.bf16.mxu0 %v20667_v60  ;;  %v20710_v8 = vld [vmem:[%s22203_s17 + $0x1308] ss:$16 sps:$4 sm:$0xff]   ;;  %v20715_v60 = vld [vmem:[%s22203_s17 + $0x14ec] ss:$16 sps:$4 sm:$0xff]  }
 0x598   : > { %14822 = vmatprep.subr.bf16.mxu1 %v20670_v33  ;;  %v20718_v33 = vld [vmem:[%s22203_s17 + $0x16ec] ss:$16 sps:$4 sm:$0xff]  }
 0x59a   : > { %14782 = vmatpush2.bf16.msra.mxu0 %v20665_v27  ;;  %v20713_v27 = vld [vmem:[%s22203_s17 + $0x14e8] ss:$16 sps:$4 sm:$0xff]  }
 0x59b   : > { %14823 = vmatpush2.bf16.msra.mxu1 %v20668_v31  ;;  %14783 = vmatprep.subr.bf16.mxu0 %v20673_v38  ;;  %v20716_v31 = vld [vmem:[%s22203_s17 + $0x16e8] ss:$16 sps:$4 sm:$0xff]   ;;  %v20721_v38 = vld [vmem:[%s22203_s17 + $0x14cc] ss:$16 sps:$4 sm:$0xff]  }
 0x59c   : > { %14824 = vmatprep.subr.bf16.mxu1 %v20676_v18  ;;  %v20724_v18 = vld [vmem:[%s22203_s17 + $0x16cc] ss:$16 sps:$4 sm:$0xff]  }
 0x59e   : > { %14784 = vmatpush2.bf16.msra.mxu0 %v20671_v13 }
 0x59f   : > { %14825 = vmatpush2.bf16.msra.mxu1 %v20674_v21  ;;  %14785 = vmatprep.subr.bf16.mxu0 %v20679_v22 }
 0x5a0   : > { %14826 = vmatprep.subr.bf16.mxu1 %v20682_v51  ;;  %v20719_v51 = vld [vmem:[%s22203_s17 + $0x14c8] ss:$16 sps:$4 sm:$0xff]  }
 0x5a2   : > { %14786 = vmatpush2.bf16.msra.mxu0 %v20677_v42  ;;  %v20722_v42 = vld [vmem:[%s22203_s17 + $0x16c8] ss:$16 sps:$4 sm:$0xff]  }
 0x5a3   : > { %14827 = vmatpush2.bf16.msra.mxu1 %v20680_v43  ;;  %14787 = vmatprep.subr.bf16.mxu0 %v20685_v2 }
 0x5a4   : > { %14828 = vmatprep.subr.bf16.mxu1 %v20688_v20  ;;  %v20727_v20 = vld [vmem:[%s22203_s17 + $0x14ac] ss:$16 sps:$4 sm:$0xff]  }
 0x5a6   : > { %14788 = vmatpush2.bf16.msra.mxu0 %v20683_v26  ;;  %v20730_v26 = vld [vmem:[%s22203_s17 + $0x16ac] ss:$16 sps:$4 sm:$0xff]  }
 0x5a7   : > { %14829 = vmatpush2.bf16.msra.mxu1 %v20686_v50  ;;  %14789 = vmatprep.subr.bf16.mxu0 %v20691_v6 }
 0x5a8   : > { %14830 = vmatprep.subr.bf16.mxu1 %v20694_v30  ;;  %v20725_v30 = vld [vmem:[%s22203_s17 + $0x14a8] ss:$16 sps:$4 sm:$0xff]  }
 0x5aa   : > { %14790 = vmatpush2.bf16.msra.mxu0 %v20689_v61  ;;  %v20728_v61 = vld [vmem:[%s22203_s17 + $0x16a8] ss:$16 sps:$4 sm:$0xff]  }
 0x5ab   : > { %14831 = vmatpush2.bf16.msra.mxu1 %v20692_v1  ;;  %14791 = vmatprep.subr.bf16.mxu0 %v20697_v37 }
 0x5ac   : > { %14832 = vmatprep.subr.bf16.mxu1 %v20700_v12  ;;  %v20734_v12 = vld [vmem:[%s22203_s17 + $0x1688] ss:$16 sps:$4 sm:$0xff]  }
 0x5ae   : > { %14792 = vmatpush2.bf16.msra.mxu0 %v20695_v36  ;;  %v20739_v36 = vld [vmem:[%s22203_s17 + $0x146c] ss:$16 sps:$4 sm:$0xff]  }
 0x5af   : > { %14833 = vmatpush2.bf16.msra.mxu1 %v20698_v35  ;;  %14793 = vmatprep.subr.bf16.mxu0 %v20703_v7  ;;  %v20742_v35 = vld [vmem:[%s22203_s17 + $0x166c] ss:$16 sps:$4 sm:$0xff]   ;;  %v20737_v7 = vld [vmem:[%s22203_s17 + $0x1468] ss:$16 sps:$4 sm:$0xff]  }
 0x5b0   : > { %14834 = vmatprep.subr.bf16.mxu1 %v20706_v49  ;;  %v20740_v49 = vld [vmem:[%s22203_s17 + $0x1668] ss:$16 sps:$4 sm:$0xff]  }
 0x5b2   : > { %14794 = vmatpush2.bf16.msra.mxu0 %v20701_v56  ;;  %v20745_v56 = vld [vmem:[%s22203_s17 + $0x144c] ss:$16 sps:$4 sm:$0xff]  }
 0x5b3   : > { %14835 = vmatpush2.bf16.msra.mxu1 %v20704_v53  ;;  %14795 = vmatprep.subr.bf16.mxu0 %v20709_v14  ;;  %v20748_v53 = vld [vmem:[%s22203_s17 + $0x164c] ss:$16 sps:$4 sm:$0xff]   ;;  %v20743_v14 = vld [vmem:[%s22203_s17 + $0x1448] ss:$16 sps:$4 sm:$0xff]  }
 0x5b4   : > { %14836 = vmatprep.subr.bf16.mxu1 %v20712_v19  ;;  %v20746_v19 = vld [vmem:[%s22203_s17 + $0x1648] ss:$16 sps:$4 sm:$0xff]  }
 0x5b6   : > { %14796 = vmatpush2.bf16.msra.mxu0 %v20707_v62  ;;  %v20751_v62 = vld [vmem:[%s22203_s17 + $0x142c] ss:$16 sps:$4 sm:$0xff]  }
 0x5b7   : > { %14837 = vmatpush2.bf16.msra.mxu1 %v20710_v8  ;;  %14847 = vmatprep.subr.bf16.mxu0 %v20715_v60  ;;  %v20754_v8 = vld [vmem:[%s22203_s17 + $0x162c] ss:$16 sps:$4 sm:$0xff]   ;;  %v20749_v60 = vld [vmem:[%s22203_s17 + $0x1428] ss:$16 sps:$4 sm:$0xff]  }
 0x5b8   : > { %14888 = vmatprep.subr.bf16.mxu1 %v20718_v33  ;;  %v20752_v33 = vld [vmem:[%s22203_s17 + $0x1628] ss:$16 sps:$4 sm:$0xff]  }
 0x5b9   : > { %v14553_v13 = vpop.f32.mrf.mxu0  ;;  %14798 = vmatmul.mubr.bf16.vlgmr.msra.gmra.mxu0 %v22677_v4 }
 0x5ba   : > { %v14594_v21 = vpop.f32.mrf.mxu1  ;;  %14839 = vmatmul.mubr.bf16.vlgmr.msra.gmra.mxu1 %v22690_v5  ;;  %v14554_v22 = vadd.f32 %v14553_v13, %v24050_v55  ;;  %14848 = vmatpush1.bf16.msra.mxu0 %v20713_v27  ;;  %v20757_v27 = vld [vmem:[%s22203_s17 + $0x140c] ss:$16 sps:$4 sm:$0xff]  }
 0x5bb   : > { %14889 = vmatpush1.bf16.msra.mxu1 %v20716_v31  ;;  %v14555_v43 = vpop.f32.mrf.mxu0  ;;  %14849 = vmatprep.subr.bf16.mxu0 %v20721_v38  ;;  %v20760_v31 = vld [vmem:[%s22203_s17 + $0x160c] ss:$16 sps:$4 sm:$0xff]   ;;  %v20755_v38 = vld [vmem:[%s22203_s17 + $0x1408] ss:$16 sps:$4 sm:$0xff]  }
 0x5bc   : > { %v14596_v2 = vpop.f32.mrf.mxu1  ;;  %14890 = vmatprep.subr.bf16.mxu1 %v20724_v18  ;;  %v24127_v50 = vadd.f32 %v14594_v21, %v14554_v22  ;;  %v14556_v4 = vadd.f32 %v14555_v43, %v24056_v24  ;;  %14879 = vmatprep.mubr.bf16.mxu0 %v22686_v15  ;;  %v20733_v15 = vld [vmem:[%s22203_s17 + $0x148c] ss:$16 sps:$4 sm:$0xff]   ;;  %v20731_v24 = vld [vmem:[%s22203_s17 + $0x1488] ss:$16 sps:$4 sm:$0xff]  }
 0x5bd   : > { %14920 = vmatprep.mubr.bf16.mxu1 %v22698_v23  ;;  %v14557_v5 = vpop.f32.mrf.mxu0  ;;  %v20736_v23 = vld [vmem:[%s22203_s17 + $0x168c] ss:$16 sps:$4 sm:$0xff]   ;;  %v20758_v18 = vld [vmem:[%s22203_s17 + $0x1608] ss:$16 sps:$4 sm:$0xff]  }
 0x5be   : > { %v14598_v55 = vpop.f32.mrf.mxu1  ;;  %v24132_v6 = vadd.f32 %v14596_v2, %v14556_v4  ;;  %14850 = vmatpush1.bf16.msra.mxu0 %v20719_v51  ;;  %v20763_v13 = vld [vmem:[%s22203_s17 + $0x15ec] ss:$16 sps:$4 sm:$0xff]   ;;  %v20761_v22 = vld [vmem:[%s22203_s17 + $0x15e8] ss:$16 sps:$4 sm:$0xff]  }
 0x5bf   : > { %14891 = vmatpush1.bf16.msra.mxu1 %v20722_v42  ;;  %v14558_v1 = vpop.f32.mrf.mxu0  ;;  %14851 = vmatprep.subr.bf16.mxu0 %v20727_v20  ;;  %v20766_v21 = vld [vmem:[%s22203_s17 + $0x17ec] ss:$16 sps:$4 sm:$0xff]   ;;  %v20764_v51 = vld [vmem:[%s22203_s17 + $0x17e8] ss:$16 sps:$4 sm:$0xff]  }
 0x5c0   : > { %v14599_v37 = vpop.f32.mrf.mxu1  ;;  %14892 = vmatprep.subr.bf16.mxu1 %v20730_v26  ;;  %v20769_v42 = vld [vmem:[%s22203_s17 + $0x15cc] ss:$16 sps:$4 sm:$0xff]   ;;  %v20767_v2 = vld [vmem:[%s22203_s17 + $0x15c8] ss:$16 sps:$4 sm:$0xff]  }
 0x5c1   : > { %v20772_v43 = vld [vmem:[%s22203_s17 + $0x17cc] ss:$16 sps:$4 sm:$0xff]   ;;  %v20770_v20 = vld [vmem:[%s22203_s17 + $0x17c8] ss:$16 sps:$4 sm:$0xff]  }
 0x5c2   : > { %14852 = vmatpush1.bf16.msra.mxu0 %v20725_v30  ;;  %v20775_v26 = vld [vmem:[%s22203_s17 + $0x15ac] ss:$16 sps:$4 sm:$0xff]   ;;  %v20773_v5 = vld [vmem:[%s22203_s17 + $0x15a8] ss:$16 sps:$4 sm:$0xff]  }
 0x5c3   : > { %14893 = vmatpush1.bf16.msra.mxu1 %v20728_v61  ;;  %14853 = vmatprep.subr.bf16.mxu0 %v20733_v15  ;;  %v20778_v4 = vld [vmem:[%s22203_s17 + $0x17ac] ss:$16 sps:$4 sm:$0xff]   ;;  %v20776_v55 = vld [vmem:[%s22203_s17 + $0x17a8] ss:$16 sps:$4 sm:$0xff]  }
 0x5c4   : > { %14894 = vmatprep.subr.bf16.mxu1 %v20736_v23  ;;  %v20781_v30 = vld [vmem:[%s22203_s17 + $0x158c] ss:$16 sps:$4 sm:$0xff]   ;;  %v20779_v1 = vld [vmem:[%s22203_s17 + $0x1588] ss:$16 sps:$4 sm:$0xff]  }
 0x5c5   : > { %v20784_v61 = vld [vmem:[%s22203_s17 + $0x178c] ss:$16 sps:$4 sm:$0xff]   ;;  %v20782_v37 = vld [vmem:[%s22203_s17 + $0x1788] ss:$16 sps:$4 sm:$0xff]  }
 0x5c6   : > { %14854 = vmatpush1.bf16.msra.mxu0 %v20731_v24  ;;  %v20787_v15 = vld [vmem:[%s22203_s17 + $0x156c] ss:$16 sps:$4 sm:$0xff]   ;;  %v20785_v24 = vld [vmem:[%s22203_s17 + $0x1568] ss:$16 sps:$4 sm:$0xff]  }
 0x5c7   : > { %14895 = vmatpush1.bf16.msra.mxu1 %v20734_v12  ;;  %14855 = vmatprep.subr.bf16.mxu0 %v20739_v36  ;;  %v20790_v23 = vld [vmem:[%s22203_s17 + $0x176c] ss:$16 sps:$4 sm:$0xff]   ;;  %v20788_v12 = vld [vmem:[%s22203_s17 + $0x1768] ss:$16 sps:$4 sm:$0xff]  }
 0x5c8   : > { %14896 = vmatprep.subr.bf16.mxu1 %v20742_v35  ;;  %v20793_v36 = vld [vmem:[%s22203_s17 + $0x154c] ss:$16 sps:$4 sm:$0xff]  }
 0x5c9   : > { %v20796_v35 = vld [vmem:[%s22203_s17 + $0x174c] ss:$16 sps:$4 sm:$0xff]  }
 0x5ca   : > { %14856 = vmatpush1.bf16.msra.mxu0 %v20737_v7  ;;  %v20791_v7 = vld [vmem:[%s22203_s17 + $0x1548] ss:$16 sps:$4 sm:$0xff]  }
 0x5cb   : > { %14897 = vmatpush1.bf16.msra.mxu1 %v20740_v49  ;;  %14857 = vmatprep.subr.bf16.mxu0 %v20745_v56  ;;  %v20794_v49 = vld [vmem:[%s22203_s17 + $0x1748] ss:$16 sps:$4 sm:$0xff]   ;;  %v20799_v56 = vld [vmem:[%s22203_s17 + $0x152c] ss:$16 sps:$4 sm:$0xff]  }
 0x5cc   : > { %14898 = vmatprep.subr.bf16.mxu1 %v20748_v53  ;;  %v20802_v53 = vld [vmem:[%s22203_s17 + $0x172c] ss:$16 sps:$4 sm:$0xff]  }
 0x5ce   : > { %14858 = vmatpush1.bf16.msra.mxu0 %v20743_v14  ;;  %v20797_v14 = vld [vmem:[%s22203_s17 + $0x1528] ss:$16 sps:$4 sm:$0xff]  }
 0x5cf   : > { %14899 = vmatpush1.bf16.msra.mxu1 %v20746_v19  ;;  %14859 = vmatprep.subr.bf16.mxu0 %v20751_v62  ;;  %v20800_v19 = vld [vmem:[%s22203_s17 + $0x1728] ss:$16 sps:$4 sm:$0xff]   ;;  %v20805_v62 = vld [vmem:[%s22203_s17 + $0x150c] ss:$16 sps:$4 sm:$0xff]  }
 0x5d0   : > { %14900 = vmatprep.subr.bf16.mxu1 %v20754_v8  ;;  %v20808_v8 = vld [vmem:[%s22203_s17 + $0x170c] ss:$16 sps:$4 sm:$0xff]  }
 0x5d2   : > { %14860 = vmatpush1.bf16.msra.mxu0 %v20749_v60  ;;  %v20803_v60 = vld [vmem:[%s22203_s17 + $0x1508] ss:$16 sps:$4 sm:$0xff]  }
 0x5d3   : > { %14901 = vmatpush1.bf16.msra.mxu1 %v20752_v33  ;;  %14861 = vmatprep.subr.bf16.mxu0 %v20757_v27  ;;  %v20806_v33 = vld [vmem:[%s22203_s17 + $0x1708] ss:$16 sps:$4 sm:$0xff]   ;;  %v20811_v27 = vld [vmem:[%s22203_s17 + $0x18ec] ss:$16 sps:$4 sm:$0xff]  }
 0x5d4   : > { %14902 = vmatprep.subr.bf16.mxu1 %v20760_v31  ;;  %v20814_v31 = vld [vmem:[%s22203_s17 + $0x1aec] ss:$16 sps:$4 sm:$0xff]  }
 0x5d6   : > { %14862 = vmatpush1.bf16.msra.mxu0 %v20755_v38  ;;  %v20809_v38 = vld [vmem:[%s22203_s17 + $0x18e8] ss:$16 sps:$4 sm:$0xff]  }
 0x5d7   : > { %14903 = vmatpush1.bf16.msra.mxu1 %v20758_v18  ;;  %14863 = vmatprep.subr.bf16.mxu0 %v20763_v13  ;;  %v20812_v18 = vld [vmem:[%s22203_s17 + $0x1ae8] ss:$16 sps:$4 sm:$0xff]   ;;  %v20817_v13 = vld [vmem:[%s22203_s17 + $0x18cc] ss:$16 sps:$4 sm:$0xff]  }
 0x5d8   : > { %14904 = vmatprep.subr.bf16.mxu1 %v20766_v21  ;;  %v20820_v21 = vld [vmem:[%s22203_s17 + $0x1acc] ss:$16 sps:$4 sm:$0xff]  }
 0x5da   : > { %14864 = vmatpush2.bf16.msra.mxu0 %v20761_v22 }
 0x5db   : > { %14905 = vmatpush2.bf16.msra.mxu1 %v20764_v51  ;;  %14865 = vmatprep.subr.bf16.mxu0 %v20769_v42 }
 0x5dc   : > { %14906 = vmatprep.subr.bf16.mxu1 %v20772_v43  ;;  %v20815_v43 = vld [vmem:[%s22203_s17 + $0x18c8] ss:$16 sps:$4 sm:$0xff]  }
 0x5de   : > { %14866 = vmatpush2.bf16.msra.mxu0 %v20767_v2  ;;  %v20818_v2 = vld [vmem:[%s22203_s17 + $0x1ac8] ss:$16 sps:$4 sm:$0xff]  }
 0x5df   : > { %14907 = vmatpush2.bf16.msra.mxu1 %v20770_v20  ;;  %14867 = vmatprep.subr.bf16.mxu0 %v20775_v26 }
 0x5e0   : > { %14908 = vmatprep.subr.bf16.mxu1 %v20778_v4  ;;  %v20823_v4 = vld [vmem:[%s22203_s17 + $0x18ac] ss:$16 sps:$4 sm:$0xff]  }
 0x5e2   : > { %14868 = vmatpush2.bf16.msra.mxu0 %v20773_v5  ;;  %v20826_v5 = vld [vmem:[%s22203_s17 + $0x1aac] ss:$16 sps:$4 sm:$0xff]  }
 0x5e3   : > { %14909 = vmatpush2.bf16.msra.mxu1 %v20776_v55  ;;  %14869 = vmatprep.subr.bf16.mxu0 %v20781_v30 }
 0x5e4   : > { %14910 = vmatprep.subr.bf16.mxu1 %v20784_v61  ;;  %v20821_v61 = vld [vmem:[%s22203_s17 + $0x18a8] ss:$16 sps:$4 sm:$0xff]  }
 0x5e6   : > { %14870 = vmatpush2.bf16.msra.mxu0 %v20779_v1  ;;  %v20824_v1 = vld [vmem:[%s22203_s17 + $0x1aa8] ss:$16 sps:$4 sm:$0xff]  }
 0x5e7   : > { %14911 = vmatpush2.bf16.msra.mxu1 %v20782_v37  ;;  %14871 = vmatprep.subr.bf16.mxu0 %v20787_v15 }
 0x5e8   : > { %14912 = vmatprep.subr.bf16.mxu1 %v20790_v23  ;;  %v20830_v23 = vld [vmem:[%s22203_s17 + $0x1a88] ss:$16 sps:$4 sm:$0xff]  }
 0x5ea   : > { %14872 = vmatpush2.bf16.msra.mxu0 %v20785_v24  ;;  %v20835_v24 = vld [vmem:[%s22203_s17 + $0x186c] ss:$16 sps:$4 sm:$0xff]  }
 0x5eb   : > { %14913 = vmatpush2.bf16.msra.mxu1 %v20788_v12  ;;  %14873 = vmatprep.subr.bf16.mxu0 %v20793_v36  ;;  %v20838_v12 = vld [vmem:[%s22203_s17 + $0x1a6c] ss:$16 sps:$4 sm:$0xff]   ;;  %v20833_v36 = vld [vmem:[%s22203_s17 + $0x1868] ss:$16 sps:$4 sm:$0xff]  }
 0x5ec   : > { %14914 = vmatprep.subr.bf16.mxu1 %v20796_v35  ;;  %v20836_v35 = vld [vmem:[%s22203_s17 + $0x1a68] ss:$16 sps:$4 sm:$0xff]  }
 0x5ee   : > { %14874 = vmatpush2.bf16.msra.mxu0 %v20791_v7  ;;  %v20841_v7 = vld [vmem:[%s22203_s17 + $0x184c] ss:$16 sps:$4 sm:$0xff]  }
 0x5ef   : > { %14915 = vmatpush2.bf16.msra.mxu1 %v20794_v49  ;;  %14875 = vmatprep.subr.bf16.mxu0 %v20799_v56  ;;  %v20844_v49 = vld [vmem:[%s22203_s17 + $0x1a4c] ss:$16 sps:$4 sm:$0xff]   ;;  %v20839_v56 = vld [vmem:[%s22203_s17 + $0x1848] ss:$16 sps:$4 sm:$0xff]  }
 0x5f0   : > { %14916 = vmatprep.subr.bf16.mxu1 %v20802_v53  ;;  %v20842_v53 = vld [vmem:[%s22203_s17 + $0x1a48] ss:$16 sps:$4 sm:$0xff]  }
 0x5f2   : > { %14876 = vmatpush2.bf16.msra.mxu0 %v20797_v14  ;;  %v20847_v14 = vld [vmem:[%s22203_s17 + $0x182c] ss:$16 sps:$4 sm:$0xff]  }
 0x5f3   : > { %14917 = vmatpush2.bf16.msra.mxu1 %v20800_v19  ;;  %14877 = vmatprep.subr.bf16.mxu0 %v20805_v62  ;;  %v20850_v19 = vld [vmem:[%s22203_s17 + $0x1a2c] ss:$16 sps:$4 sm:$0xff]   ;;  %v20845_v62 = vld [vmem:[%s22203_s17 + $0x1828] ss:$16 sps:$4 sm:$0xff]  }
 0x5f4   : > { %14918 = vmatprep.subr.bf16.mxu1 %v20808_v8  ;;  %v20848_v8 = vld [vmem:[%s22203_s17 + $0x1a28] ss:$16 sps:$4 sm:$0xff]  }
 0x5f6   : > { %14878 = vmatpush2.bf16.msra.mxu0 %v20803_v60  ;;  %v20853_v60 = vld [vmem:[%s22203_s17 + $0x180c] ss:$16 sps:$4 sm:$0xff]  }
 0x5f7   : > { %14919 = vmatpush2.bf16.msra.mxu1 %v20806_v33  ;;  %14929 = vmatprep.subr.bf16.mxu0 %v20811_v27  ;;  %v20856_v33 = vld [vmem:[%s22203_s17 + $0x1a0c] ss:$16 sps:$4 sm:$0xff]   ;;  %v20851_v27 = vld [vmem:[%s22203_s17 + $0x1808] ss:$16 sps:$4 sm:$0xff]  }
 0x5f8   : > { %14970 = vmatprep.subr.bf16.mxu1 %v20814_v31  ;;  %v20854_v31 = vld [vmem:[%s22203_s17 + $0x1a08] ss:$16 sps:$4 sm:$0xff]  }
 0x5f9   : > { %v14635_v22 = vpop.f32.mrf.mxu0  ;;  %14880 = vmatmul.mubr.bf16.vlgmr.msra.gmra.mxu0 %v22775_v10 }
 0x5fa   : > { %v14676_v51 = vpop.f32.mrf.mxu1  ;;  %14921 = vmatmul.mubr.bf16.vlgmr.msra.gmra.mxu1 %v22788_v59  ;;  %v14636_v42 = vadd.f32 %v14635_v22, %v24127_v50  ;;  %14930 = vmatpush1.bf16.msra.mxu0 %v20809_v38  ;;  %v20859_v38 = vld [vmem:[%s22203_s17 + $0x19ec] ss:$16 sps:$4 sm:$0xff]  }
 0x5fb   : > { %14971 = vmatpush1.bf16.msra.mxu1 %v20812_v18  ;;  %v14637_v20 = vpop.f32.mrf.mxu0  ;;  %14931 = vmatprep.subr.bf16.mxu0 %v20817_v13  ;;  %v20862_v18 = vld [vmem:[%s22203_s17 + $0x1bec] ss:$16 sps:$4 sm:$0xff]   ;;  %v20857_v13 = vld [vmem:[%s22203_s17 + $0x19e8] ss:$16 sps:$4 sm:$0xff]  }
 0x5fc   : > { %v14678_v26 = vpop.f32.mrf.mxu1  ;;  %14972 = vmatprep.subr.bf16.mxu1 %v20820_v21  ;;  %v24201_v55 = vadd.f32 %v14676_v51, %v14636_v42  ;;  %v14638_v10 = vadd.f32 %v14637_v20, %v24132_v6  ;;  %14961 = vmatprep.mubr.bf16.mxu0 %v22784_v25  ;;  %v20829_v25 = vld [vmem:[%s22203_s17 + $0x188c] ss:$16 sps:$4 sm:$0xff]   ;;  %v20827_v6 = vld [vmem:[%s22203_s17 + $0x1888] ss:$16 sps:$4 sm:$0xff]  }
 0x5fd   : > { %15002 = vmatprep.mubr.bf16.mxu1 %v22796_v34  ;;  %v14639_v59 = vpop.f32.mrf.mxu0  ;;  %v20832_v34 = vld [vmem:[%s22203_s17 + $0x1a8c] ss:$16 sps:$4 sm:$0xff]   ;;  %v20860_v21 = vld [vmem:[%s22203_s17 + $0x1be8] ss:$16 sps:$4 sm:$0xff]  }
 0x5fe   : > { %v14680_v50 = vpop.f32.mrf.mxu1  ;;  %v24206_v30 = vadd.f32 %v14678_v26, %v14638_v10  ;;  %14932 = vmatpush1.bf16.msra.mxu0 %v20815_v43  ;;  %v20865_v22 = vld [vmem:[%s22203_s17 + $0x19cc] ss:$16 sps:$4 sm:$0xff]   ;;  %v20863_v42 = vld [vmem:[%s22203_s17 + $0x19c8] ss:$16 sps:$4 sm:$0xff]  }
 0x5ff   : > { %14973 = vmatpush1.bf16.msra.mxu1 %v20818_v2  ;;  %v14640_v37 = vpop.f32.mrf.mxu0  ;;  %14933 = vmatprep.subr.bf16.mxu0 %v20823_v4  ;;  %v20868_v51 = vld [vmem:[%s22203_s17 + $0x1bcc] ss:$16 sps:$4 sm:$0xff]   ;;  %v20866_v43 = vld [vmem:[%s22203_s17 + $0x1bc8] ss:$16 sps:$4 sm:$0xff]  }
 0x600   : > { %v14681_v15 = vpop.f32.mrf.mxu1  ;;  %14974 = vmatprep.subr.bf16.mxu1 %v20826_v5  ;;  %v20871_v2 = vld [vmem:[%s22203_s17 + $0x19ac] ss:$16 sps:$4 sm:$0xff]   ;;  %v20869_v26 = vld [vmem:[%s22203_s17 + $0x19a8] ss:$16 sps:$4 sm:$0xff]  }
 0x601   : > { %v20874_v20 = vld [vmem:[%s22203_s17 + $0x1bac] ss:$16 sps:$4 sm:$0xff]   ;;  %v20872_v4 = vld [vmem:[%s22203_s17 + $0x1ba8] ss:$16 sps:$4 sm:$0xff]  }
 0x602   : > { %14934 = vmatpush1.bf16.msra.mxu0 %v20821_v61  ;;  %v20877_v5 = vld [vmem:[%s22203_s17 + $0x198c] ss:$16 sps:$4 sm:$0xff]   ;;  %v20875_v59 = vld [vmem:[%s22203_s17 + $0x1988] ss:$16 sps:$4 sm:$0xff]  }
 0x603   : > { %14975 = vmatpush1.bf16.msra.mxu1 %v20824_v1  ;;  %14935 = vmatprep.subr.bf16.mxu0 %v20829_v25  ;;  %v20880_v10 = vld [vmem:[%s22203_s17 + $0x1b8c] ss:$16 sps:$4 sm:$0xff]   ;;  %v20878_v50 = vld [vmem:[%s22203_s17 + $0x1b88] ss:$16 sps:$4 sm:$0xff]  }
 0x604   : > { %14976 = vmatprep.subr.bf16.mxu1 %v20832_v34  ;;  %v20883_v61 = vld [vmem:[%s22203_s17 + $0x196c] ss:$16 sps:$4 sm:$0xff]   ;;  %v20881_v37 = vld [vmem:[%s22203_s17 + $0x1968] ss:$16 sps:$4 sm:$0xff]  }
 0x605   : > { %v20886_v1 = vld [vmem:[%s22203_s17 + $0x1b6c] ss:$16 sps:$4 sm:$0xff]   ;;  %v20884_v15 = vld [vmem:[%s22203_s17 + $0x1b68] ss:$16 sps:$4 sm:$0xff]  }
 0x606   : > { %14936 = vmatpush1.bf16.msra.mxu0 %v20827_v6  ;;  %v20889_v25 = vld [vmem:[%s22203_s17 + $0x194c] ss:$16 sps:$4 sm:$0xff]   ;;  %v20887_v6 = vld [vmem:[%s22203_s17 + $0x1948] ss:$16 sps:$4 sm:$0xff]  }
 0x607   : > { %14977 = vmatpush1.bf16.msra.mxu1 %v20830_v23  ;;  %14937 = vmatprep.subr.bf16.mxu0 %v20835_v24  ;;  %v20892_v34 = vld [vmem:[%s22203_s17 + $0x1b4c] ss:$16 sps:$4 sm:$0xff]   ;;  %v20890_v23 = vld [vmem:[%s22203_s17 + $0x1b48] ss:$16 sps:$4 sm:$0xff]  }
 0x608   : > { %14978 = vmatprep.subr.bf16.mxu1 %v20838_v12  ;;  %v20895_v24 = vld [vmem:[%s22203_s17 + $0x192c] ss:$16 sps:$4 sm:$0xff]  }
 0x609   : > { %v20898_v12 = vld [vmem:[%s22203_s17 + $0x1b2c] ss:$16 sps:$4 sm:$0xff]  }
 0x60a   : > { %14938 = vmatpush1.bf16.msra.mxu0 %v20833_v36  ;;  %v20893_v36 = vld [vmem:[%s22203_s17 + $0x1928] ss:$16 sps:$4 sm:$0xff]  }
 0x60b   : > { %14979 = vmatpush1.bf16.msra.mxu1 %v20836_v35  ;;  %14939 = vmatprep.subr.bf16.mxu0 %v20841_v7  ;;  %v20896_v35 = vld [vmem:[%s22203_s17 + $0x1b28] ss:$16 sps:$4 sm:$0xff]   ;;  %v20901_v7 = vld [vmem:[%s22203_s17 + $0x190c] ss:$16 sps:$4 sm:$0xff]  }
 0x60c   : > { %14980 = vmatprep.subr.bf16.mxu1 %v20844_v49  ;;  %v20904_v49 = vld [vmem:[%s22203_s17 + $0x1b0c] ss:$16 sps:$4 sm:$0xff]  }
 0x60e   : > { %14940 = vmatpush1.bf16.msra.mxu0 %v20839_v56  ;;  %v20899_v56 = vld [vmem:[%s22203_s17 + $0x1908] ss:$16 sps:$4 sm:$0xff]  }
 0x60f   : > { %14981 = vmatpush1.bf16.msra.mxu1 %v20842_v53  ;;  %14941 = vmatprep.subr.bf16.mxu0 %v20847_v14  ;;  %v20902_v53 = vld [vmem:[%s22203_s17 + $0x1b08] ss:$16 sps:$4 sm:$0xff]   ;;  %v20907_v14 = vld [vmem:[%s22203_s17 + $0x1cec] ss:$16 sps:$4 sm:$0xff]  }
 0x610   : > { %14982 = vmatprep.subr.bf16.mxu1 %v20850_v19  ;;  %v20910_v19 = vld [vmem:[%s22203_s17 + $0x1eec] ss:$16 sps:$4 sm:$0xff]  }
 0x612   : > { %14942 = vmatpush1.bf16.msra.mxu0 %v20845_v62  ;;  %v20905_v62 = vld [vmem:[%s22203_s17 + $0x1ce8] ss:$16 sps:$4 sm:$0xff]  }
 0x613   : > { %14983 = vmatpush1.bf16.msra.mxu1 %v20848_v8  ;;  %14943 = vmatprep.subr.bf16.mxu0 %v20853_v60  ;;  %v20908_v8 = vld [vmem:[%s22203_s17 + $0x1ee8] ss:$16 sps:$4 sm:$0xff]   ;;  %v20913_v60 = vld [vmem:[%s22203_s17 + $0x1ccc] ss:$16 sps:$4 sm:$0xff]  }
 0x614   : > { %14984 = vmatprep.subr.bf16.mxu1 %v20856_v33  ;;  %v20916_v33 = vld [vmem:[%s22203_s17 + $0x1ecc] ss:$16 sps:$4 sm:$0xff]  }
 0x616   : > { %14944 = vmatpush1.bf16.msra.mxu0 %v20851_v27 }
 0x617   : > { %14985 = vmatpush1.bf16.msra.mxu1 %v20854_v31  ;;  %14945 = vmatprep.subr.bf16.mxu0 %v20859_v38 }
 0x618   : > { %14986 = vmatprep.subr.bf16.mxu1 %v20862_v18  ;;  %v20911_v18 = vld [vmem:[%s22203_s17 + $0x1cc8] ss:$16 sps:$4 sm:$0xff]  }
 0x61a   : > { %14946 = vmatpush2.bf16.msra.mxu0 %v20857_v13  ;;  %v20914_v13 = vld [vmem:[%s22203_s17 + $0x1ec8] ss:$16 sps:$4 sm:$0xff]  }
 0x61b   : > { %14987 = vmatpush2.bf16.msra.mxu1 %v20860_v21  ;;  %14947 = vmatprep.subr.bf16.mxu0 %v20865_v22 }
 0x61c   : > { %14988 = vmatprep.subr.bf16.mxu1 %v20868_v51  ;;  %v20919_v51 = vld [vmem:[%s22203_s17 + $0x1cac] ss:$16 sps:$4 sm:$0xff]  }
 0x61e   : > { %14948 = vmatpush2.bf16.msra.mxu0 %v20863_v42  ;;  %v20922_v42 = vld [vmem:[%s22203_s17 + $0x1eac] ss:$16 sps:$4 sm:$0xff]  }
 0x61f   : > { %14989 = vmatpush2.bf16.msra.mxu1 %v20866_v43  ;;  %14949 = vmatprep.subr.bf16.mxu0 %v20871_v2 }
 0x620   : > { %14990 = vmatprep.subr.bf16.mxu1 %v20874_v20  ;;  %v20917_v20 = vld [vmem:[%s22203_s17 + $0x1ca8] ss:$16 sps:$4 sm:$0xff]  }
 0x622   : > { %14950 = vmatpush2.bf16.msra.mxu0 %v20869_v26  ;;  %v20920_v26 = vld [vmem:[%s22203_s17 + $0x1ea8] ss:$16 sps:$4 sm:$0xff]  }
 0x623   : > { %14991 = vmatpush2.bf16.msra.mxu1 %v20872_v4  ;;  %14951 = vmatprep.subr.bf16.mxu0 %v20877_v5 }
 0x624   : > { %14992 = vmatprep.subr.bf16.mxu1 %v20880_v10  ;;  %v20926_v10 = vld [vmem:[%s22203_s17 + $0x1e88] ss:$16 sps:$4 sm:$0xff]  }
 0x626   : > { %14952 = vmatpush2.bf16.msra.mxu0 %v20875_v59  ;;  %v20931_v59 = vld [vmem:[%s22203_s17 + $0x1c6c] ss:$16 sps:$4 sm:$0xff]  }
 0x627   : > { %14993 = vmatpush2.bf16.msra.mxu1 %v20878_v50  ;;  %14953 = vmatprep.subr.bf16.mxu0 %v20883_v61  ;;  %v20934_v50 = vld [vmem:[%s22203_s17 + $0x1e6c] ss:$16 sps:$4 sm:$0xff]   ;;  %v20929_v61 = vld [vmem:[%s22203_s17 + $0x1c68] ss:$16 sps:$4 sm:$0xff]  }
 0x628   : > { %14994 = vmatprep.subr.bf16.mxu1 %v20886_v1  ;;  %v20932_v1 = vld [vmem:[%s22203_s17 + $0x1e68] ss:$16 sps:$4 sm:$0xff]  }
 0x62a   : > { %14954 = vmatpush2.bf16.msra.mxu0 %v20881_v37  ;;  %v20937_v37 = vld [vmem:[%s22203_s17 + $0x1c4c] ss:$16 sps:$4 sm:$0xff]  }
 0x62b   : > { %14995 = vmatpush2.bf16.msra.mxu1 %v20884_v15  ;;  %14955 = vmatprep.subr.bf16.mxu0 %v20889_v25  ;;  %v20940_v15 = vld [vmem:[%s22203_s17 + $0x1e4c] ss:$16 sps:$4 sm:$0xff]   ;;  %v20935_v25 = vld [vmem:[%s22203_s17 + $0x1c48] ss:$16 sps:$4 sm:$0xff]  }
 0x62c   : > { %14996 = vmatprep.subr.bf16.mxu1 %v20892_v34  ;;  %v20938_v34 = vld [vmem:[%s22203_s17 + $0x1e48] ss:$16 sps:$4 sm:$0xff]  }
 0x62e   : > { %14956 = vmatpush2.bf16.msra.mxu0 %v20887_v6  ;;  %v20943_v6 = vld [vmem:[%s22203_s17 + $0x1c2c] ss:$16 sps:$4 sm:$0xff]  }
 0x62f   : > { %14997 = vmatpush2.bf16.msra.mxu1 %v20890_v23  ;;  %14957 = vmatprep.subr.bf16.mxu0 %v20895_v24  ;;  %v20946_v23 = vld [vmem:[%s22203_s17 + $0x1e2c] ss:$16 sps:$4 sm:$0xff]   ;;  %v20941_v24 = vld [vmem:[%s22203_s17 + $0x1c28] ss:$16 sps:$4 sm:$0xff]  }
 0x630   : > { %14998 = vmatprep.subr.bf16.mxu1 %v20898_v12  ;;  %v20944_v12 = vld [vmem:[%s22203_s17 + $0x1e28] ss:$16 sps:$4 sm:$0xff]  }
 0x632   : > { %14958 = vmatpush2.bf16.msra.mxu0 %v20893_v36  ;;  %v20949_v36 = vld [vmem:[%s22203_s17 + $0x1c0c] ss:$16 sps:$4 sm:$0xff]  }
 0x633   : > { %14999 = vmatpush2.bf16.msra.mxu1 %v20896_v35  ;;  %14959 = vmatprep.subr.bf16.mxu0 %v20901_v7  ;;  %v20952_v35 = vld [vmem:[%s22203_s17 + $0x1e0c] ss:$16 sps:$4 sm:$0xff]   ;;  %v20947_v7 = vld [vmem:[%s22203_s17 + $0x1c08] ss:$16 sps:$4 sm:$0xff]  }
 0x634   : > { %15000 = vmatprep.subr.bf16.mxu1 %v20904_v49  ;;  %v20950_v49 = vld [vmem:[%s22203_s17 + $0x1e08] ss:$16 sps:$4 sm:$0xff]  }
 0x636   : > { %14960 = vmatpush2.bf16.msra.mxu0 %v20899_v56  ;;  %v20955_v56 = vld [vmem:[%s22203_s17 + $0x1dec] ss:$16 sps:$4 sm:$0xff]  }
 0x637   : > { %15001 = vmatpush2.bf16.msra.mxu1 %v20902_v53  ;;  %15011 = vmatprep.subr.bf16.mxu0 %v20907_v14  ;;  %v20958_v53 = vld [vmem:[%s22203_s17 + $0x1fec] ss:$16 sps:$4 sm:$0xff]   ;;  %v20953_v14 = vld [vmem:[%s22203_s17 + $0x1de8] ss:$16 sps:$4 sm:$0xff]  }
 0x638   : > { %15052 = vmatprep.subr.bf16.mxu1 %v20910_v19  ;;  %v20956_v19 = vld [vmem:[%s22203_s17 + $0x1fe8] ss:$16 sps:$4 sm:$0xff]  }
 0x639   : > { %v14717_v27 = vpop.f32.mrf.mxu0  ;;  %14962 = vmatmul.mubr.bf16.vlgmr.msra.gmra.mxu0 %v22871_v40 }
 0x63a   : > { %v14758_v31 = vpop.f32.mrf.mxu1  ;;  %15003 = vmatmul.mubr.bf16.vlgmr.msra.gmra.mxu1 %v22884_v63  ;;  %v14718_v38 = vadd.f32 %v14717_v27, %v24201_v55  ;;  %15012 = vmatpush1.bf16.msra.mxu0 %v20905_v62  ;;  %v20961_v62 = vld [vmem:[%s22203_s17 + $0x1dcc] ss:$16 sps:$4 sm:$0xff]  }
 0x63b   : > { %15053 = vmatpush1.bf16.msra.mxu1 %v20908_v8  ;;  %v14719_v21 = vpop.f32.mrf.mxu0  ;;  %15013 = vmatprep.subr.bf16.mxu0 %v20913_v60  ;;  %v20964_v8 = vld [vmem:[%s22203_s17 + $0x1fcc] ss:$16 sps:$4 sm:$0xff]   ;;  %v20959_v60 = vld [vmem:[%s22203_s17 + $0x1dc8] ss:$16 sps:$4 sm:$0xff]  }
 0x63c   : > { %v14760_v22 = vpop.f32.mrf.mxu1  ;;  %15054 = vmatprep.subr.bf16.mxu1 %v20916_v33  ;;  %v24275_v43 = vadd.f32 %v14758_v31, %v14718_v38  ;;  %v14720_v40 = vadd.f32 %v14719_v21, %v24206_v30  ;;  %15043 = vmatprep.mubr.bf16.mxu0 %v22880_v52  ;;  %v20925_v52 = vld [vmem:[%s22203_s17 + $0x1c8c] ss:$16 sps:$4 sm:$0xff]   ;;  %v20923_v30 = vld [vmem:[%s22203_s17 + $0x1c88] ss:$16 sps:$4 sm:$0xff]  }
 0x63d   : > { %15084 = vmatprep.mubr.bf16.mxu1 %v22892_v46  ;;  %v14721_v63 = vpop.f32.mrf.mxu0  ;;  %v20928_v46 = vld [vmem:[%s22203_s17 + $0x1e8c] ss:$16 sps:$4 sm:$0xff]   ;;  %v20962_v33 = vld [vmem:[%s22203_s17 + $0x1fc8] ss:$16 sps:$4 sm:$0xff]  }
 0x63e   : > { %v14762_v55 = vpop.f32.mrf.mxu1  ;;  %v24280_v2 = vadd.f32 %v14760_v22, %v14720_v40  ;;  %15014 = vmatpush1.bf16.msra.mxu0 %v20911_v18  ;;  %v20967_v27 = vld [vmem:[%s22203_s17 + $0x1dac] ss:$16 sps:$4 sm:$0xff]   ;;  %v20965_v38 = vld [vmem:[%s22203_s17 + $0x1da8] ss:$16 sps:$4 sm:$0xff]  }
 0x63f   : > { %15055 = vmatpush1.bf16.msra.mxu1 %v20914_v13  ;;  %v14722_v4 = vpop.f32.mrf.mxu0  ;;  %15015 = vmatprep.subr.bf16.mxu0 %v20919_v51  ;;  %v20970_v31 = vld [vmem:[%s22203_s17 + $0x1fac] ss:$16 sps:$4 sm:$0xff]   ;;  %v20968_v18 = vld [vmem:[%s22203_s17 + $0x1fa8] ss:$16 sps:$4 sm:$0xff]  }
 0x640   : > { %v14763_v5 = vpop.f32.mrf.mxu1  ;;  %15056 = vmatprep.subr.bf16.mxu1 %v20922_v42  ;;  %v20973_v13 = vld [vmem:[%s22203_s17 + $0x1d8c] ss:$16 sps:$4 sm:$0xff]   ;;  %v20971_v22 = vld [vmem:[%s22203_s17 + $0x1d88] ss:$16 sps:$4 sm:$0xff]  }
 0x641   : > { %v20976_v21 = vld [vmem:[%s22203_s17 + $0x1f8c] ss:$16 sps:$4 sm:$0xff]   ;;  %v20974_v51 = vld [vmem:[%s22203_s17 + $0x1f88] ss:$16 sps:$4 sm:$0xff]  }
 0x642   : > { %15016 = vmatpush1.bf16.msra.mxu0 %v20917_v20  ;;  %v20979_v42 = vld [vmem:[%s22203_s17 + $0x1d6c] ss:$16 sps:$4 sm:$0xff]   ;;  %v20977_v63 = vld [vmem:[%s22203_s17 + $0x1d68] ss:$16 sps:$4 sm:$0xff]  }
 0x643   : > { %15057 = vmatpush1.bf16.msra.mxu1 %v20920_v26  ;;  %15017 = vmatprep.subr.bf16.mxu0 %v20925_v52  ;;  %v20982_v40 = vld [vmem:[%s22203_s17 + $0x1f6c] ss:$16 sps:$4 sm:$0xff]   ;;  %v20980_v55 = vld [vmem:[%s22203_s17 + $0x1f68] ss:$16 sps:$4 sm:$0xff]  }
 0x644   : > { %15058 = vmatprep.subr.bf16.mxu1 %v20928_v46  ;;  %v20985_v20 = vld [vmem:[%s22203_s17 + $0x1d4c] ss:$16 sps:$4 sm:$0xff]   ;;  %v20983_v4 = vld [vmem:[%s22203_s17 + $0x1d48] ss:$16 sps:$4 sm:$0xff]  }
 0x645   : > { %v20988_v26 = vld [vmem:[%s22203_s17 + $0x1f4c] ss:$16 sps:$4 sm:$0xff]   ;;  %v20986_v5 = vld [vmem:[%s22203_s17 + $0x1f48] ss:$16 sps:$4 sm:$0xff]  }
 0x646   : > { %15018 = vmatpush1.bf16.msra.mxu0 %v20923_v30  ;;  %v20991_v52 = vld [vmem:[%s22203_s17 + $0x1d2c] ss:$16 sps:$4 sm:$0xff]   ;;  %v20989_v30 = vld [vmem:[%s22203_s17 + $0x1d28] ss:$16 sps:$4 sm:$0xff]  }
 0x647   : > { %15059 = vmatpush1.bf16.msra.mxu1 %v20926_v10  ;;  %15019 = vmatprep.subr.bf16.mxu0 %v20931_v59  ;;  %v20994_v46 = vld [vmem:[%s22203_s17 + $0x1f2c] ss:$16 sps:$4 sm:$0xff]   ;;  %v20992_v10 = vld [vmem:[%s22203_s17 + $0x1f28] ss:$16 sps:$4 sm:$0xff]  }
 0x648   : > { %15060 = vmatprep.subr.bf16.mxu1 %v20934_v50  ;;  %v20997_v59 = vld [vmem:[%s22203_s17 + $0x1d0c] ss:$16 sps:$4 sm:$0xff]  }
 0x649   : > { %v21000_v50 = vld [vmem:[%s22203_s17 + $0x1f0c] ss:$16 sps:$4 sm:$0xff]  }
 0x64a   : > { %15020 = vmatpush1.bf16.msra.mxu0 %v20929_v61  ;;  %v20995_v61 = vld [vmem:[%s22203_s17 + $0x1d08] ss:$16 sps:$4 sm:$0xff]  }
 0x64b   : > { %15061 = vmatpush1.bf16.msra.mxu1 %v20932_v1  ;;  %15021 = vmatprep.subr.bf16.mxu0 %v20937_v37  ;;  %v20998_v1 = vld [vmem:[%s22203_s17 + $0x1f08] ss:$16 sps:$4 sm:$0xff]   ;;  %v21003_v37 = vld [vmem:[%s22203_s17 + $0x20ec] ss:$16 sps:$4 sm:$0xff]  }
 0x64c   : > { %15062 = vmatprep.subr.bf16.mxu1 %v20940_v15  ;;  %v21006_v15 = vld [vmem:[%s22203_s17 + $0x22ec] ss:$16 sps:$4 sm:$0xff]  }
 0x64e   : > { %15022 = vmatpush1.bf16.msra.mxu0 %v20935_v25  ;;  %v21001_v25 = vld [vmem:[%s22203_s17 + $0x20e8] ss:$16 sps:$4 sm:$0xff]  }
 0x64f   : > { %15063 = vmatpush1.bf16.msra.mxu1 %v20938_v34  ;;  %15023 = vmatprep.subr.bf16.mxu0 %v20943_v6  ;;  %v21004_v34 = vld [vmem:[%s22203_s17 + $0x22e8] ss:$16 sps:$4 sm:$0xff]   ;;  %v21009_v6 = vld [vmem:[%s22203_s17 + $0x20cc] ss:$16 sps:$4 sm:$0xff]  }
 0x650   : > { %15064 = vmatprep.subr.bf16.mxu1 %v20946_v23  ;;  %v21012_v23 = vld [vmem:[%s22203_s17 + $0x22cc] ss:$16 sps:$4 sm:$0xff]  }
 0x652   : > { %15024 = vmatpush1.bf16.msra.mxu0 %v20941_v24 }
 0x653   : > { %15065 = vmatpush1.bf16.msra.mxu1 %v20944_v12  ;;  %15025 = vmatprep.subr.bf16.mxu0 %v20949_v36 }
 0x654   : > { %15066 = vmatprep.subr.bf16.mxu1 %v20952_v35  ;;  %v21007_v35 = vld [vmem:[%s22203_s17 + $0x20c8] ss:$16 sps:$4 sm:$0xff]  }
 0x656   : > { %15026 = vmatpush1.bf16.msra.mxu0 %v20947_v7  ;;  %v21010_v7 = vld [vmem:[%s22203_s17 + $0x22c8] ss:$16 sps:$4 sm:$0xff]  }
 0x657   : > { %15067 = vmatpush1.bf16.msra.mxu1 %v20950_v49  ;;  %15027 = vmatprep.subr.bf16.mxu0 %v20955_v56 }
 0x658   : > { %15068 = vmatprep.subr.bf16.mxu1 %v20958_v53  ;;  %v21015_v53 = vld [vmem:[%s22203_s17 + $0x20ac] ss:$16 sps:$4 sm:$0xff]  }
 0x65a   : > { %15028 = vmatpush2.bf16.msra.mxu0 %v20953_v14  ;;  %v21018_v14 = vld [vmem:[%s22203_s17 + $0x22ac] ss:$16 sps:$4 sm:$0xff]  }
 0x65b   : > { %15069 = vmatpush2.bf16.msra.mxu1 %v20956_v19  ;;  %15029 = vmatprep.subr.bf16.mxu0 %v20961_v62 }
 0x65c   : > { %15070 = vmatprep.subr.bf16.mxu1 %v20964_v8  ;;  %v21013_v8 = vld [vmem:[%s22203_s17 + $0x20a8] ss:$16 sps:$4 sm:$0xff]  }
 0x65e   : > { %15030 = vmatpush2.bf16.msra.mxu0 %v20959_v60  ;;  %v21016_v60 = vld [vmem:[%s22203_s17 + $0x22a8] ss:$16 sps:$4 sm:$0xff]  }
 0x65f   : > { %15071 = vmatpush2.bf16.msra.mxu1 %v20962_v33  ;;  %15031 = vmatprep.subr.bf16.mxu0 %v20967_v27 }
 0x660   : > { %15072 = vmatprep.subr.bf16.mxu1 %v20970_v31  ;;  %v21022_v31 = vld [vmem:[%s22203_s17 + $0x2288] ss:$16 sps:$4 sm:$0xff]  }
 0x662   : > { %15032 = vmatpush2.bf16.msra.mxu0 %v20965_v38  ;;  %v21027_v38 = vld [vmem:[%s22203_s17 + $0x206c] ss:$16 sps:$4 sm:$0xff]  }
 0x663   : > { %15073 = vmatpush2.bf16.msra.mxu1 %v20968_v18  ;;  %15033 = vmatprep.subr.bf16.mxu0 %v20973_v13  ;;  %v21030_v18 = vld [vmem:[%s22203_s17 + $0x226c] ss:$16 sps:$4 sm:$0xff]   ;;  %v21025_v13 = vld [vmem:[%s22203_s17 + $0x2068] ss:$16 sps:$4 sm:$0xff]  }
 0x664   : > { %15074 = vmatprep.subr.bf16.mxu1 %v20976_v21  ;;  %v21028_v21 = vld [vmem:[%s22203_s17 + $0x2268] ss:$16 sps:$4 sm:$0xff]  }
 0x666   : > { %15034 = vmatpush2.bf16.msra.mxu0 %v20971_v22  ;;  %v21033_v22 = vld [vmem:[%s22203_s17 + $0x204c] ss:$16 sps:$4 sm:$0xff]  }
 0x667   : > { %15075 = vmatpush2.bf16.msra.mxu1 %v20974_v51  ;;  %15035 = vmatprep.subr.bf16.mxu0 %v20979_v42  ;;  %v21036_v51 = vld [vmem:[%s22203_s17 + $0x224c] ss:$16 sps:$4 sm:$0xff]   ;;  %v21031_v42 = vld [vmem:[%s22203_s17 + $0x2048] ss:$16 sps:$4 sm:$0xff]  }
 0x668   : > { %15076 = vmatprep.subr.bf16.mxu1 %v20982_v40  ;;  %v21034_v40 = vld [vmem:[%s22203_s17 + $0x2248] ss:$16 sps:$4 sm:$0xff]  }
 0x66a   : > { %15036 = vmatpush2.bf16.msra.mxu0 %v20977_v63  ;;  %v21039_v63 = vld [vmem:[%s22203_s17 + $0x202c] ss:$16 sps:$4 sm:$0xff]  }
 0x66b   : > { %15077 = vmatpush2.bf16.msra.mxu1 %v20980_v55  ;;  %15037 = vmatprep.subr.bf16.mxu0 %v20985_v20  ;;  %v21042_v55 = vld [vmem:[%s22203_s17 + $0x222c] ss:$16 sps:$4 sm:$0xff]   ;;  %v21037_v20 = vld [vmem:[%s22203_s17 + $0x2028] ss:$16 sps:$4 sm:$0xff]  }
 0x66c   : > { %15078 = vmatprep.subr.bf16.mxu1 %v20988_v26  ;;  %v21040_v26 = vld [vmem:[%s22203_s17 + $0x2228] ss:$16 sps:$4 sm:$0xff]  }
 0x66e   : > { %15038 = vmatpush2.bf16.msra.mxu0 %v20983_v4  ;;  %v21045_v4 = vld [vmem:[%s22203_s17 + $0x200c] ss:$16 sps:$4 sm:$0xff]  }
 0x66f   : > { %15079 = vmatpush2.bf16.msra.mxu1 %v20986_v5  ;;  %15039 = vmatprep.subr.bf16.mxu0 %v20991_v52  ;;  %v21048_v5 = vld [vmem:[%s22203_s17 + $0x220c] ss:$16 sps:$4 sm:$0xff]   ;;  %v21043_v52 = vld [vmem:[%s22203_s17 + $0x2008] ss:$16 sps:$4 sm:$0xff]  }
 0x670   : > { %15080 = vmatprep.subr.bf16.mxu1 %v20994_v46  ;;  %v21046_v46 = vld [vmem:[%s22203_s17 + $0x2208] ss:$16 sps:$4 sm:$0xff]  }
 0x672   : > { %15040 = vmatpush2.bf16.msra.mxu0 %v20989_v30  ;;  %v21051_v30 = vld [vmem:[%s22203_s17 + $0x21ec] ss:$16 sps:$4 sm:$0xff]  }
 0x673   : > { %15081 = vmatpush2.bf16.msra.mxu1 %v20992_v10  ;;  %15041 = vmatprep.subr.bf16.mxu0 %v20997_v59  ;;  %v21054_v10 = vld [vmem:[%s22203_s17 + $0x23ec] ss:$16 sps:$4 sm:$0xff]   ;;  %v21049_v59 = vld [vmem:[%s22203_s17 + $0x21e8] ss:$16 sps:$4 sm:$0xff]  }
 0x674   : > { %15082 = vmatprep.subr.bf16.mxu1 %v21000_v50  ;;  %v21052_v50 = vld [vmem:[%s22203_s17 + $0x23e8] ss:$16 sps:$4 sm:$0xff]  }
 0x676   : > { %15042 = vmatpush2.bf16.msra.mxu0 %v20995_v61  ;;  %v21057_v61 = vld [vmem:[%s22203_s17 + $0x21cc] ss:$16 sps:$4 sm:$0xff]  }
 0x677   : > { %15083 = vmatpush2.bf16.msra.mxu1 %v20998_v1  ;;  %15093 = vmatprep.subr.bf16.mxu0 %v21003_v37  ;;  %v21060_v1 = vld [vmem:[%s22203_s17 + $0x23cc] ss:$16 sps:$4 sm:$0xff]   ;;  %v21055_v37 = vld [vmem:[%s22203_s17 + $0x21c8] ss:$16 sps:$4 sm:$0xff]  }
 0x678   : > { %15134 = vmatprep.subr.bf16.mxu1 %v21006_v15  ;;  %v21058_v15 = vld [vmem:[%s22203_s17 + $0x23c8] ss:$16 sps:$4 sm:$0xff]  }
 0x679   : > { %v14799_v24 = vpop.f32.mrf.mxu0  ;;  %15044 = vmatmul.mubr.bf16.vlgmr.msra.gmra.mxu0 %v22969_v17 }
 0x67a   : > { %v14840_v12 = vpop.f32.mrf.mxu1  ;;  %15085 = vmatmul.mubr.bf16.vlgmr.msra.gmra.mxu1 %v22982_v29  ;;  %v14800_v36 = vadd.f32 %v14799_v24, %v24275_v43  ;;  %15094 = vmatpush1.bf16.msra.mxu0 %v21001_v25  ;;  %v21063_v25 = vld [vmem:[%s22203_s17 + $0x21ac] ss:$16 sps:$4 sm:$0xff]  }
 0x67b   : > { %15135 = vmatpush1.bf16.msra.mxu1 %v21004_v34  ;;  %v14801_v49 = vpop.f32.mrf.mxu0  ;;  %15095 = vmatprep.subr.bf16.mxu0 %v21009_v6  ;;  %v21066_v34 = vld [vmem:[%s22203_s17 + $0x23ac] ss:$16 sps:$4 sm:$0xff]   ;;  %v21061_v6 = vld [vmem:[%s22203_s17 + $0x21a8] ss:$16 sps:$4 sm:$0xff]  }
 0x67c   : > { %v14842_v56 = vpop.f32.mrf.mxu1  ;;  %15136 = vmatprep.subr.bf16.mxu1 %v21012_v23  ;;  %v24349_v19 = vadd.f32 %v14840_v12, %v14800_v36  ;;  %v14802_v17 = vadd.f32 %v14801_v49, %v24280_v2  ;;  %15125 = vmatprep.mubr.bf16.mxu0 %v22978_v32  ;;  %v21021_v32 = vld [vmem:[%s22203_s17 + $0x208c] ss:$16 sps:$4 sm:$0xff]   ;;  %v21019_v2 = vld [vmem:[%s22203_s17 + $0x2088] ss:$16 sps:$4 sm:$0xff]  }
 0x67d   : > { %15166 = vmatprep.mubr.bf16.mxu1 %v22990_v45  ;;  %v14803_v29 = vpop.f32.mrf.mxu0  ;;  %v21024_v45 = vld [vmem:[%s22203_s17 + $0x228c] ss:$16 sps:$4 sm:$0xff]   ;;  %v21064_v23 = vld [vmem:[%s22203_s17 + $0x23a8] ss:$16 sps:$4 sm:$0xff]  }
 0x67e   : > { %v14844_v43 = vpop.f32.mrf.mxu1  ;;  %v24354_v62 = vadd.f32 %v14842_v56, %v14802_v17  ;;  %15096 = vmatpush1.bf16.msra.mxu0 %v21007_v35  ;;  %v21069_v24 = vld [vmem:[%s22203_s17 + $0x218c] ss:$16 sps:$4 sm:$0xff]   ;;  %v21067_v36 = vld [vmem:[%s22203_s17 + $0x2188] ss:$16 sps:$4 sm:$0xff]  }
 0x67f   : > { %15137 = vmatpush1.bf16.msra.mxu1 %v21010_v7  ;;  %v14804_v33 = vpop.f32.mrf.mxu0  ;;  %15097 = vmatprep.subr.bf16.mxu0 %v21015_v53  ;;  %v21072_v12 = vld [vmem:[%s22203_s17 + $0x238c] ss:$16 sps:$4 sm:$0xff]   ;;  %v21070_v35 = vld [vmem:[%s22203_s17 + $0x2388] ss:$16 sps:$4 sm:$0xff]  }
 0x680   : > { %v14845_v27 = vpop.f32.mrf.mxu1  ;;  %15138 = vmatprep.subr.bf16.mxu1 %v21018_v14  ;;  %v21075_v7 = vld [vmem:[%s22203_s17 + $0x216c] ss:$16 sps:$4 sm:$0xff]   ;;  %v21073_v56 = vld [vmem:[%s22203_s17 + $0x2168] ss:$16 sps:$4 sm:$0xff]  }
 0x681   : > { %v21078_v49 = vld [vmem:[%s22203_s17 + $0x236c] ss:$16 sps:$4 sm:$0xff]   ;;  %v21076_v53 = vld [vmem:[%s22203_s17 + $0x2368] ss:$16 sps:$4 sm:$0xff]  }
 0x682   : > { %15098 = vmatpush1.bf16.msra.mxu0 %v21013_v8  ;;  %v21081_v14 = vld [vmem:[%s22203_s17 + $0x214c] ss:$16 sps:$4 sm:$0xff]   ;;  %v21079_v29 = vld [vmem:[%s22203_s17 + $0x2148] ss:$16 sps:$4 sm:$0xff]  }
 0x683   : > { %15139 = vmatpush1.bf16.msra.mxu1 %v21016_v60  ;;  %15099 = vmatprep.subr.bf16.mxu0 %v21021_v32  ;;  %v21084_v17 = vld [vmem:[%s22203_s17 + $0x234c] ss:$16 sps:$4 sm:$0xff]   ;;  %v21082_v43 = vld [vmem:[%s22203_s17 + $0x2348] ss:$16 sps:$4 sm:$0xff]  }
 0x684   : > { %15140 = vmatprep.subr.bf16.mxu1 %v21024_v45  ;;  %v21087_v8 = vld [vmem:[%s22203_s17 + $0x212c] ss:$16 sps:$4 sm:$0xff]   ;;  %v21085_v33 = vld [vmem:[%s22203_s17 + $0x2128] ss:$16 sps:$4 sm:$0xff]  }
 0x685   : > { %v21090_v60 = vld [vmem:[%s22203_s17 + $0x232c] ss:$16 sps:$4 sm:$0xff]   ;;  %v21088_v27 = vld [vmem:[%s22203_s17 + $0x2328] ss:$16 sps:$4 sm:$0xff]  }
 0x686   : > { %15100 = vmatpush1.bf16.msra.mxu0 %v21019_v2  ;;  %v21093_v32 = vld [vmem:[%s22203_s17 + $0x210c] ss:$16 sps:$4 sm:$0xff]   ;;  %v21091_v2 = vld [vmem:[%s22203_s17 + $0x2108] ss:$16 sps:$4 sm:$0xff]  }
 0x687   : > { %15141 = vmatpush1.bf16.msra.mxu1 %v21022_v31  ;;  %15101 = vmatprep.subr.bf16.mxu0 %v21027_v38  ;;  %v21096_v45 = vld [vmem:[%s22203_s17 + $0x230c] ss:$16 sps:$4 sm:$0xff]   ;;  %v21094_v31 = vld [vmem:[%s22203_s17 + $0x2308] ss:$16 sps:$4 sm:$0xff]  }
 0x688   : > { %15142 = vmatprep.subr.bf16.mxu1 %v21030_v18  ;;  %v21099_v38 = vld [vmem:[%s22203_s17 + $0x24ec] ss:$16 sps:$4 sm:$0xff]  }
 0x689   : > { %v21102_v18 = vld [vmem:[%s22203_s17 + $0x26ec] ss:$16 sps:$4 sm:$0xff]  }
 0x68a   : > { %15102 = vmatpush1.bf16.msra.mxu0 %v21025_v13  ;;  %v21097_v13 = vld [vmem:[%s22203_s17 + $0x24e8] ss:$16 sps:$4 sm:$0xff]  }
 0x68b   : > { %15143 = vmatpush1.bf16.msra.mxu1 %v21028_v21  ;;  %15103 = vmatprep.subr.bf16.mxu0 %v21033_v22  ;;  %v21100_v21 = vld [vmem:[%s22203_s17 + $0x26e8] ss:$16 sps:$4 sm:$0xff]   ;;  %v21105_v22 = vld [vmem:[%s22203_s17 + $0x24cc] ss:$16 sps:$4 sm:$0xff]  }
 0x68c   : > { %15144 = vmatprep.subr.bf16.mxu1 %v21036_v51  ;;  %v21108_v51 = vld [vmem:[%s22203_s17 + $0x26cc] ss:$16 sps:$4 sm:$0xff]  }
 0x68e   : > { %15104 = vmatpush1.bf16.msra.mxu0 %v21031_v42 }
 0x68f   : > { %15145 = vmatpush1.bf16.msra.mxu1 %v21034_v40  ;;  %15105 = vmatprep.subr.bf16.mxu0 %v21039_v63 }
 0x690   : > { %15146 = vmatprep.subr.bf16.mxu1 %v21042_v55  ;;  %v21103_v55 = vld [vmem:[%s22203_s17 + $0x24c8] ss:$16 sps:$4 sm:$0xff]  }
 0x692   : > { %15106 = vmatpush1.bf16.msra.mxu0 %v21037_v20  ;;  %v21106_v20 = vld [vmem:[%s22203_s17 + $0x26c8] ss:$16 sps:$4 sm:$0xff]  }
 0x693   : > { %15147 = vmatpush1.bf16.msra.mxu1 %v21040_v26  ;;  %15107 = vmatprep.subr.bf16.mxu0 %v21045_v4 }
 0x694   : > { %15148 = vmatprep.subr.bf16.mxu1 %v21048_v5  ;;  %v21111_v5 = vld [vmem:[%s22203_s17 + $0x24ac] ss:$16 sps:$4 sm:$0xff]  }
 0x696   : > { %15108 = vmatpush1.bf16.msra.mxu0 %v21043_v52  ;;  %v21114_v52 = vld [vmem:[%s22203_s17 + $0x26ac] ss:$16 sps:$4 sm:$0xff]  }
 0x697   : > { %15149 = vmatpush1.bf16.msra.mxu1 %v21046_v46  ;;  %15109 = vmatprep.subr.bf16.mxu0 %v21051_v30 }
 0x698   : > { %15150 = vmatprep.subr.bf16.mxu1 %v21054_v10  ;;  %v21109_v10 = vld [vmem:[%s22203_s17 + $0x24a8] ss:$16 sps:$4 sm:$0xff]  }
 0x69a   : > { %15110 = vmatpush2.bf16.msra.mxu0 %v21049_v59  ;;  %v21112_v59 = vld [vmem:[%s22203_s17 + $0x26a8] ss:$16 sps:$4 sm:$0xff]  }
 0x69b   : > { %15151 = vmatpush2.bf16.msra.mxu1 %v21052_v50  ;;  %15111 = vmatprep.subr.bf16.mxu0 %v21057_v61 }
 0x69c   : > { %15152 = vmatprep.subr.bf16.mxu1 %v21060_v1  ;;  %v21118_v1 = vld [vmem:[%s22203_s17 + $0x2688] ss:$16 sps:$4 sm:$0xff]  }
 0x69e   : > { %15112 = vmatpush2.bf16.msra.mxu0 %v21055_v37  ;;  %v21123_v37 = vld [vmem:[%s22203_s17 + $0x246c] ss:$16 sps:$4 sm:$0xff]  }
 0x69f   : > { %15153 = vmatpush2.bf16.msra.mxu1 %v21058_v15  ;;  %15113 = vmatprep.subr.bf16.mxu0 %v21063_v25  ;;  %v21126_v15 = vld [vmem:[%s22203_s17 + $0x266c] ss:$16 sps:$4 sm:$0xff]   ;;  %v21121_v25 = vld [vmem:[%s22203_s17 + $0x2468] ss:$16 sps:$4 sm:$0xff]  }
 0x6a0   : > { %15154 = vmatprep.subr.bf16.mxu1 %v21066_v34  ;;  %v21124_v34 = vld [vmem:[%s22203_s17 + $0x2668] ss:$16 sps:$4 sm:$0xff]  }
 0x6a2   : > { %15114 = vmatpush2.bf16.msra.mxu0 %v21061_v6  ;;  %v21129_v6 = vld [vmem:[%s22203_s17 + $0x244c] ss:$16 sps:$4 sm:$0xff]  }
 0x6a3   : > { %15155 = vmatpush2.bf16.msra.mxu1 %v21064_v23  ;;  %15115 = vmatprep.subr.bf16.mxu0 %v21069_v24  ;;  %v21132_v23 = vld [vmem:[%s22203_s17 + $0x264c] ss:$16 sps:$4 sm:$0xff]   ;;  %v21127_v24 = vld [vmem:[%s22203_s17 + $0x2448] ss:$16 sps:$4 sm:$0xff]  }
 0x6a4   : > { %15156 = vmatprep.subr.bf16.mxu1 %v21072_v12  ;;  %v21130_v12 = vld [vmem:[%s22203_s17 + $0x2648] ss:$16 sps:$4 sm:$0xff]  }
 0x6a6   : > { %15116 = vmatpush2.bf16.msra.mxu0 %v21067_v36  ;;  %v21135_v36 = vld [vmem:[%s22203_s17 + $0x242c] ss:$16 sps:$4 sm:$0xff]  }
 0x6a7   : > { %15157 = vmatpush2.bf16.msra.mxu1 %v21070_v35  ;;  %15117 = vmatprep.subr.bf16.mxu0 %v21075_v7  ;;  %v21138_v35 = vld [vmem:[%s22203_s17 + $0x262c] ss:$16 sps:$4 sm:$0xff]   ;;  %v21133_v7 = vld [vmem:[%s22203_s17 + $0x2428] ss:$16 sps:$4 sm:$0xff]  }
 0x6a8   : > { %15158 = vmatprep.subr.bf16.mxu1 %v21078_v49  ;;  %v21136_v49 = vld [vmem:[%s22203_s17 + $0x2628] ss:$16 sps:$4 sm:$0xff]  }
 0x6aa   : > { %15118 = vmatpush2.bf16.msra.mxu0 %v21073_v56  ;;  %v21141_v56 = vld [vmem:[%s22203_s17 + $0x240c] ss:$16 sps:$4 sm:$0xff]  }
 0x6ab   : > { %15159 = vmatpush2.bf16.msra.mxu1 %v21076_v53  ;;  %15119 = vmatprep.subr.bf16.mxu0 %v21081_v14  ;;  %v21144_v53 = vld [vmem:[%s22203_s17 + $0x260c] ss:$16 sps:$4 sm:$0xff]   ;;  %v21139_v14 = vld [vmem:[%s22203_s17 + $0x2408] ss:$16 sps:$4 sm:$0xff]  }
 0x6ac   : > { %15160 = vmatprep.subr.bf16.mxu1 %v21084_v17  ;;  %v21142_v17 = vld [vmem:[%s22203_s17 + $0x2608] ss:$16 sps:$4 sm:$0xff]  }
 0x6ae   : > { %15120 = vmatpush2.bf16.msra.mxu0 %v21079_v29  ;;  %v21147_v29 = vld [vmem:[%s22203_s17 + $0x25ec] ss:$16 sps:$4 sm:$0xff]  }
 0x6af   : > { %15161 = vmatpush2.bf16.msra.mxu1 %v21082_v43  ;;  %15121 = vmatprep.subr.bf16.mxu0 %v21087_v8  ;;  %v21150_v43 = vld [vmem:[%s22203_s17 + $0x27ec] ss:$16 sps:$4 sm:$0xff]   ;;  %v21145_v8 = vld [vmem:[%s22203_s17 + $0x25e8] ss:$16 sps:$4 sm:$0xff]  }
 0x6b0   : > { %15162 = vmatprep.subr.bf16.mxu1 %v21090_v60  ;;  %v21148_v60 = vld [vmem:[%s22203_s17 + $0x27e8] ss:$16 sps:$4 sm:$0xff]  }
 0x6b2   : > { %15122 = vmatpush2.bf16.msra.mxu0 %v21085_v33  ;;  %v21153_v33 = vld [vmem:[%s22203_s17 + $0x25cc] ss:$16 sps:$4 sm:$0xff]  }
 0x6b3   : > { %15163 = vmatpush2.bf16.msra.mxu1 %v21088_v27  ;;  %15123 = vmatprep.subr.bf16.mxu0 %v21093_v32  ;;  %v21156_v27 = vld [vmem:[%s22203_s17 + $0x27cc] ss:$16 sps:$4 sm:$0xff]   ;;  %v21151_v32 = vld [vmem:[%s22203_s17 + $0x25c8] ss:$16 sps:$4 sm:$0xff]  }
 0x6b4   : > { %15164 = vmatprep.subr.bf16.mxu1 %v21096_v45  ;;  %v21154_v45 = vld [vmem:[%s22203_s17 + $0x27c8] ss:$16 sps:$4 sm:$0xff]  }
 0x6b6   : > { %15124 = vmatpush2.bf16.msra.mxu0 %v21091_v2  ;;  %v21159_v2 = vld [vmem:[%s22203_s17 + $0x25ac] ss:$16 sps:$4 sm:$0xff]  }
 0x6b7   : > { %15165 = vmatpush2.bf16.msra.mxu1 %v21094_v31  ;;  %15175 = vmatprep.subr.bf16.mxu0 %v21099_v38  ;;  %v21162_v31 = vld [vmem:[%s22203_s17 + $0x27ac] ss:$16 sps:$4 sm:$0xff]   ;;  %v21157_v38 = vld [vmem:[%s22203_s17 + $0x25a8] ss:$16 sps:$4 sm:$0xff]  }
 0x6b8   : > { %15216 = vmatprep.subr.bf16.mxu1 %v21102_v18  ;;  %v21160_v18 = vld [vmem:[%s22203_s17 + $0x27a8] ss:$16 sps:$4 sm:$0xff]  }
 0x6b9   : > { %v14881_v42 = vpop.f32.mrf.mxu0  ;;  %15126 = vmatmul.mubr.bf16.vlgmr.msra.gmra.mxu0 %v23065_v54 }
 0x6ba   : > { %v14922_v40 = vpop.f32.mrf.mxu1  ;;  %15167 = vmatmul.mubr.bf16.vlgmr.msra.gmra.mxu1 %v23078_v3  ;;  %v14882_v63 = vadd.f32 %v14881_v42, %v24349_v19  ;;  %15176 = vmatpush1.bf16.msra.mxu0 %v21097_v13  ;;  %v21165_v13 = vld [vmem:[%s22203_s17 + $0x258c] ss:$16 sps:$4 sm:$0xff]  }
 0x6bb   : > { %15217 = vmatpush1.bf16.msra.mxu1 %v21100_v21  ;;  %v14883_v26 = vpop.f32.mrf.mxu0  ;;  %15177 = vmatprep.subr.bf16.mxu0 %v21105_v22  ;;  %v21168_v21 = vld [vmem:[%s22203_s17 + $0x278c] ss:$16 sps:$4 sm:$0xff]   ;;  %v21163_v22 = vld [vmem:[%s22203_s17 + $0x2588] ss:$16 sps:$4 sm:$0xff]  }
 0x6bc   : > { %v14924_v4 = vpop.f32.mrf.mxu1  ;;  %15218 = vmatprep.subr.bf16.mxu1 %v21108_v51  ;;  %v24423_v46 = vadd.f32 %v14922_v40, %v14882_v63  ;;  %v14884_v54 = vadd.f32 %v14883_v26, %v24354_v62  ;;  %15207 = vmatprep.mubr.bf16.mxu0 %v23074_v39  ;;  %v21117_v39 = vld [vmem:[%s22203_s17 + $0x248c] ss:$16 sps:$4 sm:$0xff]   ;;  %v21115_v62 = vld [vmem:[%s22203_s17 + $0x2488] ss:$16 sps:$4 sm:$0xff]  }
 0x6bd   : > { %15248 = vmatprep.mubr.bf16.mxu1 %v23086_v0  ;;  %v14885_v3 = vpop.f32.mrf.mxu0  ;;  %v21120_v0 = vld [vmem:[%s22203_s17 + $0x268c] ss:$16 sps:$4 sm:$0xff]   ;;  %v21166_v51 = vld [vmem:[%s22203_s17 + $0x2788] ss:$16 sps:$4 sm:$0xff]  }
 0x6be   : > { %v14926_v19 = vpop.f32.mrf.mxu1  ;;  %v24428_v30 = vadd.f32 %v14924_v4, %v14884_v54  ;;  %15178 = vmatpush1.bf16.msra.mxu0 %v21103_v55  ;;  %v21171_v42 = vld [vmem:[%s22203_s17 + $0x256c] ss:$16 sps:$4 sm:$0xff]   ;;  %v21169_v63 = vld [vmem:[%s22203_s17 + $0x2568] ss:$16 sps:$4 sm:$0xff]  }
 0x6bf   : > { %15219 = vmatpush1.bf16.msra.mxu1 %v21106_v20  ;;  %v14886_v50 = vpop.f32.mrf.mxu0  ;;  %15179 = vmatprep.subr.bf16.mxu0 %v21111_v5  ;;  %v21174_v40 = vld [vmem:[%s22203_s17 + $0x276c] ss:$16 sps:$4 sm:$0xff]   ;;  %v21172_v55 = vld [vmem:[%s22203_s17 + $0x2768] ss:$16 sps:$4 sm:$0xff]  }
 0x6c0   : > { %v14927_v61 = vpop.f32.mrf.mxu1  ;;  %15220 = vmatprep.subr.bf16.mxu1 %v21114_v52  ;;  %v21177_v20 = vld [vmem:[%s22203_s17 + $0x254c] ss:$16 sps:$4 sm:$0xff]   ;;  %v21175_v4 = vld [vmem:[%s22203_s17 + $0x2548] ss:$16 sps:$4 sm:$0xff]  }
 0x6c1   : > { %v21180_v26 = vld [vmem:[%s22203_s17 + $0x274c] ss:$16 sps:$4 sm:$0xff]   ;;  %v21178_v5 = vld [vmem:[%s22203_s17 + $0x2748] ss:$16 sps:$4 sm:$0xff]  }
 0x6c2   : > { %15180 = vmatpush1.bf16.msra.mxu0 %v21109_v10  ;;  %v21183_v52 = vld [vmem:[%s22203_s17 + $0x252c] ss:$16 sps:$4 sm:$0xff]   ;;  %v21181_v3 = vld [vmem:[%s22203_s17 + $0x2528] ss:$16 sps:$4 sm:$0xff]  }
 0x6c3   : > { %15221 = vmatpush1.bf16.msra.mxu1 %v21112_v59  ;;  %15181 = vmatprep.subr.bf16.mxu0 %v21117_v39  ;;  %v21186_v54 = vld [vmem:[%s22203_s17 + $0x272c] ss:$16 sps:$4 sm:$0xff]   ;;  %v21184_v19 = vld [vmem:[%s22203_s17 + $0x2728] ss:$16 sps:$4 sm:$0xff]  }
 0x6c4   : > { %15222 = vmatprep.subr.bf16.mxu1 %v21120_v0  ;;  %v21189_v10 = vld [vmem:[%s22203_s17 + $0x250c] ss:$16 sps:$4 sm:$0xff]   ;;  %v21187_v50 = vld [vmem:[%s22203_s17 + $0x2508] ss:$16 sps:$4 sm:$0xff]  }
 0x6c5   : > { %v21192_v59 = vld [vmem:[%s22203_s17 + $0x270c] ss:$16 sps:$4 sm:$0xff]   ;;  %v21190_v61 = vld [vmem:[%s22203_s17 + $0x2708] ss:$16 sps:$4 sm:$0xff]  }
 0x6c6   : > { %15182 = vmatpush1.bf16.msra.mxu0 %v21115_v62  ;;  %v21195_v39 = vld [vmem:[%s22203_s17 + $0x28ec] ss:$16 sps:$4 sm:$0xff]   ;;  %v21193_v62 = vld [vmem:[%s22203_s17 + $0x28e8] ss:$16 sps:$4 sm:$0xff]  }
 0x6c7   : > { %15223 = vmatpush1.bf16.msra.mxu1 %v21118_v1  ;;  %15183 = vmatprep.subr.bf16.mxu0 %v21123_v37  ;;  %v21198_v0 = vld [vmem:[%s22203_s17 + $0x2aec] ss:$16 sps:$4 sm:$0xff]   ;;  %v21196_v1 = vld [vmem:[%s22203_s17 + $0x2ae8] ss:$16 sps:$4 sm:$0xff]  }
 0x6c8   : > { %15224 = vmatprep.subr.bf16.mxu1 %v21126_v15  ;;  %v21201_v37 = vld [vmem:[%s22203_s17 + $0x28cc] ss:$16 sps:$4 sm:$0xff]  }
 0x6c9   : > { %v21204_v15 = vld [vmem:[%s22203_s17 + $0x2acc] ss:$16 sps:$4 sm:$0xff]  }
 0x6ca   : > { %15184 = vmatpush1.bf16.msra.mxu0 %v21121_v25 }
 0x6cb   : > { %15225 = vmatpush1.bf16.msra.mxu1 %v21124_v34  ;;  %15185 = vmatprep.subr.bf16.mxu0 %v21129_v6  ;;  %v25061_v6 = vld [vmem:[#allocation19_spill] sm:$0xff] }
 0x6cc   : > { %15226 = vmatprep.subr.bf16.mxu1 %v21132_v23 }
 0x6ce   : > { %15186 = vmatpush1.bf16.msra.mxu0 %v21127_v24  ;;  %v21199_v24 = vld [vmem:[%s22203_s17 + $0x28c8] ss:$16 sps:$4 sm:$0xff]  }
 0x6cf   : > { %15227 = vmatpush1.bf16.msra.mxu1 %v21130_v12  ;;  %15187 = vmatprep.subr.bf16.mxu0 %v21135_v36  ;;  %v21202_v12 = vld [vmem:[%s22203_s17 + $0x2ac8] ss:$16 sps:$4 sm:$0xff]  }
 0x6d0   : > { %15228 = vmatprep.subr.bf16.mxu1 %v21138_v35 }
 0x6d2   : > { %15188 = vmatpush1.bf16.msra.mxu0 %v21133_v7  ;;  %v21207_v7 = vld [vmem:[%s22203_s17 + $0x28ac] ss:$16 sps:$4 sm:$0xff]  }
 0x6d3   : > { %15229 = vmatpush1.bf16.msra.mxu1 %v21136_v49  ;;  %15189 = vmatprep.subr.bf16.mxu0 %v21141_v56  ;;  %v21210_v49 = vld [vmem:[%s22203_s17 + $0x2aac] ss:$16 sps:$4 sm:$0xff]  }
 0x6d4   : > { %15230 = vmatprep.subr.bf16.mxu1 %v21144_v53  ;;  %v25062_v53 = vld [vmem:[#allocation18_spill] sm:$0xff] }
 0x6d6   : > { %15190 = vmatpush1.bf16.msra.mxu0 %v21139_v14 }
 0x6d7   : > { %15231 = vmatpush1.bf16.msra.mxu1 %v21142_v17  ;;  %15191 = vmatprep.subr.bf16.mxu0 %v21147_v29 }
 0x6d8   : > { %15232 = vmatprep.subr.bf16.mxu1 %v21150_v43  ;;  %v21205_v43 = vld [vmem:[%s22203_s17 + $0x28a8] ss:$16 sps:$4 sm:$0xff]  }
 0x6da   : > { %15192 = vmatpush2.bf16.msra.mxu0 %v21145_v8  ;;  %v21208_v8 = vld [vmem:[%s22203_s17 + $0x2aa8] ss:$16 sps:$4 sm:$0xff]  }
 0x6db   : > { %15233 = vmatpush2.bf16.msra.mxu1 %v21148_v60  ;;  %15193 = vmatprep.subr.bf16.mxu0 %v21153_v33 }
 0x6dc   : > { %15234 = vmatprep.subr.bf16.mxu1 %v21156_v27  ;;  %v21216_v27 = vld [vmem:[%s22203_s17 + $0x2a8c] ss:$16 sps:$4 sm:$0xff]  }
 0x6de   : > { %15194 = vmatpush2.bf16.msra.mxu0 %v21151_v32  ;;  %v21211_v32 = vld [vmem:[%s22203_s17 + $0x2888] ss:$16 sps:$4 sm:$0xff]  }
 0x6df   : > { %15235 = vmatpush2.bf16.msra.mxu1 %v21154_v45  ;;  %15195 = vmatprep.subr.bf16.mxu0 %v21159_v2  ;;  %v21214_v45 = vld [vmem:[%s22203_s17 + $0x2a88] ss:$16 sps:$4 sm:$0xff]   ;;  %v21219_v2 = vld [vmem:[%s22203_s17 + $0x286c] ss:$16 sps:$4 sm:$0xff]  }
 0x6e0   : > { %15236 = vmatprep.subr.bf16.mxu1 %v21162_v31  ;;  %v21222_v31 = vld [vmem:[%s22203_s17 + $0x2a6c] ss:$16 sps:$4 sm:$0xff]  }
 0x6e2   : > { %15196 = vmatpush2.bf16.msra.mxu0 %v21157_v38  ;;  %v21217_v38 = vld [vmem:[%s22203_s17 + $0x2868] ss:$16 sps:$4 sm:$0xff]  }
 0x6e3   : > { %15237 = vmatpush2.bf16.msra.mxu1 %v21160_v18  ;;  %15197 = vmatprep.subr.bf16.mxu0 %v21165_v13  ;;  %v21220_v18 = vld [vmem:[%s22203_s17 + $0x2a68] ss:$16 sps:$4 sm:$0xff]   ;;  %v21225_v13 = vld [vmem:[%s22203_s17 + $0x284c] ss:$16 sps:$4 sm:$0xff]  }
 0x6e4   : > { %15238 = vmatprep.subr.bf16.mxu1 %v21168_v21  ;;  %v21228_v21 = vld [vmem:[%s22203_s17 + $0x2a4c] ss:$16 sps:$4 sm:$0xff]  }
 0x6e6   : > { %15198 = vmatpush2.bf16.msra.mxu0 %v21163_v22  ;;  %v21223_v22 = vld [vmem:[%s22203_s17 + $0x2848] ss:$16 sps:$4 sm:$0xff]  }
 0x6e7   : > { %15239 = vmatpush2.bf16.msra.mxu1 %v21166_v51  ;;  %15199 = vmatprep.subr.bf16.mxu0 %v21171_v42  ;;  %v21226_v51 = vld [vmem:[%s22203_s17 + $0x2a48] ss:$16 sps:$4 sm:$0xff]   ;;  %v21231_v42 = vld [vmem:[%s22203_s17 + $0x282c] ss:$16 sps:$4 sm:$0xff]  }
 0x6e8   : > { %15240 = vmatprep.subr.bf16.mxu1 %v21174_v40  ;;  %v21234_v40 = vld [vmem:[%s22203_s17 + $0x2a2c] ss:$16 sps:$4 sm:$0xff]  }
 0x6ea   : > { %15200 = vmatpush2.bf16.msra.mxu0 %v21169_v63  ;;  %v21229_v63 = vld [vmem:[%s22203_s17 + $0x2828] ss:$16 sps:$4 sm:$0xff]  }
 0x6eb   : > { %15241 = vmatpush2.bf16.msra.mxu1 %v21172_v55  ;;  %15201 = vmatprep.subr.bf16.mxu0 %v21177_v20  ;;  %v21232_v55 = vld [vmem:[%s22203_s17 + $0x2a28] ss:$16 sps:$4 sm:$0xff]   ;;  %v21237_v20 = vld [vmem:[%s22203_s17 + $0x280c] ss:$16 sps:$4 sm:$0xff]  }
 0x6ec   : > { %15242 = vmatprep.subr.bf16.mxu1 %v21180_v26  ;;  %v21240_v26 = vld [vmem:[%s22203_s17 + $0x2a0c] ss:$16 sps:$4 sm:$0xff]  }
 0x6ee   : > { %15202 = vmatpush2.bf16.msra.mxu0 %v21175_v4  ;;  %v21235_v4 = vld [vmem:[%s22203_s17 + $0x2808] ss:$16 sps:$4 sm:$0xff]  }
 0x6ef   : > { %15243 = vmatpush2.bf16.msra.mxu1 %v21178_v5  ;;  %15203 = vmatprep.subr.bf16.mxu0 %v21183_v52  ;;  %v21238_v5 = vld [vmem:[%s22203_s17 + $0x2a08] ss:$16 sps:$4 sm:$0xff]   ;;  %v21243_v52 = vld [vmem:[%s22203_s17 + $0x29ec] ss:$16 sps:$4 sm:$0xff]  }
 0x6f0   : > { %15244 = vmatprep.subr.bf16.mxu1 %v21186_v54  ;;  %v21246_v54 = vld [vmem:[%s22203_s17 + $0x2bec] ss:$16 sps:$4 sm:$0xff]  }
 0x6f2   : > { %15204 = vmatpush2.bf16.msra.mxu0 %v21181_v3  ;;  %v21241_v3 = vld [vmem:[%s22203_s17 + $0x29e8] ss:$16 sps:$4 sm:$0xff]  }
 0x6f3   : > { %15245 = vmatpush2.bf16.msra.mxu1 %v21184_v19  ;;  %15205 = vmatprep.subr.bf16.mxu0 %v21189_v10  ;;  %v21244_v19 = vld [vmem:[%s22203_s17 + $0x2be8] ss:$16 sps:$4 sm:$0xff]   ;;  %v21249_v10 = vld [vmem:[%s22203_s17 + $0x29cc] ss:$16 sps:$4 sm:$0xff]  }
 0x6f4   : > { %15246 = vmatprep.subr.bf16.mxu1 %v21192_v59  ;;  %v21252_v59 = vld [vmem:[%s22203_s17 + $0x2bcc] ss:$16 sps:$4 sm:$0xff]  }
 0x6f6   : > { %15206 = vmatpush2.bf16.msra.mxu0 %v21187_v50  ;;  %v21247_v50 = vld [vmem:[%s22203_s17 + $0x29c8] ss:$16 sps:$4 sm:$0xff]  }
 0x6f7   : > { %15247 = vmatpush2.bf16.msra.mxu1 %v21190_v61  ;;  %15257 = vmatprep.subr.bf16.mxu0 %v21195_v39  ;;  %v21250_v61 = vld [vmem:[%s22203_s17 + $0x2bc8] ss:$16 sps:$4 sm:$0xff]   ;;  %v21255_v39 = vld [vmem:[%s22203_s17 + $0x29ac] ss:$16 sps:$4 sm:$0xff]  }
 0x6f8   : > { %15298 = vmatprep.subr.bf16.mxu1 %v21198_v0  ;;  %v21258_v0 = vld [vmem:[%s22203_s17 + $0x2bac] ss:$16 sps:$4 sm:$0xff]  }
 0x6f9   : > { %v14963_v25 = vpop.f32.mrf.mxu0  ;;  %15208 = vmatmul.mubr.bf16.vlgmr.msra.gmra.mxu0 %v23163_v9 }
 0x6fa   : > { %v15004_v34 = vpop.f32.mrf.mxu1  ;;  %15249 = vmatmul.mubr.bf16.vlgmr.msra.gmra.mxu1 %v25061_v6  ;;  %v14964_v23 = vadd.f32 %v14963_v25, %v24423_v46  ;;  %15258 = vmatpush1.bf16.msra.mxu0 %v21193_v62  ;;  %v25063_v46 = vld [vmem:[#allocation20_spill] sm:$0xff]  ;;  %v21267_v6 = vld [vmem:[%s22203_s17 + $0x296c] ss:$16 sps:$4 sm:$0xff]  }
 0x6fb   : > { %15299 = vmatpush1.bf16.msra.mxu1 %v21196_v1  ;;  %v14965_v36 = vpop.f32.mrf.mxu0  ;;  %15259 = vmatprep.subr.bf16.mxu0 %v21201_v37  ;;  %v21253_v62 = vld [vmem:[%s22203_s17 + $0x29a8] ss:$16 sps:$4 sm:$0xff]   ;;  %v21261_v37 = vld [vmem:[%s22203_s17 + $0x298c] ss:$16 sps:$4 sm:$0xff]  }
 0x6fc   : > { %v15006_v35 = vpop.f32.mrf.mxu1  ;;  %15300 = vmatprep.subr.bf16.mxu1 %v21204_v15  ;;  %v24497_v56 = vadd.f32 %v15004_v34, %v14964_v23  ;;  %v14966_v9 = vadd.f32 %v14965_v36, %v24428_v30  ;;  %15289 = vmatprep.mubr.bf16.mxu0 %v25062_v53  ;;  %v21213_v30 = vld [vmem:[%s22203_s17 + $0x288c] ss:$16 sps:$4 sm:$0xff]   ;;  %v21256_v1 = vld [vmem:[%s22203_s17 + $0x2ba8] ss:$16 sps:$4 sm:$0xff]  }
 0x6fd   : > { %15330 = vmatprep.mubr.bf16.mxu1 %v25063_v46  ;;  %v14967_v14 = vpop.f32.mrf.mxu0  ;;  %v21264_v15 = vld [vmem:[%s22203_s17 + $0x2b8c] ss:$16 sps:$4 sm:$0xff]   ;;  %v21259_v25 = vld [vmem:[%s22203_s17 + $0x2988] ss:$16 sps:$4 sm:$0xff]  }
 0x6fe   : > { %v15008_v17 = vpop.f32.mrf.mxu1  ;;  %v24502_v29 = vadd.f32 %v15006_v35, %v14966_v9  ;;  %15260 = vmatpush1.bf16.msra.mxu0 %v21199_v24  ;;  %v21262_v34 = vld [vmem:[%s22203_s17 + $0x2b88] ss:$16 sps:$4 sm:$0xff]   ;;  %v21270_v23 = vld [vmem:[%s22203_s17 + $0x2b6c] ss:$16 sps:$4 sm:$0xff]  }
 0x6ff   : > { %15301 = vmatpush1.bf16.msra.mxu1 %v21202_v12  ;;  %v14968_v60 = vpop.f32.mrf.mxu0  ;;  %15261 = vmatprep.subr.bf16.mxu0 %v21207_v7  ;;  %v21265_v24 = vld [vmem:[%s22203_s17 + $0x2968] ss:$16 sps:$4 sm:$0xff]   ;;  %v21273_v36 = vld [vmem:[%s22203_s17 + $0x294c] ss:$16 sps:$4 sm:$0xff]  }
 0x700   : > { %v15009_v33 = vpop.f32.mrf.mxu1  ;;  %15302 = vmatprep.subr.bf16.mxu1 %v21210_v49  ;;  %v21268_v12 = vld [vmem:[%s22203_s17 + $0x2b68] ss:$16 sps:$4 sm:$0xff]   ;;  %v21276_v35 = vld [vmem:[%s22203_s17 + $0x2b4c] ss:$16 sps:$4 sm:$0xff]  }
 0x701   : > { %v21271_v7 = vld [vmem:[%s22203_s17 + $0x2948] ss:$16 sps:$4 sm:$0xff]   ;;  %v21279_v9 = vld [vmem:[%s22203_s17 + $0x292c] ss:$16 sps:$4 sm:$0xff]  }
 0x702   : > { %15262 = vmatpush1.bf16.msra.mxu0 %v21205_v43  ;;  %v21274_v49 = vld [vmem:[%s22203_s17 + $0x2b48] ss:$16 sps:$4 sm:$0xff]   ;;  %v21282_v53 = vld [vmem:[%s22203_s17 + $0x2b2c] ss:$16 sps:$4 sm:$0xff]  }
 0x703   : > { %15303 = vmatpush1.bf16.msra.mxu1 %v21208_v8  ;;  %15263 = vmatprep.subr.bf16.mxu0 %v21213_v30  ;;  %v21277_v46 = vld [vmem:[%s22203_s17 + $0x2928] ss:$16 sps:$4 sm:$0xff]   ;;  %v21285_v17 = vld [vmem:[%s22203_s17 + $0x290c] ss:$16 sps:$4 sm:$0xff]  }
 0x704   : > { %15304 = vmatprep.subr.bf16.mxu1 %v21216_v27  ;;  %v21280_v14 = vld [vmem:[%s22203_s17 + $0x2b28] ss:$16 sps:$4 sm:$0xff]   ;;  %v21288_v43 = vld [vmem:[%s22203_s17 + $0x2b0c] ss:$16 sps:$4 sm:$0xff]  }
 0x705   : > { %v21283_v8 = vld [vmem:[%s22203_s17 + $0x2908] ss:$16 sps:$4 sm:$0xff]   ;;  %v21291_v33 = vld [vmem:[%s22203_s17 + $0x2cec] ss:$16 sps:$4 sm:$0xff]  }
 0x706   : > { %15264 = vmatpush1.bf16.msra.mxu0 %v21211_v32  ;;  %v21286_v60 = vld [vmem:[%s22203_s17 + $0x2b08] ss:$16 sps:$4 sm:$0xff]   ;;  %v21294_v30 = vld [vmem:[%s22203_s17 + $0x2eec] ss:$16 sps:$4 sm:$0xff]  }
 0x707   : > { %15305 = vmatpush1.bf16.msra.mxu1 %v21214_v45  ;;  %15265 = vmatprep.subr.bf16.mxu0 %v21219_v2  ;;  %v21289_v27 = vld [vmem:[%s22203_s17 + $0x2ce8] ss:$16 sps:$4 sm:$0xff]   ;;  %v21297_v45 = vld [vmem:[%s22203_s17 + $0x2ccc] ss:$16 sps:$4 sm:$0xff]  }
 0x708   : > { %15306 = vmatprep.subr.bf16.mxu1 %v21222_v31  ;;  %v21292_v32 = vld [vmem:[%s22203_s17 + $0x2ee8] ss:$16 sps:$4 sm:$0xff]   ;;  %v21300_v2 = vld [vmem:[%s22203_s17 + $0x2ecc] ss:$16 sps:$4 sm:$0xff]  }
 0x70a   : > { %15266 = vmatpush1.bf16.msra.mxu0 %v21217_v38 }
 0x70b   : > { %15307 = vmatpush1.bf16.msra.mxu1 %v21220_v18  ;;  %15267 = vmatprep.subr.bf16.mxu0 %v21225_v13  ;;  %v25064_v18 = vld [vmem:[#allocation21_spill] sm:$0xff]  ;;  %v25065_v13 = vld [vmem:[#allocation23_spill] sm:$0xff] }
 0x70c   : > { %15308 = vmatprep.subr.bf16.mxu1 %v21228_v21 }
 0x70e   : > { %15268 = vmatpush1.bf16.msra.mxu0 %v21223_v22  ;;  %v21295_v22 = vld [vmem:[%s22203_s17 + $0x2cc8] ss:$16 sps:$4 sm:$0xff]  }
 0x70f   : > { %15309 = vmatpush1.bf16.msra.mxu1 %v21226_v51  ;;  %15269 = vmatprep.subr.bf16.mxu0 %v21231_v42  ;;  %v21298_v51 = vld [vmem:[%s22203_s17 + $0x2ec8] ss:$16 sps:$4 sm:$0xff]  }
 0x710   : > { %15310 = vmatprep.subr.bf16.mxu1 %v21234_v40 }
 0x712   : > { %15270 = vmatpush1.bf16.msra.mxu0 %v21229_v63  ;;  %v21303_v63 = vld [vmem:[%s22203_s17 + $0x2cac] ss:$16 sps:$4 sm:$0xff]  }
 0x713   : > { %15311 = vmatpush1.bf16.msra.mxu1 %v21232_v55  ;;  %15271 = vmatprep.subr.bf16.mxu0 %v21237_v20  ;;  %v21306_v55 = vld [vmem:[%s22203_s17 + $0x2eac] ss:$16 sps:$4 sm:$0xff]  }
 0x714   : > { %15312 = vmatprep.subr.bf16.mxu1 %v21240_v26 }
 0x716   : > { %15272 = vmatpush1.bf16.msra.mxu0 %v21235_v4  ;;  %v25066_v4 = vld [vmem:[#allocation22_spill] sm:$0xff] }
 0x717   : > { %15313 = vmatpush1.bf16.msra.mxu1 %v21238_v5  ;;  %15273 = vmatprep.subr.bf16.mxu0 %v21243_v52 }
 0x718   : > { %15314 = vmatprep.subr.bf16.mxu1 %v21246_v54 }
 0x71a   : > { %15274 = vmatpush2.bf16.msra.mxu0 %v21241_v3  ;;  %v21301_v3 = vld [vmem:[%s22203_s17 + $0x2ca8] ss:$16 sps:$4 sm:$0xff]  }
 0x71b   : > { %15315 = vmatpush2.bf16.msra.mxu1 %v21244_v19  ;;  %15275 = vmatprep.subr.bf16.mxu0 %v21249_v10  ;;  %v21304_v19 = vld [vmem:[%s22203_s17 + $0x2ea8] ss:$16 sps:$4 sm:$0xff]  }
 0x71c   : > { %15316 = vmatprep.subr.bf16.mxu1 %v21252_v59 }
 0x71e   : > { %15276 = vmatpush2.bf16.msra.mxu0 %v21247_v50  ;;  %v21312_v50 = vld [vmem:[%s22203_s17 + $0x2e8c] ss:$16 sps:$4 sm:$0xff]  }
 0x71f   : > { %15317 = vmatpush2.bf16.msra.mxu1 %v21250_v61  ;;  %15277 = vmatprep.subr.bf16.mxu0 %v21255_v39  ;;  %v21307_v61 = vld [vmem:[%s22203_s17 + $0x2c88] ss:$16 sps:$4 sm:$0xff]  }
 0x720   : > { %15318 = vmatprep.subr.bf16.mxu1 %v21258_v0  ;;  %v21310_v39 = vld [vmem:[%s22203_s17 + $0x2e88] ss:$16 sps:$4 sm:$0xff]   ;;  %v21315_v0 = vld [vmem:[%s22203_s17 + $0x2c6c] ss:$16 sps:$4 sm:$0xff]  }
 0x722   : > { %15278 = vmatpush2.bf16.msra.mxu0 %v21253_v62  ;;  %v21318_v62 = vld [vmem:[%s22203_s17 + $0x2e6c] ss:$16 sps:$4 sm:$0xff]  }
 0x723   : > { %15319 = vmatpush2.bf16.msra.mxu1 %v21256_v1  ;;  %15279 = vmatprep.subr.bf16.mxu0 %v21261_v37  ;;  %v21313_v1 = vld [vmem:[%s22203_s17 + $0x2c68] ss:$16 sps:$4 sm:$0xff]  }
 0x724   : > { %15320 = vmatprep.subr.bf16.mxu1 %v21264_v15  ;;  %v21316_v37 = vld [vmem:[%s22203_s17 + $0x2e68] ss:$16 sps:$4 sm:$0xff]   ;;  %v21321_v15 = vld [vmem:[%s22203_s17 + $0x2c4c] ss:$16 sps:$4 sm:$0xff]  }
 0x726   : > { %15280 = vmatpush2.bf16.msra.mxu0 %v21259_v25  ;;  %v21324_v25 = vld [vmem:[%s22203_s17 + $0x2e4c] ss:$16 sps:$4 sm:$0xff]  }
 0x727   : > { %15321 = vmatpush2.bf16.msra.mxu1 %v21262_v34  ;;  %15281 = vmatprep.subr.bf16.mxu0 %v21267_v6  ;;  %v21319_v34 = vld [vmem:[%s22203_s17 + $0x2c48] ss:$16 sps:$4 sm:$0xff]  }
 0x728   : > { %15322 = vmatprep.subr.bf16.mxu1 %v21270_v23  ;;  %v21322_v6 = vld [vmem:[%s22203_s17 + $0x2e48] ss:$16 sps:$4 sm:$0xff]   ;;  %v21327_v23 = vld [vmem:[%s22203_s17 + $0x2c2c] ss:$16 sps:$4 sm:$0xff]  }
 0x72a   : > { %15282 = vmatpush2.bf16.msra.mxu0 %v21265_v24  ;;  %v21330_v24 = vld [vmem:[%s22203_s17 + $0x2e2c] ss:$16 sps:$4 sm:$0xff]  }
 0x72b   : > { %15323 = vmatpush2.bf16.msra.mxu1 %v21268_v12  ;;  %15283 = vmatprep.subr.bf16.mxu0 %v21273_v36  ;;  %v21325_v12 = vld [vmem:[%s22203_s17 + $0x2c28] ss:$16 sps:$4 sm:$0xff]  }
 0x72c   : > { %15324 = vmatprep.subr.bf16.mxu1 %v21276_v35  ;;  %v21328_v36 = vld [vmem:[%s22203_s17 + $0x2e28] ss:$16 sps:$4 sm:$0xff]   ;;  %v21333_v35 = vld [vmem:[%s22203_s17 + $0x2c0c] ss:$16 sps:$4 sm:$0xff]  }
 0x72e   : > { %15284 = vmatpush2.bf16.msra.mxu0 %v21271_v7  ;;  %v21336_v7 = vld [vmem:[%s22203_s17 + $0x2e0c] ss:$16 sps:$4 sm:$0xff]  }
 0x72f   : > { %15325 = vmatpush2.bf16.msra.mxu1 %v21274_v49  ;;  %15285 = vmatprep.subr.bf16.mxu0 %v21279_v9  ;;  %v21331_v49 = vld [vmem:[%s22203_s17 + $0x2c08] ss:$16 sps:$4 sm:$0xff]  }
 0x730   : > { %15326 = vmatprep.subr.bf16.mxu1 %v21282_v53  ;;  %v21334_v9 = vld [vmem:[%s22203_s17 + $0x2e08] ss:$16 sps:$4 sm:$0xff]   ;;  %v21339_v53 = vld [vmem:[%s22203_s17 + $0x2dec] ss:$16 sps:$4 sm:$0xff]  }
 0x732   : > { %15286 = vmatpush2.bf16.msra.mxu0 %v21277_v46  ;;  %v21342_v46 = vld [vmem:[%s22203_s17 + $0x2fec] ss:$16 sps:$4 sm:$0xff]  }
 0x733   : > { %15327 = vmatpush2.bf16.msra.mxu1 %v21280_v14  ;;  %15287 = vmatprep.subr.bf16.mxu0 %v21285_v17  ;;  %v21337_v14 = vld [vmem:[%s22203_s17 + $0x2de8] ss:$16 sps:$4 sm:$0xff]  }
 0x734   : > { %15328 = vmatprep.subr.bf16.mxu1 %v21288_v43  ;;  %v21340_v17 = vld [vmem:[%s22203_s17 + $0x2fe8] ss:$16 sps:$4 sm:$0xff]   ;;  %v21345_v43 = vld [vmem:[%s22203_s17 + $0x2dcc] ss:$16 sps:$4 sm:$0xff]  }
 0x736   : > { %15288 = vmatpush2.bf16.msra.mxu0 %v21283_v8  ;;  %v21348_v8 = vld [vmem:[%s22203_s17 + $0x2fcc] ss:$16 sps:$4 sm:$0xff]  }
 0x737   : > { %15329 = vmatpush2.bf16.msra.mxu1 %v21286_v60  ;;  %15339 = vmatprep.subr.bf16.mxu0 %v21291_v33  ;;  %v21343_v60 = vld [vmem:[%s22203_s17 + $0x2dc8] ss:$16 sps:$4 sm:$0xff]  }
 0x738   : > { %15380 = vmatprep.subr.bf16.mxu1 %v21294_v30  ;;  %v21346_v33 = vld [vmem:[%s22203_s17 + $0x2fc8] ss:$16 sps:$4 sm:$0xff]   ;;  %v21351_v30 = vld [vmem:[%s22203_s17 + $0x2dac] ss:$16 sps:$4 sm:$0xff]  }
 0x739   : > { %v15045_v31 = vpop.f32.mrf.mxu0  ;;  %15290 = vmatmul.mubr.bf16.vlgmr.msra.gmra.mxu0 %v25064_v18  ;;  %v21358_v18 = vld [vmem:[%s22203_s17 + $0x2f88] ss:$16 sps:$4 sm:$0xff]  }
 0x73a   : > { %v15086_v38 = vpop.f32.mrf.mxu1  ;;  %15331 = vmatmul.mubr.bf16.vlgmr.msra.gmra.mxu1 %v25065_v13  ;;  %v15046_v21 = vadd.f32 %v15045_v31, %v24497_v56  ;;  %15340 = vmatpush1.bf16.msra.mxu0 %v21289_v27  ;;  %v25067_v56 = vld [vmem:[#allocation24_spill] sm:$0xff]  ;;  %v21354_v27 = vld [vmem:[%s22203_s17 + $0x2fac] ss:$16 sps:$4 sm:$0xff]  }
 0x73b   : > { %15381 = vmatpush1.bf16.msra.mxu1 %v21292_v32  ;;  %v15047_v42 = vpop.f32.mrf.mxu0  ;;  %15341 = vmatprep.subr.bf16.mxu0 %v21297_v45  ;;  %v21349_v32 = vld [vmem:[%s22203_s17 + $0x2da8] ss:$16 sps:$4 sm:$0xff]   ;;  %v21360_v31 = vld [vmem:[%s22203_s17 + $0x2f8c] ss:$16 sps:$4 sm:$0xff]  }
 0x73c   : > { %v15088_v40 = vpop.f32.mrf.mxu1  ;;  %15382 = vmatprep.subr.bf16.mxu1 %v21300_v2  ;;  %v24571_v20 = vadd.f32 %v15086_v38, %v15046_v21  ;;  %v15048_v26 = vadd.f32 %v15047_v42, %v24502_v29  ;;  %15371 = vmatprep.mubr.bf16.mxu0 %v25066_v4  ;;  %v21309_v29 = vld [vmem:[%s22203_s17 + $0x2c8c] ss:$16 sps:$4 sm:$0xff]   ;;  %v21352_v45 = vld [vmem:[%s22203_s17 + $0x2fa8] ss:$16 sps:$4 sm:$0xff]  }
 0x73d   : > { %15412 = vmatprep.mubr.bf16.mxu1 %v25067_v56  ;;  %v15049_v5 = vpop.f32.mrf.mxu0  ;;  %v21357_v2 = vld [vmem:[%s22203_s17 + $0x2d8c] ss:$16 sps:$4 sm:$0xff]   ;;  %v21355_v38 = vld [vmem:[%s22203_s17 + $0x2d88] ss:$16 sps:$4 sm:$0xff]  }
 0x73e   : > { %v15090_v52 = vpop.f32.mrf.mxu1  ;;  %v24576_v54 = vadd.f32 %v15088_v40, %v15048_v26  ;;  %15342 = vmatpush1.bf16.msra.mxu0 %v21295_v22  ;;  %v21363_v13 = vld [vmem:[%s22203_s17 + $0x2d6c] ss:$16 sps:$4 sm:$0xff]   ;;  %v21361_v22 = vld [vmem:[%s22203_s17 + $0x2d68] ss:$16 sps:$4 sm:$0xff]  }
 0x73f   : > { %15383 = vmatpush1.bf16.msra.mxu1 %v21298_v51  ;;  %v15050_v10 = vpop.f32.mrf.mxu0  ;;  %15343 = vmatprep.subr.bf16.mxu0 %v21303_v63  ;;  %v21366_v21 = vld [vmem:[%s22203_s17 + $0x2f6c] ss:$16 sps:$4 sm:$0xff]   ;;  %v21364_v51 = vld [vmem:[%s22203_s17 + $0x2f68] ss:$16 sps:$4 sm:$0xff]  }
 0x740   : > { %v15091_v59 = vpop.f32.mrf.mxu1  ;;  %15384 = vmatprep.subr.bf16.mxu1 %v21306_v55  ;;  %v21369_v42 = vld [vmem:[%s22203_s17 + $0x2d4c] ss:$16 sps:$4 sm:$0xff]   ;;  %v21367_v63 = vld [vmem:[%s22203_s17 + $0x2d48] ss:$16 sps:$4 sm:$0xff]  }
 0x741   : > { %v21372_v40 = vld [vmem:[%s22203_s17 + $0x2f4c] ss:$16 sps:$4 sm:$0xff]   ;;  %v21370_v55 = vld [vmem:[%s22203_s17 + $0x2f48] ss:$16 sps:$4 sm:$0xff]  }
 0x742   : > { %15344 = vmatpush1.bf16.msra.mxu0 %v21301_v3  ;;  %v21375_v26 = vld [vmem:[%s22203_s17 + $0x2d2c] ss:$16 sps:$4 sm:$0xff]   ;;  %v21373_v56 = vld [vmem:[%s22203_s17 + $0x2d28] ss:$16 sps:$4 sm:$0xff]  }
 0x743   : > { %15385 = vmatpush1.bf16.msra.mxu1 %v21304_v19  ;;  %15345 = vmatprep.subr.bf16.mxu0 %v21309_v29  ;;  %v21378_v4 = vld [vmem:[%s22203_s17 + $0x2f2c] ss:$16 sps:$4 sm:$0xff]   ;;  %v21376_v5 = vld [vmem:[%s22203_s17 + $0x2f28] ss:$16 sps:$4 sm:$0xff]  }
 0x744   : > { %15386 = vmatprep.subr.bf16.mxu1 %v21312_v50  ;;  %v21381_v52 = vld [vmem:[%s22203_s17 + $0x2d0c] ss:$16 sps:$4 sm:$0xff]   ;;  %v21379_v19 = vld [vmem:[%s22203_s17 + $0x2d08] ss:$16 sps:$4 sm:$0xff]  }
 0x745   : > { %v21384_v3 = vld [vmem:[%s22203_s17 + $0x2f0c] ss:$16 sps:$4 sm:$0xff]   ;;  %v21382_v10 = vld [vmem:[%s22203_s17 + $0x2f08] ss:$16 sps:$4 sm:$0xff]  }
 0x746   : > { %15346 = vmatpush1.bf16.msra.mxu0 %v21307_v61  ;;  %v21387_v59 = vld [vmem:[%s22203_s17 + $0x30ec] ss:$16 sps:$4 sm:$0xff]   ;;  %v21385_v50 = vld [vmem:[%s22203_s17 + $0x30e8] ss:$16 sps:$4 sm:$0xff]  }
 0x747   : > { %15387 = vmatpush1.bf16.msra.mxu1 %v21310_v39  ;;  %15347 = vmatprep.subr.bf16.mxu0 %v21315_v0  ;;  %v21390_v29 = vld [vmem:[%s22203_s17 + $0x32ec] ss:$16 sps:$4 sm:$0xff]   ;;  %v21388_v61 = vld [vmem:[%s22203_s17 + $0x32e8] ss:$16 sps:$4 sm:$0xff]  }
 0x748   : > { %15388 = vmatprep.subr.bf16.mxu1 %v21318_v62  ;;  %v21393_v39 = vld [vmem:[%s22203_s17 + $0x30cc] ss:$16 sps:$4 sm:$0xff]  }
 0x749   : > { %v21396_v0 = vld [vmem:[%s22203_s17 + $0x32cc] ss:$16 sps:$4 sm:$0xff]  }
 0x74a   : > { %15348 = vmatpush1.bf16.msra.mxu0 %v21313_v1 }
 0x74b   : > { %15389 = vmatpush1.bf16.msra.mxu1 %v21316_v37  ;;  %15349 = vmatprep.subr.bf16.mxu0 %v21321_v15  ;;  %v25068_v37 = vld [vmem:[#allocation25_spill] sm:$0xff]  ;;  %v25069_v15 = vld [vmem:[#allocation27_spill] sm:$0xff] }
 0x74c   : > { %15390 = vmatprep.subr.bf16.mxu1 %v21324_v25 }
 0x74e   : > { %15350 = vmatpush1.bf16.msra.mxu0 %v21319_v34  ;;  %v21391_v34 = vld [vmem:[%s22203_s17 + $0x30c8] ss:$16 sps:$4 sm:$0xff]  }
 0x74f   : > { %15391 = vmatpush1.bf16.msra.mxu1 %v21322_v6  ;;  %15351 = vmatprep.subr.bf16.mxu0 %v21327_v23  ;;  %v21394_v6 = vld [vmem:[%s22203_s17 + $0x32c8] ss:$16 sps:$4 sm:$0xff]  }
 0x750   : > { %15392 = vmatprep.subr.bf16.mxu1 %v21330_v24 }
 0x752   : > { %15352 = vmatpush1.bf16.msra.mxu0 %v21325_v12  ;;  %v21399_v12 = vld [vmem:[%s22203_s17 + $0x30ac] ss:$16 sps:$4 sm:$0xff]  }
 0x753   : > { %15393 = vmatpush1.bf16.msra.mxu1 %v21328_v36  ;;  %15353 = vmatprep.subr.bf16.mxu0 %v21333_v35  ;;  %v21402_v36 = vld [vmem:[%s22203_s17 + $0x32ac] ss:$16 sps:$4 sm:$0xff]  }
 0x754   : > { %15394 = vmatprep.subr.bf16.mxu1 %v21336_v7 }
 0x756   : > { %15354 = vmatpush1.bf16.msra.mxu0 %v21331_v49  ;;  %v25070_v49 = vld [vmem:[#allocation26_spill] sm:$0xff] }
 0x757   : > { %15395 = vmatpush1.bf16.msra.mxu1 %v21334_v9  ;;  %15355 = vmatprep.subr.bf16.mxu0 %v21339_v53 }
 0x758   : > { %15396 = vmatprep.subr.bf16.mxu1 %v21342_v46 }
 0x75a   : > { %15356 = vmatpush2.bf16.msra.mxu0 %v21337_v14  ;;  %v21397_v14 = vld [vmem:[%s22203_s17 + $0x30a8] ss:$16 sps:$4 sm:$0xff]  }
 0x75b   : > { %15397 = vmatpush2.bf16.msra.mxu1 %v21340_v17  ;;  %15357 = vmatprep.subr.bf16.mxu0 %v21345_v43  ;;  %v21400_v17 = vld [vmem:[%s22203_s17 + $0x32a8] ss:$16 sps:$4 sm:$0xff]  }
 0x75c   : > { %15398 = vmatprep.subr.bf16.mxu1 %v21348_v8 }
 0x75e   : > { %15358 = vmatpush2.bf16.msra.mxu0 %v21343_v60  ;;  %v21408_v60 = vld [vmem:[%s22203_s17 + $0x328c] ss:$16 sps:$4 sm:$0xff]  }
 0x75f   : > { %15399 = vmatpush2.bf16.msra.mxu1 %v21346_v33  ;;  %15359 = vmatprep.subr.bf16.mxu0 %v21351_v30  ;;  %v21403_v33 = vld [vmem:[%s22203_s17 + $0x3088] ss:$16 sps:$4 sm:$0xff]  }
 0x760   : > { %15400 = vmatprep.subr.bf16.mxu1 %v21354_v27  ;;  %v21406_v30 = vld [vmem:[%s22203_s17 + $0x3288] ss:$16 sps:$4 sm:$0xff]   ;;  %v21411_v27 = vld [vmem:[%s22203_s17 + $0x306c] ss:$16 sps:$4 sm:$0xff]  }
 0x762   : > { %15360 = vmatpush2.bf16.msra.mxu0 %v21349_v32  ;;  %v21414_v32 = vld [vmem:[%s22203_s17 + $0x326c] ss:$16 sps:$4 sm:$0xff]  }
 0x763   : > { %15401 = vmatpush2.bf16.msra.mxu1 %v21352_v45  ;;  %15361 = vmatprep.subr.bf16.mxu0 %v21357_v2  ;;  %v21409_v45 = vld [vmem:[%s22203_s17 + $0x3068] ss:$16 sps:$4 sm:$0xff]  }
 0x764   : > { %15402 = vmatprep.subr.bf16.mxu1 %v21360_v31  ;;  %v21412_v2 = vld [vmem:[%s22203_s17 + $0x3268] ss:$16 sps:$4 sm:$0xff]   ;;  %v21417_v31 = vld [vmem:[%s22203_s17 + $0x304c] ss:$16 sps:$4 sm:$0xff]  }
 0x766   : > { %15362 = vmatpush2.bf16.msra.mxu0 %v21355_v38  ;;  %v21420_v38 = vld [vmem:[%s22203_s17 + $0x324c] ss:$16 sps:$4 sm:$0xff]  }
 0x767   : > { %15403 = vmatpush2.bf16.msra.mxu1 %v21358_v18  ;;  %15363 = vmatprep.subr.bf16.mxu0 %v21363_v13  ;;  %v21415_v18 = vld [vmem:[%s22203_s17 + $0x3048] ss:$16 sps:$4 sm:$0xff]  }
 0x768   : > { %15404 = vmatprep.subr.bf16.mxu1 %v21366_v21  ;;  %v21418_v13 = vld [vmem:[%s22203_s17 + $0x3248] ss:$16 sps:$4 sm:$0xff]   ;;  %v21423_v21 = vld [vmem:[%s22203_s17 + $0x302c] ss:$16 sps:$4 sm:$0xff]  }
 0x76a   : > { %15364 = vmatpush2.bf16.msra.mxu0 %v21361_v22  ;;  %v21426_v22 = vld [vmem:[%s22203_s17 + $0x322c] ss:$16 sps:$4 sm:$0xff]  }
 0x76b   : > { %15405 = vmatpush2.bf16.msra.mxu1 %v21364_v51  ;;  %15365 = vmatprep.subr.bf16.mxu0 %v21369_v42  ;;  %v21421_v51 = vld [vmem:[%s22203_s17 + $0x3028] ss:$16 sps:$4 sm:$0xff]  }
 0x76c   : > { %15406 = vmatprep.subr.bf16.mxu1 %v21372_v40  ;;  %v21424_v42 = vld [vmem:[%s22203_s17 + $0x3228] ss:$16 sps:$4 sm:$0xff]   ;;  %v21429_v40 = vld [vmem:[%s22203_s17 + $0x300c] ss:$16 sps:$4 sm:$0xff]  }
 0x76e   : > { %15366 = vmatpush2.bf16.msra.mxu0 %v21367_v63  ;;  %v21432_v63 = vld [vmem:[%s22203_s17 + $0x320c] ss:$16 sps:$4 sm:$0xff]  }
 0x76f   : > { %15407 = vmatpush2.bf16.msra.mxu1 %v21370_v55  ;;  %15367 = vmatprep.subr.bf16.mxu0 %v21375_v26  ;;  %v21427_v55 = vld [vmem:[%s22203_s17 + $0x3008] ss:$16 sps:$4 sm:$0xff]  }
 0x770   : > { %15408 = vmatprep.subr.bf16.mxu1 %v21378_v4  ;;  %v21430_v26 = vld [vmem:[%s22203_s17 + $0x3208] ss:$16 sps:$4 sm:$0xff]   ;;  %v21435_v4 = vld [vmem:[%s22203_s17 + $0x31ec] ss:$16 sps:$4 sm:$0xff]  }
 0x772   : > { %15368 = vmatpush2.bf16.msra.mxu0 %v21373_v56  ;;  %v21438_v56 = vld [vmem:[%s22203_s17 + $0x33ec] ss:$16 sps:$4 sm:$0xff]  }
 0x773   : > { %15409 = vmatpush2.bf16.msra.mxu1 %v21376_v5  ;;  %15369 = vmatprep.subr.bf16.mxu0 %v21381_v52  ;;  %v21433_v5 = vld [vmem:[%s22203_s17 + $0x31e8] ss:$16 sps:$4 sm:$0xff]  }
 0x774   : > { %15410 = vmatprep.subr.bf16.mxu1 %v21384_v3  ;;  %v21436_v52 = vld [vmem:[%s22203_s17 + $0x33e8] ss:$16 sps:$4 sm:$0xff]   ;;  %v21441_v3 = vld [vmem:[%s22203_s17 + $0x31cc] ss:$16 sps:$4 sm:$0xff]  }
 0x776   : > { %15370 = vmatpush2.bf16.msra.mxu0 %v21379_v19  ;;  %v21444_v19 = vld [vmem:[%s22203_s17 + $0x33cc] ss:$16 sps:$4 sm:$0xff]  }
 0x777   : > { %15411 = vmatpush2.bf16.msra.mxu1 %v21382_v10  ;;  %15421 = vmatprep.subr.bf16.mxu0 %v21387_v59  ;;  %v21439_v10 = vld [vmem:[%s22203_s17 + $0x31c8] ss:$16 sps:$4 sm:$0xff]  }
 0x778   : > { %15462 = vmatprep.subr.bf16.mxu1 %v21390_v29  ;;  %v21442_v59 = vld [vmem:[%s22203_s17 + $0x33c8] ss:$16 sps:$4 sm:$0xff]   ;;  %v21447_v29 = vld [vmem:[%s22203_s17 + $0x31ac] ss:$16 sps:$4 sm:$0xff]  }
 0x779   : > { %v15127_v62 = vpop.f32.mrf.mxu0  ;;  %15372 = vmatmul.mubr.bf16.vlgmr.msra.gmra.mxu0 %v25068_v37  ;;  %v21454_v37 = vld [vmem:[%s22203_s17 + $0x3388] ss:$16 sps:$4 sm:$0xff]  }
 0x77a   : > { %v15168_v1 = vpop.f32.mrf.mxu1  ;;  %15413 = vmatmul.mubr.bf16.vlgmr.msra.gmra.mxu1 %v25069_v15  ;;  %v15128_v25 = vadd.f32 %v15127_v62, %v24571_v20  ;;  %15422 = vmatpush1.bf16.msra.mxu0 %v21385_v50  ;;  %v25071_v20 = vld [vmem:[#allocation28_spill] sm:$0xff]  ;;  %v21450_v50 = vld [vmem:[%s22203_s17 + $0x33ac] ss:$16 sps:$4 sm:$0xff]  }
 0x77b   : > { %15463 = vmatpush1.bf16.msra.mxu1 %v21388_v61  ;;  %v15129_v23 = vpop.f32.mrf.mxu0  ;;  %15423 = vmatprep.subr.bf16.mxu0 %v21393_v39  ;;  %v21445_v61 = vld [vmem:[%s22203_s17 + $0x31a8] ss:$16 sps:$4 sm:$0xff]   ;;  %v21456_v62 = vld [vmem:[%s22203_s17 + $0x338c] ss:$16 sps:$4 sm:$0xff]  }
 0x77c   : > { %v15170_v24 = vpop.f32.mrf.mxu1  ;;  %15464 = vmatprep.subr.bf16.mxu1 %v21396_v0  ;;  %v24645_v35 = vadd.f32 %v15168_v1, %v15128_v25  ;;  %v15130_v7 = vadd.f32 %v15129_v23, %v24576_v54  ;;  %15453 = vmatprep.mubr.bf16.mxu0 %v25070_v49  ;;  %v21405_v54 = vld [vmem:[%s22203_s17 + $0x308c] ss:$16 sps:$4 sm:$0xff]   ;;  %v21448_v39 = vld [vmem:[%s22203_s17 + $0x33a8] ss:$16 sps:$4 sm:$0xff]  }
 0x77d   : > { %15494 = vmatprep.mubr.bf16.mxu1 %v25071_v20  ;;  %v15131_v9 = vpop.f32.mrf.mxu0  ;;  %v21453_v0 = vld [vmem:[%s22203_s17 + $0x318c] ss:$16 sps:$4 sm:$0xff]   ;;  %v21451_v1 = vld [vmem:[%s22203_s17 + $0x3188] ss:$16 sps:$4 sm:$0xff]  }
 0x77e   : > { %v15172_v53 = vpop.f32.mrf.mxu1  ;;  %v24650_v46 = vadd.f32 %v15170_v24, %v15130_v7  ;;  %15424 = vmatpush1.bf16.msra.mxu0 %v21391_v34  ;;  %v21459_v15 = vld [vmem:[%s22203_s17 + $0x316c] ss:$16 sps:$4 sm:$0xff]   ;;  %v21457_v34 = vld [vmem:[%s22203_s17 + $0x3168] ss:$16 sps:$4 sm:$0xff]  }
 0x77f   : > { %15465 = vmatpush1.bf16.msra.mxu1 %v21394_v6  ;;  %v15132_v43 = vpop.f32.mrf.mxu0  ;;  %15425 = vmatprep.subr.bf16.mxu0 %v21399_v12  ;;  %v21462_v25 = vld [vmem:[%s22203_s17 + $0x336c] ss:$16 sps:$4 sm:$0xff]   ;;  %v21460_v6 = vld [vmem:[%s22203_s17 + $0x3368] ss:$16 sps:$4 sm:$0xff]  }
 0x780   : > { %v15173_v8 = vpop.f32.mrf.mxu1  ;;  %15466 = vmatprep.subr.bf16.mxu1 %v21402_v36  ;;  %v21465_v23 = vld [vmem:[%s22203_s17 + $0x314c] ss:$16 sps:$4 sm:$0xff]   ;;  %v21463_v12 = vld [vmem:[%s22203_s17 + $0x3148] ss:$16 sps:$4 sm:$0xff]  }
 0x781   : > { %v21468_v24 = vld [vmem:[%s22203_s17 + $0x334c] ss:$16 sps:$4 sm:$0xff]   ;;  %v21466_v36 = vld [vmem:[%s22203_s17 + $0x3348] ss:$16 sps:$4 sm:$0xff]  }
 0x782   : > { %15426 = vmatpush1.bf16.msra.mxu0 %v21397_v14  ;;  %v21471_v7 = vld [vmem:[%s22203_s17 + $0x312c] ss:$16 sps:$4 sm:$0xff]   ;;  %v21469_v20 = vld [vmem:[%s22203_s17 + $0x3128] ss:$16 sps:$4 sm:$0xff]  }
 0x783   : > { %15467 = vmatpush1.bf16.msra.mxu1 %v21400_v17  ;;  %15427 = vmatprep.subr.bf16.mxu0 %v21405_v54  ;;  %v21474_v49 = vld [vmem:[%s22203_s17 + $0x332c] ss:$16 sps:$4 sm:$0xff]   ;;  %v21472_v9 = vld [vmem:[%s22203_s17 + $0x3328] ss:$16 sps:$4 sm:$0xff]  }
 0x784   : > { %15468 = vmatprep.subr.bf16.mxu1 %v21408_v60  ;;  %v21477_v53 = vld [vmem:[%s22203_s17 + $0x310c] ss:$16 sps:$4 sm:$0xff]   ;;  %v21475_v17 = vld [vmem:[%s22203_s17 + $0x3108] ss:$16 sps:$4 sm:$0xff]  }
 0x785   : > { %v21480_v14 = vld [vmem:[%s22203_s17 + $0x330c] ss:$16 sps:$4 sm:$0xff]   ;;  %v21478_v43 = vld [vmem:[%s22203_s17 + $0x3308] ss:$16 sps:$4 sm:$0xff]  }
 0x786   : > { %15428 = vmatpush1.bf16.msra.mxu0 %v21403_v33  ;;  %v21483_v8 = vld [vmem:[%s22203_s17 + $0x34ec] ss:$16 sps:$4 sm:$0xff]   ;;  %v21481_v60 = vld [vmem:[%s22203_s17 + $0x34e8] ss:$16 sps:$4 sm:$0xff]  }
 0x787   : > { %15469 = vmatpush1.bf16.msra.mxu1 %v21406_v30  ;;  %15429 = vmatprep.subr.bf16.mxu0 %v21411_v27  ;;  %v21486_v54 = vld [vmem:[%s22203_s17 + $0x36ec] ss:$16 sps:$4 sm:$0xff]   ;;  %v21484_v33 = vld [vmem:[%s22203_s17 + $0x36e8] ss:$16 sps:$4 sm:$0xff]  }
 0x788   : > { %15470 = vmatprep.subr.bf16.mxu1 %v21414_v32  ;;  %v21489_v30 = vld [vmem:[%s22203_s17 + $0x34cc] ss:$16 sps:$4 sm:$0xff]  }
 0x789   : > { %v21492_v27 = vld [vmem:[%s22203_s17 + $0x36cc] ss:$16 sps:$4 sm:$0xff]  }
 0x78a   : > { %15430 = vmatpush1.bf16.msra.mxu0 %v21409_v45 }
 0x78b   : > { %15471 = vmatpush1.bf16.msra.mxu1 %v21412_v2  ;;  %15431 = vmatprep.subr.bf16.mxu0 %v21417_v31  ;;  %v25072_v2 = vld [vmem:[#allocation29_spill] sm:$0xff]  ;;  %v25073_v31 = vld [vmem:[#allocation31_spill] sm:$0xff] }
 0x78c   : > { %15472 = vmatprep.subr.bf16.mxu1 %v21420_v38 }
 0x78e   : > { %15432 = vmatpush1.bf16.msra.mxu0 %v21415_v18  ;;  %v21487_v18 = vld [vmem:[%s22203_s17 + $0x34c8] ss:$16 sps:$4 sm:$0xff]  }
 0x78f   : > { %15473 = vmatpush1.bf16.msra.mxu1 %v21418_v13  ;;  %15433 = vmatprep.subr.bf16.mxu0 %v21423_v21  ;;  %v21490_v13 = vld [vmem:[%s22203_s17 + $0x36c8] ss:$16 sps:$4 sm:$0xff]  }
 0x790   : > { %15474 = vmatprep.subr.bf16.mxu1 %v21426_v22 }
 0x792   : > { %15434 = vmatpush1.bf16.msra.mxu0 %v21421_v51  ;;  %v21495_v51 = vld [vmem:[%s22203_s17 + $0x34ac] ss:$16 sps:$4 sm:$0xff]  }
 0x793   : > { %15475 = vmatpush1.bf16.msra.mxu1 %v21424_v42  ;;  %15435 = vmatprep.subr.bf16.mxu0 %v21429_v40  ;;  %v21498_v42 = vld [vmem:[%s22203_s17 + $0x36ac] ss:$16 sps:$4 sm:$0xff]  }
 0x794   : > { %15476 = vmatprep.subr.bf16.mxu1 %v21432_v63 }
 0x796   : > { %15436 = vmatpush1.bf16.msra.mxu0 %v21427_v55  ;;  %v25074_v55 = vld [vmem:[#allocation30_spill] sm:$0xff] }
 0x797   : > { %15477 = vmatpush1.bf16.msra.mxu1 %v21430_v26  ;;  %15437 = vmatprep.subr.bf16.mxu0 %v21435_v4 }
 0x798   : > { %15478 = vmatprep.subr.bf16.mxu1 %v21438_v56 }
 0x79a   : > { %15438 = vmatpush2.bf16.msra.mxu0 %v21433_v5  ;;  %v21493_v5 = vld [vmem:[%s22203_s17 + $0x34a8] ss:$16 sps:$4 sm:$0xff]  }
 0x79b   : > { %15479 = vmatpush2.bf16.msra.mxu1 %v21436_v52  ;;  %15439 = vmatprep.subr.bf16.mxu0 %v21441_v3  ;;  %v21496_v52 = vld [vmem:[%s22203_s17 + $0x36a8] ss:$16 sps:$4 sm:$0xff]  }
 0x79c   : > { %15480 = vmatprep.subr.bf16.mxu1 %v21444_v19 }
 0x79e   : > { %15440 = vmatpush2.bf16.msra.mxu0 %v21439_v10  ;;  %v21504_v10 = vld [vmem:[%s22203_s17 + $0x368c] ss:$16 sps:$4 sm:$0xff]  }
 0x79f   : > { %15481 = vmatpush2.bf16.msra.mxu1 %v21442_v59  ;;  %15441 = vmatprep.subr.bf16.mxu0 %v21447_v29  ;;  %v21499_v59 = vld [vmem:[%s22203_s17 + $0x3488] ss:$16 sps:$4 sm:$0xff]  }
 0x7a0   : > { %15482 = vmatprep.subr.bf16.mxu1 %v21450_v50  ;;  %v21502_v29 = vld [vmem:[%s22203_s17 + $0x3688] ss:$16 sps:$4 sm:$0xff]   ;;  %v21507_v50 = vld [vmem:[%s22203_s17 + $0x346c] ss:$16 sps:$4 sm:$0xff]  }
 0x7a2   : > { %15442 = vmatpush2.bf16.msra.mxu0 %v21445_v61  ;;  %v21510_v61 = vld [vmem:[%s22203_s17 + $0x366c] ss:$16 sps:$4 sm:$0xff]  }
 0x7a3   : > { %15483 = vmatpush2.bf16.msra.mxu1 %v21448_v39  ;;  %15443 = vmatprep.subr.bf16.mxu0 %v21453_v0  ;;  %v21505_v39 = vld [vmem:[%s22203_s17 + $0x3468] ss:$16 sps:$4 sm:$0xff]  }
 0x7a4   : > { %15484 = vmatprep.subr.bf16.mxu1 %v21456_v62  ;;  %v21508_v0 = vld [vmem:[%s22203_s17 + $0x3668] ss:$16 sps:$4 sm:$0xff]   ;;  %v21513_v62 = vld [vmem:[%s22203_s17 + $0x344c] ss:$16 sps:$4 sm:$0xff]  }
 0x7a6   : > { %15444 = vmatpush2.bf16.msra.mxu0 %v21451_v1  ;;  %v21516_v1 = vld [vmem:[%s22203_s17 + $0x364c] ss:$16 sps:$4 sm:$0xff]  }
 0x7a7   : > { %15485 = vmatpush2.bf16.msra.mxu1 %v21454_v37  ;;  %15445 = vmatprep.subr.bf16.mxu0 %v21459_v15  ;;  %v21511_v37 = vld [vmem:[%s22203_s17 + $0x3448] ss:$16 sps:$4 sm:$0xff]  }
 0x7a8   : > { %15486 = vmatprep.subr.bf16.mxu1 %v21462_v25  ;;  %v21514_v15 = vld [vmem:[%s22203_s17 + $0x3648] ss:$16 sps:$4 sm:$0xff]   ;;  %v21519_v25 = vld [vmem:[%s22203_s17 + $0x342c] ss:$16 sps:$4 sm:$0xff]  }
 0x7aa   : > { %15446 = vmatpush2.bf16.msra.mxu0 %v21457_v34  ;;  %v21522_v34 = vld [vmem:[%s22203_s17 + $0x362c] ss:$16 sps:$4 sm:$0xff]  }
 0x7ab   : > { %15487 = vmatpush2.bf16.msra.mxu1 %v21460_v6  ;;  %15447 = vmatprep.subr.bf16.mxu0 %v21465_v23  ;;  %v21517_v6 = vld [vmem:[%s22203_s17 + $0x3428] ss:$16 sps:$4 sm:$0xff]  }
 0x7ac   : > { %15488 = vmatprep.subr.bf16.mxu1 %v21468_v24  ;;  %v21520_v23 = vld [vmem:[%s22203_s17 + $0x3628] ss:$16 sps:$4 sm:$0xff]   ;;  %v21525_v24 = vld [vmem:[%s22203_s17 + $0x340c] ss:$16 sps:$4 sm:$0xff]  }
 0x7ae   : > { %15448 = vmatpush2.bf16.msra.mxu0 %v21463_v12  ;;  %v21528_v12 = vld [vmem:[%s22203_s17 + $0x360c] ss:$16 sps:$4 sm:$0xff]  }
 0x7af   : > { %15489 = vmatpush2.bf16.msra.mxu1 %v21466_v36  ;;  %15449 = vmatprep.subr.bf16.mxu0 %v21471_v7  ;;  %v21523_v36 = vld [vmem:[%s22203_s17 + $0x3408] ss:$16 sps:$4 sm:$0xff]  }
 0x7b0   : > { %15490 = vmatprep.subr.bf16.mxu1 %v21474_v49  ;;  %v21526_v7 = vld [vmem:[%s22203_s17 + $0x3608] ss:$16 sps:$4 sm:$0xff]   ;;  %v21531_v49 = vld [vmem:[%s22203_s17 + $0x35ec] ss:$16 sps:$4 sm:$0xff]  }
 0x7b2   : > { %15450 = vmatpush2.bf16.msra.mxu0 %v21469_v20  ;;  %v21534_v20 = vld [vmem:[%s22203_s17 + $0x37ec] ss:$16 sps:$4 sm:$0xff]  }
 0x7b3   : > { %15491 = vmatpush2.bf16.msra.mxu1 %v21472_v9  ;;  %15451 = vmatprep.subr.bf16.mxu0 %v21477_v53  ;;  %v21529_v9 = vld [vmem:[%s22203_s17 + $0x35e8] ss:$16 sps:$4 sm:$0xff]  }
 0x7b4   : > { %15492 = vmatprep.subr.bf16.mxu1 %v21480_v14  ;;  %v21532_v53 = vld [vmem:[%s22203_s17 + $0x37e8] ss:$16 sps:$4 sm:$0xff]   ;;  %v21537_v14 = vld [vmem:[%s22203_s17 + $0x35cc] ss:$16 sps:$4 sm:$0xff]  }
 0x7b6   : > { %15452 = vmatpush2.bf16.msra.mxu0 %v21475_v17  ;;  %v21540_v17 = vld [vmem:[%s22203_s17 + $0x37cc] ss:$16 sps:$4 sm:$0xff]  }
 0x7b7   : > { %15493 = vmatpush2.bf16.msra.mxu1 %v21478_v43  ;;  %15503 = vmatprep.subr.bf16.mxu0 %v21483_v8  ;;  %v21535_v43 = vld [vmem:[%s22203_s17 + $0x35c8] ss:$16 sps:$4 sm:$0xff]  }
 0x7b8   : > { %15544 = vmatprep.subr.bf16.mxu1 %v21486_v54  ;;  %v21538_v8 = vld [vmem:[%s22203_s17 + $0x37c8] ss:$16 sps:$4 sm:$0xff]   ;;  %v21543_v54 = vld [vmem:[%s22203_s17 + $0x35ac] ss:$16 sps:$4 sm:$0xff]  }
 0x7b9   : > { %v15209_v32 = vpop.f32.mrf.mxu0  ;;  %15454 = vmatmul.mubr.bf16.vlgmr.msra.gmra.mxu0 %v25072_v2  ;;  %v21550_v2 = vld [vmem:[%s22203_s17 + $0x3788] ss:$16 sps:$4 sm:$0xff]  }
 0x7ba   : > { %v15250_v45 = vpop.f32.mrf.mxu1  ;;  %15495 = vmatmul.mubr.bf16.vlgmr.msra.gmra.mxu1 %v25073_v31  ;;  %v15210_v38 = vadd.f32 %v15209_v32, %v24645_v35  ;;  %15504 = vmatpush1.bf16.msra.mxu0 %v21481_v60  ;;  %v25075_v35 = vld [vmem:[#allocation32_spill] sm:$0xff]  ;;  %v21546_v60 = vld [vmem:[%s22203_s17 + $0x37ac] ss:$16 sps:$4 sm:$0xff]  }
 0x7bb   : > { %15545 = vmatpush1.bf16.msra.mxu1 %v21484_v33  ;;  %v15211_v21 = vpop.f32.mrf.mxu0  ;;  %15505 = vmatprep.subr.bf16.mxu0 %v21489_v30  ;;  %v21541_v33 = vld [vmem:[%s22203_s17 + $0x35a8] ss:$16 sps:$4 sm:$0xff]   ;;  %v21552_v32 = vld [vmem:[%s22203_s17 + $0x378c] ss:$16 sps:$4 sm:$0xff]  }
 0x7bc   : > { %v15252_v22 = vpop.f32.mrf.mxu1  ;;  %15546 = vmatprep.subr.bf16.mxu1 %v21492_v27  ;;  %v24719_v40 = vadd.f32 %v15250_v45, %v15210_v38  ;;  %v15212_v63 = vadd.f32 %v15211_v21, %v24650_v46  ;;  %15535 = vmatprep.mubr.bf16.mxu0 %v25074_v55  ;;  %v21501_v46 = vld [vmem:[%s22203_s17 + $0x348c] ss:$16 sps:$4 sm:$0xff]   ;;  %v21544_v30 = vld [vmem:[%s22203_s17 + $0x37a8] ss:$16 sps:$4 sm:$0xff]  }
 0x7bd   : > { %15576 = vmatprep.mubr.bf16.mxu1 %v25075_v35  ;;  %v15213_v26 = vpop.f32.mrf.mxu0  ;;  %v21549_v27 = vld [vmem:[%s22203_s17 + $0x358c] ss:$16 sps:$4 sm:$0xff]   ;;  %v21547_v45 = vld [vmem:[%s22203_s17 + $0x3588] ss:$16 sps:$4 sm:$0xff]  }
 0x7be   : > { %v15254_v4 = vpop.f32.mrf.mxu1  ;;  %v24724_v56 = vadd.f32 %v15252_v22, %v15212_v63  ;;  %15506 = vmatpush1.bf16.msra.mxu0 %v21487_v18  ;;  %v21555_v31 = vld [vmem:[%s22203_s17 + $0x356c] ss:$16 sps:$4 sm:$0xff]   ;;  %v21553_v18 = vld [vmem:[%s22203_s17 + $0x3568] ss:$16 sps:$4 sm:$0xff]  }
 0x7bf   : > { %15547 = vmatpush1.bf16.msra.mxu1 %v21490_v13  ;;  %v15214_v3 = vpop.f32.mrf.mxu0  ;;  %15507 = vmatprep.subr.bf16.mxu0 %v21495_v51  ;;  %v21558_v38 = vld [vmem:[%s22203_s17 + $0x376c] ss:$16 sps:$4 sm:$0xff]   ;;  %v21556_v13 = vld [vmem:[%s22203_s17 + $0x3768] ss:$16 sps:$4 sm:$0xff]  }
 0x7c0   : > { %v15255_v19 = vpop.f32.mrf.mxu1  ;;  %15548 = vmatprep.subr.bf16.mxu1 %v21498_v42  ;;  %v21561_v21 = vld [vmem:[%s22203_s17 + $0x354c] ss:$16 sps:$4 sm:$0xff]   ;;  %v21559_v51 = vld [vmem:[%s22203_s17 + $0x3548] ss:$16 sps:$4 sm:$0xff]  }
 0x7c1   : > { %v21564_v22 = vld [vmem:[%s22203_s17 + $0x374c] ss:$16 sps:$4 sm:$0xff]   ;;  %v21562_v42 = vld [vmem:[%s22203_s17 + $0x3748] ss:$16 sps:$4 sm:$0xff]  }
 0x7c2   : > { %15508 = vmatpush1.bf16.msra.mxu0 %v21493_v5  ;;  %v21567_v63 = vld [vmem:[%s22203_s17 + $0x352c] ss:$16 sps:$4 sm:$0xff]   ;;  %v21565_v35 = vld [vmem:[%s22203_s17 + $0x3528] ss:$16 sps:$4 sm:$0xff]  }
 0x7c3   : > { %15549 = vmatpush1.bf16.msra.mxu1 %v21496_v52  ;;  %15509 = vmatprep.subr.bf16.mxu0 %v21501_v46  ;;  %v21570_v55 = vld [vmem:[%s22203_s17 + $0x372c] ss:$16 sps:$4 sm:$0xff]   ;;  %v21568_v26 = vld [vmem:[%s22203_s17 + $0x3728] ss:$16 sps:$4 sm:$0xff]  }
 0x7c4   : > { %15550 = vmatprep.subr.bf16.mxu1 %v21504_v10  ;;  %v21573_v4 = vld [vmem:[%s22203_s17 + $0x350c] ss:$16 sps:$4 sm:$0xff]   ;;  %v21571_v52 = vld [vmem:[%s22203_s17 + $0x3508] ss:$16 sps:$4 sm:$0xff]  }
 0x7c5   : > { %v21576_v5 = vld [vmem:[%s22203_s17 + $0x370c] ss:$16 sps:$4 sm:$0xff]   ;;  %v21574_v3 = vld [vmem:[%s22203_s17 + $0x3708] ss:$16 sps:$4 sm:$0xff]  }
 0x7c6   : > { %15510 = vmatpush1.bf16.msra.mxu0 %v21499_v59  ;;  %v21579_v19 = vld [vmem:[%s22203_s17 + $0x38ec] ss:$16 sps:$4 sm:$0xff]   ;;  %v21577_v10 = vld [vmem:[%s22203_s17 + $0x38e8] ss:$16 sps:$4 sm:$0xff]  }
 0x7c7   : > { %15551 = vmatpush1.bf16.msra.mxu1 %v21502_v29  ;;  %15511 = vmatprep.subr.bf16.mxu0 %v21507_v50  ;;  %v21582_v46 = vld [vmem:[%s22203_s17 + $0x3aec] ss:$16 sps:$4 sm:$0xff]   ;;  %v21580_v59 = vld [vmem:[%s22203_s17 + $0x3ae8] ss:$16 sps:$4 sm:$0xff]  }
 0x7c8   : > { %15552 = vmatprep.subr.bf16.mxu1 %v21510_v61  ;;  %v21585_v29 = vld [vmem:[%s22203_s17 + $0x38cc] ss:$16 sps:$4 sm:$0xff]  }
 0x7c9   : > { %v21588_v50 = vld [vmem:[%s22203_s17 + $0x3acc] ss:$16 sps:$4 sm:$0xff]  }
 0x7ca   : > { %15512 = vmatpush1.bf16.msra.mxu0 %v21505_v39 }
 0x7cb   : > { %15553 = vmatpush1.bf16.msra.mxu1 %v21508_v0  ;;  %15513 = vmatprep.subr.bf16.mxu0 %v21513_v62  ;;  %v25076_v0 = vld [vmem:[#allocation33_spill] sm:$0xff] }
 0x7cc   : > { %15554 = vmatprep.subr.bf16.mxu1 %v21516_v1  ;;  %v21583_v1 = vld [vmem:[%s22203_s17 + $0x38c8] ss:$16 sps:$4 sm:$0xff]  }
 0x7ce   : > { %15514 = vmatpush1.bf16.msra.mxu0 %v21511_v37  ;;  %v21586_v37 = vld [vmem:[%s22203_s17 + $0x3ac8] ss:$16 sps:$4 sm:$0xff]  }
 0x7cf   : > { %15555 = vmatpush1.bf16.msra.mxu1 %v21514_v15  ;;  %15515 = vmatprep.subr.bf16.mxu0 %v21519_v25 }
 0x7d0   : > { %15556 = vmatprep.subr.bf16.mxu1 %v21522_v34  ;;  %v21591_v34 = vld [vmem:[%s22203_s17 + $0x38ac] ss:$16 sps:$4 sm:$0xff]  }
 0x7d2   : > { %15516 = vmatpush1.bf16.msra.mxu0 %v21517_v6  ;;  %v21594_v6 = vld [vmem:[%s22203_s17 + $0x3aac] ss:$16 sps:$4 sm:$0xff]  }
 0x7d3   : > { %15557 = vmatpush1.bf16.msra.mxu1 %v21520_v23  ;;  %15517 = vmatprep.subr.bf16.mxu0 %v21525_v24  ;;  %v25077_v24 = vld [vmem:[#allocation34_spill] sm:$0xff] }
 0x7d4   : > { %15558 = vmatprep.subr.bf16.mxu1 %v21528_v12 }
 0x7d6   : > { %15518 = vmatpush1.bf16.msra.mxu0 %v21523_v36 }
 0x7d7   : > { %15559 = vmatpush1.bf16.msra.mxu1 %v21526_v7  ;;  %15519 = vmatprep.subr.bf16.mxu0 %v21531_v49  ;;  %v21589_v49 = vld [vmem:[%s22203_s17 + $0x38a8] ss:$16 sps:$4 sm:$0xff]  }
 0x7d8   : > { %15560 = vmatprep.subr.bf16.mxu1 %v21534_v20  ;;  %v21592_v20 = vld [vmem:[%s22203_s17 + $0x3aa8] ss:$16 sps:$4 sm:$0xff]  }
 0x7da   : > { %15520 = vmatpush2.bf16.msra.mxu0 %v21529_v9 }
 0x7db   : > { %15561 = vmatpush2.bf16.msra.mxu1 %v21532_v53  ;;  %15521 = vmatprep.subr.bf16.mxu0 %v21537_v14  ;;  %v21600_v14 = vld [vmem:[%s22203_s17 + $0x3a8c] ss:$16 sps:$4 sm:$0xff]  }
 0x7dc   : > { %15562 = vmatprep.subr.bf16.mxu1 %v21540_v17  ;;  %v21595_v17 = vld [vmem:[%s22203_s17 + $0x3888] ss:$16 sps:$4 sm:$0xff]  }
 0x7de   : > { %15522 = vmatpush2.bf16.msra.mxu0 %v21535_v43  ;;  %v21598_v43 = vld [vmem:[%s22203_s17 + $0x3a88] ss:$16 sps:$4 sm:$0xff]  }
 0x7df   : > { %15563 = vmatpush2.bf16.msra.mxu1 %v21538_v8  ;;  %15523 = vmatprep.subr.bf16.mxu0 %v21543_v54  ;;  %v21603_v8 = vld [vmem:[%s22203_s17 + $0x386c] ss:$16 sps:$4 sm:$0xff]  }
 0x7e0   : > { %15564 = vmatprep.subr.bf16.mxu1 %v21546_v60  ;;  %v21606_v54 = vld [vmem:[%s22203_s17 + $0x3a6c] ss:$16 sps:$4 sm:$0xff]   ;;  %v21601_v60 = vld [vmem:[%s22203_s17 + $0x3868] ss:$16 sps:$4 sm:$0xff]  }
 0x7e2   : > { %15524 = vmatpush2.bf16.msra.mxu0 %v21541_v33  ;;  %v21604_v33 = vld [vmem:[%s22203_s17 + $0x3a68] ss:$16 sps:$4 sm:$0xff]  }
 0x7e3   : > { %15565 = vmatpush2.bf16.msra.mxu1 %v21544_v30  ;;  %15525 = vmatprep.subr.bf16.mxu0 %v21549_v27  ;;  %v21609_v30 = vld [vmem:[%s22203_s17 + $0x384c] ss:$16 sps:$4 sm:$0xff]  }
 0x7e4   : > { %15566 = vmatprep.subr.bf16.mxu1 %v21552_v32  ;;  %v21612_v27 = vld [vmem:[%s22203_s17 + $0x3a4c] ss:$16 sps:$4 sm:$0xff]   ;;  %v21607_v32 = vld [vmem:[%s22203_s17 + $0x3848] ss:$16 sps:$4 sm:$0xff]  }
 0x7e6   : > { %15526 = vmatpush2.bf16.msra.mxu0 %v21547_v45  ;;  %v21610_v45 = vld [vmem:[%s22203_s17 + $0x3a48] ss:$16 sps:$4 sm:$0xff]  }
 0x7e7   : > { %15567 = vmatpush2.bf16.msra.mxu1 %v21550_v2  ;;  %15527 = vmatprep.subr.bf16.mxu0 %v21555_v31  ;;  %v21615_v2 = vld [vmem:[%s22203_s17 + $0x382c] ss:$16 sps:$4 sm:$0xff]  }
 0x7e8   : > { %15568 = vmatprep.subr.bf16.mxu1 %v21558_v38  ;;  %v21618_v31 = vld [vmem:[%s22203_s17 + $0x3a2c] ss:$16 sps:$4 sm:$0xff]   ;;  %v21613_v38 = vld [vmem:[%s22203_s17 + $0x3828] ss:$16 sps:$4 sm:$0xff]  }
 0x7ea   : > { %15528 = vmatpush2.bf16.msra.mxu0 %v21553_v18  ;;  %v21616_v18 = vld [vmem:[%s22203_s17 + $0x3a28] ss:$16 sps:$4 sm:$0xff]  }
 0x7eb   : > { %15569 = vmatpush2.bf16.msra.mxu1 %v21556_v13  ;;  %15529 = vmatprep.subr.bf16.mxu0 %v21561_v21  ;;  %v21621_v13 = vld [vmem:[%s22203_s17 + $0x380c] ss:$16 sps:$4 sm:$0xff]  }
 0x7ec   : > { %15570 = vmatprep.subr.bf16.mxu1 %v21564_v22  ;;  %v21624_v21 = vld [vmem:[%s22203_s17 + $0x3a0c] ss:$16 sps:$4 sm:$0xff]   ;;  %v21619_v22 = vld [vmem:[%s22203_s17 + $0x3808] ss:$16 sps:$4 sm:$0xff]  }
 0x7ee   : > { %15530 = vmatpush2.bf16.msra.mxu0 %v21559_v51  ;;  %v21622_v51 = vld [vmem:[%s22203_s17 + $0x3a08] ss:$16 sps:$4 sm:$0xff]  }
 0x7ef   : > { %15571 = vmatpush2.bf16.msra.mxu1 %v21562_v42  ;;  %15531 = vmatprep.subr.bf16.mxu0 %v21567_v63  ;;  %v21627_v42 = vld [vmem:[%s22203_s17 + $0x39ec] ss:$16 sps:$4 sm:$0xff]  }
 0x7f0   : > { %15572 = vmatprep.subr.bf16.mxu1 %v21570_v55  ;;  %v21630_v63 = vld [vmem:[%s22203_s17 + $0x3bec] ss:$16 sps:$4 sm:$0xff]   ;;  %v21625_v55 = vld [vmem:[%s22203_s17 + $0x39e8] ss:$16 sps:$4 sm:$0xff]  }
 0x7f2   : > { %15532 = vmatpush2.bf16.msra.mxu0 %v21565_v35  ;;  %v21628_v35 = vld [vmem:[%s22203_s17 + $0x3be8] ss:$16 sps:$4 sm:$0xff]  }
 0x7f3   : > { %15573 = vmatpush2.bf16.msra.mxu1 %v21568_v26  ;;  %15533 = vmatprep.subr.bf16.mxu0 %v21573_v4  ;;  %v21633_v26 = vld [vmem:[%s22203_s17 + $0x39cc] ss:$16 sps:$4 sm:$0xff]  }
 0x7f4   : > { %15574 = vmatprep.subr.bf16.mxu1 %v21576_v5  ;;  %v21636_v4 = vld [vmem:[%s22203_s17 + $0x3bcc] ss:$16 sps:$4 sm:$0xff]   ;;  %v21631_v5 = vld [vmem:[%s22203_s17 + $0x39c8] ss:$16 sps:$4 sm:$0xff]  }
 0x7f6   : > { %15534 = vmatpush2.bf16.msra.mxu0 %v21571_v52  ;;  %v21634_v52 = vld [vmem:[%s22203_s17 + $0x3bc8] ss:$16 sps:$4 sm:$0xff]  }
 0x7f7   : > { %15575 = vmatpush2.bf16.msra.mxu1 %v21574_v3  ;;  %15585 = vmatprep.subr.bf16.mxu0 %v21579_v19  ;;  %v21639_v3 = vld [vmem:[%s22203_s17 + $0x39ac] ss:$16 sps:$4 sm:$0xff]  }
 0x7f8   : > { %15626 = vmatprep.subr.bf16.mxu1 %v21582_v46  ;;  %v21642_v19 = vld [vmem:[%s22203_s17 + $0x3bac] ss:$16 sps:$4 sm:$0xff]   ;;  %v21637_v46 = vld [vmem:[%s22203_s17 + $0x39a8] ss:$16 sps:$4 sm:$0xff]  }
 0x7f9   : > { %v15291_v61 = vpop.f32.mrf.mxu0  ;;  %15536 = vmatmul.mubr.bf16.vlgmr.msra.gmra.mxu0 %v25076_v0  ;;  %v21654_v0 = vld [vmem:[%s22203_s17 + $0x3b6c] ss:$16 sps:$4 sm:$0xff]  }
 0x7fa   : > { %v15332_v39 = vpop.f32.mrf.mxu1  ;;  %15577 = vmatmul.mubr.bf16.vlgmr.msra.gmra.mxu1 %v23564_v47  ;;  %v15292_v62 = vadd.f32 %v15291_v61, %v24719_v40  ;;  %15586 = vmatpush1.bf16.msra.mxu0 %v21577_v10  ;;  %v25078_v40 = vld [vmem:[#allocation35_spill] sm:$0xff] }
 0x7fb   : > { %15627 = vmatpush1.bf16.msra.mxu1 %v21580_v59  ;;  %v15293_v15 = vpop.f32.mrf.mxu0  ;;  %15587 = vmatprep.subr.bf16.mxu0 %v21585_v29  ;;  %v21640_v10 = vld [vmem:[%s22203_s17 + $0x3ba8] ss:$16 sps:$4 sm:$0xff]   ;;  %v21645_v59 = vld [vmem:[%s22203_s17 + $0x398c] ss:$16 sps:$4 sm:$0xff]  }
 0x7fc   : > { %v15334_v25 = vpop.f32.mrf.mxu1  ;;  %15628 = vmatprep.subr.bf16.mxu1 %v21588_v50  ;;  %v24793_v23 = vadd.f32 %v15332_v39, %v15292_v62  ;;  %v15294_v47 = vadd.f32 %v15293_v15, %v24724_v56  ;;  %15617 = vmatprep.mubr.bf16.mxu0 %v25077_v24  ;;  %v21597_v56 = vld [vmem:[%s22203_s17 + $0x388c] ss:$16 sps:$4 sm:$0xff]   ;;  %v21643_v50 = vld [vmem:[%s22203_s17 + $0x3988] ss:$16 sps:$4 sm:$0xff]  }
 0x7fd   : > { %15658 = vmatprep.mubr.bf16.mxu1 %v25078_v40  ;;  %v15295_v12 = vpop.f32.mrf.mxu0  ;;  %v21648_v29 = vld [vmem:[%s22203_s17 + $0x3b8c] ss:$16 sps:$4 sm:$0xff]   ;;  %v21646_v61 = vld [vmem:[%s22203_s17 + $0x3b88] ss:$16 sps:$4 sm:$0xff]  }
 0x7fe   : > { %v15336_v36 = vpop.f32.mrf.mxu1  ;;  %v24798_v7 = vadd.f32 %v15334_v25, %v15294_v47  ;;  %15588 = vmatpush1.bf16.msra.mxu0 %v21583_v1  ;;  %v21651_v39 = vld [vmem:[%s22203_s17 + $0x396c] ss:$16 sps:$4 sm:$0xff]   ;;  %v21649_v62 = vld [vmem:[%s22203_s17 + $0x3968] ss:$16 sps:$4 sm:$0xff]  }
 0x7ff   : > { %15629 = vmatpush1.bf16.msra.mxu1 %v21586_v37  ;;  %v15296_v9 = vpop.f32.mrf.mxu0  ;;  %15589 = vmatprep.subr.bf16.mxu0 %v21591_v34  ;;  %v21652_v1 = vld [vmem:[%s22203_s17 + $0x3b68] ss:$16 sps:$4 sm:$0xff]   ;;  %v21657_v37 = vld [vmem:[%s22203_s17 + $0x394c] ss:$16 sps:$4 sm:$0xff]  }
 0x800   : > { %v15337_v53 = vpop.f32.mrf.mxu1  ;;  %15630 = vmatprep.subr.bf16.mxu1 %v21594_v6  ;;  %v21660_v15 = vld [vmem:[%s22203_s17 + $0x3b4c] ss:$16 sps:$4 sm:$0xff]   ;;  %v21655_v25 = vld [vmem:[%s22203_s17 + $0x3948] ss:$16 sps:$4 sm:$0xff]  }
 0x801   : > { %v21658_v34 = vld [vmem:[%s22203_s17 + $0x3b48] ss:$16 sps:$4 sm:$0xff]   ;;  %v21663_v6 = vld [vmem:[%s22203_s17 + $0x392c] ss:$16 sps:$4 sm:$0xff]  }
 0x802   : > { %15590 = vmatpush1.bf16.msra.mxu0 %v21589_v49  ;;  %v21666_v47 = vld [vmem:[%s22203_s17 + $0x3b2c] ss:$16 sps:$4 sm:$0xff]   ;;  %v21661_v24 = vld [vmem:[%s22203_s17 + $0x3928] ss:$16 sps:$4 sm:$0xff]  }
 0x803   : > { %15631 = vmatpush1.bf16.msra.mxu1 %v21592_v20  ;;  %15591 = vmatprep.subr.bf16.mxu0 %v21597_v56  ;;  %v21664_v40 = vld [vmem:[%s22203_s17 + $0x3b28] ss:$16 sps:$4 sm:$0xff]   ;;  %v21669_v12 = vld [vmem:[%s22203_s17 + $0x390c] ss:$16 sps:$4 sm:$0xff]  }
 0x804   : > { %15632 = vmatprep.subr.bf16.mxu1 %v21600_v14  ;;  %v21672_v36 = vld [vmem:[%s22203_s17 + $0x3b0c] ss:$16 sps:$4 sm:$0xff]   ;;  %v21667_v49 = vld [vmem:[%s22203_s17 + $0x3908] ss:$16 sps:$4 sm:$0xff]  }
 0x805   : > { %v21670_v20 = vld [vmem:[%s22203_s17 + $0x3b08] ss:$16 sps:$4 sm:$0xff]   ;;  %v21675_v9 = vld [vmem:[%s22203_s17 + $0x3cec] ss:$16 sps:$4 sm:$0xff]  }
 0x806   : > { %15592 = vmatpush1.bf16.msra.mxu0 %v21595_v17  ;;  %v21678_v53 = vld [vmem:[%s22203_s17 + $0x3eec] ss:$16 sps:$4 sm:$0xff]   ;;  %v21673_v56 = vld [vmem:[%s22203_s17 + $0x3ce8] ss:$16 sps:$4 sm:$0xff]  }
 0x807   : > { %15633 = vmatpush1.bf16.msra.mxu1 %v21598_v43  ;;  %15593 = vmatprep.subr.bf16.mxu0 %v21603_v8  ;;  %v21676_v14 = vld [vmem:[%s22203_s17 + $0x3ee8] ss:$16 sps:$4 sm:$0xff]   ;;  %v21681_v17 = vld [vmem:[%s22203_s17 + $0x3ccc] ss:$16 sps:$4 sm:$0xff]  }
 0x808   : > { %15634 = vmatprep.subr.bf16.mxu1 %v21606_v54  ;;  %v21684_v43 = vld [vmem:[%s22203_s17 + $0x3ecc] ss:$16 sps:$4 sm:$0xff]  }
 0x80a   : > { %15594 = vmatpush1.bf16.msra.mxu0 %v21601_v60  ;;  %v25079_v60 = vld [vmem:[#allocation36_spill] sm:$0xff] }
 0x80b   : > { %15635 = vmatpush1.bf16.msra.mxu1 %v21604_v33  ;;  %15595 = vmatprep.subr.bf16.mxu0 %v21609_v30  ;;  %v21679_v30 = vld [vmem:[%s22203_s17 + $0x3cc8] ss:$16 sps:$4 sm:$0xff]  }
 0x80c   : > { %15636 = vmatprep.subr.bf16.mxu1 %v21612_v27  ;;  %v21682_v27 = vld [vmem:[%s22203_s17 + $0x3ec8] ss:$16 sps:$4 sm:$0xff]  }
 0x80e   : > { %15596 = vmatpush1.bf16.msra.mxu0 %v21607_v32 }
 0x80f   : > { %15637 = vmatpush1.bf16.msra.mxu1 %v21610_v45  ;;  %15597 = vmatprep.subr.bf16.mxu0 %v21615_v2  ;;  %v21687_v2 = vld [vmem:[%s22203_s17 + $0x3cac] ss:$16 sps:$4 sm:$0xff]  }
 0x810   : > { %15638 = vmatprep.subr.bf16.mxu1 %v21618_v31  ;;  %v21690_v31 = vld [vmem:[%s22203_s17 + $0x3eac] ss:$16 sps:$4 sm:$0xff]  }
 0x812   : > { %15598 = vmatpush1.bf16.msra.mxu0 %v21613_v38 }
 0x813   : > { %15639 = vmatpush1.bf16.msra.mxu1 %v21616_v18  ;;  %15599 = vmatprep.subr.bf16.mxu0 %v21621_v13 }
 0x814   : > { %15640 = vmatprep.subr.bf16.mxu1 %v21624_v21  ;;  %v21685_v21 = vld [vmem:[%s22203_s17 + $0x3ca8] ss:$16 sps:$4 sm:$0xff]  }
 0x816   : > { %15600 = vmatpush1.bf16.msra.mxu0 %v21619_v22  ;;  %v21688_v22 = vld [vmem:[%s22203_s17 + $0x3ea8] ss:$16 sps:$4 sm:$0xff]  }
 0x817   : > { %15641 = vmatpush1.bf16.msra.mxu1 %v21622_v51  ;;  %15601 = vmatprep.subr.bf16.mxu0 %v21627_v42 }
 0x818   : > { %15642 = vmatprep.subr.bf16.mxu1 %v21630_v63  ;;  %v21694_v63 = vld [vmem:[%s22203_s17 + $0x3e88] ss:$16 sps:$4 sm:$0xff]  }
 0x81a   : > { %15602 = vmatpush2.bf16.msra.mxu0 %v21625_v55  ;;  %v21699_v55 = vld [vmem:[%s22203_s17 + $0x3c6c] ss:$16 sps:$4 sm:$0xff]  }
 0x81b   : > { %15643 = vmatpush2.bf16.msra.mxu1 %v21628_v35  ;;  %15603 = vmatprep.subr.bf16.mxu0 %v21633_v26  ;;  %v21702_v35 = vld [vmem:[%s22203_s17 + $0x3e6c] ss:$16 sps:$4 sm:$0xff]   ;;  %v21697_v26 = vld [vmem:[%s22203_s17 + $0x3c68] ss:$16 sps:$4 sm:$0xff]  }
 0x81c   : > { %15644 = vmatprep.subr.bf16.mxu1 %v21636_v4  ;;  %v21700_v4 = vld [vmem:[%s22203_s17 + $0x3e68] ss:$16 sps:$4 sm:$0xff]  }
 0x81e   : > { %15604 = vmatpush2.bf16.msra.mxu0 %v21631_v5  ;;  %v21705_v5 = vld [vmem:[%s22203_s17 + $0x3c4c] ss:$16 sps:$4 sm:$0xff]  }
 0x81f   : > { %15645 = vmatpush2.bf16.msra.mxu1 %v21634_v52  ;;  %15605 = vmatprep.subr.bf16.mxu0 %v21639_v3  ;;  %v21708_v52 = vld [vmem:[%s22203_s17 + $0x3e4c] ss:$16 sps:$4 sm:$0xff]   ;;  %v21703_v3 = vld [vmem:[%s22203_s17 + $0x3c48] ss:$16 sps:$4 sm:$0xff]  }
 0x820   : > { %15646 = vmatprep.subr.bf16.mxu1 %v21642_v19  ;;  %v21706_v19 = vld [vmem:[%s22203_s17 + $0x3e48] ss:$16 sps:$4 sm:$0xff]  }
 0x822   : > { %15606 = vmatpush2.bf16.msra.mxu0 %v21637_v46  ;;  %v21711_v46 = vld [vmem:[%s22203_s17 + $0x3c2c] ss:$16 sps:$4 sm:$0xff]  }
 0x823   : > { %15647 = vmatpush2.bf16.msra.mxu1 %v21640_v10  ;;  %15607 = vmatprep.subr.bf16.mxu0 %v21645_v59  ;;  %v21714_v10 = vld [vmem:[%s22203_s17 + $0x3e2c] ss:$16 sps:$4 sm:$0xff]   ;;  %v21709_v59 = vld [vmem:[%s22203_s17 + $0x3c28] ss:$16 sps:$4 sm:$0xff]  }
 0x824   : > { %15648 = vmatprep.subr.bf16.mxu1 %v21648_v29  ;;  %v21712_v29 = vld [vmem:[%s22203_s17 + $0x3e28] ss:$16 sps:$4 sm:$0xff]  }
 0x826   : > { %15608 = vmatpush2.bf16.msra.mxu0 %v21643_v50  ;;  %v21717_v50 = vld [vmem:[%s22203_s17 + $0x3c0c] ss:$16 sps:$4 sm:$0xff]  }
 0x827   : > { %15649 = vmatpush2.bf16.msra.mxu1 %v21646_v61  ;;  %15609 = vmatprep.subr.bf16.mxu0 %v21651_v39  ;;  %v21720_v61 = vld [vmem:[%s22203_s17 + $0x3e0c] ss:$16 sps:$4 sm:$0xff]   ;;  %v21715_v39 = vld [vmem:[%s22203_s17 + $0x3c08] ss:$16 sps:$4 sm:$0xff]  }
 0x828   : > { %15650 = vmatprep.subr.bf16.mxu1 %v21654_v0  ;;  %v21718_v0 = vld [vmem:[%s22203_s17 + $0x3e08] ss:$16 sps:$4 sm:$0xff]  }
 0x82a   : > { %15610 = vmatpush2.bf16.msra.mxu0 %v21649_v62  ;;  %v21723_v62 = vld [vmem:[%s22203_s17 + $0x3dec] ss:$16 sps:$4 sm:$0xff]  }
 0x82b   : > { %15651 = vmatpush2.bf16.msra.mxu1 %v21652_v1  ;;  %15611 = vmatprep.subr.bf16.mxu0 %v21657_v37  ;;  %v21726_v1 = vld [vmem:[%s22203_s17 + $0x3fec] ss:$16 sps:$4 sm:$0xff]   ;;  %v21721_v37 = vld [vmem:[%s22203_s17 + $0x3de8] ss:$16 sps:$4 sm:$0xff]  }
 0x82c   : > { %15652 = vmatprep.subr.bf16.mxu1 %v21660_v15  ;;  %v21724_v15 = vld [vmem:[%s22203_s17 + $0x3fe8] ss:$16 sps:$4 sm:$0xff]  }
 0x82e   : > { %15612 = vmatpush2.bf16.msra.mxu0 %v21655_v25  ;;  %v21729_v25 = vld [vmem:[%s22203_s17 + $0x3dcc] ss:$16 sps:$4 sm:$0xff]  }
 0x82f   : > { %15653 = vmatpush2.bf16.msra.mxu1 %v21658_v34  ;;  %15613 = vmatprep.subr.bf16.mxu0 %v21663_v6  ;;  %v21732_v34 = vld [vmem:[%s22203_s17 + $0x3fcc] ss:$16 sps:$4 sm:$0xff]   ;;  %v21727_v6 = vld [vmem:[%s22203_s17 + $0x3dc8] ss:$16 sps:$4 sm:$0xff]  }
 0x830   : > { %15654 = vmatprep.subr.bf16.mxu1 %v21666_v47  ;;  %v21730_v47 = vld [vmem:[%s22203_s17 + $0x3fc8] ss:$16 sps:$4 sm:$0xff]  }
 0x832   : > { %15614 = vmatpush2.bf16.msra.mxu0 %v21661_v24  ;;  %v21735_v24 = vld [vmem:[%s22203_s17 + $0x3dac] ss:$16 sps:$4 sm:$0xff]  }
 0x833   : > { %15655 = vmatpush2.bf16.msra.mxu1 %v21664_v40  ;;  %15615 = vmatprep.subr.bf16.mxu0 %v21669_v12  ;;  %v21738_v40 = vld [vmem:[%s22203_s17 + $0x3fac] ss:$16 sps:$4 sm:$0xff]   ;;  %v21733_v12 = vld [vmem:[%s22203_s17 + $0x3da8] ss:$16 sps:$4 sm:$0xff]  }
 0x834   : > { %15656 = vmatprep.subr.bf16.mxu1 %v21672_v36  ;;  %v21736_v36 = vld [vmem:[%s22203_s17 + $0x3fa8] ss:$16 sps:$4 sm:$0xff]  }
 0x836   : > { %15616 = vmatpush2.bf16.msra.mxu0 %v21667_v49  ;;  %v21741_v49 = vld [vmem:[%s22203_s17 + $0x3d8c] ss:$16 sps:$4 sm:$0xff]  }
 0x837   : > { %15657 = vmatpush2.bf16.msra.mxu1 %v21670_v20  ;;  %15667 = vmatprep.subr.bf16.mxu0 %v21675_v9  ;;  %v21744_v20 = vld [vmem:[%s22203_s17 + $0x3f8c] ss:$16 sps:$4 sm:$0xff]   ;;  %v21739_v9 = vld [vmem:[%s22203_s17 + $0x3d88] ss:$16 sps:$4 sm:$0xff]  }
 0x838   : > { %15708 = vmatprep.subr.bf16.mxu1 %v21678_v53  ;;  %v21742_v53 = vld [vmem:[%s22203_s17 + $0x3f88] ss:$16 sps:$4 sm:$0xff]  }
 0x839   : > { %v15373_v8 = vpop.f32.mrf.mxu0  ;;  %15618 = vmatmul.mubr.bf16.vlgmr.msra.gmra.mxu0 %v25079_v60  ;;  %v21751_v60 = vld [vmem:[%s22203_s17 + $0x3d48] ss:$16 sps:$4 sm:$0xff]  }
 0x83a   : > { %v15414_v54 = vpop.f32.mrf.mxu1  ;;  %15659 = vmatmul.mubr.bf16.vlgmr.msra.gmra.mxu1 %v23660_v11  ;;  %v15374_v33 = vadd.f32 %v15373_v8, %v24793_v23  ;;  %15668 = vmatpush1.bf16.msra.mxu0 %v21673_v56  ;;  %v21747_v56 = vld [vmem:[%s22203_s17 + $0x3d6c] ss:$16 sps:$4 sm:$0xff]  }
 0x83b   : > { %15709 = vmatpush1.bf16.msra.mxu1 %v21676_v14  ;;  %v15375_v32 = vpop.f32.mrf.mxu0  ;;  %15669 = vmatprep.subr.bf16.mxu0 %v21681_v17  ;;  %v21750_v14 = vld [vmem:[%s22203_s17 + $0x3f6c] ss:$16 sps:$4 sm:$0xff]   ;;  %v21745_v17 = vld [vmem:[%s22203_s17 + $0x3d68] ss:$16 sps:$4 sm:$0xff]  }
 0x83c   : > { %v15416_v45 = vpop.f32.mrf.mxu1  ;;  %15710 = vmatprep.subr.bf16.mxu1 %v21684_v43  ;;  %v24867_v38 = vadd.f32 %v15414_v54, %v15374_v33  ;;  %v15376_v11 = vadd.f32 %v15375_v32, %v24798_v7  ;;  %15699 = vmatprep.mubr.bf16.mxu0 %v23656_v41  ;;  %v21693_v41 = vld [vmem:[%s22203_s17 + $0x3c8c] ss:$16 sps:$4 sm:$0xff]   ;;  %v21691_v7 = vld [vmem:[%s22203_s17 + $0x3c88] ss:$16 sps:$4 sm:$0xff]  }
 0x83d   : > { %15740 = vmatprep.mubr.bf16.mxu1 %v23668_v58  ;;  %v15377_v23 = vpop.f32.mrf.mxu0  ;;  %v21696_v58 = vld [vmem:[%s22203_s17 + $0x3e8c] ss:$16 sps:$4 sm:$0xff]   ;;  %v21748_v43 = vld [vmem:[%s22203_s17 + $0x3f68] ss:$16 sps:$4 sm:$0xff]  }
 0x83e   : > { %v15418_v18 = vpop.f32.mrf.mxu1  ;;  %v24872_v13 = vadd.f32 %v15416_v45, %v15376_v11  ;;  %15670 = vmatpush1.bf16.msra.mxu0 %v21679_v30  ;;  %v21753_v8 = vld [vmem:[%s22203_s17 + $0x3d4c] ss:$16 sps:$4 sm:$0xff]   ;;  %v21754_v33 = vld [vmem:[%s22203_s17 + $0x3f48] ss:$16 sps:$4 sm:$0xff]  }
 0x83f   : > { %15711 = vmatpush1.bf16.msra.mxu1 %v21682_v27  ;;  %v15378_v51 = vpop.f32.mrf.mxu0  ;;  %15671 = vmatprep.subr.bf16.mxu0 %v21687_v2  ;;  %v21756_v54 = vld [vmem:[%s22203_s17 + $0x3f4c] ss:$16 sps:$4 sm:$0xff]   ;;  %v21757_v32 = vld [vmem:[%s22203_s17 + $0x3d28] ss:$16 sps:$4 sm:$0xff]  }
 0x840   : > { %v15419_v42 = vpop.f32.mrf.mxu1  ;;  %15712 = vmatprep.subr.bf16.mxu1 %v21690_v31  ;;  %v21759_v30 = vld [vmem:[%s22203_s17 + $0x3d2c] ss:$16 sps:$4 sm:$0xff]   ;;  %v21760_v45 = vld [vmem:[%s22203_s17 + $0x3f28] ss:$16 sps:$4 sm:$0xff]  }
 0x841   : > { %v21762_v27 = vld [vmem:[%s22203_s17 + $0x3f2c] ss:$16 sps:$4 sm:$0xff]   ;;  %v21763_v11 = vld [vmem:[%s22203_s17 + $0x3d08] ss:$16 sps:$4 sm:$0xff]  }
 0x842   : > { %15672 = vmatpush1.bf16.msra.mxu0 %v21685_v21  ;;  %v21765_v2 = vld [vmem:[%s22203_s17 + $0x3d0c] ss:$16 sps:$4 sm:$0xff]   ;;  %v21766_v23 = vld [vmem:[%s22203_s17 + $0x3f08] ss:$16 sps:$4 sm:$0xff]  }
 0x843   : > { %15713 = vmatpush1.bf16.msra.mxu1 %v21688_v22  ;;  %15673 = vmatprep.subr.bf16.mxu0 %v21693_v41  ;;  %v21768_v31 = vld [vmem:[%s22203_s17 + $0x3f0c] ss:$16 sps:$4 sm:$0xff]  }
 0x844   : > { %15714 = vmatprep.subr.bf16.mxu1 %v21696_v58 }
 0x846   : > { %15674 = vmatpush1.bf16.msra.mxu0 %v21691_v7 }
 0x847   : > { %15715 = vmatpush1.bf16.msra.mxu1 %v21694_v63  ;;  %15675 = vmatprep.subr.bf16.mxu0 %v21699_v55 }
 0x848   : > { %15716 = vmatprep.subr.bf16.mxu1 %v21702_v35 }
 0x84a   : > { %15676 = vmatpush1.bf16.msra.mxu0 %v21697_v26 }
 0x84b   : > { %15717 = vmatpush1.bf16.msra.mxu1 %v21700_v4  ;;  %15677 = vmatprep.subr.bf16.mxu0 %v21705_v5 }
 0x84c   : > { %15718 = vmatprep.subr.bf16.mxu1 %v21708_v52 }
 0x84e   : > { %15678 = vmatpush1.bf16.msra.mxu0 %v21703_v3 }
 0x84f   : > { %15719 = vmatpush1.bf16.msra.mxu1 %v21706_v19  ;;  %15679 = vmatprep.subr.bf16.mxu0 %v21711_v46 }
 0x850   : > { %15720 = vmatprep.subr.bf16.mxu1 %v21714_v10 }
 0x852   : > { %15680 = vmatpush1.bf16.msra.mxu0 %v21709_v59 }
 0x853   : > { %15721 = vmatpush1.bf16.msra.mxu1 %v21712_v29  ;;  %15681 = vmatprep.subr.bf16.mxu0 %v21717_v50 }
 0x854   : > { %15722 = vmatprep.subr.bf16.mxu1 %v21720_v61 }
 0x856   : > { %15682 = vmatpush1.bf16.msra.mxu0 %v21715_v39 }
 0x857   : > { %15723 = vmatpush1.bf16.msra.mxu1 %v21718_v0  ;;  %15683 = vmatprep.subr.bf16.mxu0 %v21723_v62 }
 0x858   : > { %15724 = vmatprep.subr.bf16.mxu1 %v21726_v1 }
 0x85a   : > { %15684 = vmatpush2.bf16.msra.mxu0 %v21721_v37 }
 0x85b   : > { %15725 = vmatpush2.bf16.msra.mxu1 %v21724_v15  ;;  %15685 = vmatprep.subr.bf16.mxu0 %v21729_v25 }
 0x85c   : > { %15726 = vmatprep.subr.bf16.mxu1 %v21732_v34  ;;  %v22024_v34 = vmov 1983009808  }
 0x85e   : > { %15686 = vmatpush2.bf16.msra.mxu0 %v21727_v6  ;;  %v15756_v6 = vunpack.c.l.s4 %v22024_v34 }
 0x85f   : > { %15727 = vmatpush2.bf16.msra.mxu1 %v21730_v47  ;;  %15687 = vmatprep.subr.bf16.mxu0 %v21735_v24 }
 0x860   : > { %15728 = vmatprep.subr.bf16.mxu1 %v21738_v40 }
 0x862   : > { %15688 = vmatpush2.bf16.msra.mxu0 %v21733_v12  ;;  %v15757_v12 = vunpack.c.0.s8 %v15756_v6 }
 0x863   : > { %15729 = vmatpush2.bf16.msra.mxu1 %v21736_v36  ;;  %15689 = vmatprep.subr.bf16.mxu0 %v21741_v49 }
 0x864   : > { %15730 = vmatprep.subr.bf16.mxu1 %v21744_v20 }
 0x866   : > { %15690 = vmatpush2.bf16.msra.mxu0 %v21739_v9 }
 0x867   : > { %15731 = vmatpush2.bf16.msra.mxu1 %v21742_v53  ;;  %15691 = vmatprep.subr.bf16.mxu0 %v21747_v56 }
 0x868   : > { %15732 = vmatprep.subr.bf16.mxu1 %v21750_v14 }
 0x86a   : > { %15692 = vmatpush2.bf16.msra.mxu0 %v21745_v17  ;;  %v25080_v17 = vld [vmem:[#allocation17_spill] sm:$0xff] }
 0x86b   : > { %15733 = vmatpush2.bf16.msra.mxu1 %v21748_v43  ;;  %15693 = vmatprep.subr.bf16.mxu0 %v21753_v8  ;;  %v24933_v43 = vsub.s32 %v15757_v12, %v25080_v17 }
 0x86c   : > { %15734 = vmatprep.subr.bf16.mxu1 %v21756_v54 }
 0x86e   : > { %15694 = vmatpush2.bf16.msra.mxu0 %v21751_v60 }
 0x86f   : > { %15735 = vmatpush2.bf16.msra.mxu1 %v21754_v33  ;;  %15695 = vmatprep.subr.bf16.mxu0 %v21759_v30 }
 0x870   : > { %15736 = vmatprep.subr.bf16.mxu1 %v21762_v27  ;;  %v15761_v27 = vrot.slane %v15753_v44, %v24933_v43 }
 0x872   : > { %15696 = vmatpush2.bf16.msra.mxu0 %v21757_v32 }
 0x873   : > { %15737 = vmatpush2.bf16.msra.mxu1 %v21760_v45  ;;  %15697 = vmatprep.subr.bf16.mxu0 %v21765_v2  ;;  %v364_v45 = vld [vmem:[#allocation2] sm:$0xff] }
 0x874   : > { %15738 = vmatprep.subr.bf16.mxu1 %v21768_v31 }
 0x876   : > { %15698 = vmatpush2.bf16.msra.mxu0 %v21763_v11 }
 0x877   : > { %15739 = vmatpush2.bf16.msra.mxu1 %v21766_v23 }
 0x879   : > { %v15455_v18 = vpop.f32.mrf.mxu0  ;;  %15700 = vmatmul.mubr.bf16.vlgmr.msra.gmra.mxu0 %v23736_v16 }
 0x87a   : > { %v15496_v21 = vpop.f32.mrf.mxu1  ;;  %15741 = vmatmul.mubr.bf16.vlgmr.msra.gmra.mxu1 %v23746_v28  ;;  %v15456_v22 = vadd.f32 %v15455_v18, %v24867_v38 }
 0x87b   : > { %v15457_v51 = vpop.f32.mrf.mxu0 }
 0x87c   : > { %v15498_v42 = vpop.f32.mrf.mxu1  ;;  %v15497_v41 = vadd.f32 %v15496_v21, %v15456_v22  ;;  %v15458_v58 = vadd.f32 %v15457_v51, %v24872_v13 }
 0x87d   : > { %v15459_v7 = vpop.f32.mrf.mxu0 }
 0x87e   : > { %v15500_v63 = vpop.f32.mrf.mxu1  ;;  %v15499_v55 = vadd.f32 %v15498_v42, %v15458_v58 }
 0x87f   : > { %v15460_v35 = vpop.f32.mrf.mxu0 }
 0x880   : > { %v15501_v26 = vpop.f32.mrf.mxu1 }
 0x8b9   : > { %v15537_v4 = vpop.f32.mrf.mxu0 }
 0x8ba   : > { %v15578_v5 = vpop.f32.mrf.mxu1  ;;  %v15538_v52 = vadd.f32 %v15537_v4, %v15497_v41 }
 0x8bb   : > { %v15539_v3 = vpop.f32.mrf.mxu0 }
 0x8bc   : > { %v15580_v19 = vpop.f32.mrf.mxu1  ;;  %v15579_v16 = vadd.f32 %v15578_v5, %v15538_v52  ;;  %v15540_v46 = vadd.f32 %v15539_v3, %v15499_v55 }
 0x8bd   : > { %v15541_v28 = vpop.f32.mrf.mxu0 }
 0x8be   : > { %v15582_v10 = vpop.f32.mrf.mxu1  ;;  %v15581_v38 = vadd.f32 %v15580_v19, %v15540_v46 }
 0x8bf   : > { %v15542_v59 = vpop.f32.mrf.mxu0 }
 0x8c0   : > { %v15583_v29 = vpop.f32.mrf.mxu1 }
 0x8f9   : > { %v15619_v50 = vpop.f32.mrf.mxu0 }
 0x8fa   : > { %v15660_v61 = vpop.f32.mrf.mxu1  ;;  %v15620_v13 = vadd.f32 %v15619_v50, %v15579_v16 }
 0x8fb   : > { %v15621_v39 = vpop.f32.mrf.mxu0 }
 0x8fc   : > { %v15662_v0 = vpop.f32.mrf.mxu1  ;;  %v15661_v62 = vadd.f32 %v15660_v61, %v15620_v13  ;;  %v15622_v47 = vadd.f32 %v15621_v39, %v15581_v38 }
 0x8fd   : > { %v15623_v1 = vpop.f32.mrf.mxu0 }
 0x8fe   : > { %v15664_v37 = vpop.f32.mrf.mxu1  ;;  %v15663_v36 = vadd.f32 %v15662_v0, %v15622_v47 }
 0x8ff   : > { %v15624_v15 = vpop.f32.mrf.mxu0 }
 0x900   : > { %v15665_v25 = vpop.f32.mrf.mxu1 }
 0x939   : > { %v15701_v24 = vpop.f32.mrf.mxu0 }
 0x93a   : > { %v15742_v40 = vpop.f32.mrf.mxu1  ;;  %v15702_v49 = vadd.f32 %v15701_v24, %v15661_v62 }
 0x93b   : > { %v15703_v20 = vpop.f32.mrf.mxu0 }
 0x93c   : > { %v15744_v9 = vpop.f32.mrf.mxu1  ;;  %v15704_v53 = vadd.f32 %v15703_v20, %v15663_v36  ;;  %v15743_v8 = vadd.f32 %v15742_v40, %v15702_v49 }
 0x93d   : > { %v15705_v56 = vpop.f32.mrf.mxu0 }
 0x93e   : > { %v15746_v14 = vpop.f32.mrf.mxu1  ;;  %v15745_v54 = vadd.f32 %v15744_v9, %v15704_v53 }
 0x93f   : > { %v15706_v60 = vpop.f32.mrf.mxu0 }
 0x940   : > { %v15747_v33 = vpop.f32.mrf.mxu1  ;;  %v15754_v30 = vcombine.low %v15743_v8, %v15745_v54 }
 0x942   : > { %v15768_v32 = vrot.slane %v15754_v30, %v24933_v43 }
 0x944   : > { %v15769_v2 = vcombine.low %v15761_v27, %v15768_v32  ;;  %15776 = sbr.rel (%p18471_p2) target bundleno = 2815 (0xaff), region = 76 }
 0x946   : > { %v15771_v31 = vadd.f32 %v15769_v2, %v364_v45 }
 0x948   : > { %15772 = vst [vmem:[#allocation2] sm:$0xff] %v15771_v31 }
 0x949   : > { %v21769_v11 = vld [vmem:[#allocation8 + $0x78] sm:$0xff]   ;;  %v21773_v22 = vld [vmem:[#allocation8 + $0x70] sm:$0xff]   ;;  %v21777_v51 = vld [vmem:[#allocation8 + $0x68] sm:$0xff]   ;;  %v22025_v24 = vmov 0.0   ;;  %vm22026_vm0 = vmmov 0   ;;  %vm16298_vm1 = vcmask 9216  }
 0x94a   : > { %v21770_v23 = vld [vmem:[#allocation8 + $0xf8] sm:$0xff]   ;;  %18520 = vmatprep.subr.bf16.mxu0 %v21769_v11  ;;  %v21774_v57 = vld [vmem:[#allocation8 + $0xf0] sm:$0xff]   ;;  %v21778_v42 = vld [vmem:[#allocation8 + $0xe8] sm:$0xff]  }
 0x94b   : > { %v21771_v18 = vld [vmem:[#allocation8 + $0x38] sm:$0xff]   ;;  %18542 = vmatprep.subr.bf16.mxu1 %v21770_v23  ;;  %v21775_v48 = vld [vmem:[#allocation8 + $0x30] sm:$0xff]   ;;  %v21779_v41 = vld [vmem:[#allocation8 + $0x28] sm:$0xff]  }
 0x94c   : > { %v21772_v21 = vld [vmem:[#allocation8 + $0xb8] sm:$0xff]   ;;  %18521 = vmatpush3.bf16.msra.mxu0 %v21771_v18  ;;  %v21776_v44 = vld [vmem:[#allocation8 + $0xb0] sm:$0xff]   ;;  %v21780_v58 = vld [vmem:[#allocation8 + $0xa8] sm:$0xff]  }
 0x94d   : > { %18543 = vmatpush3.bf16.msra.mxu1 %v21772_v21  ;;  %18522 = vmatprep.subr.bf16.mxu0 %v21773_v22  ;;  %v21781_v7 = vld [vmem:[#allocation8 + $0x60] sm:$0xff]   ;;  %v21785_v26 = vld [vmem:[#allocation8 + $0x58] sm:$0xff]   ;;  %v21789_v3 = vld [vmem:[#allocation8 + $0x50] sm:$0xff]  }
 0x94e   : > { %18544 = vmatprep.subr.bf16.mxu1 %v21774_v57  ;;  %v21782_v63 = vld [vmem:[#allocation8 + $0xe0] sm:$0xff]   ;;  %v21786_v4 = vld [vmem:[#allocation8 + $0xd8] sm:$0xff]   ;;  %v21790_v19 = vld [vmem:[#allocation8 + $0xd0] sm:$0xff]  }
 0x94f   : > { %v21783_v55 = vld [vmem:[#allocation8 + $0x20] sm:$0xff]   ;;  %v21787_v5 = vld [vmem:[#allocation8 + $0x18] sm:$0xff]   ;;  %v21791_v16 = vld [vmem:[#allocation8 + $0x10] sm:$0xff]  }
 0x950   : > { %18523 = vmatpush3.bf16.msra.mxu0 %v21775_v48  ;;  %v21784_v35 = vld [vmem:[#allocation8 + $0xa0] sm:$0xff]   ;;  %v21788_v52 = vld [vmem:[#allocation8 + $0x98] sm:$0xff]   ;;  %v21792_v46 = vld [vmem:[#allocation8 + $0x90] sm:$0xff]  }
 0x951   : > { %18545 = vmatpush3.bf16.msra.mxu1 %v21776_v44  ;;  %18524 = vmatprep.subr.bf16.mxu0 %v21777_v51  ;;  %v21793_v28 = vld [vmem:[#allocation8 + $0x48] sm:$0xff]   ;;  %v21797_v13 = vld [vmem:[#allocation8 + $0x40] sm:$0xff]   ;;  %v15778_v15 = vld [vmem:[#allocation6] sm:$0xf] }
 0x952   : > { %18546 = vmatprep.subr.bf16.mxu1 %v21778_v42  ;;  %v21794_v10 = vld [vmem:[#allocation8 + $0xc8] sm:$0xff]   ;;  %v21798_v0 = vld [vmem:[#allocation8 + $0xc0] sm:$0xff]   ;;  %v15777_v36 = vld [vmem:[#allocation2] sm:$0xff] }
 0x953   : > { %v21795_v38 = vld [vmem:[#allocation8 + $0x8] sm:$0xff]   ;;  %v21799_v1 = vld [vmem:[#allocation8] sm:$0xff]   ;;  %v21804_v31 = vld [vmem:[%s25003_s5 + $0x20] sm:$0xff]  }
 0x954   : > { %18525 = vmatpush3.bf16.msra.mxu0 %v21779_v41  ;;  %v25081_v59 = vld [vmem:[#allocation17_spill] sm:$0xff]  ;;  %v21807_v18 = vld [vmem:[%s25003_s5 + $0x8] sm:$0xff]   ;;  %v21808_v21 = vld [vmem:[%s25003_s5] sm:$0xff]  }
 0x955   : > { %18547 = vmatpush3.bf16.msra.mxu1 %v21780_v58  ;;  %18526 = vmatprep.subr.bf16.mxu0 %v21781_v7  ;;  %v15782_v29 = vsub.s32 0, %v25081_v59  ;;  %v21796_v50 = vld [vmem:[#allocation8 + $0x88] sm:$0xff]   ;;  %v15786_v61 = vsub.s32 1, %v25081_v59  ;;  %v15790_v39 = vsub.s32 2, %v25081_v59  ;;  %v15794_v62 = vsub.s32 3, %v25081_v59  ;;  %v21800_v37 = vld [vmem:[#allocation8 + $0x80] sm:$0xff]  }
 0x956   : > { %18548 = vmatprep.subr.bf16.mxu1 %v21782_v63  ;;  %v21801_v27 = vld [vmem:[%s25003_s5 + $0x38] sm:$0xff]   ;;  %v21802_v2 = vld [vmem:[%s25003_s5 + $0x30] sm:$0xff]   ;;  %v18472_v48 = vld [vmem:[#allocation9] ss:$0 sm:$0xff] }
 0x957   : > { %v15783_v25 = vrot.slane %v15778_v15, %v15782_v29  ;;  %v15787_v34 = vrot.slane %v15778_v15, %v15786_v61  ;;  %v15791_v6 = vrot.slane %v15778_v15, %v15790_v39  ;;  %v15795_v47 = vrot.slane %v15778_v15, %v15794_v62  ;;  %v21805_v11 = vld [vmem:[%s25003_s5 + $0x18] sm:$0xff]   ;;  %v21806_v23 = vld [vmem:[%s25003_s5 + $0x10] sm:$0xff]  }
 0x958   : > { %18527 = vmatpush3.bf16.msra.mxu0 %v21783_v55 }
 0x959   : > { %18549 = vmatpush3.bf16.msra.mxu1 %v21784_v35  ;;  %18528 = vmatprep.subr.bf16.mxu0 %v21785_v26  ;;  %v15796_v40 = vcombine.low %v15783_v25, %v15787_v34  ;;  %v15797_v12 = vcombine.low %v15791_v6, %v15795_v47 }
 0x95a   : > { %18550 = vmatprep.subr.bf16.mxu1 %v21786_v4 }
 0x95b   : > { %v15804_v49 = vrot.slane %v15796_v40, %v24933_v43  ;;  %v15811_v20 = vrot.slane %v15797_v12, %v24933_v43 }
 0x95c   : > { %18529 = vmatpush3.bf16.msra.mxu0 %v21787_v5 }
 0x95d   : > { %18551 = vmatpush3.bf16.msra.mxu1 %v21788_v52  ;;  %18530 = vmatprep.subr.bf16.mxu0 %v21789_v3  ;;  %v15812_v9 = vcombine.low %v15804_v49, %v15811_v20  ;;  %v18505_v52 = vld [vmem:[#allocation11] ss:$0 sm:$0xff] }
 0x95e   : > { %18552 = vmatprep.subr.bf16.mxu1 %v21790_v19 }
 0x95f   : > { %v15814_v53 = vadd.f32 %v15812_v9, %v15777_v36 }
 0x960   : > { %18531 = vmatpush3.bf16.msra.mxu0 %v21791_v16 }
 0x961   : > { %18553 = vmatpush3.bf16.msra.mxu1 %v21792_v46  ;;  %18532 = vmatprep.subr.bf16.mxu0 %v21793_v28  ;;  %v15815_v56 = vmax.f32 %v15814_v53, 0.0 }
 0x962   : > { %18554 = vmatprep.subr.bf16.mxu1 %v21794_v10 }
 0x963   : > { %v15824_v14 = vrot.slane %v15815_v56, %v24933_v43  ;;  %v15817_v17 = vcombine.high %v15815_v56, %v15815_v56 }
 0x964   : > { %18533 = vmatpush3.bf16.msra.mxu0 %v21795_v38 }
 0x965   : > { %18555 = vmatpush3.bf16.msra.mxu1 %v21796_v50  ;;  %18534 = vmatprep.subr.bf16.mxu0 %v21797_v13  ;;  %v15832_v8 = vcombine.high %v15824_v14, %v15824_v14  ;;  %v15831_v54 = vrot.slane %v15817_v17, %v24933_v43  ;;  %v15838_v60 = vpack.c.bf16 %v15824_v14, %v15824_v14  ;;  %v21803_v43 = vld [vmem:[%s25003_s5 + $0x28] sm:$0xff]  }
 0x966   : > { %18556 = vmatprep.subr.bf16.mxu1 %v21798_v0 }
 0x967   : > { %v15839_v33 = vpack.c.bf16 %v15832_v8, %v15832_v8  ;;  %v15833_v30 = vcombine.high %v15831_v54, %v15831_v54  ;;  %v15840_v32 = vpack.c.bf16 %v15831_v54, %v15831_v54 }
 0x968   : > { %18535 = vmatpush3.bf16.msra.mxu0 %v21799_v1 }
 0x969   : > { %18557 = vmatpush3.bf16.msra.mxu1 %v21800_v37  ;;  %18573 = vmatprep.subr.bf16.mxu0 %v22025_v24  ;;  %v15841_v45 = vpack.c.bf16 %v15833_v30, %v15833_v30 }
 0x96a   : > { %16137 = vmatprep.mubr.bf16.mxu0 %v15839_v33 }
 0x96b   : > { %16138 = vmatmul.mubr.bf16.vlgmr.msra.gmra.mxu0 %v15838_v60  ;;  %16177 = vmatprep.mubr.bf16.mxu1 %v15841_v45 }
 0x96c   : > { %18574 = vmatpush3.bf16.msra.mxu0 %v21801_v27  ;;  %16178 = vmatmul.mubr.bf16.vlgmr.msra.gmra.mxu1 %v15840_v32 }
 0x96d   : > { %18575 = vmatprep.subr.bf16.mxu0 %v22025_v24  ;;  %18589 = vmatprep.mubr.msk.bf16.mxu0 %vm22026_vm0, %v22025_v24 }
 0x970   : > { %18576 = vmatpush3.bf16.msra.mxu0 %v21802_v2 }
 0x971   : > { %18577 = vmatprep.subr.bf16.mxu0 %v22025_v24 }
 0x974   : > { %18578 = vmatpush3.bf16.msra.mxu0 %v21803_v43 }
 0x975   : > { %18579 = vmatprep.subr.bf16.mxu0 %v22025_v24 }
 0x978   : > { %18580 = vmatpush3.bf16.msra.mxu0 %v21804_v31 }
 0x979   : > { %18581 = vmatprep.subr.bf16.mxu0 %v22025_v24 }
 0x97c   : > { %18582 = vmatpush3.bf16.msra.mxu0 %v21805_v11 }
 0x97d   : > { %18583 = vmatprep.subr.bf16.mxu0 %v22025_v24 }
 0x980   : > { %18584 = vmatpush3.bf16.msra.mxu0 %v21806_v23 }
 0x981   : > { %18585 = vmatprep.subr.bf16.mxu0 %v22025_v24 }
 0x984   : > { %18586 = vmatpush3.bf16.msra.mxu0 %v21807_v18 }
 0x985   : > { %18587 = vmatprep.subr.bf16.mxu0 %v22025_v24 }
 0x988   : > { %18588 = vmatpush3.bf16.msra.mxu0 %v21808_v21 }
 0xa2b   : > { %v18536_v22 = vpop.f32.mrf.mxu0 }
 0xa2c   : > { %v18558_v57 = vpop.f32.mrf.mxu1 }
 0xa2d   : > { %v18537_v44 = vpop.f32.mrf.mxu0 }
 0xa2e   : > { %v18538_v51 = vadd.f32 %v18537_v44, %v18536_v22  ;;  %v18559_v42 = vpop.f32.mrf.mxu1 }
 0xa2f   : > { %v18539_v41 = vpop.f32.mrf.mxu0  ;;  %v18560_v7 = vadd.f32 %v18559_v42, %v18558_v57 }
 0xa30   : > { %v16140_v58 = vadd.f32 %v18538_v51, %v18472_v48  ;;  %v18561_v63 = vpop.f32.mrf.mxu1 }
 0xa31   : > { %v18540_v55 = vpop.f32.mrf.mxu0 }
 0xa32   : > { %v16180_v35 = vadd.f32 %v18560_v7, %v16140_v58  ;;  %v18562_v26 = vpop.f32.mrf.mxu1 }
 0xa34   : > { %v16185_v4 = vmax.f32 %v16180_v35, 0.0 }
 0xa36   : > { %v16186_v5 = vpack.c.bf16 %v16185_v4, %v16185_v4 }
 0xa38   : > { %18590 = vmatmul.mubr.bf16.vlgmr.msra.gmra.mxu0 %v16186_v5 }
 0xaf8   : > { %v16292_v3 = vpop.f32.mrf.mxu0 }
 0xaf9   : > { %v16293_v19 = vadd.f32 %v18505_v52, %v16292_v3 }
 0xafa   : > { %v18591_v16 = vpop.f32.mrf.mxu0 }
 0xafb   : > { %16299 = vst.msk [vmem:[#allocation12] sm:$0x3] %vm16298_vm1, %v16293_v19 }
 0xafc   : > { %v16295_v46 = vpop.f32.mrf.mxu0 }
 0xafe   : > { %v18592_v28 = vpop.f32.mrf.mxu0 }
 0xaff PF: > { %p18641_p1 = scmp.eq.s32.totalorder %s22087_s28, 1  ;;  %s22027_s10 = smov [#allocation12]  }
 0xb00   : > { %s16307_s29 = sshll.u32 %s22027_s10, 4  ;;  %s16308_s29 = int_to_ptr.vmem [resolvable:$true] %s16307_s29 }
 0xb01   : > { %s21941_s11 = scalar_lea.vmem %s16308_s29, 32  ;;  %p21948_p11 = scmp.lt.s32.totalorder %s16308_s29, %s16308_s29 }
 0xb02   : > { %p21942_p5 = scmp.ne.s32.totalorder %s16308_s29, %s21941_s11  ;;  %p21949_p10 = scmp.lt.s32.totalorder %s21941_s11, %s21941_s11 }
 0xb04   : > { %p21943_p3 = pnand %p21942_p5, %p18641_p1  ;;  %p21950_p13 = por %p21949_p10, %p21948_p11 }
 0xb06   : > { %p21944_p7 = pneg %p21943_p3 }
 0xb08   : > { %p21951_p6 = pnand %p21950_p13, %p21944_p7 }
 0xb0a   : > { %21954 = shalt.err (!%p21951_p6)
}
 0xb0b   : > { %18612 = dma.vmem_to_hbm [thread:$0]  (%p18641_p1), %s16308_s29, 32, %s25005_s7, [#allocation5]  }
 0xb0c   : > { %21994 = dma.done.wait (%p18641_p1), [#allocation5], 32  }
 0xb0d   : > { %21996 = vsyncadd (%p18641_p1), [#allocation5], 4294967264 }
 0xb0e PF: > { %p20_p8 = scmp.ge.s32.totalorder %s22154_s14, 4   ;;  %s25082_s24 = smov %s22003_s25 }
 0xb0f   : > { %s25083_s25 = smov %s22007_s26  ;;  %s25084_s26 = smov %s22165_s20 }
 0xb10   : > { %s25085_s27 = smov %s22154_s14  ;;  %22 = sbr.rel (!%p20_p8) target bundleno = 6 (0x6), region = 112 }
 0xb15   :  { %16320 = vsyncpa [#allocation4], 1 }
 0xb16   :  { %16322 = vsyncpa [#allocation4 + $0x1], 1 }
 0xb17   :  { %16323 = vsyncpa [#allocation7], 1 }
 0xb18   :  { %16324 = vsyncpa [#allocation10], 1 }
 0xb19   :  { %16325 = vsyncpa [#allocation5], 1 }
 0xb1a   :  { %16327 = vsyncpa [#allocation5 + $0x1], 1 }

</bundles_post_ra>
